<compile_context>
chip_gen: v7x
topology: tpu7x:2x2x1
jax: 0.10.0
libtpu: 0.0.40
codegen_flags: <defaults>
</compile_context>

<pallas_src>
import functools

import jax
import jax.numpy as jnp
from jax.experimental import pallas as pl
from jax.experimental.pallas import tpu as pltpu

IGNORE_INDEX = -100   # nn.CrossEntropyLoss default
NEG_INF = -1e30


def _loss_kernel(x_ref, wl_ref, bl_ref, we_ref, lab_ref, out_ref,
                 h_scr, m_scr, l_scr, t_scr, *, tv, v_actual, v_padded):
    # x_ref  : [TN, H]  bf16  embedded tokens (per N tile)
    # wl_ref : [H, H]   bf16  linear weight (PyTorch [out, in] layout)
    # bl_ref : [1, H]   f32   linear bias
    # we_ref : [TV, H]  bf16  tied embedding / output-projection weight tile
    # lab_ref: [TN, 1]  i32   labels
    # out_ref: [TN, 1]  f32   per-row loss (valid * (lse - target_logit))
    v = pl.program_id(1)
    nv = pl.num_programs(1)

    @pl.when(v == 0)
    def _init():
        # h = x @ Wl.T + b, computed once per N tile and reused across all V tiles.
        h = jax.lax.dot_general(
            x_ref[...], wl_ref[...], (((1,), (1,)), ((), ())),
            preferred_element_type=jnp.float32) + bl_ref[...]
        h_scr[...] = h.astype(jnp.bfloat16)
        m_scr[...] = jnp.full_like(m_scr, NEG_INF)   # running max
        l_scr[...] = jnp.zeros_like(l_scr)           # running sum-exp
        t_scr[...] = jnp.zeros_like(t_scr)           # target logit

    # logits tile: [TN, TV]  (h @ We_tile.T), f32 accumulate on the MXU.
    logits = jax.lax.dot_general(
        h_scr[...], we_ref[...], (((1,), (1,)), ((), ())),
        preferred_element_type=jnp.float32)

    labels = lab_ref[...]                                            # [TN, 1] i32
    col = jax.lax.broadcasted_iota(jnp.int32, logits.shape, 1) + v * tv
    if v_padded != v_actual:                                         # static branch
        logits = jnp.where(col < v_actual, logits, NEG_INF)          # mask padded vocab

    # Target-logit extraction without materializing a f32 one-hot.
    t_scr[...] += jnp.sum(jnp.where(col == labels, logits, 0.0),
                          axis=-1, keepdims=True)

    # Online log-softmax update.
    m_tile = jnp.max(logits, axis=-1, keepdims=True)
    m_new = jnp.maximum(m_scr[...], m_tile)
    alpha = jnp.exp(m_scr[...] - m_new)
    l_scr[...] = alpha * l_scr[...] + jnp.sum(jnp.exp(logits - m_new),
                                              axis=-1, keepdims=True)
    m_scr[...] = m_new

    @pl.when(v == nv - 1)
    def _finalize():
        lse = m_scr[...] + jnp.log(l_scr[...])                       # [TN, 1]
        valid = (labels != IGNORE_INDEX).astype(jnp.float32)
        out_ref[...] = valid * (lse - t_scr[...])


def model_forward(input_ids, labels, emb_w, lin_w, lin_b, *, tn=128, tv=2048):
    """input_ids, labels: [B, S] int32. Returns scalar f32 loss (sum CE / num valid)."""
    B, S = input_ids.shape
    V, H = emb_w.shape
    N = B * S

    # N tile: largest candidate <= tn that divides N (keeps >=2 tiles for megacore).
    while tn > 8 and N % tn:
        tn //= 2
    assert N % tn == 0, "B*S must be a multiple of 8"
    n_tiles = N // tn

    # V tile, with vocab padded up to a multiple of it (padded cols masked in-kernel).
    tv = min(tv, pl.cdiv(V, 128) * 128)
    v_padded = pl.cdiv(V, tv) * tv
    v_tiles = v_padded // tv

    emb_bf = emb_w.astype(jnp.bfloat16)
    we = emb_bf if v_padded == V else jnp.pad(emb_bf, ((0, v_padded - V), (0, 0)))

    # TODO(synk): fuse this embedding gather into the kernel (manual per-row DMA with
    # scalar-prefetched input_ids); kept as an XLA gather producing a bf16 [N, H] slab.
    x = jnp.take(emb_bf, input_ids.reshape(-1), axis=0)              # [N, H] bf16
    wl = lin_w.astype(jnp.bfloat16)                                  # [H, H] bf16
    bl = lin_b.reshape(1, H).astype(jnp.float32)                     # [1, H] f32
    lab2d = labels.reshape(N, 1).astype(jnp.int32)                   # [N, 1] i32

    kernel = functools.partial(_loss_kernel, tv=tv, v_actual=V, v_padded=v_padded)

    flops = 2 * N * H * H + 2 * N * H * v_padded
    bytes_accessed = (x.size * 2 + wl.size * 2 + bl.size * 4
                      + n_tiles * we.size * 2 + lab2d.size * 4 + N * 4)

    per_row_loss = pl.pallas_call(
        kernel,
        out_shape=jax.ShapeDtypeStruct((N, 1), jnp.float32),
        grid_spec=pltpu.PrefetchScalarGridSpec(
            num_scalar_prefetch=0,
            grid=(n_tiles, v_tiles),
            in_specs=[
                pl.BlockSpec((tn, H), lambda n, v: (n, 0)),   # embedded tokens
                pl.BlockSpec((H, H), lambda n, v: (0, 0)),    # linear weight
                pl.BlockSpec((1, H), lambda n, v: (0, 0)),    # linear bias
                pl.BlockSpec((tv, H), lambda n, v: (v, 0)),   # tied emb weight tile
                pl.BlockSpec((tn, 1), lambda n, v: (n, 0)),   # labels
            ],
            out_specs=pl.BlockSpec((tn, 1), lambda n, v: (n, 0)),
            scratch_shapes=[
                pltpu.VMEM((tn, H), jnp.bfloat16),   # h = x @ Wl.T + b (reused over V)
                pltpu.VMEM((tn, 1), jnp.float32),    # running max
                pltpu.VMEM((tn, 1), jnp.float32),    # running sum-exp
                pltpu.VMEM((tn, 1), jnp.float32),    # target logit
            ]),
        compiler_params=pltpu.CompilerParams(
            dimension_semantics=("parallel", "arbitrary"),
            vmem_limit_bytes=64 * 1024 * 1024),
        cost_estimate=pl.CostEstimate(
            flops=flops,
            transcendentals=N * v_padded,
            bytes_accessed=bytes_accessed),
    )(x, wl, bl, we, lab2d)

    loss_sum = jnp.sum(per_row_loss)                                  # reduction='sum'
    loss_w = jnp.sum((labels.reshape(-1) > -1).astype(jnp.float32))   # loss_weights
    return loss_sum / loss_w


if __name__ == "__main__":
    # Module spec: hidden_size=256, vocab_size=30000; small batch/seq for the test.
    B, S = 2, 128
    H, V = 256, 30000

    key = jax.random.PRNGKey(0)
    k_emb, k_lw, k_lb, k_ids, k_lab = jax.random.split(key, 5)

    emb_w = jax.random.normal(k_emb, (V, H), dtype=jnp.float32) * 0.02
    lin_w = jax.random.normal(k_lw, (H, H), dtype=jnp.float32) * 0.1
    lin_b = jax.random.normal(k_lb, (H,), dtype=jnp.float32) * 0.1

    input_ids = jax.random.randint(k_ids, (B, S), 0, V, dtype=jnp.int32)
    labels = jax.random.randint(k_lab, (B, S), 0, V, dtype=jnp.int32)
    # a few ignored positions (CrossEntropyLoss ignore_index=-100)
    labels = labels.at[0, 0].set(IGNORE_INDEX).at[1, 3].set(IGNORE_INDEX)

    loss = jax.jit(model_forward)(input_ids, labels, emb_w, lin_w, lin_b)
    jax.block_until_ready(loss)

    # Pure-JAX reference (same bf16 rounding of matmul inputs as the kernel).
    emb_r = emb_w.astype(jnp.bfloat16).astype(jnp.float32)
    wl_r = lin_w.astype(jnp.bfloat16).astype(jnp.float32)
    x_r = jnp.take(emb_r, input_ids.reshape(-1), axis=0)
    h_r = (x_r @ wl_r.T + lin_b).astype(jnp.bfloat16).astype(jnp.float32)
    logits_r = h_r @ emb_r.T
    lab_flat = labels.reshape(-1)
    lse_r = jax.nn.logsumexp(logits_r, axis=-1)
    tgt_r = jnp.take_along_axis(
        logits_r, jnp.clip(lab_flat, 0, V - 1)[:, None], axis=-1)[:, 0]
    valid_r = (lab_flat != IGNORE_INDEX).astype(jnp.float32)
    ref = jnp.sum(valid_r * (lse_r - tgt_r)) / jnp.sum(
        (lab_flat > -1).astype(jnp.float32))

    assert jnp.allclose(loss, ref, rtol=2e-3, atol=2e-3), (loss, ref)
    print("KERNEL_OK")
</pallas_src>

<mosaic_0001>
module attributes {stable_mosaic.version = 11 : i64} {
  func.func @_loss_kernel(%arg0: i32, %arg1: i32, %arg2: memref<128x256xbf16, #tpu.memory_space<vmem>>, %arg3: memref<256x256xbf16, #tpu.memory_space<vmem>>, %arg4: memref<1x256xf32, #tpu.memory_space<vmem>>, %arg5: memref<2048x256xbf16, #tpu.memory_space<vmem>>, %arg6: memref<128x1xi32, #tpu.memory_space<vmem>>, %arg7: memref<128x1xf32, #tpu.memory_space<vmem>>, %arg8: memref<128x256xbf16, #tpu.memory_space<vmem>>, %arg9: memref<128x1xf32, #tpu.memory_space<vmem>>, %arg10: memref<128x1xf32, #tpu.memory_space<vmem>>, %arg11: memref<128x1xf32, #tpu.memory_space<vmem>>) attributes {dimension_semantics = [#tpu.dimension_semantics<parallel>, #tpu.dimension_semantics<arbitrary>], iteration_bounds = array<i64: 2, 15>, scalar_prefetch = 0 : i64, scratch_operands = 4 : i64, tpu.core_type = #tpu.core_type<tc>, window_params = [{transform_indices = @transform_0, window_bounds = array<i64: 128, 256>}, {pipeline_mode = #tpu.pipeline_mode<synchronous>, transform_indices = @transform_1, window_bounds = array<i64: 256, 256>}, {pipeline_mode = #tpu.pipeline_mode<synchronous>, transform_indices = @transform_2, window_bounds = array<i64: 1, 256>}, {transform_indices = @transform_3, window_bounds = array<i64: 2048, 256>}, {transform_indices = @transform_4, window_bounds = array<i64: 128, 1>}, {transform_indices = @transform_5, window_bounds = array<i64: 128, 1>}]} {
    %c0_i32 = arith.constant 0 : i32
    %0 = arith.cmpi eq, %arg1, %c0_i32 : i32
    %1 = arith.extui %0 : i1 to i32
    %c0_i32_0 = arith.constant 0 : i32
    %2 = arith.cmpi ne, %1, %c0_i32_0 : i32
    scf.if %2 {
      %c0_26 = arith.constant 0 : index
      %c0_27 = arith.constant 0 : index
      %44 = vector.load %arg2[%c0_26, %c0_27] : memref<128x256xbf16, #tpu.memory_space<vmem>>, vector<128x256xbf16>
      %c0_28 = arith.constant 0 : index
      %c0_29 = arith.constant 0 : index
      %45 = vector.load %arg3[%c0_28, %c0_29] : memref<256x256xbf16, #tpu.memory_space<vmem>>, vector<256x256xbf16>
      %cst_30 = arith.constant dense<0.000000e+00> : vector<128x256xf32>
      %46 = tpu.matmul %44, %45, %cst_30 {dimension_numbers = #tpu.dot_dimension_numbers<[1], [1], [0], [0], [0, 0, 1, 0], [], []>} : vector<128x256xbf16>, vector<256x256xbf16>, vector<128x256xf32> -> vector<128x256xf32>
      %c0_31 = arith.constant 0 : index
      %c0_32 = arith.constant 0 : index
      %47 = vector.load %arg4[%c0_31, %c0_32] : memref<1x256xf32, #tpu.memory_space<vmem>>, vector<1x256xf32>
      %48 = vector.broadcast %47 : vector<1x256xf32> to vector<128x256xf32>
      %49 = arith.addf %46, %48 : vector<128x256xf32>
      %50 = arith.truncf %49 : vector<128x256xf32> to vector<128x256xbf16>
      %c0_33 = arith.constant 0 : index
      %c0_34 = arith.constant 0 : index
      %51 = vector.load %arg8[%c0_33, %c0_34] : memref<128x256xbf16, #tpu.memory_space<vmem>>, vector<128x256xbf16>
      tpu.vector_store %arg8[%c0_33, %c0_34], %50 {strides = array<i32>} : memref<128x256xbf16, #tpu.memory_space<vmem>>, vector<128x256xbf16>,
      %cst_35 = arith.constant -1.000000e+30 : f32
      %52 = vector.broadcast %cst_35 : f32 to vector<128x1xf32>
      %c0_36 = arith.constant 0 : index
      %c0_37 = arith.constant 0 : index
      %53 = vector.load %arg9[%c0_36, %c0_37] : memref<128x1xf32, #tpu.memory_space<vmem>>, vector<128x1xf32>
      tpu.vector_store %arg9[%c0_36, %c0_37], %52 {strides = array<i32>} : memref<128x1xf32, #tpu.memory_space<vmem>>, vector<128x1xf32>,
      %cst_38 = arith.constant 0.000000e+00 : f32
      %54 = vector.broadcast %cst_38 : f32 to vector<128x1xf32>
      %c0_39 = arith.constant 0 : index
      %c0_40 = arith.constant 0 : index
      %55 = vector.load %arg10[%c0_39, %c0_40] : memref<128x1xf32, #tpu.memory_space<vmem>>, vector<128x1xf32>
      tpu.vector_store %arg10[%c0_39, %c0_40], %54 {strides = array<i32>} : memref<128x1xf32, #tpu.memory_space<vmem>>, vector<128x1xf32>,
      %cst_41 = arith.constant 0.000000e+00 : f32
      %56 = vector.broadcast %cst_41 : f32 to vector<128x1xf32>
      %c0_42 = arith.constant 0 : index
      %c0_43 = arith.constant 0 : index
      %57 = vector.load %arg11[%c0_42, %c0_43] : memref<128x1xf32, #tpu.memory_space<vmem>>, vector<128x1xf32>
      tpu.vector_store %arg11[%c0_42, %c0_43], %56 {strides = array<i32>} : memref<128x1xf32, #tpu.memory_space<vmem>>, vector<128x1xf32>,
    } else {
    }
    %c0 = arith.constant 0 : index
    %c0_1 = arith.constant 0 : index
    %3 = vector.load %arg8[%c0, %c0_1] : memref<128x256xbf16, #tpu.memory_space<vmem>>, vector<128x256xbf16>
    %c0_2 = arith.constant 0 : index
    %c0_3 = arith.constant 0 : index
    %4 = vector.load %arg5[%c0_2, %c0_3] : memref<2048x256xbf16, #tpu.memory_space<vmem>>, vector<2048x256xbf16>
    %cst = arith.constant dense<0.000000e+00> : vector<128x2048xf32>
    %5 = tpu.matmul %3, %4, %cst {dimension_numbers = #tpu.dot_dimension_numbers<[1], [1], [0], [0], [0, 0, 1, 0], [], []>} : vector<128x256xbf16>, vector<2048x256xbf16>, vector<128x2048xf32> -> vector<128x2048xf32>
    %c0_4 = arith.constant 0 : index
    %c0_5 = arith.constant 0 : index
    %6 = vector.load %arg6[%c0_4, %c0_5] : memref<128x1xi32, #tpu.memory_space<vmem>>, vector<128x1xi32>
    %7 = tpu.iota {dimensions = array<i32: 1>} : vector<128x2048xi32>
    %c2048_i32 = arith.constant 2048 : i32
    %8 = arith.muli %arg1, %c2048_i32 : i32
    %9 = vector.broadcast %8 : i32 to vector<128x2048xi32>
    %10 = arith.addi %7, %9 : vector<128x2048xi32>
    %c30000_i32 = arith.constant 30000 : i32
    %11 = vector.broadcast %c30000_i32 : i32 to vector<128x2048xi32>
    %12 = arith.cmpi slt, %10, %11 : vector<128x2048xi32>
    %cst_6 = arith.constant -1.000000e+30 : f32
    %13 = vector.broadcast %cst_6 : f32 to vector<128x2048xf32>
    %14 = arith.select %12, %5, %13 : vector<128x2048xi1>, vector<128x2048xf32>
    %c0_7 = arith.constant 0 : index
    %c0_8 = arith.constant 0 : index
    %15 = vector.load %arg11[%c0_7, %c0_8] : memref<128x1xf32, #tpu.memory_space<vmem>>, vector<128x1xf32>
    %16 = vector.broadcast %6 : vector<128x1xi32> to vector<128x2048xi32>
    %17 = arith.cmpi eq, %10, %16 : vector<128x2048xi32>
    %cst_9 = arith.constant 0.000000e+00 : f32
    %18 = vector.broadcast %cst_9 : f32 to vector<128x2048xf32>
    %19 = arith.select %17, %14, %18 : vector<128x2048xi1>, vector<128x2048xf32>
    %cst_10 = arith.constant dense<0.000000e+00> : vector<128xf32>
    %20 = vector.multi_reduction <add>, %19, %cst_10 [1] : vector<128x2048xf32> to vector<128xf32>
    %21 = vector.shape_cast %20 : vector<128xf32> to vector<128x1xf32>
    %22 = arith.addf %15, %21 : vector<128x1xf32>
    %c0_11 = arith.constant 0 : index
    %c0_12 = arith.constant 0 : index
    %23 = vector.load %arg11[%c0_11, %c0_12] : memref<128x1xf32, #tpu.memory_space<vmem>>, vector<128x1xf32>
    tpu.vector_store %arg11[%c0_11, %c0_12], %22 {strides = array<i32>} : memref<128x1xf32, #tpu.memory_space<vmem>>, vector<128x1xf32>,
    %cst_13 = arith.constant dense<0xFF800000> : vector<128xf32>
    %24 = vector.multi_reduction <maximumf>, %14, %cst_13 [1] : vector<128x2048xf32> to vector<128xf32>
    %25 = vector.shape_cast %24 : vector<128xf32> to vector<128x1xf32>
    %c0_14 = arith.constant 0 : index
    %c0_15 = arith.constant 0 : index
    %26 = vector.load %arg9[%c0_14, %c0_15] : memref<128x1xf32, #tpu.memory_space<vmem>>, vector<128x1xf32>
    %27 = arith.maximumf %26, %25 : vector<128x1xf32>
    %c0_16 = arith.constant 0 : index
    %c0_17 = arith.constant 0 : index
    %28 = vector.load %arg9[%c0_16, %c0_17] : memref<128x1xf32, #tpu.memory_space<vmem>>, vector<128x1xf32>
    %29 = arith.subf %28, %27 : vector<128x1xf32>
    %30 = math.exp %29 : vector<128x1xf32>
    %c0_18 = arith.constant 0 : index
    %c0_19 = arith.constant 0 : index
    %31 = vector.load %arg10[%c0_18, %c0_19] : memref<128x1xf32, #tpu.memory_space<vmem>>, vector<128x1xf32>
    %32 = arith.mulf %30, %31 : vector<128x1xf32>
    %33 = vector.broadcast %27 : vector<128x1xf32> to vector<128x2048xf32>
    %34 = arith.subf %14, %33 : vector<128x2048xf32>
    %35 = math.exp %34 : vector<128x2048xf32>
    %cst_20 = arith.constant dense<0.000000e+00> : vector<128xf32>
    %36 = vector.multi_reduction <add>, %35, %cst_20 [1] : vector<128x2048xf32> to vector<128xf32>
    %37 = vector.shape_cast %36 : vector<128xf32> to vector<128x1xf32>
    %38 = arith.addf %32, %37 : vector<128x1xf32>
    %c0_21 = arith.constant 0 : index
    %c0_22 = arith.constant 0 : index
    %39 = vector.load %arg10[%c0_21, %c0_22] : memref<128x1xf32, #tpu.memory_space<vmem>>, vector<128x1xf32>
    tpu.vector_store %arg10[%c0_21, %c0_22], %38 {strides = array<i32>} : memref<128x1xf32, #tpu.memory_space<vmem>>, vector<128x1xf32>,
    %c0_23 = arith.constant 0 : index
    %c0_24 = arith.constant 0 : index
    %40 = vector.load %arg9[%c0_23, %c0_24] : memref<128x1xf32, #tpu.memory_space<vmem>>, vector<128x1xf32>
    tpu.vector_store %arg9[%c0_23, %c0_24], %27 {strides = array<i32>} : memref<128x1xf32, #tpu.memory_space<vmem>>, vector<128x1xf32>,
    %c14_i32 = arith.constant 14 : i32
    %41 = arith.cmpi eq, %arg1, %c14_i32 : i32
    %42 = arith.extui %41 : i1 to i32
    %c0_i32_25 = arith.constant 0 : i32
    %43 = arith.cmpi ne, %42, %c0_i32_25 : i32
    scf.if %43 {
      %c0_26 = arith.constant 0 : index
      %c0_27 = arith.constant 0 : index
      %44 = vector.load %arg9[%c0_26, %c0_27] : memref<128x1xf32, #tpu.memory_space<vmem>>, vector<128x1xf32>
      %c0_28 = arith.constant 0 : index
      %c0_29 = arith.constant 0 : index
      %45 = vector.load %arg10[%c0_28, %c0_29] : memref<128x1xf32, #tpu.memory_space<vmem>>, vector<128x1xf32>
      %46 = math.log %45 : vector<128x1xf32>
      %47 = arith.addf %44, %46 : vector<128x1xf32>
      %c-100_i32 = arith.constant -100 : i32
      %48 = vector.broadcast %c-100_i32 : i32 to vector<128x1xi32>
      %49 = arith.cmpi ne, %6, %48 : vector<128x1xi32>
      %50 = arith.extui %49 : vector<128x1xi1> to vector<128x1xi32>
      %51 = arith.sitofp %50 : vector<128x1xi32> to vector<128x1xf32>
      %c0_30 = arith.constant 0 : index
      %c0_31 = arith.constant 0 : index
      %52 = vector.load %arg11[%c0_30, %c0_31] : memref<128x1xf32, #tpu.memory_space<vmem>>, vector<128x1xf32>
      %53 = arith.subf %47, %52 : vector<128x1xf32>
      %54 = arith.mulf %51, %53 : vector<128x1xf32>
      %c0_32 = arith.constant 0 : index
      %c0_33 = arith.constant 0 : index
      %55 = vector.load %arg7[%c0_32, %c0_33] : memref<128x1xf32, #tpu.memory_space<vmem>>, vector<128x1xf32>
      tpu.vector_store %arg7[%c0_32, %c0_33], %54 {strides = array<i32>} : memref<128x1xf32, #tpu.memory_space<vmem>>, vector<128x1xf32>,
    } else {
    }
    return
  }
  func.func @transform_0(%arg0: i32, %arg1: i32) -> (i32, i32) {
    %c0_i32 = arith.constant 0 : i32
    %c0_i32_0 = arith.constant 0 : i32
    return %arg0, %c0_i32 : i32, i32
  }
  func.func @transform_1(%arg0: i32, %arg1: i32) -> (i32, i32) {
    %c0_i32 = arith.constant 0 : i32
    %c0_i32_0 = arith.constant 0 : i32
    %c0_i32_1 = arith.constant 0 : i32
    return %c0_i32, %c0_i32_0 : i32, i32
  }
  func.func @transform_2(%arg0: i32, %arg1: i32) -> (i32, i32) {
    %c0_i32 = arith.constant 0 : i32
    %c0_i32_0 = arith.constant 0 : i32
    %c0_i32_1 = arith.constant 0 : i32
    return %c0_i32, %c0_i32_0 : i32, i32
  }
  func.func @transform_3(%arg0: i32, %arg1: i32) -> (i32, i32) {
    %c0_i32 = arith.constant 0 : i32
    %c0_i32_0 = arith.constant 0 : i32
    return %arg1, %c0_i32 : i32, i32
  }
  func.func @transform_4(%arg0: i32, %arg1: i32) -> (i32, i32) {
    %c0_i32 = arith.constant 0 : i32
    %c0_i32_0 = arith.constant 0 : i32
    return %arg0, %c0_i32 : i32, i32
  }
  func.func @transform_5(%arg0: i32, %arg1: i32) -> (i32, i32) {
    %c0_i32 = arith.constant 0 : i32
    %c0_i32_0 = arith.constant 0 : i32
    return %arg0, %c0_i32 : i32, i32
  }
}

</mosaic_0001>

<bundles_post_ra>
// kernel: model_forward.1
= control target key start
LH: loop header
LB: loop body
LE: loop exit
PB: predicated region body
PF: predicated region fallthrough
CT: control target
= control target key end

     0   :  { %s14016_s0 = inlined_call_operand.hbm [shape: bf16[256,256], index: 0, kind: input, shape index: {}]   ;;  %s14017_s1 = inlined_call_operand.hbm [shape: bf16[256,256], index: 1, kind: input, shape index: {}]   ;;  %s14018_s2 = inlined_call_operand.hbm [shape: f32[1,256], index: 2, kind: input, shape index: {}]   ;;  %s14019_s3 = inlined_call_operand.hbm [shape: bf16[30720,256], index: 3, kind: input, shape index: {}]   ;;  %s14020_s4 = inlined_call_operand.hbm [shape: s32[256,1], index: 4, kind: input, shape index: {}]   ;;  %s14021_s5 = inlined_call_operand.hbm [shape: f32[256,1], index: 5, kind: output, shape index: {}]  }
   0x1   :  { %14612 = sst [smem:[#allocation323_spill]] %s14017_s1 }
   0x2   :  { %14613 = sst [smem:[#allocation324_spill]] %s14018_s2 }
   0x3   :  { %14614 = sst [smem:[#allocation325_spill]] %s14019_s3 }
   0x4   :  { %14615 = sst [smem:[#allocation326_spill]] %s14021_s5 }
   0x5   :  { %10 = vsyncpa [#allocation7], 0 }
   0x6   :  { %12 = vsyncpa [#allocation7 + $0x1], 0 }
   0x7   :  { %13 = vsyncpa [#allocation10], 0 }
   0x8   :  { %14 = vsyncpa [#allocation13], 0 }
   0x9   :  { %16 = vsyncpa [#allocation13 + $0x1], 0 }
   0xa   :  { %17 = vsyncpa [#allocation8], 0 }
   0xb   :  { %19 = vsyncpa [#allocation8 + $0x1], 0  ;;  %s8338_s18 = smov 0   ;;  %s8340_s19 = smov 0  }
   0xc   :  { %s8342_s20 = smov 0   ;;  %s8344_s21 = smov 0  }
   0xd   :  { %s8346_s22 = smov 0   ;;  %s8348_s23 = smov 0  }
   0xe   :  { %s8350_s24 = smov 0   ;;  %s8352_s25 = smov 0  }
   0xf   :  { %s8354_s26 = smov 0   ;;  %s8356_s27 = smov 0  }
  0x10   :  { %s8358_s28 = smov 0  }
  0x11 LB: > { %14616 = sst [smem:[#allocation21_spill]] %s8260_s20  ;;  %s8392_s29 = sadd.s32 4294967295, %s8292_s28   ;;  %s8292_s28 = sphi %s8358_s28, %s25_s28   ;;  %s8288_s27 = sphi %s8356_s27, %s15902_s27   ;;  %s8284_s26 = sphi %s8354_s26, %s15893_s26   ;;  %s8280_s25 = sphi %s8352_s25, %s15901_s25   ;;  %s8276_s24 = sphi %s8350_s24, %s15892_s24   ;;  %s8272_s23 = sphi %s8348_s23, %s15900_s23   ;;  %s8268_s22 = sphi %s8346_s22, %s15899_s22   ;;  %s8264_s21 = sphi %s8344_s21, %s15898_s21   ;;  %s8260_s20 = sphi %s8342_s20, %s15897_s20   ;;  %s8256_s19 = sphi %s8340_s19, %s15896_s19   ;;  %s8252_s18 = sphi %s8338_s18, %s15895_s18  }
  0x12   : > { %14617 = sst [smem:[#allocation22_spill]] %s8264_s21  ;;  %s6432_s30 = sadd.s32 4294967294, %s8292_s28  }
  0x13   : > { %14618 = sst [smem:[#allocation23_spill]] %s8284_s26  ;;  %p57_p0 = scmp.ne.s32.totalorder %s8268_s22, %s8264_s21 }
  0x14   : > { %p14023_p1 = scmp.eq.s32.totalorder %s8392_s29, 0  ;;  %p125_p2 = scmp.ne.s32.totalorder %s8256_s19, %s8252_s18 }
  0x15   : > { %p181_p5 = scmp.eq.s32.totalorder %s6432_s30, 29  ;;  %p6433_p7 = scmp.ge.s32.totalorder %s8292_s28, 1 }
  0x16   : > { %p8402_p4 = por %p14023_p1, %p57_p0  ;;  %p8408_p6 = por %p125_p2, %p14023_p1 }
  0x17   : > { %p8413_p8 = por %p181_p5, %p57_p0  ;;  %p188_p9 = scmp.lt.s32.totalorder %s8292_s28, 31 }
  0x18   : > { %s14619_s6 = scalar_select %p8402_p4, 1, 0 }
  0x19   : > { %s14620_s7 = scalar_select %p8408_p6, 1, 0 }
  0x1a   : > { %s14621_s8 = scalar_select %p8413_p8, 1, 0 }
  0x1b   : > { %p8418_p10 = pnand %p6433_p7, %p188_p9  ;;  %s8294_s10 = smov [#allocation9]  }
  0x1c   : > { %14622 = sst [smem:[#allocation24_spill]] %s14621_s8  ;;  %s200_s11 = sshll.u32 %s8294_s10, 4  ;;  %s201_s11 = int_to_ptr.vmem [resolvable:$true] %s200_s11 }
  0x1d   : > { %s14623_s9 = scalar_select %p8418_p10, 1, 0 }
  0x1e   : > { %p6837_p11 = pneg %p8418_p10  ;;  %s34_s13 = sadd.s32 1, %s8284_s26 }
  0x1f   : > { %s14625_s1 = sld [smem:[#allocation323_spill]] }
  0x20   : > { %p8426_p12 = pnand %p6837_p11, %p14023_p1 }
  0x22   : > { %p14037_p0 = pneg %p8426_p12 }
  0x25   : > { %s8012_s16 = scalar_lea.hbm %s14625_s1, 4096 }
  0x26   : > { %p8013_p13 = scmp.ne.s32.totalorder %s14625_s1, %s8012_s16  ;;  %p8019_p7 = scmp.lt.u32.totalorder %s8012_s16, %s14625_s1 }
  0x28   : > { %p8015_p2 = pnand %p14037_p0, %p8013_p13 }
  0x2a   : > { %p8016_p5 = pneg %p8015_p2 }
  0x2c   : > { %p8021_p9 = pnand %p8019_p7, %p8016_p5 }
  0x2e   : > { %8024 = shalt.err (!%p8021_p9)
}
  0x2f   : > { %s8025_s8 = scalar_lea.vmem %s201_s11, 4096  ;;  %p8033_p8 = scmp.lt.s32.totalorder %s201_s11, %s201_s11 }
  0x30   : > { %p8026_p11 = scmp.ne.s32.totalorder %s201_s11, %s8025_s8  ;;  %p8034_p6 = scmp.lt.s32.totalorder %s8025_s8, %s8025_s8 }
  0x32   : > { %p8028_p1 = pnand %p8026_p11, %p14037_p0  ;;  %p8035_p4 = por %p8034_p6, %p8033_p8 }
  0x34   : > { %p8029_p3 = pneg %p8028_p1 }
  0x36   : > { %p8036_p10 = pnand %p8035_p4, %p8029_p3 }
  0x38   : > { %8039 = shalt.err (!%p8036_p10)
}
  0x39   : > { %s14027_s14 = smov 128   ;;  %s14029_s15 = smov 8  }
  0x3a   : > { %6840 = dma.hbm_to_vmem [thread:$0]  (!%p8426_p12), %s14625_s1, 4096, %s201_s11, [#allocation10], %s14027_s14, %s14027_s14, %s14029_s15  }
  0x3b   : > { %p8456_p1 = scmp.ge.s32.totalorder %s34_s13, 15  ;;  %p14036_p3 = scmp.eq.s32.totalorder %s8292_s28, 0 }
  0x3c   : > { %s112_s18 = sadd.s32 1, %s8260_s20  ;;  %p119_p4 = scmp.ne.s32.totalorder %s8260_s20, %s8256_s19 }
  0x3d   : > { %s14626_s17 = scalar_select %p8456_p1, 1, 0 }
  0x3e   : > { %s15904_s13 = smov (%p8456_p1, %s34_s13), 0  ;;  %p121_p6 = por %p119_p4, %p14036_p3 }
  0x3f   : > { %14627 = sst [smem:[#allocation25_spill]] %s15904_s13  ;;  %p14035_p8 = scmp.lt.s32.totalorder %s8292_s28, 30 }
  0x40   : > { %s109_s30 = ssub.s32 %s8284_s26, %s15904_s13  ;;  %s247_s10 = sand.u32 1, %s8292_s28  }
  0x41   : > { %p110_p10 = scmp.eq.s32.totalorder %s109_s30, 0  ;;  %s249_s11 = sand.u32 1, %s8260_s20  }
  0x42   : > { %s6786_s8 = sshll.u32 %s8284_s26, 15  ;;  %s6441_s14 = sshll.u32 %s249_s11, 11 }
  0x43   : > { %s8477_s16 = scalar_select %p110_p10, %s8260_s20, %s112_s18  }
  0x44   : > { %s14629_s3 = sld [smem:[#allocation325_spill]]  ;;  %p8486_p13 = pnand %p14035_p8, %p121_p6 }
  0x45   : > { %14628 = sst [smem:[#allocation26_spill]] %s8477_s16  ;;  %s251_s30 = scalar_lea.vmem [#allocation12], %s6441_s14 }
  0x46   : > { %s259_s18 = sshll.u32 %s251_s30, 4  ;;  %s8492_s11 = scalar_lea.sflag [#allocation13], %s247_s10  ;;  %s8490_s18 = int_to_ptr.vmem [resolvable:$true] %s259_s18 }
  0x47   : > { %p8042_p5 = pneg %p8486_p13 }
  0x4a   : > { %s8482_s21 = scalar_lea.hbm %s14629_s3, %s6786_s8  ;;  %s8045_s13 = scalar_lea.hbm %s14629_s3, 491520 }
  0x4b   : > { %s8040_s1 = scalar_lea.hbm %s8482_s21, 32768  ;;  %p8046_p11 = scmp.lt.u32.totalorder %s8482_s21, %s14629_s3 }
  0x4c   : > { %p8041_p2 = scmp.ne.s32.totalorder %s8482_s21, %s8040_s1  ;;  %p8047_p4 = scmp.lt.u32.totalorder %s8045_s13, %s8040_s1 }
  0x4d   : > { %p8049_p10 = scmp.lt.u32.totalorder %s8040_s1, %s8482_s21 }
  0x4e   : > { %p8043_p7 = pnand %p8042_p5, %p8041_p2  ;;  %p8048_p6 = por %p8047_p4, %p8046_p11 }
  0x50   : > { %p8044_p9 = pneg %p8043_p7  ;;  %p8050_p8 = por %p8049_p10, %p8048_p6 }
  0x52   : > { %p8051_p3 = pnand %p8050_p8, %p8044_p9 }
  0x54   : > { %8054 = shalt.err (!%p8051_p3)
}
  0x55   : > { %s8055_s14 = scalar_lea.vmem %s8490_s18, 32768  ;;  %s8297_s10 = smov [#allocation12]  }
  0x56   : > { %p8056_p2 = scmp.ne.s32.totalorder %s8490_s18, %s8055_s14  ;;  %s8060_s30 = sshll.u32 %s8297_s10, 4  ;;  %s8061_s30 = int_to_ptr.vmem [resolvable:$false] %s8060_s30 }
  0x57   : > { %s8062_s26 = scalar_lea.vmem %s8061_s30, 65536  ;;  %p8063_p1 = scmp.lt.s32.totalorder %s8490_s18, %s8061_s30 }
  0x58   : > { %p8058_p7 = pnand %p8056_p2, %p8042_p5  ;;  %p8064_p11 = scmp.lt.s32.totalorder %s8062_s26, %s8055_s14 }
  0x5a   : > { %p8059_p0 = pneg %p8058_p7  ;;  %p8065_p4 = por %p8064_p11, %p8063_p1 }
  0x5c   : > { %p8066_p6 = pnand %p8065_p4, %p8059_p0 }
  0x5e   : > { %8069 = shalt.err (!%p8066_p6)
}
  0x5f   : > { %s14631_s13 = smov 8   ;;  %s14632_s16 = smov 128  }
  0x60   : > { %6850 = dma.hbm_to_vmem [thread:$0]  (!%p8486_p13), %s8482_s21, 32768, %s8490_s18, %s8492_s11, %s14632_s16, %s14632_s16, %s14631_s13  }
  0x61   : > { %s8298_s1 = smov [#allocation11]   ;;  %s14633_s2 = sld [smem:[#allocation324_spill]] }
  0x62   : > { %s214_s15 = sshll.u32 %s8298_s1, 4  ;;  %p14634_p1 = pneg %p8426_p12  ;;  %s215_s15 = int_to_ptr.vmem [resolvable:$true] %s214_s15 }
  0x67   : > { %s8070_s14 = scalar_lea.hbm %s14633_s2, 32 }
  0x68   : > { %p8071_p0 = scmp.ne.s32.totalorder %s14633_s2, %s8070_s14  ;;  %p8077_p5 = scmp.lt.u32.totalorder %s8070_s14, %s14633_s2 }
  0x6a   : > { %p8073_p3 = pnand %p8071_p0, %p14634_p1 }
  0x6c   : > { %p8074_p8 = pneg %p8073_p3 }
  0x6e   : > { %p8079_p13 = pnand %p8077_p5, %p8074_p8 }
  0x70   : > { %8082 = shalt.err (!%p8079_p13)
}
  0x71   : > { %s8083_s21 = scalar_lea.vmem %s215_s15, 32  ;;  %p14635_p10 = pmov %p14634_p1 }
  0x72   : > { %p8084_p9 = scmp.ne.s32.totalorder %s215_s15, %s8083_s21  ;;  %p8091_p11 = scmp.lt.s32.totalorder %s215_s15, %s215_s15 }
  0x73   : > { %p8092_p4 = scmp.lt.s32.totalorder %s8083_s21, %s8083_s21 }
  0x74   : > { %p8086_p2 = pnand %p8084_p9, %p14635_p10 }
  0x75   : > { %p8093_p6 = por %p8092_p4, %p8091_p11 }
  0x76   : > { %p8087_p7 = pneg %p8086_p2 }
  0x78   : > { %p8094_p0 = pnand %p8093_p6, %p8087_p7 }
  0x7a   : > { %8097 = shalt.err (!%p8094_p0)
}
  0x7b   : > { %6843 = dma.hbm_to_vmem [thread:$0]  (!%p8426_p12), %s14633_s2, 32, %s215_s15, [#allocation10]  }
  0x7c   : > { %s37_s3 = sadd.s32 1, %s8288_s27  ;;  %s44_s8 = sadd.s32 1, %s8272_s23 }
  0x7d   : > { %p14636_p1 = scmp.ne.s32.totalorder %s14626_s17, 0  ;;  %p51_p3 = scmp.ne.s32.totalorder %s8272_s23, %s8268_s22 }
  0x7e   : > { %s225_s12 = sand.u32 1, %s8272_s23   ;;  %p14637_p5 = scmp.eq.s32.totalorder %s8292_s28, 0 }
  0x7f   : > { %s15906_s3 = smov (!%p14636_p1, %s37_s3), %s8288_s27  ;;  %p14638_p9 = scmp.eq.s32.totalorder %s8392_s29, 29 }
  0x80   : > { %p39_p8 = scmp.ge.s32.totalorder %s15906_s3, 2  ;;  %p53_p13 = por %p14637_p5, %p51_p3 }
  0x81   : > { %p8555_p10 = por %p14638_p9, %p51_p3  ;;  %s8561_s15 = sshll.u32 %s225_s12, 7 }
  0x82   : > { %s15908_s3 = smov (%p39_p8, %s15906_s3), 0  ;;  %s14039_s14 = sshll.u32 %s8288_s27, 11 }
  0x83   : > { %14640 = sst [smem:[#allocation27_spill]] %s15908_s3  ;;  %s41_s17 = ssub.s32 %s8288_s27, %s15908_s3 }
  0x84   : > { %p42_p12 = scmp.eq.s32.totalorder %s41_s17, 0  ;;  %s8571_s5 = scalar_lea.hbm %s14016_s0, %s14039_s14 }
  0x85   : > { %s229_s21 = scalar_lea.vmem [#allocation6], %s8561_s15  ;;  %p14641_p2 = scmp.lt.s32.totalorder %s8292_s28, 30 }
  0x86   : > { %s237_s18 = sshll.u32 %s229_s21, 4  ;;  %s8585_s30 = scalar_lea.sflag [#allocation7], %s225_s12  ;;  %s8583_s18 = int_to_ptr.vmem [resolvable:$true] %s237_s18 }
  0x87   : > { %p8576_p7 = pnand %p14641_p2, %p53_p13  ;;  %s8098_s26 = scalar_lea.hbm %s8571_s5, 2048 }
  0x88   : > { %s8581_s17 = scalar_select %p42_p12, %s8272_s23, %s44_s8  }
  0x89   : > { %p8099_p11 = scmp.ne.s32.totalorder %s8571_s5, %s8098_s26  ;;  %p8100_p4 = pneg %p8576_p7 }
  0x8a   : > { %s8103_s2 = scalar_lea.hbm %s14016_s0, 4096  ;;  %p8104_p1 = scmp.lt.u32.totalorder %s8571_s5, %s14016_s0 }
  0x8b   : > { %p8101_p6 = pnand %p8100_p4, %p8099_p11  ;;  %p8105_p3 = scmp.lt.u32.totalorder %s8103_s2, %s8098_s26 }
  0x8c   : > { %p8107_p5 = scmp.lt.u32.totalorder %s8098_s26, %s8571_s5 }
  0x8d   : > { %p8102_p0 = pneg %p8101_p6  ;;  %p8106_p8 = por %p8105_p3, %p8104_p1 }
  0x8f   : > { %p8108_p13 = por %p8107_p5, %p8106_p8 }
  0x91   : > { %p8109_p9 = pnand %p8108_p13, %p8102_p0 }
  0x93   : > { %8112 = shalt.err (!%p8109_p9)
}
  0x94   : > { %s8113_s8 = scalar_lea.vmem %s8583_s18, 2048  ;;  %s8299_s12 = smov [#allocation6]  }
  0x95   : > { %p8114_p12 = scmp.ne.s32.totalorder %s8583_s18, %s8113_s8  ;;  %s8118_s14 = sshll.u32 %s8299_s12, 4  ;;  %s8119_s14 = int_to_ptr.vmem [resolvable:$false] %s8118_s14 }
  0x96   : > { %s8120_s20 = scalar_lea.vmem %s8119_s14, 4096  ;;  %p8121_p6 = scmp.lt.s32.totalorder %s8583_s18, %s8119_s14 }
  0x97   : > { %p8116_p2 = pnand %p8114_p12, %p8100_p4  ;;  %p8122_p1 = scmp.lt.s32.totalorder %s8120_s20, %s8113_s8 }
  0x99   : > { %p8117_p11 = pneg %p8116_p2  ;;  %p8123_p3 = por %p8122_p1, %p8121_p6 }
  0x9b   : > { %p8124_p8 = pnand %p8123_p3, %p8117_p11 }
  0x9d   : > { %8127 = shalt.err (!%p8124_p8)
}
  0x9e   : > { %6847 = dma.hbm_to_vmem [thread:$0]  (!%p8576_p7), %s8571_s5, 2048, %s8583_s18, %s8585_s30, %s14632_s16, %s14632_s16, %s14631_s13  }
  0x9f   : > { %s14643_s2 = sshll.u32 %s8288_s27, 11  ;;  %s273_s8 = scalar_lea.vmem [#allocation14], %s8561_s15 }
  0xa0   : > { %s8621_s21 = scalar_lea.hbm %s14020_s4, %s14643_s2  ;;  %s280_s12 = sshll.u32 %s273_s8, 4  ;;  %s8624_s12 = int_to_ptr.vmem [resolvable:$true] %s280_s12 }
  0xa1   : > { %s8128_s14 = scalar_lea.hbm %s8621_s21, 2048  ;;  %s8133_s30 = scalar_lea.hbm %s14020_s4, 4096 }
  0xa2   : > { %p8129_p0 = scmp.ne.s32.totalorder %s8621_s21, %s8128_s14  ;;  %p8134_p9 = scmp.lt.u32.totalorder %s8621_s21, %s14020_s4 }
  0xa3   : > { %p8135_p12 = scmp.lt.u32.totalorder %s8133_s30, %s8128_s14  ;;  %p8137_p11 = scmp.lt.u32.totalorder %s8128_s14, %s8621_s21 }
  0xa4   : > { %p8131_p5 = pnand %p8129_p0, %p8100_p4 }
  0xa5   : > { %p8136_p2 = por %p8135_p12, %p8134_p9 }
  0xa6   : > { %p8132_p13 = pneg %p8131_p5 }
  0xa7   : > { %p8138_p6 = por %p8137_p11, %p8136_p2 }
  0xa9   : > { %p8139_p1 = pnand %p8138_p6, %p8132_p13 }
  0xab   : > { %8142 = shalt.err (!%p8139_p1)
}
  0xac   : > { %s8143_s15 = scalar_lea.vmem %s8624_s12, 2048  ;;  %s8300_s3 = smov [#allocation14]  }
  0xad   : > { %p8144_p3 = scmp.ne.s32.totalorder %s8624_s12, %s8143_s15  ;;  %s8148_s26 = sshll.u32 %s8300_s3, 4  ;;  %s8149_s26 = int_to_ptr.vmem [resolvable:$false] %s8148_s26 }
  0xae   : > { %s8150_s8 = scalar_lea.vmem %s8149_s26, 4096  ;;  %p8151_p5 = scmp.lt.s32.totalorder %s8624_s12, %s8149_s26 }
  0xaf   : > { %p8146_p8 = pnand %p8144_p3, %p8100_p4  ;;  %p8152_p9 = scmp.lt.s32.totalorder %s8150_s8, %s8143_s15 }
  0xb1   : > { %p8147_p0 = pneg %p8146_p8  ;;  %p8153_p12 = por %p8152_p9, %p8151_p5 }
  0xb3   : > { %p8154_p2 = pnand %p8153_p12, %p8147_p0 }
  0xb5   : > { %8157 = shalt.err (!%p8154_p2)
}
  0xb6   : > { %6853 = dma.hbm_to_vmem [thread:$0]  (!%p8576_p7), %s8621_s21, 2048, %s8624_s12, %s8492_s11, %s14632_s16, %s14632_s16, %s14631_s13  }
  0xb7   : > { %p14644_p4 = scmp.ne.s32.totalorder %s14623_s9, 0 }
  0xb9   : > { %292 = sbr.rel (%p14644_p4) target bundleno = 2177 (0x881), region = 40 }
  0xc0   : > { %s8656_s14 = sand.u32 1, %s8268_s22   ;;  %p14645_p13 = scmp.ne.s32.totalorder %s14619_s6, 0 }
  0xc1   : > { %s6449_s5 = sshll.u32 %s8656_s14, 7  ;;  %s295_s18 = scalar_lea.sflag [#allocation7], %s8656_s14 }
  0xc2   : > { %s8660_s30 = scalar_lea.vmem [#allocation6], %s6449_s5 }
  0xc3   : > { %8231 = dma.done.wait (%p14645_p13), %s295_s18, 2048  }
  0xc4   : > { %8233 = vsyncadd (%p14645_p13), %s295_s18, 4294965248  ;;  %p14646_p7 = scmp.eq.s32.totalorder %s8392_s29, 0 }
  0xc6   : > { %8235 = dma.done.wait (%p14646_p7), [#allocation10], 4128   ;;  %p14647_p11 = pmov %p14646_p7 }
  0xc7   : > { %s311_s9 = sand.u32 1, %s8392_s29   ;;  %s313_s11 = sand.u32 1, %s8256_s19  }
  0xc8   : > { %8237 = vsyncadd (%p14647_p11), [#allocation10], 4294963168  ;;  %s6452_s13 = sshll.u32 %s313_s11, 11  ;;  %s312_s16 = scalar_lea.sflag [#allocation13], %s311_s9 }
  0xc9   : > { %s8672_s1 = scalar_lea.vmem [#allocation12], %s6452_s13  ;;  %p14648_p6 = scmp.ne.s32.totalorder %s14620_s7, 0 }
  0xcb   : > { %8239 = dma.done.wait (%p14648_p6), %s312_s16, 32768  }
  0xcc   : > { %8241 = vsyncadd (%p14648_p6), %s312_s16, 4294934528  ;;  %s8678_s21 = scalar_lea.vmem [#allocation14], %s6449_s5 }
  0xcd   : > { %8243 = dma.done.wait (%p14645_p13), %s312_s16, 2048  }
  0xce   : > { %8245 = vsyncadd (%p14645_p13), %s312_s16, 4294965248  ;;  %s8684_s12 = scalar_lea.vmem [#allocation15], %s6449_s5  ;;  %p6455_p1 = scmp.ne.s32.totalorder %s8276_s24, 0 }
  0xcf   : > { %v6962_v0 = vld [vmem:[#allocation9 + $0x4] ss:$8 sps:$4 sm:$0xff] (!%p6455_p1)   ;;  %v6964_v1 = vld [vmem:[#allocation9] ss:$8 sps:$4 sm:$0xff] (!%p6455_p1)   ;;  %v6965_v2 = vld [vmem:[#allocation9 + $0x14] ss:$8 sps:$4 sm:$0xff] (!%p6455_p1)   ;;  %v419_v50 = vlaneseq (!%p6455_p1) }
  0xd0   : > { %368 = sbr.rel (%p6455_p1) target bundleno = 580 (0x244), region = 64  ;;  %669 = vmatprep.subr.bf16.mxu0 (!%p6455_p1), %v6962_v0  ;;  %6789 = vmatprep.subr.bf16.mxu1 (!%p6455_p1), %v6962_v0  ;;  %v6967_v3 = vld [vmem:[#allocation9 + $0x10] ss:$8 sps:$4 sm:$0xff] (!%p6455_p1)   ;;  %v6968_v4 = vld [vmem:[#allocation9 + $0x24] ss:$8 sps:$4 sm:$0xff] (!%p6455_p1)   ;;  %vm814_vm0 = vcmask (!%p6455_p1), 7168  }
  0xd1   : > { %670 = vmatpush1.bf16.xpose.msra.mxu0 (!%p6455_p1), %v6964_v1  ;;  %6805 = vmatpush1.bf16.xpose.msra.mxu1 (!%p6455_p1), %v6964_v1  ;;  %v6970_v5 = vld [vmem:[#allocation9 + $0x20] ss:$8 sps:$4 sm:$0xff] (!%p6455_p1)   ;;  %v6971_v6 = vld [vmem:[#allocation9 + $0x34] ss:$8 sps:$4 sm:$0xff] (!%p6455_p1)   ;;  %v7012_v7 = vld [vmem:[%s8660_s30 + $0x4] ss:$8 sps:$4 sm:$0xff] (!%p6455_p1)  }
  0xd2   : > { %671 = vmatprep.subr.bf16.mxu0 (!%p6455_p1), %v6965_v2  ;;  %6790 = vmatprep.subr.bf16.mxu1 (!%p6455_p1), %v6965_v2  ;;  %v6973_v8 = vld [vmem:[#allocation9 + $0x30] ss:$8 sps:$4 sm:$0xff] (!%p6455_p1)   ;;  %v7015_v9 = vld [vmem:[%s8660_s30 + $0x44] ss:$8 sps:$4 sm:$0xff] (!%p6455_p1)   ;;  %v6976_v11 = vld [vmem:[#allocation9 + $0x40] ss:$8 sps:$4 sm:$0xff] (!%p6455_p1)  }
  0xd3   : > { %v6974_v10 = vld [vmem:[#allocation9 + $0x44] ss:$8 sps:$4 sm:$0xff] (!%p6455_p1)   ;;  %701 = vmatprep.mubr.bf16.mxu0 (!%p6455_p1), %v7012_v7  ;;  %741 = vmatprep.mubr.bf16.mxu1 (!%p6455_p1), %v7015_v9  ;;  %v6977_v12 = vld [vmem:[#allocation9 + $0x54] ss:$8 sps:$4 sm:$0xff] (!%p6455_p1)   ;;  %v6979_v13 = vld [vmem:[#allocation9 + $0x50] ss:$8 sps:$4 sm:$0xff] (!%p6455_p1)  }
  0xd4   : > { %v6980_v14 = vld [vmem:[#allocation9 + $0x64] ss:$8 sps:$4 sm:$0xff] (!%p6455_p1)   ;;  %v6982_v15 = vld [vmem:[#allocation9 + $0x60] ss:$8 sps:$4 sm:$0xff] (!%p6455_p1)   ;;  %v6983_v16 = vld [vmem:[#allocation9 + $0x74] ss:$8 sps:$4 sm:$0xff] (!%p6455_p1)  }
  0xd5   : > { %v6985_v17 = vld [vmem:[#allocation9 + $0x70] ss:$8 sps:$4 sm:$0xff] (!%p6455_p1)   ;;  %v6986_v18 = vld [vmem:[#allocation9 + $0x84] ss:$8 sps:$4 sm:$0xff] (!%p6455_p1)   ;;  %v6988_v19 = vld [vmem:[#allocation9 + $0x80] ss:$8 sps:$4 sm:$0xff] (!%p6455_p1)  }
  0xd6   : > { %v6989_v20 = vld [vmem:[#allocation9 + $0x94] ss:$8 sps:$4 sm:$0xff] (!%p6455_p1)   ;;  %v6991_v21 = vld [vmem:[#allocation9 + $0x90] ss:$8 sps:$4 sm:$0xff] (!%p6455_p1)   ;;  %v6992_v22 = vld [vmem:[#allocation9 + $0xa4] ss:$8 sps:$4 sm:$0xff] (!%p6455_p1)  }
  0xd7   : > { %v6994_v23 = vld [vmem:[#allocation9 + $0xa0] ss:$8 sps:$4 sm:$0xff]   ;;  %v6995_v24 = vld [vmem:[#allocation9 + $0xb4] ss:$8 sps:$4 sm:$0xff]   ;;  %v6997_v25 = vld [vmem:[#allocation9 + $0xb0] ss:$8 sps:$4 sm:$0xff]  }
  0xd8   : > { %v6998_v26 = vld [vmem:[#allocation9 + $0xc4] ss:$8 sps:$4 sm:$0xff]   ;;  %v7000_v27 = vld [vmem:[#allocation9 + $0xc0] ss:$8 sps:$4 sm:$0xff]   ;;  %v7001_v28 = vld [vmem:[#allocation9 + $0xd4] ss:$8 sps:$4 sm:$0xff]  }
  0xd9   : > { %672 = vmatpush1.bf16.xpose.msra.mxu0 %v6967_v3  ;;  %6806 = vmatpush1.bf16.xpose.msra.mxu1 %v6967_v3  ;;  %v7003_v29 = vld [vmem:[#allocation9 + $0xd0] ss:$8 sps:$4 sm:$0xff]   ;;  %v7004_v30 = vld [vmem:[#allocation9 + $0xe4] ss:$8 sps:$4 sm:$0xff]   ;;  %v7006_v31 = vld [vmem:[#allocation9 + $0xe0] ss:$8 sps:$4 sm:$0xff]  }
  0xda   : > { %673 = vmatprep.subr.bf16.mxu0 %v6968_v4  ;;  %6791 = vmatprep.subr.bf16.mxu1 %v6968_v4  ;;  %v7007_v32 = vld [vmem:[#allocation9 + $0xf4] ss:$8 sps:$4 sm:$0xff]   ;;  %v7009_v33 = vld [vmem:[#allocation9 + $0xf0] ss:$8 sps:$4 sm:$0xff]   ;;  %v7010_v34 = vld [vmem:[%s8660_s30] ss:$8 sps:$4 sm:$0xff]  }
  0xdb   : > { %v7013_v35 = vld [vmem:[%s8660_s30 + $0x40] ss:$8 sps:$4 sm:$0xff]   ;;  %v7016_v36 = vld [vmem:[%s8660_s30 + $0x14] ss:$8 sps:$4 sm:$0xff]   ;;  %v7020_v38 = vld [vmem:[%s8660_s30 + $0x10] ss:$8 sps:$4 sm:$0xff]  }
  0xdc   : > { %v7018_v37 = vld [vmem:[%s8660_s30 + $0x54] ss:$8 sps:$4 sm:$0xff]   ;;  %v7021_v39 = vld [vmem:[%s8660_s30 + $0x50] ss:$8 sps:$4 sm:$0xff]   ;;  %v7022_v40 = vld [vmem:[%s8660_s30 + $0x24] ss:$8 sps:$4 sm:$0xff]  }
  0xdd   : > { %v7024_v41 = vld [vmem:[%s8660_s30 + $0x64] ss:$8 sps:$4 sm:$0xff]   ;;  %v7026_v42 = vld [vmem:[%s8660_s30 + $0x20] ss:$8 sps:$4 sm:$0xff]   ;;  %v7028_v44 = vld [vmem:[%s8660_s30 + $0x34] ss:$8 sps:$4 sm:$0xff]  }
  0xde   : > { %v7027_v43 = vld [vmem:[%s8660_s30 + $0x60] ss:$8 sps:$4 sm:$0xff]   ;;  %v7030_v45 = vld [vmem:[%s8660_s30 + $0x74] ss:$8 sps:$4 sm:$0xff]   ;;  %v7032_v46 = vld [vmem:[%s8660_s30 + $0x30] ss:$8 sps:$4 sm:$0xff]  }
  0xdf   : > { %v7033_v47 = vld [vmem:[%s8660_s30 + $0x70] ss:$8 sps:$4 sm:$0xff]   ;;  %v8301_v48 = vmov -1e+30   ;;  %v8302_v49 = vmov 0.0   ;;  %v420_v51 = vshrl.u32 %v419_v50, 7 }
  0xe0   : > { %815 = vst.msk [vmem:[#allocation3] sm:$0xff] %vm814_vm0, %v8301_v48  ;;  %816 = vst.msk [vmem:[#allocation3 + $0x8] sm:$0xff] %vm814_vm0, %v8301_v48  ;;  %v417_v53 = vld [vmem:[#allocation11] sm:$0x3] }
  0xe1   : > { %674 = vmatpush1.bf16.xpose.msra.mxu0 %v6970_v5  ;;  %6807 = vmatpush1.bf16.xpose.msra.mxu1 %v6970_v5  ;;  %817 = vst.msk [vmem:[#allocation3 + $0x10] sm:$0xff] %vm814_vm0, %v8301_v48  ;;  %818 = vst.msk [vmem:[#allocation3 + $0x18] sm:$0xff] %vm814_vm0, %v8301_v48  ;;  %v421_v52 = vsub.s32 0, %v420_v51  ;;  %v425_v54 = vsub.s32 1, %v420_v51 }
  0xe2   : > { %675 = vmatprep.subr.bf16.mxu0 %v6971_v6  ;;  %6792 = vmatprep.subr.bf16.mxu1 %v6971_v6  ;;  %819 = vst.msk [vmem:[#allocation3 + $0x20] sm:$0xff] %vm814_vm0, %v8301_v48  ;;  %820 = vst.msk [vmem:[#allocation3 + $0x28] sm:$0xff] %vm814_vm0, %v8301_v48 }
  0xe3   : > { %821 = vst.msk [vmem:[#allocation3 + $0x30] sm:$0xff] %vm814_vm0, %v8301_v48  ;;  %822 = vst.msk [vmem:[#allocation3 + $0x38] sm:$0xff] %vm814_vm0, %v8301_v48  ;;  %v8751_v55 = vrot.slane %v417_v53, %v421_v52  ;;  %v8753_v58 = vrot.slane %v417_v53, %v425_v54 }
  0xe4   : > { %823 = vst.msk [vmem:[#allocation3 + $0x40] sm:$0xff] %vm814_vm0, %v8301_v48  ;;  %824 = vst.msk [vmem:[#allocation3 + $0x48] sm:$0xff] %vm814_vm0, %v8301_v48 }
  0xe5   : > { %825 = vst.msk [vmem:[#allocation3 + $0x50] sm:$0xff] %vm814_vm0, %v8301_v48  ;;  %826 = vst.msk [vmem:[#allocation3 + $0x58] sm:$0xff] %vm814_vm0, %v8301_v48 }
  0xe6   : > { %827 = vst.msk [vmem:[#allocation3 + $0x60] sm:$0xff] %vm814_vm0, %v8301_v48  ;;  %828 = vst.msk [vmem:[#allocation3 + $0x68] sm:$0xff] %vm814_vm0, %v8301_v48 }
  0xe7   : > { %829 = vst.msk [vmem:[#allocation3 + $0x70] sm:$0xff] %vm814_vm0, %v8301_v48  ;;  %830 = vst.msk [vmem:[#allocation3 + $0x78] sm:$0xff] %vm814_vm0, %v8301_v48 }
  0xe8   : > { %831 = vst.msk [vmem:[#allocation4] sm:$0xff] %vm814_vm0, %v8302_v49  ;;  %832 = vst.msk [vmem:[#allocation4 + $0x8] sm:$0xff] %vm814_vm0, %v8302_v49 }
  0xe9   : > { %676 = vmatpush1.bf16.xpose.msra.mxu0 %v6973_v8  ;;  %6808 = vmatpush1.bf16.xpose.msra.mxu1 %v6973_v8  ;;  %833 = vst.msk [vmem:[#allocation4 + $0x10] sm:$0xff] %vm814_vm0, %v8302_v49  ;;  %834 = vst.msk [vmem:[#allocation4 + $0x18] sm:$0xff] %vm814_vm0, %v8302_v49 }
  0xea   : > { %677 = vmatprep.subr.bf16.mxu0 %v6974_v10  ;;  %6793 = vmatprep.subr.bf16.mxu1 %v6974_v10  ;;  %835 = vst.msk [vmem:[#allocation4 + $0x20] sm:$0xff] %vm814_vm0, %v8302_v49  ;;  %836 = vst.msk [vmem:[#allocation4 + $0x28] sm:$0xff] %vm814_vm0, %v8302_v49 }
  0xeb   : > { %837 = vst.msk [vmem:[#allocation4 + $0x30] sm:$0xff] %vm814_vm0, %v8302_v49  ;;  %838 = vst.msk [vmem:[#allocation4 + $0x38] sm:$0xff] %vm814_vm0, %v8302_v49 }
  0xec   : > { %839 = vst.msk [vmem:[#allocation4 + $0x40] sm:$0xff] %vm814_vm0, %v8302_v49  ;;  %840 = vst.msk [vmem:[#allocation4 + $0x48] sm:$0xff] %vm814_vm0, %v8302_v49 }
  0xed   : > { %841 = vst.msk [vmem:[#allocation4 + $0x50] sm:$0xff] %vm814_vm0, %v8302_v49  ;;  %842 = vst.msk [vmem:[#allocation4 + $0x58] sm:$0xff] %vm814_vm0, %v8302_v49 }
  0xee   : > { %843 = vst.msk [vmem:[#allocation4 + $0x60] sm:$0xff] %vm814_vm0, %v8302_v49  ;;  %844 = vst.msk [vmem:[#allocation4 + $0x68] sm:$0xff] %vm814_vm0, %v8302_v49 }
  0xef   : > { %845 = vst.msk [vmem:[#allocation4 + $0x70] sm:$0xff] %vm814_vm0, %v8302_v49  ;;  %846 = vst.msk [vmem:[#allocation4 + $0x78] sm:$0xff] %vm814_vm0, %v8302_v49 }
  0xf0   : > { %847 = vst.msk [vmem:[#allocation5] sm:$0xff] %vm814_vm0, %v8302_v49  ;;  %848 = vst.msk [vmem:[#allocation5 + $0x8] sm:$0xff] %vm814_vm0, %v8302_v49 }
  0xf1   : > { %678 = vmatpush1.bf16.xpose.msra.mxu0 %v6976_v11  ;;  %6809 = vmatpush1.bf16.xpose.msra.mxu1 %v6976_v11  ;;  %849 = vst.msk [vmem:[#allocation5 + $0x10] sm:$0xff] %vm814_vm0, %v8302_v49  ;;  %850 = vst.msk [vmem:[#allocation5 + $0x18] sm:$0xff] %vm814_vm0, %v8302_v49 }
  0xf2   : > { %679 = vmatprep.subr.bf16.mxu0 %v6977_v12  ;;  %6794 = vmatprep.subr.bf16.mxu1 %v6977_v12  ;;  %851 = vst.msk [vmem:[#allocation5 + $0x20] sm:$0xff] %vm814_vm0, %v8302_v49  ;;  %852 = vst.msk [vmem:[#allocation5 + $0x28] sm:$0xff] %vm814_vm0, %v8302_v49 }
  0xf3   : > { %853 = vst.msk [vmem:[#allocation5 + $0x30] sm:$0xff] %vm814_vm0, %v8302_v49  ;;  %854 = vst.msk [vmem:[#allocation5 + $0x38] sm:$0xff] %vm814_vm0, %v8302_v49 }
  0xf4   : > { %855 = vst.msk [vmem:[#allocation5 + $0x40] sm:$0xff] %vm814_vm0, %v8302_v49  ;;  %856 = vst.msk [vmem:[#allocation5 + $0x48] sm:$0xff] %vm814_vm0, %v8302_v49 }
  0xf5   : > { %857 = vst.msk [vmem:[#allocation5 + $0x50] sm:$0xff] %vm814_vm0, %v8302_v49  ;;  %858 = vst.msk [vmem:[#allocation5 + $0x58] sm:$0xff] %vm814_vm0, %v8302_v49 }
  0xf6   : > { %859 = vst.msk [vmem:[#allocation5 + $0x60] sm:$0xff] %vm814_vm0, %v8302_v49  ;;  %860 = vst.msk [vmem:[#allocation5 + $0x68] sm:$0xff] %vm814_vm0, %v8302_v49 }
  0xf7   : > { %861 = vst.msk [vmem:[#allocation5 + $0x70] sm:$0xff] %vm814_vm0, %v8302_v49  ;;  %862 = vst.msk [vmem:[#allocation5 + $0x78] sm:$0xff] %vm814_vm0, %v8302_v49 }
  0xf9   : > { %680 = vmatpush1.bf16.xpose.msra.mxu0 %v6979_v13  ;;  %6810 = vmatpush1.bf16.xpose.msra.mxu1 %v6979_v13 }
  0xfa   : > { %681 = vmatprep.subr.bf16.mxu0 %v6980_v14  ;;  %6795 = vmatprep.subr.bf16.mxu1 %v6980_v14 }
 0x101   : > { %682 = vmatpush1.bf16.xpose.msra.mxu0 %v6982_v15  ;;  %6811 = vmatpush1.bf16.xpose.msra.mxu1 %v6982_v15 }
 0x102   : > { %683 = vmatprep.subr.bf16.mxu0 %v6983_v16  ;;  %6796 = vmatprep.subr.bf16.mxu1 %v6983_v16 }
 0x109   : > { %684 = vmatpush1.bf16.xpose.msra.mxu0 %v6985_v17  ;;  %6812 = vmatpush1.bf16.xpose.msra.mxu1 %v6985_v17 }
 0x10a   : > { %685 = vmatprep.subr.bf16.mxu0 %v6986_v18  ;;  %6797 = vmatprep.subr.bf16.mxu1 %v6986_v18 }
 0x111   : > { %686 = vmatpush1.bf16.xpose.msra.mxu0 %v6988_v19  ;;  %6813 = vmatpush1.bf16.xpose.msra.mxu1 %v6988_v19 }
 0x112   : > { %687 = vmatprep.subr.bf16.mxu0 %v6989_v20  ;;  %6798 = vmatprep.subr.bf16.mxu1 %v6989_v20 }
 0x119   : > { %688 = vmatpush1.bf16.xpose.msra.mxu0 %v6991_v21  ;;  %6814 = vmatpush1.bf16.xpose.msra.mxu1 %v6991_v21 }
 0x11a   : > { %689 = vmatprep.subr.bf16.mxu0 %v6992_v22  ;;  %6799 = vmatprep.subr.bf16.mxu1 %v6992_v22 }
 0x121   : > { %690 = vmatpush1.bf16.xpose.msra.mxu0 %v6994_v23  ;;  %6815 = vmatpush1.bf16.xpose.msra.mxu1 %v6994_v23 }
 0x122   : > { %691 = vmatprep.subr.bf16.mxu0 %v6995_v24  ;;  %6800 = vmatprep.subr.bf16.mxu1 %v6995_v24 }
 0x129   : > { %692 = vmatpush1.bf16.xpose.msra.mxu0 %v6997_v25  ;;  %6816 = vmatpush1.bf16.xpose.msra.mxu1 %v6997_v25 }
 0x12a   : > { %693 = vmatprep.subr.bf16.mxu0 %v6998_v26  ;;  %6801 = vmatprep.subr.bf16.mxu1 %v6998_v26 }
 0x131   : > { %694 = vmatpush1.bf16.xpose.msra.mxu0 %v7000_v27  ;;  %6817 = vmatpush1.bf16.xpose.msra.mxu1 %v7000_v27 }
 0x132   : > { %695 = vmatprep.subr.bf16.mxu0 %v7001_v28  ;;  %6802 = vmatprep.subr.bf16.mxu1 %v7001_v28 }
 0x139   : > { %696 = vmatpush1.bf16.xpose.msra.mxu0 %v7003_v29  ;;  %6818 = vmatpush1.bf16.xpose.msra.mxu1 %v7003_v29 }
 0x13a   : > { %697 = vmatprep.subr.bf16.mxu0 %v7004_v30  ;;  %6803 = vmatprep.subr.bf16.mxu1 %v7004_v30 }
 0x141   : > { %698 = vmatpush1.bf16.xpose.msra.mxu0 %v7006_v31  ;;  %6819 = vmatpush1.bf16.xpose.msra.mxu1 %v7006_v31 }
 0x142   : > { %699 = vmatprep.subr.bf16.mxu0 %v7007_v32  ;;  %6804 = vmatprep.subr.bf16.mxu1 %v7007_v32 }
 0x149   : > { %700 = vmatpush1.bf16.xpose.msra.mxu0 %v7009_v33  ;;  %6820 = vmatpush1.bf16.xpose.msra.mxu1 %v7009_v33 }
 0x150   : > { %702 = vmatmul.mubr.bf16.vlgmr.msra.gmra.mrb[0].mxu0 %v7010_v34  ;;  %742 = vmatmul.mubr.bf16.vlgmr.msra.gmra.mrb[0].mxu1 %v7013_v35 }
 0x151   : > { %711 = vmatprep.mubr.bf16.mxu0 %v7016_v36  ;;  %751 = vmatprep.mubr.bf16.mxu1 %v7018_v37 }
 0x158   : > { %712 = vmatmul.mubr.bf16.gmra.mrb[4].mxu0 %v7020_v38  ;;  %752 = vmatmul.mubr.bf16.gmra.mrb[4].mxu1 %v7021_v39 }
 0x159   : > { %721 = vmatprep.mubr.bf16.mxu0 %v7022_v40  ;;  %761 = vmatprep.mubr.bf16.mxu1 %v7024_v41 }
 0x160   : > { %722 = vmatmul.mubr.bf16.gmra.mrb[8].mxu0 %v7026_v42  ;;  %762 = vmatmul.mubr.bf16.gmra.mrb[8].mxu1 %v7027_v43 }
 0x161   : > { %731 = vmatprep.mubr.bf16.mxu0 %v7028_v44  ;;  %771 = vmatprep.mubr.bf16.mxu1 %v7030_v45 }
 0x168   : > { %732 = vmatmul.mubr.bf16.gmra.mrb[12].mxu0 %v7032_v46  ;;  %772 = vmatmul.mubr.bf16.gmra.mrb[12].mxu1 %v7033_v47 }
 0x223   : > { %v703_v56 = vpop.f32.mrb[0].mxu0  ;;  %v743_v57 = vpop.f32.mrb[0].mxu1 }
 0x224   : > { %v705_v59 = vpop.f32.mrb[1].mxu0  ;;  %v745_v60 = vpop.f32.mrb[1].mxu1  ;;  %v704_v63 = vadd.f32 %v703_v56, %v8751_v55  ;;  %v744_v0 = vadd.f32 %v743_v57, %v8751_v55 }
 0x225   : > { %v707_v61 = vpop.f32.mrb[2].mxu0  ;;  %v747_v62 = vpop.f32.mrb[2].mxu1  ;;  %v706_v5 = vadd.f32 %v705_v59, %v8753_v58  ;;  %v746_v6 = vadd.f32 %v745_v60, %v8753_v58 }
 0x226   : > { %v708_v1 = vadd.f32 %v707_v61, %v8751_v55  ;;  %v748_v2 = vadd.f32 %v747_v62, %v8751_v55  ;;  %v709_v3 = vpop.f32.mrb[3].mxu0  ;;  %v749_v4 = vpop.f32.mrb[3].mxu1 }
 0x227   : > { %v710_v7 = vadd.f32 %v709_v3, %v8753_v58  ;;  %v750_v8 = vadd.f32 %v749_v4, %v8753_v58 }
 0x228   : > { %v782_v9 = vpack.c.bf16 %v708_v1, %v704_v63  ;;  %v790_v10 = vpack.c.bf16 %v748_v2, %v744_v0 }
 0x229   : > { %v783_v11 = vpack.c.bf16 %v710_v7, %v706_v5  ;;  %v791_v12 = vpack.c.bf16 %v750_v8, %v746_v6 }
 0x22a   : > { %798 = vst [vmem:[#allocation2] sm:$0xff] %v782_v9  ;;  %806 = vst [vmem:[#allocation2 + $0x40] sm:$0xff] %v790_v10 }
 0x22b   : > { %799 = vst [vmem:[#allocation2 + $0x8] sm:$0xff] %v783_v11  ;;  %807 = vst [vmem:[#allocation2 + $0x48] sm:$0xff] %v791_v12  ;;  %v713_v13 = vpop.f32.mrb[4].mxu0  ;;  %v753_v14 = vpop.f32.mrb[4].mxu1 }
 0x22c   : > { %v715_v15 = vpop.f32.mrb[5].mxu0  ;;  %v755_v16 = vpop.f32.mrb[5].mxu1  ;;  %v714_v19 = vadd.f32 %v713_v13, %v8751_v55  ;;  %v754_v20 = vadd.f32 %v753_v14, %v8751_v55 }
 0x22d   : > { %v717_v17 = vpop.f32.mrb[6].mxu0  ;;  %v757_v18 = vpop.f32.mrb[6].mxu1  ;;  %v716_v25 = vadd.f32 %v715_v15, %v8753_v58  ;;  %v756_v26 = vadd.f32 %v755_v16, %v8753_v58 }
 0x22e   : > { %v718_v21 = vadd.f32 %v717_v17, %v8751_v55  ;;  %v758_v22 = vadd.f32 %v757_v18, %v8751_v55  ;;  %v719_v23 = vpop.f32.mrb[7].mxu0  ;;  %v759_v24 = vpop.f32.mrb[7].mxu1 }
 0x22f   : > { %v720_v27 = vadd.f32 %v719_v23, %v8753_v58  ;;  %v760_v28 = vadd.f32 %v759_v24, %v8753_v58 }
 0x230   : > { %v784_v29 = vpack.c.bf16 %v718_v21, %v714_v19  ;;  %v792_v30 = vpack.c.bf16 %v758_v22, %v754_v20 }
 0x231   : > { %v785_v31 = vpack.c.bf16 %v720_v27, %v716_v25  ;;  %v793_v32 = vpack.c.bf16 %v760_v28, %v756_v26 }
 0x232   : > { %800 = vst [vmem:[#allocation2 + $0x10] sm:$0xff] %v784_v29  ;;  %808 = vst [vmem:[#allocation2 + $0x50] sm:$0xff] %v792_v30 }
 0x233   : > { %801 = vst [vmem:[#allocation2 + $0x18] sm:$0xff] %v785_v31  ;;  %809 = vst [vmem:[#allocation2 + $0x58] sm:$0xff] %v793_v32  ;;  %v723_v33 = vpop.f32.mrb[8].mxu0  ;;  %v763_v34 = vpop.f32.mrb[8].mxu1 }
 0x234   : > { %v725_v35 = vpop.f32.mrb[9].mxu0  ;;  %v765_v36 = vpop.f32.mrb[9].mxu1  ;;  %v724_v39 = vadd.f32 %v723_v33, %v8751_v55  ;;  %v764_v40 = vadd.f32 %v763_v34, %v8751_v55 }
 0x235   : > { %v727_v37 = vpop.f32.mrb[10].mxu0  ;;  %v767_v38 = vpop.f32.mrb[10].mxu1  ;;  %v726_v45 = vadd.f32 %v725_v35, %v8753_v58  ;;  %v766_v46 = vadd.f32 %v765_v36, %v8753_v58 }
 0x236   : > { %v728_v41 = vadd.f32 %v727_v37, %v8751_v55  ;;  %v768_v42 = vadd.f32 %v767_v38, %v8751_v55  ;;  %v729_v43 = vpop.f32.mrb[11].mxu0  ;;  %v769_v44 = vpop.f32.mrb[11].mxu1 }
 0x237   : > { %v730_v47 = vadd.f32 %v729_v43, %v8753_v58  ;;  %v770_v48 = vadd.f32 %v769_v44, %v8753_v58 }
 0x238   : > { %v786_v49 = vpack.c.bf16 %v728_v41, %v724_v39  ;;  %v794_v50 = vpack.c.bf16 %v768_v42, %v764_v40 }
 0x239   : > { %v787_v51 = vpack.c.bf16 %v730_v47, %v726_v45  ;;  %v795_v52 = vpack.c.bf16 %v770_v48, %v766_v46 }
 0x23a   : > { %802 = vst [vmem:[#allocation2 + $0x20] sm:$0xff] %v786_v49  ;;  %810 = vst [vmem:[#allocation2 + $0x60] sm:$0xff] %v794_v50 }
 0x23b   : > { %803 = vst [vmem:[#allocation2 + $0x28] sm:$0xff] %v787_v51  ;;  %811 = vst [vmem:[#allocation2 + $0x68] sm:$0xff] %v795_v52  ;;  %v733_v53 = vpop.f32.mrb[12].mxu0  ;;  %v773_v54 = vpop.f32.mrb[12].mxu1 }
 0x23c   : > { %v735_v56 = vpop.f32.mrb[13].mxu0  ;;  %v775_v57 = vpop.f32.mrb[13].mxu1  ;;  %v734_v61 = vadd.f32 %v733_v53, %v8751_v55  ;;  %v774_v62 = vadd.f32 %v773_v54, %v8751_v55 }
 0x23d   : > { %v737_v59 = vpop.f32.mrb[14].mxu0  ;;  %v777_v60 = vpop.f32.mrb[14].mxu1  ;;  %v736_v3 = vadd.f32 %v735_v56, %v8753_v58  ;;  %v776_v4 = vadd.f32 %v775_v57, %v8753_v58 }
 0x23e   : > { %v738_v63 = vadd.f32 %v737_v59, %v8751_v55  ;;  %v778_v0 = vadd.f32 %v777_v60, %v8751_v55  ;;  %v739_v1 = vpop.f32.mrb[15].mxu0  ;;  %v779_v2 = vpop.f32.mrb[15].mxu1 }
 0x23f   : > { %v740_v5 = vadd.f32 %v739_v1, %v8753_v58  ;;  %v780_v6 = vadd.f32 %v779_v2, %v8753_v58 }
 0x240   : > { %v788_v7 = vpack.c.bf16 %v738_v63, %v734_v61  ;;  %v796_v8 = vpack.c.bf16 %v778_v0, %v774_v62 }
 0x241   : > { %v789_v9 = vpack.c.bf16 %v740_v5, %v736_v3  ;;  %v797_v10 = vpack.c.bf16 %v780_v6, %v776_v4 }
 0x242   : > { %804 = vst [vmem:[#allocation2 + $0x30] sm:$0xff] %v788_v7  ;;  %812 = vst [vmem:[#allocation2 + $0x70] sm:$0xff] %v796_v8 }
 0x243   : > { %805 = vst [vmem:[#allocation2 + $0x38] sm:$0xff] %v789_v9  ;;  %813 = vst [vmem:[#allocation2 + $0x78] sm:$0xff] %v797_v10 }
 0x244 PF: > { %v7036_v55 = vld [vmem:[%s8672_s1 + $0x4] ss:$8 sps:$4 sm:$0xff]   ;;  %v7038_v58 = vld [vmem:[%s8672_s1] ss:$8 sps:$4 sm:$0xff]   ;;  %v7042_v13 = vld [vmem:[%s8672_s1 + $0x14] ss:$8 sps:$4 sm:$0xff]  }
 0x245   : > { %2415 = vmatprep.subr.bf16.mxu0 %v7036_v55  ;;  %v7039_v11 = vld [vmem:[%s8672_s1 + $0x104] ss:$8 sps:$4 sm:$0xff]   ;;  %v7041_v12 = vld [vmem:[%s8672_s1 + $0x100] ss:$8 sps:$4 sm:$0xff]   ;;  %v7045_v14 = vld [vmem:[%s8672_s1 + $0x114] ss:$8 sps:$4 sm:$0xff]  }
 0x246   : > { %2416 = vmatpush1.bf16.xpose.msra.mxu0 %v7038_v58  ;;  %2528 = vmatprep.subr.bf16.mxu1 %v7039_v11  ;;  %v7044_v15 = vld [vmem:[%s8672_s1 + $0x10] ss:$8 sps:$4 sm:$0xff]   ;;  %v7048_v16 = vld [vmem:[%s8672_s1 + $0x24] ss:$8 sps:$4 sm:$0xff]   ;;  %v7050_v19 = vld [vmem:[%s8672_s1 + $0x20] ss:$8 sps:$4 sm:$0xff]  }
 0x247   : > { %2529 = vmatpush1.bf16.xpose.msra.mxu1 %v7041_v12  ;;  %2417 = vmatprep.subr.bf16.mxu0 %v7042_v13  ;;  %v7047_v17 = vld [vmem:[%s8672_s1 + $0x110] ss:$8 sps:$4 sm:$0xff]   ;;  %v7051_v18 = vld [vmem:[%s8672_s1 + $0x124] ss:$8 sps:$4 sm:$0xff]   ;;  %v7054_v20 = vld [vmem:[%s8672_s1 + $0x34] ss:$8 sps:$4 sm:$0xff]  }
 0x248   : > { %2530 = vmatprep.subr.bf16.mxu1 %v7045_v14  ;;  %v7053_v21 = vld [vmem:[%s8672_s1 + $0x120] ss:$8 sps:$4 sm:$0xff]   ;;  %v7057_v22 = vld [vmem:[%s8672_s1 + $0x134] ss:$8 sps:$4 sm:$0xff]   ;;  %v7056_v23 = vld [vmem:[%s8672_s1 + $0x30] ss:$8 sps:$4 sm:$0xff]  }
 0x249   : > { %v7060_v24 = vld [vmem:[%s8672_s1 + $0x44] ss:$8 sps:$4 sm:$0xff]   ;;  %v7059_v25 = vld [vmem:[%s8672_s1 + $0x130] ss:$8 sps:$4 sm:$0xff]   ;;  %v7062_v27 = vld [vmem:[%s8672_s1 + $0x40] ss:$8 sps:$4 sm:$0xff]  }
 0x24a   : > { %v7063_v26 = vld [vmem:[%s8672_s1 + $0x144] ss:$8 sps:$4 sm:$0xff]   ;;  %v7066_v28 = vld [vmem:[%s8672_s1 + $0x54] ss:$8 sps:$4 sm:$0xff]   ;;  %v7065_v29 = vld [vmem:[%s8672_s1 + $0x140] ss:$8 sps:$4 sm:$0xff]  }
 0x24b   : > { %v7069_v30 = vld [vmem:[%s8672_s1 + $0x154] ss:$8 sps:$4 sm:$0xff]   ;;  %v7068_v31 = vld [vmem:[%s8672_s1 + $0x50] ss:$8 sps:$4 sm:$0xff]   ;;  %v7072_v32 = vld [vmem:[%s8672_s1 + $0x64] ss:$8 sps:$4 sm:$0xff]  }
 0x24c   : > { %v7071_v33 = vld [vmem:[%s8672_s1 + $0x150] ss:$8 sps:$4 sm:$0xff]   ;;  %v7075_v34 = vld [vmem:[%s8672_s1 + $0x164] ss:$8 sps:$4 sm:$0xff]   ;;  %v7074_v36 = vld [vmem:[%s8672_s1 + $0x60] ss:$8 sps:$4 sm:$0xff]  }
 0x24d   : > { %v8813_v35 = vld [vmem:[#allocation2 + $0x8] sm:$0xff]  ;;  %v7078_v37 = vld [vmem:[%s8672_s1 + $0x74] ss:$8 sps:$4 sm:$0xff]   ;;  %v7080_v40 = vld [vmem:[%s8672_s1 + $0x70] ss:$8 sps:$4 sm:$0xff]   ;;  %v8303_v54 = vmov 0  }
 0x24e   : > { %2418 = vmatpush1.bf16.xpose.msra.mxu0 %v7044_v15  ;;  %2447 = vmatprep.mubr.bf16.mxu0 %v8813_v35  ;;  %v7077_v38 = vld [vmem:[%s8672_s1 + $0x160] ss:$8 sps:$4 sm:$0xff]   ;;  %v7081_v39 = vld [vmem:[%s8672_s1 + $0x174] ss:$8 sps:$4 sm:$0xff]   ;;  %v7084_v41 = vld [vmem:[%s8672_s1 + $0x84] ss:$8 sps:$4 sm:$0xff]  }
 0x24f   : > { %2419 = vmatprep.subr.bf16.mxu0 %v7048_v16  ;;  %2531 = vmatpush1.bf16.xpose.msra.mxu1 %v7047_v17  ;;  %v7083_v42 = vld [vmem:[%s8672_s1 + $0x170] ss:$8 sps:$4 sm:$0xff]   ;;  %v7087_v43 = vld [vmem:[%s8672_s1 + $0x184] ss:$8 sps:$4 sm:$0xff]   ;;  %v7086_v44 = vld [vmem:[%s8672_s1 + $0x80] ss:$8 sps:$4 sm:$0xff]  }
 0x250   : > { %2532 = vmatprep.subr.bf16.mxu1 %v7051_v18  ;;  %2560 = vmatprep.mubr.bf16.mxu1 %v8813_v35  ;;  %v7090_v45 = vld [vmem:[%s8672_s1 + $0x94] ss:$8 sps:$4 sm:$0xff]   ;;  %v7089_v46 = vld [vmem:[%s8672_s1 + $0x180] ss:$8 sps:$4 sm:$0xff]   ;;  %v7092_v48 = vld [vmem:[%s8672_s1 + $0x90] ss:$8 sps:$4 sm:$0xff]  }
 0x251   : > { %v7093_v47 = vld [vmem:[%s8672_s1 + $0x194] ss:$8 sps:$4 sm:$0xff]   ;;  %v7096_v49 = vld [vmem:[%s8672_s1 + $0xa4] ss:$8 sps:$4 sm:$0xff]   ;;  %v7095_v50 = vld [vmem:[%s8672_s1 + $0x190] ss:$8 sps:$4 sm:$0xff]   ;;  %7034 = vset.pattern.permute.xlu0 %v8303_v54  ;;  %7035 = vset.pattern.permute.xlu1 %v8303_v54 }
 0x252   : > { %v7099_v51 = vld [vmem:[%s8672_s1 + $0x1a4] ss:$8 sps:$4 sm:$0xff]   ;;  %v7098_v52 = vld [vmem:[%s8672_s1 + $0xa0] ss:$8 sps:$4 sm:$0xff]   ;;  %v7102_v53 = vld [vmem:[%s8672_s1 + $0xb4] ss:$8 sps:$4 sm:$0xff]  }
 0x253   : > { %v7101_v56 = vld [vmem:[%s8672_s1 + $0x1a0] ss:$8 sps:$4 sm:$0xff]   ;;  %v7105_v57 = vld [vmem:[%s8672_s1 + $0x1b4] ss:$8 sps:$4 sm:$0xff]   ;;  %v7104_v61 = vld [vmem:[%s8672_s1 + $0xb0] ss:$8 sps:$4 sm:$0xff]  }
 0x254   : > { %v8838_v59 = vld [vmem:[%s8678_s21] sm:$0xff]  ;;  %v8842_v60 = vld [vmem:[%s8678_s21 + $0x8] sm:$0xff]  ;;  %v7107_v63 = vld [vmem:[%s8672_s1 + $0x1b0] ss:$8 sps:$4 sm:$0xff]   ;;  %s6760_s29 = sshll.u32 %s8276_s24, 11  ;;  %p6761_p3 = scmp.ne.s32.totalorder %s8276_s24, 14 }
 0x255   : > { %14649 = vst [vmem:[#allocation28_spill] sm:$0xff] %v8838_v59  ;;  %3659 = vperm.xlu0 %7034, %v8838_v59   ;;  %14650 = vst [vmem:[#allocation29_spill] sm:$0xff] %v8842_v60  ;;  %v7108_v62 = vld [vmem:[%s8672_s1 + $0xc4] ss:$8 sps:$4 sm:$0xff]   ;;  %v7110_v1 = vld [vmem:[%s8672_s1 + $0xc0] ss:$8 sps:$4 sm:$0xff]  }
 0x256   : > { %2420 = vmatpush1.bf16.xpose.msra.mxu0 %v7050_v19  ;;  %v7111_v0 = vld [vmem:[%s8672_s1 + $0x1c4] ss:$8 sps:$4 sm:$0xff]   ;;  %v7114_v2 = vld [vmem:[%s8672_s1 + $0xd4] ss:$8 sps:$4 sm:$0xff]   ;;  %v7113_v3 = vld [vmem:[%s8672_s1 + $0x1c0] ss:$8 sps:$4 sm:$0xff]  }
 0x257   : > { %2421 = vmatprep.subr.bf16.mxu0 %v7054_v20  ;;  %2533 = vmatpush1.bf16.xpose.msra.mxu1 %v7053_v21  ;;  %v7117_v4 = vld [vmem:[%s8672_s1 + $0x1d4] ss:$8 sps:$4 sm:$0xff]   ;;  %v7116_v5 = vld [vmem:[%s8672_s1 + $0xd0] ss:$8 sps:$4 sm:$0xff]   ;;  %v7120_v6 = vld [vmem:[%s8672_s1 + $0xe4] ss:$8 sps:$4 sm:$0xff]  }
 0x258   : > { %2534 = vmatprep.subr.bf16.mxu1 %v7057_v22  ;;  %v7119_v7 = vld [vmem:[%s8672_s1 + $0x1d0] ss:$8 sps:$4 sm:$0xff]   ;;  %v7123_v8 = vld [vmem:[%s8672_s1 + $0x1e4] ss:$8 sps:$4 sm:$0xff]   ;;  %v7122_v9 = vld [vmem:[%s8672_s1 + $0xe0] ss:$8 sps:$4 sm:$0xff]  }
 0x259   : > { %3662 = vperm.xlu0 %7034, %v8842_v60   ;;  %v7126_v10 = vld [vmem:[%s8672_s1 + $0xf4] ss:$8 sps:$4 sm:$0xff]   ;;  %v7125_v55 = vld [vmem:[%s8672_s1 + $0x1e0] ss:$8 sps:$4 sm:$0xff]   ;;  %v7128_v11 = vld [vmem:[%s8672_s1 + $0xf0] ss:$8 sps:$4 sm:$0xff]  }
 0x25a   : > { %v7129_v58 = vld [vmem:[%s8672_s1 + $0x1f4] ss:$8 sps:$4 sm:$0xff]   ;;  %v7134_v12 = vld [vmem:[%s8672_s1 + $0x204] ss:$8 sps:$4 sm:$0xff]   ;;  %v7131_v13 = vld [vmem:[%s8672_s1 + $0x1f0] ss:$8 sps:$4 sm:$0xff]  }
 0x25b   : > { %v7137_v14 = vld [vmem:[%s8672_s1 + $0x304] ss:$8 sps:$4 sm:$0xff]   ;;  %v7132_v16 = vld [vmem:[%s8672_s1 + $0x200] ss:$8 sps:$4 sm:$0xff]   ;;  %v7140_v17 = vld [vmem:[%s8672_s1 + $0x214] ss:$8 sps:$4 sm:$0xff]  }
 0x25c   : > { %v8865_v15 = vld [vmem:[#allocation2] sm:$0xff]  ;;  %v8869_v18 = vld [vmem:[#allocation2 + $0x18] sm:$0xff]  ;;  %v8878_v22 = vld [vmem:[#allocation2 + $0x10] sm:$0xff] }
 0x25d   : > { %v7135_v19 = vld [vmem:[%s8672_s1 + $0x300] ss:$8 sps:$4 sm:$0xff]   ;;  %v7143_v20 = vld [vmem:[%s8672_s1 + $0x314] ss:$8 sps:$4 sm:$0xff]   ;;  %v7138_v21 = vld [vmem:[%s8672_s1 + $0x210] ss:$8 sps:$4 sm:$0xff]  }
 0x25e   : > { %2422 = vmatpush1.bf16.xpose.msra.mxu0 %v7056_v23  ;;  %v7146_v23 = vld [vmem:[%s8672_s1 + $0x224] ss:$8 sps:$4 sm:$0xff]   ;;  %v7324_v60 = vld [vmem:[%s8672_s1 + $0x600] ss:$8 sps:$4 sm:$0xff]  }
 0x25f   : > { %2423 = vmatprep.subr.bf16.mxu0 %v7060_v24  ;;  %2535 = vmatpush1.bf16.xpose.msra.mxu1 %v7059_v25  ;;  %v8881_v24 = vld [vmem:[#allocation2 + $0x28] sm:$0xff]  ;;  %v7141_v25 = vld [vmem:[%s8672_s1 + $0x310] ss:$8 sps:$4 sm:$0xff]  }
 0x260   : > { %2536 = vmatprep.subr.bf16.mxu1 %v7063_v26  ;;  %v7149_v26 = vld [vmem:[%s8672_s1 + $0x324] ss:$8 sps:$4 sm:$0xff]  }
 0x261   : > { %v7173_v54 = vld [vmem:[%s8672_s1 + $0x364] ss:$8 sps:$4 sm:$0xff]  }
 0x266   : > { %2424 = vmatpush1.bf16.xpose.msra.mxu0 %v7062_v27  ;;  %v7144_v27 = vld [vmem:[%s8672_s1 + $0x220] ss:$8 sps:$4 sm:$0xff]  }
 0x267   : > { %2425 = vmatprep.subr.bf16.mxu0 %v7066_v28  ;;  %2537 = vmatpush1.bf16.xpose.msra.mxu1 %v7065_v29  ;;  %v8890_v28 = vld [vmem:[#allocation2 + $0x20] sm:$0xff] }
 0x268   : > { %2538 = vmatprep.subr.bf16.mxu1 %v7069_v30  ;;  %v7152_v29 = vld [vmem:[%s8672_s1 + $0x234] ss:$8 sps:$4 sm:$0xff]  }
 0x269   : > { %v8893_v30 = vld [vmem:[#allocation2 + $0x38] sm:$0xff] }
 0x26e   : > { %2426 = vmatpush1.bf16.xpose.msra.mxu0 %v7068_v31  ;;  %v7147_v31 = vld [vmem:[%s8672_s1 + $0x320] ss:$8 sps:$4 sm:$0xff]  }
 0x26f   : > { %2427 = vmatprep.subr.bf16.mxu0 %v7072_v32  ;;  %2539 = vmatpush1.bf16.xpose.msra.mxu1 %v7071_v33  ;;  %v7155_v32 = vld [vmem:[%s8672_s1 + $0x334] ss:$8 sps:$4 sm:$0xff]   ;;  %v7150_v33 = vld [vmem:[%s8672_s1 + $0x230] ss:$8 sps:$4 sm:$0xff]  }
 0x270   : > { %2540 = vmatprep.subr.bf16.mxu1 %v7075_v34  ;;  %v8902_v34 = vld [vmem:[#allocation2 + $0x30] sm:$0xff] }
 0x276   : > { %2428 = vmatpush1.bf16.xpose.msra.mxu0 %v7074_v36  ;;  %v7158_v36 = vld [vmem:[%s8672_s1 + $0x244] ss:$8 sps:$4 sm:$0xff]  }
 0x277   : > { %2429 = vmatprep.subr.bf16.mxu0 %v7078_v37  ;;  %2541 = vmatpush1.bf16.xpose.msra.mxu1 %v7077_v38  ;;  %v8905_v37 = vld [vmem:[#allocation2 + $0x48] sm:$0xff]  ;;  %v7153_v38 = vld [vmem:[%s8672_s1 + $0x330] ss:$8 sps:$4 sm:$0xff]  }
 0x278   : > { %2542 = vmatprep.subr.bf16.mxu1 %v7081_v39  ;;  %v7161_v39 = vld [vmem:[%s8672_s1 + $0x344] ss:$8 sps:$4 sm:$0xff]  }
 0x27e   : > { %2430 = vmatpush1.bf16.xpose.msra.mxu0 %v7080_v40  ;;  %v8914_v40 = vld [vmem:[%s8678_s21 + $0x10] sm:$0xff] }
 0x27f   : > { %2431 = vmatprep.subr.bf16.mxu0 %v7084_v41  ;;  %2543 = vmatpush1.bf16.xpose.msra.mxu1 %v7083_v42  ;;  %14651 = vst [vmem:[#allocation30_spill] sm:$0xff] %v8914_v40  ;;  %v8917_v41 = vld [vmem:[%s8678_s21 + $0x18] sm:$0xff]  ;;  %v7156_v42 = vld [vmem:[%s8672_s1 + $0x240] ss:$8 sps:$4 sm:$0xff]  }
 0x280   : > { %2544 = vmatprep.subr.bf16.mxu1 %v7087_v43  ;;  %14652 = vst [vmem:[#allocation31_spill] sm:$0xff] %v8917_v41  ;;  %3665 = vperm.xlu1 %7035, %v8914_v40   ;;  %v8921_v43 = vld [vmem:[#allocation2 + $0x40] sm:$0xff] }
 0x281   : > { %3668 = vperm.xlu0 %7034, %v8917_v41  }
 0x286   : > { %2432 = vmatpush1.bf16.xpose.msra.mxu0 %v7086_v44  ;;  %v7164_v44 = vld [vmem:[%s8672_s1 + $0x254] ss:$8 sps:$4 sm:$0xff]  }
 0x287   : > { %2433 = vmatprep.subr.bf16.mxu0 %v7090_v45  ;;  %2545 = vmatpush1.bf16.xpose.msra.mxu1 %v7089_v46  ;;  %v8925_v45 = vld [vmem:[#allocation2 + $0x58] sm:$0xff]  ;;  %v7159_v46 = vld [vmem:[%s8672_s1 + $0x340] ss:$8 sps:$4 sm:$0xff]  }
 0x288   : > { %2546 = vmatprep.subr.bf16.mxu1 %v7093_v47  ;;  %v7167_v47 = vld [vmem:[%s8672_s1 + $0x354] ss:$8 sps:$4 sm:$0xff]  }
 0x28e   : > { %2434 = vmatpush1.bf16.xpose.msra.mxu0 %v7092_v48  ;;  %v8934_v48 = vld [vmem:[%s8678_s21 + $0x20] sm:$0xff] }
 0x28f   : > { %2435 = vmatprep.subr.bf16.mxu0 %v7096_v49  ;;  %2547 = vmatpush1.bf16.xpose.msra.mxu1 %v7095_v50  ;;  %14653 = vst [vmem:[#allocation32_spill] sm:$0xff] %v8934_v48  ;;  %v7162_v49 = vld [vmem:[%s8672_s1 + $0x250] ss:$8 sps:$4 sm:$0xff]  }
 0x290   : > { %2548 = vmatprep.subr.bf16.mxu1 %v7099_v51  ;;  %3671 = vperm.xlu1 %7035, %v8934_v48   ;;  %v8938_v50 = vld [vmem:[#allocation2 + $0x50] sm:$0xff] }
 0x291   : > { %v7170_v51 = vld [vmem:[%s8672_s1 + $0x264] ss:$8 sps:$4 sm:$0xff]  }
 0x296   : > { %2436 = vmatpush1.bf16.xpose.msra.mxu0 %v7098_v52  ;;  %v8941_v52 = vld [vmem:[#allocation2 + $0x68] sm:$0xff] }
 0x297   : > { %2437 = vmatprep.subr.bf16.mxu0 %v7102_v53  ;;  %2549 = vmatpush1.bf16.xpose.msra.mxu1 %v7101_v56  ;;  %v7165_v53 = vld [vmem:[%s8672_s1 + $0x350] ss:$8 sps:$4 sm:$0xff]   ;;  %v7168_v56 = vld [vmem:[%s8672_s1 + $0x260] ss:$8 sps:$4 sm:$0xff]  }
 0x298   : > { %2550 = vmatprep.subr.bf16.mxu1 %v7105_v57  ;;  %v8950_v57 = vld [vmem:[#allocation2 + $0x60] sm:$0xff] }
 0x29e   : > { %2438 = vmatpush1.bf16.xpose.msra.mxu0 %v7104_v61  ;;  %v7176_v61 = vld [vmem:[%s8672_s1 + $0x274] ss:$8 sps:$4 sm:$0xff]  }
 0x29f   : > { %2439 = vmatprep.subr.bf16.mxu0 %v7108_v62  ;;  %2551 = vmatpush1.bf16.xpose.msra.mxu1 %v7107_v63  ;;  %v8953_v62 = vld [vmem:[#allocation2 + $0x78] sm:$0xff]  ;;  %v7171_v63 = vld [vmem:[%s8672_s1 + $0x360] ss:$8 sps:$4 sm:$0xff]  }
 0x2a0   : > { %2552 = vmatprep.subr.bf16.mxu1 %v7111_v0  ;;  %v7179_v0 = vld [vmem:[%s8672_s1 + $0x374] ss:$8 sps:$4 sm:$0xff]  }
 0x2a6   : > { %2440 = vmatpush1.bf16.xpose.msra.mxu0 %v7110_v1  ;;  %v7174_v1 = vld [vmem:[%s8672_s1 + $0x270] ss:$8 sps:$4 sm:$0xff]  }
 0x2a7   : > { %2441 = vmatprep.subr.bf16.mxu0 %v7114_v2  ;;  %2553 = vmatpush1.bf16.xpose.msra.mxu1 %v7113_v3  ;;  %v8962_v2 = vld [vmem:[#allocation2 + $0x70] sm:$0xff] }
 0x2a8   : > { %2554 = vmatprep.subr.bf16.mxu1 %v7117_v4  ;;  %v7182_v3 = vld [vmem:[%s8672_s1 + $0x284] ss:$8 sps:$4 sm:$0xff]   ;;  %v7177_v4 = vld [vmem:[%s8672_s1 + $0x370] ss:$8 sps:$4 sm:$0xff]  }
 0x2ae   : > { %2442 = vmatpush1.bf16.xpose.msra.mxu0 %v7116_v5  ;;  %v7185_v5 = vld [vmem:[%s8672_s1 + $0x384] ss:$8 sps:$4 sm:$0xff]  }
 0x2af   : > { %2443 = vmatprep.subr.bf16.mxu0 %v7120_v6  ;;  %2555 = vmatpush1.bf16.xpose.msra.mxu1 %v7119_v7  ;;  %v7180_v6 = vld [vmem:[%s8672_s1 + $0x280] ss:$8 sps:$4 sm:$0xff]   ;;  %v7188_v7 = vld [vmem:[%s8672_s1 + $0x294] ss:$8 sps:$4 sm:$0xff]  }
 0x2b0   : > { %2556 = vmatprep.subr.bf16.mxu1 %v7123_v8  ;;  %v7183_v8 = vld [vmem:[%s8672_s1 + $0x380] ss:$8 sps:$4 sm:$0xff]  }
 0x2b6   : > { %2444 = vmatpush1.bf16.xpose.msra.mxu0 %v7122_v9  ;;  %v7191_v9 = vld [vmem:[%s8672_s1 + $0x394] ss:$8 sps:$4 sm:$0xff]  }
 0x2b7   : > { %2445 = vmatprep.subr.bf16.mxu0 %v7126_v10  ;;  %2557 = vmatpush1.bf16.xpose.msra.mxu1 %v7125_v55  ;;  %v7186_v10 = vld [vmem:[%s8672_s1 + $0x290] ss:$8 sps:$4 sm:$0xff]   ;;  %v7194_v55 = vld [vmem:[%s8672_s1 + $0x2a4] ss:$8 sps:$4 sm:$0xff]  }
 0x2b8   : > { %2558 = vmatprep.subr.bf16.mxu1 %v7129_v58  ;;  %v7189_v58 = vld [vmem:[%s8672_s1 + $0x390] ss:$8 sps:$4 sm:$0xff]  }
 0x2be   : > { %2446 = vmatpush1.bf16.xpose.msra.mxu0 %v7128_v11  ;;  %v7192_v11 = vld [vmem:[%s8672_s1 + $0x2a0] ss:$8 sps:$4 sm:$0xff]  }
 0x2bf   : > { %2641 = vmatprep.subr.bf16.mxu0 %v7134_v12  ;;  %2559 = vmatpush1.bf16.xpose.msra.mxu1 %v7131_v13  ;;  %v7200_v12 = vld [vmem:[%s8672_s1 + $0x2b4] ss:$8 sps:$4 sm:$0xff]   ;;  %v7195_v13 = vld [vmem:[%s8672_s1 + $0x3a0] ss:$8 sps:$4 sm:$0xff]  }
 0x2c0   : > { %2754 = vmatprep.subr.bf16.mxu1 %v7137_v14  ;;  %v7203_v14 = vld [vmem:[%s8672_s1 + $0x3b4] ss:$8 sps:$4 sm:$0xff]  }
 0x2c5   : > { %2448 = vmatmul.mubr.bf16.vlgmr.msra.gmra.mrb[0].mxu0 %v8865_v15 }
 0x2c6   : > { %2642 = vmatpush1.bf16.xpose.msra.mxu0 %v7132_v16  ;;  %2457 = vmatprep.mubr.bf16.mxu0 %v8869_v18  ;;  %v7198_v16 = vld [vmem:[%s8672_s1 + $0x2b0] ss:$8 sps:$4 sm:$0xff]  }
 0x2c7   : > { %2561 = vmatmul.mubr.bf16.vlgmr.msra.gmra.mrb[0].mxu1 %v8865_v15  ;;  %2643 = vmatprep.subr.bf16.mxu0 %v7140_v17  ;;  %v7206_v17 = vld [vmem:[%s8672_s1 + $0x2c4] ss:$8 sps:$4 sm:$0xff]  }
 0x2c8   : > { %2755 = vmatpush1.bf16.xpose.msra.mxu1 %v7135_v19  ;;  %2570 = vmatprep.mubr.bf16.mxu1 %v8869_v18  ;;  %v7201_v19 = vld [vmem:[%s8672_s1 + $0x3b0] ss:$8 sps:$4 sm:$0xff]  }
 0x2c9   : > { %2756 = vmatprep.subr.bf16.mxu1 %v7143_v20  ;;  %v7209_v20 = vld [vmem:[%s8672_s1 + $0x3c4] ss:$8 sps:$4 sm:$0xff]  }
 0x2cd   : > { %2458 = vmatmul.mubr.bf16.gmra.mrb[4].mxu0 %v8878_v22 }
 0x2ce   : > { %2644 = vmatpush1.bf16.xpose.msra.mxu0 %v7138_v21  ;;  %2467 = vmatprep.mubr.bf16.mxu0 %v8881_v24  ;;  %v7204_v21 = vld [vmem:[%s8672_s1 + $0x2c0] ss:$8 sps:$4 sm:$0xff]  }
 0x2cf   : > { %2645 = vmatprep.subr.bf16.mxu0 %v7146_v23  ;;  %2571 = vmatmul.mubr.bf16.gmra.mrb[4].mxu1 %v8878_v22  ;;  %v7212_v23 = vld [vmem:[%s8672_s1 + $0x2d4] ss:$8 sps:$4 sm:$0xff]  }
 0x2d0   : > { %2757 = vmatpush1.bf16.xpose.msra.mxu1 %v7141_v25  ;;  %2580 = vmatprep.mubr.bf16.mxu1 %v8881_v24  ;;  %v7207_v25 = vld [vmem:[%s8672_s1 + $0x3c0] ss:$8 sps:$4 sm:$0xff]  }
 0x2d1   : > { %2758 = vmatprep.subr.bf16.mxu1 %v7149_v26  ;;  %v7215_v26 = vld [vmem:[%s8672_s1 + $0x3d4] ss:$8 sps:$4 sm:$0xff]  }
 0x2d5   : > { %2468 = vmatmul.mubr.bf16.gmra.mrb[8].mxu0 %v8890_v28 }
 0x2d6   : > { %2646 = vmatpush1.bf16.xpose.msra.mxu0 %v7144_v27  ;;  %2477 = vmatprep.mubr.bf16.mxu0 %v8893_v30  ;;  %v7210_v27 = vld [vmem:[%s8672_s1 + $0x2d0] ss:$8 sps:$4 sm:$0xff]  }
 0x2d7   : > { %2647 = vmatprep.subr.bf16.mxu0 %v7152_v29  ;;  %2581 = vmatmul.mubr.bf16.gmra.mrb[8].mxu1 %v8890_v28  ;;  %v7218_v29 = vld [vmem:[%s8672_s1 + $0x2e4] ss:$8 sps:$4 sm:$0xff]  }
 0x2d8   : > { %2759 = vmatpush1.bf16.xpose.msra.mxu1 %v7147_v31  ;;  %2590 = vmatprep.mubr.bf16.mxu1 %v8893_v30  ;;  %v7213_v31 = vld [vmem:[%s8672_s1 + $0x3d0] ss:$8 sps:$4 sm:$0xff]  }
 0x2d9   : > { %2760 = vmatprep.subr.bf16.mxu1 %v7155_v32  ;;  %v7221_v32 = vld [vmem:[%s8672_s1 + $0x3e4] ss:$8 sps:$4 sm:$0xff]  }
 0x2dd   : > { %2478 = vmatmul.mubr.bf16.gmra.mrb[12].mxu0 %v8902_v34 }
 0x2de   : > { %2648 = vmatpush1.bf16.xpose.msra.mxu0 %v7150_v33  ;;  %2487 = vmatprep.mubr.bf16.mxu0 %v8905_v37  ;;  %v7216_v33 = vld [vmem:[%s8672_s1 + $0x2e0] ss:$8 sps:$4 sm:$0xff]  }
 0x2df   : > { %2649 = vmatprep.subr.bf16.mxu0 %v7158_v36  ;;  %2591 = vmatmul.mubr.bf16.gmra.mrb[12].mxu1 %v8902_v34  ;;  %v7224_v36 = vld [vmem:[%s8672_s1 + $0x2f4] ss:$8 sps:$4 sm:$0xff]  }
 0x2e0   : > { %2761 = vmatpush1.bf16.xpose.msra.mxu1 %v7153_v38  ;;  %2600 = vmatprep.mubr.bf16.mxu1 %v8905_v37  ;;  %v7219_v38 = vld [vmem:[%s8672_s1 + $0x3e0] ss:$8 sps:$4 sm:$0xff]  }
 0x2e1   : > { %2762 = vmatprep.subr.bf16.mxu1 %v7161_v39  ;;  %v7227_v39 = vld [vmem:[%s8672_s1 + $0x3f4] ss:$8 sps:$4 sm:$0xff]  }
 0x2e5   : > { %2488 = vmatmul.mubr.bf16.gmra.mrb[16].mxu0 %v8921_v43 }
 0x2e6   : > { %2650 = vmatpush1.bf16.xpose.msra.mxu0 %v7156_v42  ;;  %2497 = vmatprep.mubr.bf16.mxu0 %v8925_v45  ;;  %v7222_v42 = vld [vmem:[%s8672_s1 + $0x2f0] ss:$8 sps:$4 sm:$0xff]  }
 0x2e7   : > { %2651 = vmatprep.subr.bf16.mxu0 %v7164_v44  ;;  %2601 = vmatmul.mubr.bf16.gmra.mrb[16].mxu1 %v8921_v43  ;;  %v7230_v44 = vld [vmem:[%s8672_s1 + $0x404] ss:$8 sps:$4 sm:$0xff]  }
 0x2e8   : > { %2763 = vmatpush1.bf16.xpose.msra.mxu1 %v7159_v46  ;;  %2610 = vmatprep.mubr.bf16.mxu1 %v8925_v45  ;;  %v7225_v46 = vld [vmem:[%s8672_s1 + $0x3f0] ss:$8 sps:$4 sm:$0xff]  }
 0x2e9   : > { %2764 = vmatprep.subr.bf16.mxu1 %v7167_v47  ;;  %v7233_v47 = vld [vmem:[%s8672_s1 + $0x504] ss:$8 sps:$4 sm:$0xff]  }
 0x2ed   : > { %2498 = vmatmul.mubr.bf16.gmra.mrb[20].mxu0 %v8938_v50 }
 0x2ee   : > { %2652 = vmatpush1.bf16.xpose.msra.mxu0 %v7162_v49  ;;  %2507 = vmatprep.mubr.bf16.mxu0 %v8941_v52  ;;  %v7228_v49 = vld [vmem:[%s8672_s1 + $0x400] ss:$8 sps:$4 sm:$0xff]  }
 0x2ef   : > { %2653 = vmatprep.subr.bf16.mxu0 %v7170_v51  ;;  %2611 = vmatmul.mubr.bf16.gmra.mrb[20].mxu1 %v8938_v50  ;;  %v7236_v51 = vld [vmem:[%s8672_s1 + $0x414] ss:$8 sps:$4 sm:$0xff]  }
 0x2f0   : > { %2765 = vmatpush1.bf16.xpose.msra.mxu1 %v7165_v53  ;;  %2620 = vmatprep.mubr.bf16.mxu1 %v8941_v52  ;;  %v7231_v53 = vld [vmem:[%s8672_s1 + $0x500] ss:$8 sps:$4 sm:$0xff]  }
 0x2f1   : > { %2766 = vmatprep.subr.bf16.mxu1 %v7173_v54  ;;  %v7239_v54 = vld [vmem:[%s8672_s1 + $0x514] ss:$8 sps:$4 sm:$0xff]  }
 0x2f5   : > { %2508 = vmatmul.mubr.bf16.gmra.mrb[24].mxu0 %v8950_v57 }
 0x2f6   : > { %2654 = vmatpush1.bf16.xpose.msra.mxu0 %v7168_v56  ;;  %2517 = vmatprep.mubr.bf16.mxu0 %v8953_v62  ;;  %v7234_v56 = vld [vmem:[%s8672_s1 + $0x410] ss:$8 sps:$4 sm:$0xff]  }
 0x2f7   : > { %2655 = vmatprep.subr.bf16.mxu0 %v7176_v61  ;;  %2621 = vmatmul.mubr.bf16.gmra.mrb[24].mxu1 %v8950_v57  ;;  %v7242_v61 = vld [vmem:[%s8672_s1 + $0x424] ss:$8 sps:$4 sm:$0xff]  }
 0x2f8   : > { %2767 = vmatpush1.bf16.xpose.msra.mxu1 %v7171_v63  ;;  %2630 = vmatprep.mubr.bf16.mxu1 %v8953_v62  ;;  %v7237_v63 = vld [vmem:[%s8672_s1 + $0x510] ss:$8 sps:$4 sm:$0xff]  }
 0x2f9   : > { %2768 = vmatprep.subr.bf16.mxu1 %v7179_v0  ;;  %v7245_v0 = vld [vmem:[%s8672_s1 + $0x524] ss:$8 sps:$4 sm:$0xff]  }
 0x2fd   : > { %2518 = vmatmul.mubr.bf16.gmra.mrb[28].mxu0 %v8962_v2 }
 0x2fe   : > { %2656 = vmatpush1.bf16.xpose.msra.mxu0 %v7174_v1  ;;  %2673 = vmatprep.mubr.bf16.mxu0 %v8813_v35  ;;  %v7240_v1 = vld [vmem:[%s8672_s1 + $0x420] ss:$8 sps:$4 sm:$0xff]  }
 0x2ff   : > { %2657 = vmatprep.subr.bf16.mxu0 %v7182_v3  ;;  %2631 = vmatmul.mubr.bf16.gmra.mrb[28].mxu1 %v8962_v2  ;;  %v7248_v3 = vld [vmem:[%s8672_s1 + $0x434] ss:$8 sps:$4 sm:$0xff]  }
 0x300   : > { %2769 = vmatpush1.bf16.xpose.msra.mxu1 %v7177_v4  ;;  %2786 = vmatprep.mubr.bf16.mxu1 %v8813_v35  ;;  %v7197_v35 = vld [vmem:[%s8672_s1 + $0x3a4] ss:$8 sps:$4 sm:$0xff]   ;;  %v7243_v4 = vld [vmem:[%s8672_s1 + $0x520] ss:$8 sps:$4 sm:$0xff]  }
 0x301   : > { %2770 = vmatprep.subr.bf16.mxu1 %v7185_v5  ;;  %v7251_v5 = vld [vmem:[%s8672_s1 + $0x534] ss:$8 sps:$4 sm:$0xff]  }
 0x306   : > { %2658 = vmatpush1.bf16.xpose.msra.mxu0 %v7180_v6  ;;  %v7246_v6 = vld [vmem:[%s8672_s1 + $0x430] ss:$8 sps:$4 sm:$0xff]  }
 0x307   : > { %2659 = vmatprep.subr.bf16.mxu0 %v7188_v7  ;;  %v7254_v7 = vld [vmem:[%s8672_s1 + $0x444] ss:$8 sps:$4 sm:$0xff]  }
 0x308   : > { %2771 = vmatpush1.bf16.xpose.msra.mxu1 %v7183_v8  ;;  %v7249_v8 = vld [vmem:[%s8672_s1 + $0x530] ss:$8 sps:$4 sm:$0xff]  }
 0x309   : > { %2772 = vmatprep.subr.bf16.mxu1 %v7191_v9  ;;  %v7257_v9 = vld [vmem:[%s8672_s1 + $0x544] ss:$8 sps:$4 sm:$0xff]  }
 0x30e   : > { %2660 = vmatpush1.bf16.xpose.msra.mxu0 %v7186_v10  ;;  %v7252_v10 = vld [vmem:[%s8672_s1 + $0x440] ss:$8 sps:$4 sm:$0xff]  }
 0x30f   : > { %2661 = vmatprep.subr.bf16.mxu0 %v7194_v55  ;;  %v7260_v55 = vld [vmem:[%s8672_s1 + $0x454] ss:$8 sps:$4 sm:$0xff]  }
 0x310   : > { %2773 = vmatpush1.bf16.xpose.msra.mxu1 %v7189_v58  ;;  %v7255_v58 = vld [vmem:[%s8672_s1 + $0x540] ss:$8 sps:$4 sm:$0xff]  }
 0x311   : > { %2774 = vmatprep.subr.bf16.mxu1 %v7197_v35  ;;  %v7263_v35 = vld [vmem:[%s8672_s1 + $0x554] ss:$8 sps:$4 sm:$0xff]  }
 0x316   : > { %2662 = vmatpush1.bf16.xpose.msra.mxu0 %v7192_v11  ;;  %v7258_v11 = vld [vmem:[%s8672_s1 + $0x450] ss:$8 sps:$4 sm:$0xff]  }
 0x317   : > { %2663 = vmatprep.subr.bf16.mxu0 %v7200_v12  ;;  %v7266_v12 = vld [vmem:[%s8672_s1 + $0x464] ss:$8 sps:$4 sm:$0xff]  }
 0x318   : > { %2775 = vmatpush1.bf16.xpose.msra.mxu1 %v7195_v13  ;;  %v7261_v13 = vld [vmem:[%s8672_s1 + $0x550] ss:$8 sps:$4 sm:$0xff]  }
 0x319   : > { %2776 = vmatprep.subr.bf16.mxu1 %v7203_v14  ;;  %v7269_v14 = vld [vmem:[%s8672_s1 + $0x564] ss:$8 sps:$4 sm:$0xff]  }
 0x31e   : > { %2664 = vmatpush1.bf16.xpose.msra.mxu0 %v7198_v16  ;;  %v7264_v16 = vld [vmem:[%s8672_s1 + $0x460] ss:$8 sps:$4 sm:$0xff]  }
 0x31f   : > { %2665 = vmatprep.subr.bf16.mxu0 %v7206_v17  ;;  %v7272_v17 = vld [vmem:[%s8672_s1 + $0x474] ss:$8 sps:$4 sm:$0xff]  }
 0x320   : > { %2777 = vmatpush1.bf16.xpose.msra.mxu1 %v7201_v19  ;;  %v7267_v19 = vld [vmem:[%s8672_s1 + $0x560] ss:$8 sps:$4 sm:$0xff]  }
 0x321   : > { %2778 = vmatprep.subr.bf16.mxu1 %v7209_v20  ;;  %v7275_v20 = vld [vmem:[%s8672_s1 + $0x574] ss:$8 sps:$4 sm:$0xff]  }
 0x326   : > { %2666 = vmatpush1.bf16.xpose.msra.mxu0 %v7204_v21  ;;  %v7270_v21 = vld [vmem:[%s8672_s1 + $0x470] ss:$8 sps:$4 sm:$0xff]  }
 0x327   : > { %2667 = vmatprep.subr.bf16.mxu0 %v7212_v23  ;;  %v7278_v23 = vld [vmem:[%s8672_s1 + $0x484] ss:$8 sps:$4 sm:$0xff]  }
 0x328   : > { %2779 = vmatpush1.bf16.xpose.msra.mxu1 %v7207_v25  ;;  %v7273_v25 = vld [vmem:[%s8672_s1 + $0x570] ss:$8 sps:$4 sm:$0xff]  }
 0x329   : > { %2780 = vmatprep.subr.bf16.mxu1 %v7215_v26  ;;  %v7281_v26 = vld [vmem:[%s8672_s1 + $0x584] ss:$8 sps:$4 sm:$0xff]  }
 0x32e   : > { %2668 = vmatpush1.bf16.xpose.msra.mxu0 %v7210_v27  ;;  %v9064_v27 = vld [vmem:[#allocation2 + $0x8] sm:$0xff] }
 0x32f   : > { %2669 = vmatprep.subr.bf16.mxu0 %v7218_v29  ;;  %v7276_v29 = vld [vmem:[%s8672_s1 + $0x480] ss:$8 sps:$4 sm:$0xff]  }
 0x330   : > { %2781 = vmatpush1.bf16.xpose.msra.mxu1 %v7213_v31  ;;  %v7284_v31 = vld [vmem:[%s8672_s1 + $0x494] ss:$8 sps:$4 sm:$0xff]  }
 0x331   : > { %2782 = vmatprep.subr.bf16.mxu1 %v7221_v32  ;;  %v7279_v32 = vld [vmem:[%s8672_s1 + $0x580] ss:$8 sps:$4 sm:$0xff]  }
 0x336   : > { %2670 = vmatpush1.bf16.xpose.msra.mxu0 %v7216_v33  ;;  %v7287_v33 = vld [vmem:[%s8672_s1 + $0x594] ss:$8 sps:$4 sm:$0xff]  }
 0x337   : > { %2671 = vmatprep.subr.bf16.mxu0 %v7224_v36  ;;  %v7282_v36 = vld [vmem:[%s8672_s1 + $0x490] ss:$8 sps:$4 sm:$0xff]  }
 0x338   : > { %2783 = vmatpush1.bf16.xpose.msra.mxu1 %v7219_v38  ;;  %v7290_v38 = vld [vmem:[%s8672_s1 + $0x4a4] ss:$8 sps:$4 sm:$0xff]  }
 0x339   : > { %2784 = vmatprep.subr.bf16.mxu1 %v7227_v39  ;;  %v7285_v39 = vld [vmem:[%s8672_s1 + $0x590] ss:$8 sps:$4 sm:$0xff]  }
 0x33e   : > { %2672 = vmatpush1.bf16.xpose.msra.mxu0 %v7222_v42  ;;  %v7293_v42 = vld [vmem:[%s8672_s1 + $0x5a4] ss:$8 sps:$4 sm:$0xff]  }
 0x33f   : > { %2867 = vmatprep.subr.bf16.mxu0 %v7230_v44  ;;  %v7288_v44 = vld [vmem:[%s8672_s1 + $0x4a0] ss:$8 sps:$4 sm:$0xff]  }
 0x340   : > { %2785 = vmatpush1.bf16.xpose.msra.mxu1 %v7225_v46  ;;  %v7296_v46 = vld [vmem:[%s8672_s1 + $0x4b4] ss:$8 sps:$4 sm:$0xff]  }
 0x341   : > { %2980 = vmatprep.subr.bf16.mxu1 %v7233_v47  ;;  %v7291_v47 = vld [vmem:[%s8672_s1 + $0x5a0] ss:$8 sps:$4 sm:$0xff]  }
 0x345   : > { %2674 = vmatmul.mubr.bf16.vlgmr.msra.gmra.mrb[32].mxu0 %v8865_v15 }
 0x346   : > { %2868 = vmatpush1.bf16.xpose.msra.mxu0 %v7228_v49  ;;  %2683 = vmatprep.mubr.bf16.mxu0 %v8869_v18  ;;  %v7299_v49 = vld [vmem:[%s8672_s1 + $0x5b4] ss:$8 sps:$4 sm:$0xff]  }
 0x347   : > { %2787 = vmatmul.mubr.bf16.vlgmr.msra.gmra.mrb[32].mxu1 %v8865_v15  ;;  %2869 = vmatprep.subr.bf16.mxu0 %v7236_v51 }
 0x348   : > { %2981 = vmatpush1.bf16.xpose.msra.mxu1 %v7231_v53  ;;  %2796 = vmatprep.mubr.bf16.mxu1 %v8869_v18 }
 0x349   : > { %2982 = vmatprep.subr.bf16.mxu1 %v7239_v54 }
 0x34d   : > { %2684 = vmatmul.mubr.bf16.gmra.mrb[36].mxu0 %v8878_v22 }
 0x34e   : > { %2870 = vmatpush1.bf16.xpose.msra.mxu0 %v7234_v56  ;;  %2693 = vmatprep.mubr.bf16.mxu0 %v8881_v24 }
 0x34f   : > { %2797 = vmatmul.mubr.bf16.gmra.mrb[36].mxu1 %v8878_v22  ;;  %2871 = vmatprep.subr.bf16.mxu0 %v7242_v61  ;;  %v7294_v61 = vld [vmem:[%s8672_s1 + $0x4b0] ss:$8 sps:$4 sm:$0xff]  }
 0x350   : > { %2983 = vmatpush1.bf16.xpose.msra.mxu1 %v7237_v63  ;;  %2806 = vmatprep.mubr.bf16.mxu1 %v8881_v24 }
 0x351   : > { %2984 = vmatprep.subr.bf16.mxu1 %v7245_v0  ;;  %v7302_v0 = vld [vmem:[%s8672_s1 + $0x4c4] ss:$8 sps:$4 sm:$0xff]  }
 0x355   : > { %2694 = vmatmul.mubr.bf16.gmra.mrb[40].mxu0 %v8890_v28 }
 0x356   : > { %2872 = vmatpush1.bf16.xpose.msra.mxu0 %v7240_v1  ;;  %2703 = vmatprep.mubr.bf16.mxu0 %v8893_v30 }
 0x357   : > { %2807 = vmatmul.mubr.bf16.gmra.mrb[40].mxu1 %v8890_v28  ;;  %2873 = vmatprep.subr.bf16.mxu0 %v7248_v3  ;;  %v7297_v3 = vld [vmem:[%s8672_s1 + $0x5b0] ss:$8 sps:$4 sm:$0xff]  }
 0x358   : > { %2985 = vmatpush1.bf16.xpose.msra.mxu1 %v7243_v4  ;;  %2816 = vmatprep.mubr.bf16.mxu1 %v8893_v30 }
 0x359   : > { %2986 = vmatprep.subr.bf16.mxu1 %v7251_v5  ;;  %v7305_v5 = vld [vmem:[%s8672_s1 + $0x5c4] ss:$8 sps:$4 sm:$0xff]  }
 0x35d   : > { %2704 = vmatmul.mubr.bf16.gmra.mrb[44].mxu0 %v8902_v34 }
 0x35e   : > { %2874 = vmatpush1.bf16.xpose.msra.mxu0 %v7246_v6  ;;  %2713 = vmatprep.mubr.bf16.mxu0 %v8905_v37 }
 0x35f   : > { %2817 = vmatmul.mubr.bf16.gmra.mrb[44].mxu1 %v8902_v34  ;;  %2875 = vmatprep.subr.bf16.mxu0 %v7254_v7 }
 0x360   : > { %2987 = vmatpush1.bf16.xpose.msra.mxu1 %v7249_v8  ;;  %2826 = vmatprep.mubr.bf16.mxu1 %v8905_v37 }
 0x361   : > { %2988 = vmatprep.subr.bf16.mxu1 %v7257_v9  ;;  %v7300_v9 = vld [vmem:[%s8672_s1 + $0x4c0] ss:$8 sps:$4 sm:$0xff]  }
 0x365   : > { %2714 = vmatmul.mubr.bf16.gmra.mrb[48].mxu0 %v8921_v43 }
 0x366   : > { %2876 = vmatpush1.bf16.xpose.msra.mxu0 %v7252_v10  ;;  %2723 = vmatprep.mubr.bf16.mxu0 %v8925_v45 }
 0x367   : > { %2827 = vmatmul.mubr.bf16.gmra.mrb[48].mxu1 %v8921_v43  ;;  %2877 = vmatprep.subr.bf16.mxu0 %v7260_v55 }
 0x368   : > { %2989 = vmatpush1.bf16.xpose.msra.mxu1 %v7255_v58  ;;  %2836 = vmatprep.mubr.bf16.mxu1 %v8925_v45  ;;  %v7308_v58 = vld [vmem:[%s8672_s1 + $0x4d4] ss:$8 sps:$4 sm:$0xff]  }
 0x369   : > { %2990 = vmatprep.subr.bf16.mxu1 %v7263_v35 }
 0x36d   : > { %2724 = vmatmul.mubr.bf16.gmra.mrb[52].mxu0 %v8938_v50 }
 0x36e   : > { %2878 = vmatpush1.bf16.xpose.msra.mxu0 %v7258_v11  ;;  %2733 = vmatprep.mubr.bf16.mxu0 %v8941_v52  ;;  %v7303_v11 = vld [vmem:[%s8672_s1 + $0x5c0] ss:$8 sps:$4 sm:$0xff]  }
 0x36f   : > { %2837 = vmatmul.mubr.bf16.gmra.mrb[52].mxu1 %v8938_v50  ;;  %2879 = vmatprep.subr.bf16.mxu0 %v7266_v12 }
 0x370   : > { %2991 = vmatpush1.bf16.xpose.msra.mxu1 %v7261_v13  ;;  %2846 = vmatprep.mubr.bf16.mxu1 %v8941_v52  ;;  %v7311_v13 = vld [vmem:[%s8672_s1 + $0x5d4] ss:$8 sps:$4 sm:$0xff]  }
 0x371   : > { %2992 = vmatprep.subr.bf16.mxu1 %v7269_v14 }
 0x375   : > { %2734 = vmatmul.mubr.bf16.gmra.mrb[56].mxu0 %v8950_v57 }
 0x376   : > { %2880 = vmatpush1.bf16.xpose.msra.mxu0 %v7264_v16  ;;  %2743 = vmatprep.mubr.bf16.mxu0 %v8953_v62 }
 0x377   : > { %2847 = vmatmul.mubr.bf16.gmra.mrb[56].mxu1 %v8950_v57  ;;  %2881 = vmatprep.subr.bf16.mxu0 %v7272_v17 }
 0x378   : > { %2993 = vmatpush1.bf16.xpose.msra.mxu1 %v7267_v19  ;;  %2856 = vmatprep.mubr.bf16.mxu1 %v8953_v62 }
 0x379   : > { %2994 = vmatprep.subr.bf16.mxu1 %v7275_v20  ;;  %v7306_v20 = vld [vmem:[%s8672_s1 + $0x4d0] ss:$8 sps:$4 sm:$0xff]  }
 0x37d   : > { %2744 = vmatmul.mubr.bf16.gmra.mrb[60].mxu0 %v8962_v2 }
 0x37e   : > { %2882 = vmatpush1.bf16.xpose.msra.mxu0 %v7270_v21  ;;  %2899 = vmatprep.mubr.bf16.mxu0 %v9064_v27 }
 0x37f   : > { %2857 = vmatmul.mubr.bf16.gmra.mrb[60].mxu1 %v8962_v2  ;;  %2883 = vmatprep.subr.bf16.mxu0 %v7278_v23 }
 0x380   : > { %2995 = vmatpush1.bf16.xpose.msra.mxu1 %v7273_v25  ;;  %3012 = vmatprep.mubr.bf16.mxu1 %v9064_v27  ;;  %v7314_v25 = vld [vmem:[%s8672_s1 + $0x4e4] ss:$8 sps:$4 sm:$0xff]  }
 0x381   : > { %2996 = vmatprep.subr.bf16.mxu1 %v7281_v26 }
 0x386   : > { %2884 = vmatpush1.bf16.xpose.msra.mxu0 %v7276_v29  ;;  %v7309_v29 = vld [vmem:[%s8672_s1 + $0x5d0] ss:$8 sps:$4 sm:$0xff]  }
 0x387   : > { %2885 = vmatprep.subr.bf16.mxu0 %v7284_v31 }
 0x388   : > { %2997 = vmatpush1.bf16.xpose.msra.mxu1 %v7279_v32  ;;  %v7317_v32 = vld [vmem:[%s8672_s1 + $0x5e4] ss:$8 sps:$4 sm:$0xff]  }
 0x389   : > { %2998 = vmatprep.subr.bf16.mxu1 %v7287_v33 }
 0x38e   : > { %2886 = vmatpush1.bf16.xpose.msra.mxu0 %v7282_v36 }
 0x38f   : > { %2887 = vmatprep.subr.bf16.mxu0 %v7290_v38 }
 0x390   : > { %2999 = vmatpush1.bf16.xpose.msra.mxu1 %v7285_v39 }
 0x391   : > { %3000 = vmatprep.subr.bf16.mxu1 %v7293_v42  ;;  %v7312_v42 = vld [vmem:[%s8672_s1 + $0x4e0] ss:$8 sps:$4 sm:$0xff]  }
 0x396   : > { %2888 = vmatpush1.bf16.xpose.msra.mxu0 %v7288_v44 }
 0x397   : > { %2889 = vmatprep.subr.bf16.mxu0 %v7296_v46 }
 0x398   : > { %3001 = vmatpush1.bf16.xpose.msra.mxu1 %v7291_v47  ;;  %v9081_v51 = vpop.f32.mrb[0].mxu0  ;;  %v7320_v47 = vld [vmem:[%s8672_s1 + $0x4f4] ss:$8 sps:$4 sm:$0xff]  }
 0x399   : > { %v9083_v53 = vpop.f32.mrb[1].mxu0  ;;  %3002 = vmatprep.subr.bf16.mxu1 %v7299_v49 }
 0x39a   : > { %v9085_v54 = vpop.f32.mrb[2].mxu0  ;;  %v9087_v56 = vpop.f32.mrb[0].mxu1 }
 0x39b   : > { %v9090_v63 = vpop.f32.mrb[3].mxu0  ;;  %v9093_v1 = vpop.f32.mrb[1].mxu1 }
 0x39c   : > { %v9096_v4 = vpop.f32.mrb[2].mxu1 }
 0x39d   : > { %v9099_v6 = vpop.f32.mrb[3].mxu1 }
 0x39e   : > { %2890 = vmatpush1.bf16.xpose.msra.mxu0 %v7294_v61 }
 0x39f   : > { %2891 = vmatprep.subr.bf16.mxu0 %v7302_v0  ;;  %v7315_v0 = vld [vmem:[%s8672_s1 + $0x5e0] ss:$8 sps:$4 sm:$0xff]  }
 0x3a0   : > { %3003 = vmatpush1.bf16.xpose.msra.mxu1 %v7297_v3  ;;  %v9101_v7 = vpop.f32.mrb[4].mxu0 }
 0x3a1   : > { %3004 = vmatprep.subr.bf16.mxu1 %v7305_v5  ;;  %v9103_v8 = vpop.f32.mrb[5].mxu0  ;;  %v7323_v5 = vld [vmem:[%s8672_s1 + $0x5f4] ss:$8 sps:$4 sm:$0xff]  }
 0x3a2   : > { %v9106_v10 = vpop.f32.mrb[6].mxu0  ;;  %v9108_v55 = vpop.f32.mrb[4].mxu1 }
 0x3a3   : > { %v9111_v35 = vpop.f32.mrb[7].mxu0  ;;  %v9114_v12 = vpop.f32.mrb[5].mxu1 }
 0x3a4   : > { %v9117_v14 = vpop.f32.mrb[6].mxu1 }
 0x3a5   : > { %v9119_v16 = vpop.f32.mrb[7].mxu1 }
 0x3a6   : > { %2892 = vmatpush1.bf16.xpose.msra.mxu0 %v7300_v9 }
 0x3a7   : > { %2893 = vmatprep.subr.bf16.mxu0 %v7308_v58 }
 0x3a8   : > { %3005 = vmatpush1.bf16.xpose.msra.mxu1 %v7303_v11  ;;  %v9121_v17 = vpop.f32.mrb[8].mxu0 }
 0x3a9   : > { %3006 = vmatprep.subr.bf16.mxu1 %v7311_v13  ;;  %v9123_v19 = vpop.f32.mrb[9].mxu0  ;;  %v7318_v13 = vld [vmem:[%s8672_s1 + $0x4f0] ss:$8 sps:$4 sm:$0xff]  }
 0x3aa   : > { %v9126_v21 = vpop.f32.mrb[10].mxu0  ;;  %v9128_v23 = vpop.f32.mrb[8].mxu1 }
 0x3ab   : > { %v9131_v26 = vpop.f32.mrb[11].mxu0  ;;  %v9134_v31 = vpop.f32.mrb[9].mxu1 }
 0x3ac   : > { %v9137_v33 = vpop.f32.mrb[10].mxu1 }
 0x3ad   : > { %v9139_v36 = vpop.f32.mrb[11].mxu1 }
 0x3ae   : > { %2894 = vmatpush1.bf16.xpose.msra.mxu0 %v7306_v20 }
 0x3af   : > { %2895 = vmatprep.subr.bf16.mxu0 %v7314_v25 }
 0x3b0   : > { %3007 = vmatpush1.bf16.xpose.msra.mxu1 %v7309_v29  ;;  %v9141_v38 = vpop.f32.mrb[12].mxu0  ;;  %v7326_v29 = vld [vmem:[%s8672_s1 + $0x604] ss:$8 sps:$4 sm:$0xff]  }
 0x3b1   : > { %3008 = vmatprep.subr.bf16.mxu1 %v7317_v32  ;;  %v9143_v39 = vpop.f32.mrb[13].mxu0 }
 0x3b2   : > { %v9146_v44 = vpop.f32.mrb[14].mxu0  ;;  %v9148_v46 = vpop.f32.mrb[12].mxu1 }
 0x3b3   : > { %v9151_v49 = vpop.f32.mrb[15].mxu0  ;;  %v9153_v61 = vpop.f32.mrb[13].mxu1 }
 0x3b4   : > { %14654 = vst [vmem:[#allocation33_spill] sm:$0xff] %v9153_v61  ;;  %v9156_v3 = vpop.f32.mrb[14].mxu1 }
 0x3b5   : > { %v9159_v9 = vpop.f32.mrb[15].mxu1 }
 0x3b6   : > { %14655 = vst [vmem:[#allocation34_spill] sm:$0xff] %v9159_v9  ;;  %2896 = vmatpush1.bf16.xpose.msra.mxu0 %v7312_v42  ;;  %v7321_v42 = vld [vmem:[%s8672_s1 + $0x5f0] ss:$8 sps:$4 sm:$0xff]   ;;  %v7332_v9 = vld [vmem:[%s8672_s1 + $0x614] ss:$8 sps:$4 sm:$0xff]  }
 0x3b7   : > { %2897 = vmatprep.subr.bf16.mxu0 %v7320_v47 }
 0x3b8   : > { %3009 = vmatpush1.bf16.xpose.msra.mxu1 %v7315_v0  ;;  %v9161_v58 = vpop.f32.mrb[16].mxu0  ;;  %v7329_v0 = vld [vmem:[%s8672_s1 + $0x704] ss:$8 sps:$4 sm:$0xff]  }
 0x3b9   : > { %3010 = vmatprep.subr.bf16.mxu1 %v7323_v5  ;;  %v9163_v11 = vpop.f32.mrb[17].mxu0 }
 0x3ba   : > { %v9166_v20 = vpop.f32.mrb[18].mxu0  ;;  %v9168_v25 = vpop.f32.mrb[16].mxu1 }
 0x3bb   : > { %14656 = vst [vmem:[#allocation35_spill] sm:$0xff] %v9168_v25  ;;  %v9171_v32 = vpop.f32.mrb[19].mxu0  ;;  %v9173_v48 = vpop.f32.mrb[17].mxu1 }
 0x3bc   : > { %14657 = vst [vmem:[#allocation36_spill] sm:$0xff] %v9173_v48  ;;  %v9176_v47 = vpop.f32.mrb[18].mxu1 }
 0x3bd   : > { %14658 = vst [vmem:[#allocation37_spill] sm:$0xff] %v9176_v47  ;;  %v9179_v5 = vpop.f32.mrb[19].mxu1 }
 0x3be   : > { %14659 = vst [vmem:[#allocation38_spill] sm:$0xff] %v9179_v5  ;;  %2898 = vmatpush1.bf16.xpose.msra.mxu0 %v7318_v13  ;;  %v7327_v5 = vld [vmem:[%s8672_s1 + $0x700] ss:$8 sps:$4 sm:$0xff]  }
 0x3bf   : > { %3093 = vmatprep.subr.bf16.mxu0 %v7326_v29  ;;  %v7335_v29 = vld [vmem:[%s8672_s1 + $0x714] ss:$8 sps:$4 sm:$0xff]  }
 0x3c0   : > { %3011 = vmatpush1.bf16.xpose.msra.mxu1 %v7321_v42  ;;  %v9181_v41 = vpop.f32.mrb[20].mxu0 }
 0x3c1   : > { %3206 = vmatprep.subr.bf16.mxu1 %v7329_v0  ;;  %v9183_v40 = vpop.f32.mrb[21].mxu0 }
 0x3c2   : > { %v9186_v59 = vpop.f32.mrb[22].mxu0  ;;  %v9188_v48 = vpop.f32.mrb[20].mxu1 }
 0x3c3   : > { %14660 = vst [vmem:[#allocation39_spill] sm:$0xff] %v9188_v48  ;;  %v9191_v61 = vpop.f32.mrb[23].mxu0  ;;  %v9193_v47 = vpop.f32.mrb[21].mxu1 }
 0x3c4   : > { %14661 = vst [vmem:[#allocation40_spill] sm:$0xff] %v9193_v47  ;;  %v9196_v13 = vpop.f32.mrb[22].mxu1 }
 0x3c5   : > { %14662 = vst [vmem:[#allocation41_spill] sm:$0xff] %v9196_v13  ;;  %2900 = vmatmul.mubr.bf16.vlgmr.msra.gmra.mrb[64].mxu0 %v8865_v15  ;;  %v9200_v42 = vpop.f32.mrb[23].mxu1  ;;  %v7330_v13 = vld [vmem:[%s8672_s1 + $0x610] ss:$8 sps:$4 sm:$0xff]  }
 0x3c6   : > { %14663 = vst [vmem:[#allocation42_spill] sm:$0xff] %v9200_v42  ;;  %3094 = vmatpush1.bf16.xpose.msra.mxu0 %v7324_v60  ;;  %2909 = vmatprep.mubr.bf16.mxu0 %v8869_v18  ;;  %v7338_v60 = vld [vmem:[%s8672_s1 + $0x624] ss:$8 sps:$4 sm:$0xff]  }
 0x3c7   : > { %3013 = vmatmul.mubr.bf16.vlgmr.msra.gmra.mrb[64].mxu1 %v8865_v15  ;;  %3095 = vmatprep.subr.bf16.mxu0 %v7332_v9  ;;  %v7333_v9 = vld [vmem:[%s8672_s1 + $0x710] ss:$8 sps:$4 sm:$0xff]  }
 0x3c8   : > { %3207 = vmatpush1.bf16.xpose.msra.mxu1 %v7327_v5  ;;  %3022 = vmatprep.mubr.bf16.mxu1 %v8869_v18  ;;  %v9205_v0 = vpop.f32.mrb[24].mxu0  ;;  %v7341_v18 = vld [vmem:[%s8672_s1 + $0x724] ss:$8 sps:$4 sm:$0xff]  }
 0x3c9   : > { %3208 = vmatprep.subr.bf16.mxu1 %v7335_v29  ;;  %v9207_v47 = vpop.f32.mrb[25].mxu0 }
 0x3ca   : > { %v9210_v48 = vpop.f32.mrb[26].mxu0  ;;  %v9212_v42 = vpop.f32.mrb[24].mxu1 }
 0x3cb   : > { %14664 = vst [vmem:[#allocation43_spill] sm:$0xff] %v9210_v48  ;;  %14665 = vst [vmem:[#allocation44_spill] sm:$0xff] %v9212_v42  ;;  %v9215_v25 = vpop.f32.mrb[27].mxu0  ;;  %v9217_v15 = vpop.f32.mrb[25].mxu1 }
 0x3cc   : > { %14666 = vst [vmem:[#allocation45_spill] sm:$0xff] %v9215_v25  ;;  %14667 = vst [vmem:[#allocation46_spill] sm:$0xff] %v9217_v15  ;;  %v9220_v5 = vpop.f32.mrb[26].mxu1  ;;  %v7336_v25 = vld [vmem:[%s8672_s1 + $0x620] ss:$8 sps:$4 sm:$0xff]  }
 0x3cd   : > { %14668 = vst [vmem:[#allocation47_spill] sm:$0xff] %v9220_v5  ;;  %2910 = vmatmul.mubr.bf16.gmra.mrb[68].mxu0 %v8878_v22  ;;  %v9224_v29 = vpop.f32.mrb[27].mxu1 }
 0x3ce   : > { %14669 = vst [vmem:[#allocation48_spill] sm:$0xff] %v9224_v29  ;;  %3096 = vmatpush1.bf16.xpose.msra.mxu0 %v7330_v13  ;;  %2919 = vmatprep.mubr.bf16.mxu0 %v8881_v24  ;;  %v7344_v13 = vld [vmem:[%s8672_s1 + $0x634] ss:$8 sps:$4 sm:$0xff]  }
 0x3cf   : > { %3023 = vmatmul.mubr.bf16.gmra.mrb[68].mxu1 %v8878_v22  ;;  %3097 = vmatprep.subr.bf16.mxu0 %v7338_v60  ;;  %v7339_v60 = vld [vmem:[%s8672_s1 + $0x720] ss:$8 sps:$4 sm:$0xff]  }
 0x3d0   : > { %3209 = vmatpush1.bf16.xpose.msra.mxu1 %v7333_v9  ;;  %3032 = vmatprep.mubr.bf16.mxu1 %v8881_v24  ;;  %v9229_v15 = vpop.f32.mrb[28].mxu0  ;;  %v7347_v9 = vld [vmem:[%s8672_s1 + $0x734] ss:$8 sps:$4 sm:$0xff]  }
 0x3d1   : > { %3210 = vmatprep.subr.bf16.mxu1 %v7341_v18  ;;  %v9231_v5 = vpop.f32.mrb[29].mxu0 }
 0x3d2   : > { %v9234_v48 = vpop.f32.mrb[30].mxu0  ;;  %v9236_v29 = vpop.f32.mrb[28].mxu1 }
 0x3d3   : > { %14670 = vst [vmem:[#allocation49_spill] sm:$0xff] %v9236_v29  ;;  %v9239_v42 = vpop.f32.mrb[31].mxu0  ;;  %v9241_v22 = vpop.f32.mrb[29].mxu1  ;;  %v7345_v29 = vld [vmem:[%s8672_s1 + $0x730] ss:$8 sps:$4 sm:$0xff]  }
 0x3d4   : > { %14671 = vst [vmem:[#allocation50_spill] sm:$0xff] %v9241_v22  ;;  %v9244_v24 = vpop.f32.mrb[30].mxu1  ;;  %v7342_v22 = vld [vmem:[%s8672_s1 + $0x630] ss:$8 sps:$4 sm:$0xff]  }
 0x3d5   : > { %14672 = vst [vmem:[#allocation51_spill] sm:$0xff] %v9244_v24  ;;  %2920 = vmatmul.mubr.bf16.gmra.mrb[72].mxu0 %v8890_v28  ;;  %v9248_v18 = vpop.f32.mrb[31].mxu1  ;;  %v7350_v24 = vld [vmem:[%s8672_s1 + $0x644] ss:$8 sps:$4 sm:$0xff]  }
 0x3d6   : > { %14673 = vst [vmem:[#allocation52_spill] sm:$0xff] %v9248_v18  ;;  %3098 = vmatpush1.bf16.xpose.msra.mxu0 %v7336_v25  ;;  %2929 = vmatprep.mubr.bf16.mxu0 %v8893_v30  ;;  %v7353_v18 = vld [vmem:[%s8672_s1 + $0x744] ss:$8 sps:$4 sm:$0xff]   ;;  %v7351_v25 = vld [vmem:[%s8672_s1 + $0x740] ss:$8 sps:$4 sm:$0xff]  }
 0x3d7   : > { %3033 = vmatmul.mubr.bf16.gmra.mrb[72].mxu1 %v8890_v28  ;;  %3099 = vmatprep.subr.bf16.mxu0 %v7344_v13  ;;  %v7348_v28 = vld [vmem:[%s8672_s1 + $0x640] ss:$8 sps:$4 sm:$0xff]   ;;  %v7359_v13 = vld [vmem:[%s8672_s1 + $0x754] ss:$8 sps:$4 sm:$0xff]  }
 0x3d8   : > { %3211 = vmatpush1.bf16.xpose.msra.mxu1 %v7339_v60  ;;  %3042 = vmatprep.mubr.bf16.mxu1 %v8893_v30  ;;  %v7356_v30 = vld [vmem:[%s8672_s1 + $0x654] ss:$8 sps:$4 sm:$0xff]   ;;  %v7363_v60 = vld [vmem:[%s8672_s1 + $0x760] ss:$8 sps:$4 sm:$0xff]  }
 0x3d9   : > { %3212 = vmatprep.subr.bf16.mxu1 %v7347_v9  ;;  %v7369_v9 = vld [vmem:[%s8672_s1 + $0x770] ss:$8 sps:$4 sm:$0xff]  }
 0x3dd   : > { %2930 = vmatmul.mubr.bf16.gmra.mrb[76].mxu0 %v8902_v34 }
 0x3de   : > { %3100 = vmatpush1.bf16.xpose.msra.mxu0 %v7342_v22  ;;  %2939 = vmatprep.mubr.bf16.mxu0 %v8905_v37  ;;  %v7365_v22 = vld [vmem:[%s8672_s1 + $0x764] ss:$8 sps:$4 sm:$0xff]  }
 0x3df   : > { %3043 = vmatmul.mubr.bf16.gmra.mrb[76].mxu1 %v8902_v34  ;;  %3101 = vmatprep.subr.bf16.mxu0 %v7350_v24  ;;  %v7354_v34 = vld [vmem:[%s8672_s1 + $0x650] ss:$8 sps:$4 sm:$0xff]   ;;  %v7371_v24 = vld [vmem:[%s8672_s1 + $0x774] ss:$8 sps:$4 sm:$0xff]  }
 0x3e0   : > { %3213 = vmatpush1.bf16.xpose.msra.mxu1 %v7345_v29  ;;  %3052 = vmatprep.mubr.bf16.mxu1 %v8905_v37  ;;  %v7362_v37 = vld [vmem:[%s8672_s1 + $0x664] ss:$8 sps:$4 sm:$0xff]   ;;  %v7357_v29 = vld [vmem:[%s8672_s1 + $0x750] ss:$8 sps:$4 sm:$0xff]  }
 0x3e1   : > { %3214 = vmatprep.subr.bf16.mxu1 %v7353_v18  ;;  %v7377_v18 = vld [vmem:[%s8672_s1 + $0x784] ss:$8 sps:$4 sm:$0xff]  }
 0x3e5   : > { %2940 = vmatmul.mubr.bf16.gmra.mrb[80].mxu0 %v8921_v43 }
 0x3e6   : > { %3102 = vmatpush1.bf16.xpose.msra.mxu0 %v7348_v28  ;;  %2949 = vmatprep.mubr.bf16.mxu0 %v8925_v45  ;;  %v7375_v28 = vld [vmem:[%s8672_s1 + $0x780] ss:$8 sps:$4 sm:$0xff]  }
 0x3e7   : > { %3053 = vmatmul.mubr.bf16.gmra.mrb[80].mxu1 %v8921_v43  ;;  %3103 = vmatprep.subr.bf16.mxu0 %v7356_v30  ;;  %v7360_v43 = vld [vmem:[%s8672_s1 + $0x660] ss:$8 sps:$4 sm:$0xff]   ;;  %v7383_v30 = vld [vmem:[%s8672_s1 + $0x794] ss:$8 sps:$4 sm:$0xff]  }
 0x3e8   : > { %3215 = vmatpush1.bf16.xpose.msra.mxu1 %v7351_v25  ;;  %3062 = vmatprep.mubr.bf16.mxu1 %v8925_v45  ;;  %v7368_v45 = vld [vmem:[%s8672_s1 + $0x674] ss:$8 sps:$4 sm:$0xff]   ;;  %v7378_v25 = vld [vmem:[%s8672_s1 + $0x690] ss:$8 sps:$4 sm:$0xff]  }
 0x3e9   : > { %3216 = vmatprep.subr.bf16.mxu1 %v7359_v13  ;;  %v7381_v13 = vld [vmem:[%s8672_s1 + $0x790] ss:$8 sps:$4 sm:$0xff]  }
 0x3ed   : > { %2950 = vmatmul.mubr.bf16.gmra.mrb[84].mxu0 %v8938_v50 }
 0x3ee   : > { %3104 = vmatpush1.bf16.xpose.msra.mxu0 %v7354_v34  ;;  %2959 = vmatprep.mubr.bf16.mxu0 %v8941_v52  ;;  %v7389_v34 = vld [vmem:[%s8672_s1 + $0x7a4] ss:$8 sps:$4 sm:$0xff]  }
 0x3ef   : > { %3063 = vmatmul.mubr.bf16.gmra.mrb[84].mxu1 %v8938_v50  ;;  %3105 = vmatprep.subr.bf16.mxu0 %v7362_v37  ;;  %v7366_v50 = vld [vmem:[%s8672_s1 + $0x670] ss:$8 sps:$4 sm:$0xff]   ;;  %v7392_v37 = vld [vmem:[%s8672_s1 + $0x6b4] ss:$8 sps:$4 sm:$0xff]  }
 0x3f0   : > { %3217 = vmatpush1.bf16.xpose.msra.mxu1 %v7357_v29  ;;  %3072 = vmatprep.mubr.bf16.mxu1 %v8941_v52  ;;  %v7374_v52 = vld [vmem:[%s8672_s1 + $0x684] ss:$8 sps:$4 sm:$0xff]   ;;  %v7387_v29 = vld [vmem:[%s8672_s1 + $0x7a0] ss:$8 sps:$4 sm:$0xff]  }
 0x3f1   : > { %3218 = vmatprep.subr.bf16.mxu1 %v7365_v22  ;;  %v7395_v22 = vld [vmem:[%s8672_s1 + $0x7b4] ss:$8 sps:$4 sm:$0xff]  }
 0x3f5   : > { %2960 = vmatmul.mubr.bf16.gmra.mrb[88].mxu0 %v8950_v57 }
 0x3f6   : > { %3106 = vmatpush1.bf16.xpose.msra.mxu0 %v7360_v43  ;;  %2969 = vmatprep.mubr.bf16.mxu0 %v8953_v62 }
 0x3f7   : > { %3073 = vmatmul.mubr.bf16.gmra.mrb[88].mxu1 %v8950_v57  ;;  %3107 = vmatprep.subr.bf16.mxu0 %v7368_v45  ;;  %v7372_v57 = vld [vmem:[%s8672_s1 + $0x680] ss:$8 sps:$4 sm:$0xff]  }
 0x3f8   : > { %3219 = vmatpush1.bf16.xpose.msra.mxu1 %v7363_v60  ;;  %3082 = vmatprep.mubr.bf16.mxu1 %v8953_v62  ;;  %v7380_v62 = vld [vmem:[%s8672_s1 + $0x694] ss:$8 sps:$4 sm:$0xff]  }
 0x3f9   : > { %3220 = vmatprep.subr.bf16.mxu1 %v7371_v24 }
 0x3fd   : > { %2970 = vmatmul.mubr.bf16.gmra.mrb[92].mxu0 %v8962_v2 }
 0x3fe   : > { %3108 = vmatpush1.bf16.xpose.msra.mxu0 %v7366_v50  ;;  %3125 = vmatprep.mubr.bf16.mxu0 %v9064_v27  ;;  %v7390_v50 = vld [vmem:[%s8672_s1 + $0x6b0] ss:$8 sps:$4 sm:$0xff]  }
 0x3ff   : > { %3083 = vmatmul.mubr.bf16.gmra.mrb[92].mxu1 %v8962_v2  ;;  %3109 = vmatprep.subr.bf16.mxu0 %v7374_v52  ;;  %v7386_v2 = vld [vmem:[%s8672_s1 + $0x6a4] ss:$8 sps:$4 sm:$0xff]  }
 0x400   : > { %3221 = vmatpush1.bf16.xpose.msra.mxu1 %v7369_v9  ;;  %3238 = vmatprep.mubr.bf16.mxu1 %v9064_v27  ;;  %v7384_v27 = vld [vmem:[%s8672_s1 + $0x6a0] ss:$8 sps:$4 sm:$0xff]   ;;  %v7398_v9 = vld [vmem:[%s8672_s1 + $0x6c4] ss:$8 sps:$4 sm:$0xff]  }
 0x401   : > { %3222 = vmatprep.subr.bf16.mxu1 %v7377_v18 }
 0x406   : > { %3110 = vmatpush1.bf16.xpose.msra.mxu0 %v7372_v57  ;;  %v7393_v57 = vld [vmem:[%s8672_s1 + $0x7b0] ss:$8 sps:$4 sm:$0xff]  }
 0x407   : > { %3111 = vmatprep.subr.bf16.mxu0 %v7380_v62 }
 0x408   : > { %3223 = vmatpush1.bf16.xpose.msra.mxu1 %v7375_v28  ;;  %v7401_v28 = vld [vmem:[%s8672_s1 + $0x7c4] ss:$8 sps:$4 sm:$0xff]  }
 0x409   : > { %3224 = vmatprep.subr.bf16.mxu1 %v7383_v30 }
 0x40e   : > { %3112 = vmatpush1.bf16.xpose.msra.mxu0 %v7378_v25 }
 0x40f   : > { %3113 = vmatprep.subr.bf16.mxu0 %v7386_v2 }
 0x410   : > { %3225 = vmatpush1.bf16.xpose.msra.mxu1 %v7381_v13 }
 0x411   : > { %3226 = vmatprep.subr.bf16.mxu1 %v7389_v34 }
 0x416   : > { %3114 = vmatpush1.bf16.xpose.msra.mxu0 %v7384_v27  ;;  %v7396_v27 = vld [vmem:[%s8672_s1 + $0x6c0] ss:$8 sps:$4 sm:$0xff]  }
 0x417   : > { %3115 = vmatprep.subr.bf16.mxu0 %v7392_v37 }
 0x418   : > { %3227 = vmatpush1.bf16.xpose.msra.mxu1 %v7387_v29  ;;  %v9305_v43 = vpop.f32.mrb[32].mxu0 }
 0x419   : > { %v9307_v45 = vpop.f32.mrb[33].mxu0  ;;  %3228 = vmatprep.subr.bf16.mxu1 %v7395_v22  ;;  %v7404_v22 = vld [vmem:[%s8672_s1 + $0x6d4] ss:$8 sps:$4 sm:$0xff]  }
 0x41a   : > { %v9309_v60 = vpop.f32.mrb[34].mxu0  ;;  %v9311_v24 = vpop.f32.mrb[32].mxu1 }
 0x41b   : > { %14674 = vst [vmem:[#allocation53_spill] sm:$0xff] %v9311_v24  ;;  %v9314_v52 = vpop.f32.mrb[35].mxu0  ;;  %v9317_v18 = vpop.f32.mrb[33].mxu1 }
 0x41c   : > { %14675 = vst [vmem:[#allocation54_spill] sm:$0xff] %v9314_v52  ;;  %14676 = vst [vmem:[#allocation55_spill] sm:$0xff] %v9317_v18  ;;  %v9320_v62 = vpop.f32.mrb[34].mxu1 }
 0x41d   : > { %14677 = vst [vmem:[#allocation56_spill] sm:$0xff] %v9320_v62  ;;  %v9323_v30 = vpop.f32.mrb[35].mxu1  ;;  %v7402_v62 = vld [vmem:[%s8672_s1 + $0x6d0] ss:$8 sps:$4 sm:$0xff]  }
 0x41e   : > { %14678 = vst [vmem:[#allocation57_spill] sm:$0xff] %v9323_v30  ;;  %3116 = vmatpush1.bf16.xpose.msra.mxu0 %v7390_v50  ;;  %v7407_v30 = vld [vmem:[%s8672_s1 + $0x7d4] ss:$8 sps:$4 sm:$0xff]  }
 0x41f   : > { %3117 = vmatprep.subr.bf16.mxu0 %v7398_v9  ;;  %v7399_v9 = vld [vmem:[%s8672_s1 + $0x7c0] ss:$8 sps:$4 sm:$0xff]  }
 0x420   : > { %3229 = vmatpush1.bf16.xpose.msra.mxu1 %v7393_v57  ;;  %v9325_v25 = vpop.f32.mrb[36].mxu0 }
 0x421   : > { %v9327_v2 = vpop.f32.mrb[37].mxu0  ;;  %3230 = vmatprep.subr.bf16.mxu1 %v7401_v28 }
 0x422   : > { %14679 = vst [vmem:[#allocation58_spill] sm:$0xff] %v9327_v2  ;;  %v9329_v13 = vpop.f32.mrb[38].mxu0  ;;  %v9331_v34 = vpop.f32.mrb[36].mxu1 }
 0x423   : > { %14680 = vst [vmem:[#allocation59_spill] sm:$0xff] %v9331_v34  ;;  %v9334_v37 = vpop.f32.mrb[39].mxu0  ;;  %v9336_v29 = vpop.f32.mrb[37].mxu1 }
 0x424   : > { %14681 = vst [vmem:[#allocation60_spill] sm:$0xff] %v9334_v37  ;;  %14682 = vst [vmem:[#allocation61_spill] sm:$0xff] %v9336_v29  ;;  %v9339_v50 = vpop.f32.mrb[38].mxu1  ;;  %v7408_v37 = vld [vmem:[%s8672_s1 + $0x6e0] ss:$8 sps:$4 sm:$0xff]  }
 0x425   : > { %14683 = vst [vmem:[#allocation62_spill] sm:$0xff] %v9339_v50  ;;  %v9342_v57 = vpop.f32.mrb[39].mxu1 }
 0x426   : > { %14684 = vst [vmem:[#allocation63_spill] sm:$0xff] %v9342_v57  ;;  %3118 = vmatpush1.bf16.xpose.msra.mxu0 %v7396_v27  ;;  %v7410_v57 = vld [vmem:[%s8672_s1 + $0x6e4] ss:$8 sps:$4 sm:$0xff]  }
 0x427   : > { %3119 = vmatprep.subr.bf16.mxu0 %v7404_v22  ;;  %v7405_v22 = vld [vmem:[%s8672_s1 + $0x7d0] ss:$8 sps:$4 sm:$0xff]  }
 0x428   : > { %3231 = vmatpush1.bf16.xpose.msra.mxu1 %v7399_v9  ;;  %v9345_v28 = vpop.f32.mrb[40].mxu0 }
 0x429   : > { %v9347_v18 = vpop.f32.mrb[41].mxu0  ;;  %3232 = vmatprep.subr.bf16.mxu1 %v7407_v30 }
 0x42a   : > { %14685 = vst [vmem:[#allocation64_spill] sm:$0xff] %v9347_v18  ;;  %v9349_v34 = vpop.f32.mrb[42].mxu0  ;;  %v9351_v29 = vpop.f32.mrb[40].mxu1  ;;  %v7413_v18 = vld [vmem:[%s8672_s1 + $0x7e4] ss:$8 sps:$4 sm:$0xff]  }
 0x42b   : > { %14686 = vst [vmem:[#allocation65_spill] sm:$0xff] %v9351_v29  ;;  %v9354_v50 = vpop.f32.mrb[43].mxu0  ;;  %v9356_v24 = vpop.f32.mrb[41].mxu1 }
 0x42c   : > { %14687 = vst [vmem:[#allocation66_spill] sm:$0xff] %v9354_v50  ;;  %14688 = vst [vmem:[#allocation67_spill] sm:$0xff] %v9356_v24  ;;  %v9359_v27 = vpop.f32.mrb[42].mxu1 }
 0x42d   : > { %14689 = vst [vmem:[#allocation68_spill] sm:$0xff] %v9359_v27  ;;  %v9362_v9 = vpop.f32.mrb[43].mxu1 }
 0x42e   : > { %14690 = vst [vmem:[#allocation69_spill] sm:$0xff] %v9362_v9  ;;  %3120 = vmatpush1.bf16.xpose.msra.mxu0 %v7402_v62  ;;  %v7416_v9 = vld [vmem:[%s8672_s1 + $0x6f4] ss:$8 sps:$4 sm:$0xff]   ;;  %v7411_v62 = vld [vmem:[%s8672_s1 + $0x7e0] ss:$8 sps:$4 sm:$0xff]  }
 0x42f   : > { %3121 = vmatprep.subr.bf16.mxu0 %v7410_v57 }
 0x430   : > { %3233 = vmatpush1.bf16.xpose.msra.mxu1 %v7405_v22  ;;  %v9365_v30 = vpop.f32.mrb[44].mxu0  ;;  %v7419_v22 = vld [vmem:[%s8672_s1 + $0x7f4] ss:$8 sps:$4 sm:$0xff]  }
 0x431   : > { %14691 = vst [vmem:[#allocation70_spill] sm:$0xff] %v9365_v30  ;;  %v9367_v29 = vpop.f32.mrb[45].mxu0  ;;  %3234 = vmatprep.subr.bf16.mxu1 %v7413_v18 }
 0x432   : > { %14692 = vst [vmem:[#allocation71_spill] sm:$0xff] %v9367_v29  ;;  %v9369_v50 = vpop.f32.mrb[46].mxu0  ;;  %v9371_v24 = vpop.f32.mrb[44].mxu1 }
 0x433   : > { %14693 = vst [vmem:[#allocation72_spill] sm:$0xff] %v9369_v50  ;;  %14694 = vst [vmem:[#allocation73_spill] sm:$0xff] %v9371_v24  ;;  %v9374_v27 = vpop.f32.mrb[47].mxu0  ;;  %v9376_v2 = vpop.f32.mrb[45].mxu1 }
 0x434   : > { %14695 = vst [vmem:[#allocation74_spill] sm:$0xff] %v9374_v27  ;;  %14696 = vst [vmem:[#allocation75_spill] sm:$0xff] %v9376_v2  ;;  %v9379_v52 = vpop.f32.mrb[46].mxu1  ;;  %v7414_v2 = vld [vmem:[%s8672_s1 + $0x6f0] ss:$8 sps:$4 sm:$0xff]  }
 0x435   : > { %14697 = vst [vmem:[#allocation76_spill] sm:$0xff] %v9379_v52  ;;  %v9382_v57 = vpop.f32.mrb[47].mxu1 }
 0x436   : > { %14698 = vst [vmem:[#allocation77_spill] sm:$0xff] %v9382_v57  ;;  %3122 = vmatpush1.bf16.xpose.msra.mxu0 %v7408_v37  ;;  %v7417_v57 = vld [vmem:[%s8672_s1 + $0x7f0] ss:$8 sps:$4 sm:$0xff]  }
 0x437   : > { %3123 = vmatprep.subr.bf16.mxu0 %v7416_v9 }
 0x438   : > { %3235 = vmatpush1.bf16.xpose.msra.mxu1 %v7411_v62  ;;  %v9385_v18 = vpop.f32.mrb[48].mxu0 }
 0x439   : > { %14699 = vst [vmem:[#allocation78_spill] sm:$0xff] %v9385_v18  ;;  %v9387_v24 = vpop.f32.mrb[49].mxu0  ;;  %3236 = vmatprep.subr.bf16.mxu1 %v7419_v22 }
 0x43a   : > { %14700 = vst [vmem:[#allocation79_spill] sm:$0xff] %v9387_v24  ;;  %v9389_v29 = vpop.f32.mrb[50].mxu0  ;;  %v9391_v27 = vpop.f32.mrb[48].mxu1 }
 0x43b   : > { %14701 = vst [vmem:[#allocation80_spill] sm:$0xff] %v9389_v29  ;;  %14702 = vst [vmem:[#allocation81_spill] sm:$0xff] %v9391_v27  ;;  %v9394_v50 = vpop.f32.mrb[51].mxu0  ;;  %v9396_v52 = vpop.f32.mrb[49].mxu1 }
 0x43c   : > { %14703 = vst [vmem:[#allocation82_spill] sm:$0xff] %v9394_v50  ;;  %14704 = vst [vmem:[#allocation83_spill] sm:$0xff] %v9396_v52  ;;  %v9398_v30 = vpop.f32.mrb[50].mxu1 }
 0x43d   : > { %14705 = vst [vmem:[#allocation84_spill] sm:$0xff] %v9398_v30  ;;  %v9401_v37 = vpop.f32.mrb[51].mxu1  ;;  %v7965_v30 = vld [vmem:[#allocation2] sm:$0xff] }
 0x43e   : > { %14706 = vst [vmem:[#allocation85_spill] sm:$0xff] %v9401_v37  ;;  %3124 = vmatpush1.bf16.xpose.msra.mxu0 %v7414_v2  ;;  %v7966_v2 = vld [vmem:[#allocation2 + $0x18] sm:$0xff] }
 0x440   : > { %3237 = vmatpush1.bf16.xpose.msra.mxu1 %v7417_v57  ;;  %v9403_v9 = vpop.f32.mrb[52].mxu0 }
 0x441   : > { %14707 = vst [vmem:[#allocation86_spill] sm:$0xff] %v9403_v9  ;;  %v9405_v62 = vpop.f32.mrb[53].mxu0 }
 0x442   : > { %14708 = vst [vmem:[#allocation87_spill] sm:$0xff] %v9405_v62  ;;  %v9407_v22 = vpop.f32.mrb[54].mxu0  ;;  %v9409_v24 = vpop.f32.mrb[52].mxu1 }
 0x443   : > { %14709 = vst [vmem:[#allocation88_spill] sm:$0xff] %v9407_v22  ;;  %14710 = vst [vmem:[#allocation89_spill] sm:$0xff] %v9409_v24  ;;  %v9411_v27 = vpop.f32.mrb[55].mxu0  ;;  %v9413_v50 = vpop.f32.mrb[53].mxu1  ;;  %v7967_v22 = vld [vmem:[#allocation2 + $0x10] sm:$0xff] }
 0x444   : > { %14711 = vst [vmem:[#allocation90_spill] sm:$0xff] %v9411_v27  ;;  %14712 = vst [vmem:[#allocation91_spill] sm:$0xff] %v9413_v50  ;;  %v9415_v52 = vpop.f32.mrb[54].mxu1 }
 0x445   : > { %14713 = vst [vmem:[#allocation92_spill] sm:$0xff] %v9415_v52  ;;  %3126 = vmatmul.mubr.bf16.vlgmr.msra.gmra.mrb[96].mxu0 %v7965_v30  ;;  %v9417_v29 = vpop.f32.mrb[55].mxu1 }
 0x446   : > { %14714 = vst [vmem:[#allocation93_spill] sm:$0xff] %v9417_v29  ;;  %3135 = vmatprep.mubr.bf16.mxu0 %v7966_v2 }
 0x447   : > { %3239 = vmatmul.mubr.bf16.vlgmr.msra.gmra.mrb[96].mxu1 %v7965_v30  ;;  %v7968_v30 = vld [vmem:[#allocation2 + $0x28] sm:$0xff] }
 0x448   : > { %v9419_v57 = vpop.f32.mrb[56].mxu0  ;;  %3248 = vmatprep.mubr.bf16.mxu1 %v7966_v2 }
 0x449   : > { %14715 = vst [vmem:[#allocation94_spill] sm:$0xff] %v9419_v57  ;;  %v9421_v37 = vpop.f32.mrb[57].mxu0  ;;  %v7969_v57 = vld [vmem:[#allocation2 + $0x20] sm:$0xff] }
 0x44a   : > { %14716 = vst [vmem:[#allocation95_spill] sm:$0xff] %v9421_v37  ;;  %v9423_v62 = vpop.f32.mrb[58].mxu0  ;;  %v9425_v24 = vpop.f32.mrb[56].mxu1 }
 0x44b   : > { %14717 = vst [vmem:[#allocation96_spill] sm:$0xff] %v9423_v62  ;;  %14718 = vst [vmem:[#allocation97_spill] sm:$0xff] %v9425_v24  ;;  %v9427_v27 = vpop.f32.mrb[59].mxu0  ;;  %v9429_v50 = vpop.f32.mrb[57].mxu1 }
 0x44c   : > { %14719 = vst [vmem:[#allocation98_spill] sm:$0xff] %v9427_v27  ;;  %14720 = vst [vmem:[#allocation99_spill] sm:$0xff] %v9429_v50  ;;  %v9431_v52 = vpop.f32.mrb[58].mxu1 }
 0x44d   : > { %14721 = vst [vmem:[#allocation100_spill] sm:$0xff] %v9431_v52  ;;  %3136 = vmatmul.mubr.bf16.gmra.mrb[100].mxu0 %v7967_v22  ;;  %v9433_v29 = vpop.f32.mrb[59].mxu1 }
 0x44e   : > { %14722 = vst [vmem:[#allocation101_spill] sm:$0xff] %v9433_v29  ;;  %3145 = vmatprep.mubr.bf16.mxu0 %v7968_v30 }
 0x44f   : > { %3249 = vmatmul.mubr.bf16.gmra.mrb[100].mxu1 %v7967_v22  ;;  %v7970_v22 = vld [vmem:[#allocation2 + $0x38] sm:$0xff] }
 0x450   : > { %v9435_v2 = vpop.f32.mrb[60].mxu0  ;;  %3258 = vmatprep.mubr.bf16.mxu1 %v7968_v30  ;;  %v7971_v30 = vld [vmem:[#allocation2 + $0x30] sm:$0xff] }
 0x451   : > { %14723 = vst [vmem:[#allocation102_spill] sm:$0xff] %v9435_v2  ;;  %v9437_v37 = vpop.f32.mrb[61].mxu0 }
 0x452   : > { %14724 = vst [vmem:[#allocation103_spill] sm:$0xff] %v9437_v37  ;;  %v9439_v62 = vpop.f32.mrb[62].mxu0  ;;  %v9441_v24 = vpop.f32.mrb[60].mxu1  ;;  %v7972_v37 = vld [vmem:[#allocation2 + $0x48] sm:$0xff] }
 0x453   : > { %14725 = vst [vmem:[#allocation104_spill] sm:$0xff] %v9439_v62  ;;  %14726 = vst [vmem:[#allocation105_spill] sm:$0xff] %v9441_v24  ;;  %v9443_v27 = vpop.f32.mrb[63].mxu0  ;;  %v9445_v50 = vpop.f32.mrb[61].mxu1  ;;  %v7973_v24 = vld [vmem:[#allocation2 + $0x40] sm:$0xff] }
 0x454   : > { %14727 = vst [vmem:[#allocation106_spill] sm:$0xff] %v9443_v27  ;;  %14728 = vst [vmem:[#allocation107_spill] sm:$0xff] %v9445_v50  ;;  %v9447_v52 = vpop.f32.mrb[62].mxu1  ;;  %v7974_v27 = vld [vmem:[#allocation2 + $0x58] sm:$0xff]  ;;  %v7976_v50 = vld [vmem:[#allocation2 + $0x68] sm:$0xff] }
 0x455   : > { %14729 = vst [vmem:[#allocation108_spill] sm:$0xff] %v9447_v52  ;;  %3146 = vmatmul.mubr.bf16.gmra.mrb[104].mxu0 %v7969_v57  ;;  %v9449_v29 = vpop.f32.mrb[63].mxu1  ;;  %v7975_v52 = vld [vmem:[#allocation2 + $0x50] sm:$0xff] }
 0x456   : > { %14730 = vst [vmem:[#allocation109_spill] sm:$0xff] %v9449_v29  ;;  %3155 = vmatprep.mubr.bf16.mxu0 %v7970_v22 }
 0x457   : > { %3259 = vmatmul.mubr.bf16.gmra.mrb[104].mxu1 %v7969_v57  ;;  %v7977_v57 = vld [vmem:[#allocation2 + $0x60] sm:$0xff] }
 0x458   : > { %3268 = vmatprep.mubr.bf16.mxu1 %v7970_v22  ;;  %v7978_v22 = vld [vmem:[#allocation2 + $0x78] sm:$0xff] }
 0x45d   : > { %3156 = vmatmul.mubr.bf16.gmra.mrb[108].mxu0 %v7971_v30 }
 0x45e   : > { %3165 = vmatprep.mubr.bf16.mxu0 %v7972_v37 }
 0x45f   : > { %3269 = vmatmul.mubr.bf16.gmra.mrb[108].mxu1 %v7971_v30  ;;  %v7979_v30 = vld [vmem:[#allocation2 + $0x70] sm:$0xff] }
 0x460   : > { %3278 = vmatprep.mubr.bf16.mxu1 %v7972_v37 }
 0x465   : > { %3166 = vmatmul.mubr.bf16.gmra.mrb[112].mxu0 %v7973_v24 }
 0x466   : > { %3175 = vmatprep.mubr.bf16.mxu0 %v7974_v27 }
 0x467   : > { %3279 = vmatmul.mubr.bf16.gmra.mrb[112].mxu1 %v7973_v24 }
 0x468   : > { %3288 = vmatprep.mubr.bf16.mxu1 %v7974_v27 }
 0x46d   : > { %3176 = vmatmul.mubr.bf16.gmra.mrb[116].mxu0 %v7975_v52 }
 0x46e   : > { %3185 = vmatprep.mubr.bf16.mxu0 %v7976_v50 }
 0x46f   : > { %3289 = vmatmul.mubr.bf16.gmra.mrb[116].mxu1 %v7975_v52 }
 0x470   : > { %3298 = vmatprep.mubr.bf16.mxu1 %v7976_v50 }
 0x475   : > { %3186 = vmatmul.mubr.bf16.gmra.mrb[120].mxu0 %v7977_v57 }
 0x476   : > { %3195 = vmatprep.mubr.bf16.mxu0 %v7978_v22 }
 0x477   : > { %3299 = vmatmul.mubr.bf16.gmra.mrb[120].mxu1 %v7977_v57 }
 0x478   : > { %3308 = vmatprep.mubr.bf16.mxu1 %v7978_v22 }
 0x47d   : > { %3196 = vmatmul.mubr.bf16.gmra.mrb[124].mxu0 %v7979_v30 }
 0x47f   : > { %3309 = vmatmul.mubr.bf16.gmra.mrb[124].mxu1 %v7979_v30 }
 0x498   : > { %v9451_v37 = vpop.f32.mrb[64].mxu0 }
 0x499   : > { %14731 = vst [vmem:[#allocation110_spill] sm:$0xff] %v9451_v37  ;;  %v9453_v29 = vpop.f32.mrb[65].mxu0 }
 0x49a   : > { %14732 = vst [vmem:[#allocation111_spill] sm:$0xff] %v9453_v29  ;;  %v9455_v24 = vpop.f32.mrb[66].mxu0  ;;  %v9457_v27 = vpop.f32.mrb[64].mxu1 }
 0x49b   : > { %14733 = vst [vmem:[#allocation112_spill] sm:$0xff] %v9455_v24  ;;  %14734 = vst [vmem:[#allocation113_spill] sm:$0xff] %v9457_v27  ;;  %v9459_v62 = vpop.f32.mrb[67].mxu0  ;;  %v9461_v52 = vpop.f32.mrb[65].mxu1 }
 0x49c   : > { %14735 = vst [vmem:[#allocation114_spill] sm:$0xff] %v9459_v62  ;;  %14736 = vst [vmem:[#allocation115_spill] sm:$0xff] %v9461_v52  ;;  %v9463_v50 = vpop.f32.mrb[66].mxu1 }
 0x49d   : > { %14737 = vst [vmem:[#allocation116_spill] sm:$0xff] %v9463_v50  ;;  %v9465_v2 = vpop.f32.mrb[67].mxu1 }
 0x49e   : > { %14738 = vst [vmem:[#allocation117_spill] sm:$0xff] %v9465_v2 }
 0x4a0   : > { %v9467_v57 = vpop.f32.mrb[68].mxu0 }
 0x4a1   : > { %14739 = vst [vmem:[#allocation118_spill] sm:$0xff] %v9467_v57  ;;  %v9469_v22 = vpop.f32.mrb[69].mxu0 }
 0x4a2   : > { %14740 = vst [vmem:[#allocation119_spill] sm:$0xff] %v9469_v22  ;;  %v9471_v30 = vpop.f32.mrb[70].mxu0  ;;  %v9473_v37 = vpop.f32.mrb[68].mxu1 }
 0x4a3   : > { %14741 = vst [vmem:[#allocation120_spill] sm:$0xff] %v9471_v30  ;;  %14742 = vst [vmem:[#allocation121_spill] sm:$0xff] %v9473_v37  ;;  %v9475_v29 = vpop.f32.mrb[71].mxu0  ;;  %v9477_v24 = vpop.f32.mrb[69].mxu1 }
 0x4a4   : > { %14743 = vst [vmem:[#allocation122_spill] sm:$0xff] %v9475_v29  ;;  %14744 = vst [vmem:[#allocation123_spill] sm:$0xff] %v9477_v24  ;;  %v9479_v27 = vpop.f32.mrb[70].mxu1 }
 0x4a5   : > { %14745 = vst [vmem:[#allocation124_spill] sm:$0xff] %v9479_v27  ;;  %v9481_v62 = vpop.f32.mrb[71].mxu1 }
 0x4a6   : > { %14746 = vst [vmem:[#allocation125_spill] sm:$0xff] %v9481_v62 }
 0x4a8   : > { %v9483_v52 = vpop.f32.mrb[72].mxu0 }
 0x4a9   : > { %14747 = vst [vmem:[#allocation126_spill] sm:$0xff] %v9483_v52  ;;  %v9485_v50 = vpop.f32.mrb[73].mxu0 }
 0x4aa   : > { %14748 = vst [vmem:[#allocation127_spill] sm:$0xff] %v9485_v50  ;;  %v9487_v2 = vpop.f32.mrb[74].mxu0  ;;  %v9489_v57 = vpop.f32.mrb[72].mxu1 }
 0x4ab   : > { %14749 = vst [vmem:[#allocation128_spill] sm:$0xff] %v9487_v2  ;;  %14750 = vst [vmem:[#allocation129_spill] sm:$0xff] %v9489_v57  ;;  %v9491_v22 = vpop.f32.mrb[75].mxu0  ;;  %v9493_v30 = vpop.f32.mrb[73].mxu1 }
 0x4ac   : > { %14751 = vst [vmem:[#allocation130_spill] sm:$0xff] %v9491_v22  ;;  %14752 = vst [vmem:[#allocation131_spill] sm:$0xff] %v9493_v30  ;;  %v9495_v37 = vpop.f32.mrb[74].mxu1 }
 0x4ad   : > { %14753 = vst [vmem:[#allocation132_spill] sm:$0xff] %v9495_v37  ;;  %v9497_v29 = vpop.f32.mrb[75].mxu1 }
 0x4ae   : > { %14754 = vst [vmem:[#allocation133_spill] sm:$0xff] %v9497_v29 }
 0x4b0   : > { %v9499_v24 = vpop.f32.mrb[76].mxu0 }
 0x4b1   : > { %14755 = vst [vmem:[#allocation134_spill] sm:$0xff] %v9499_v24  ;;  %v9501_v27 = vpop.f32.mrb[77].mxu0  ;;  %v3335_v24 = vlaneseq }
 0x4b2   : > { %14756 = vst [vmem:[#allocation135_spill] sm:$0xff] %v9501_v27  ;;  %v9503_v62 = vpop.f32.mrb[78].mxu0  ;;  %v9505_v50 = vpop.f32.mrb[76].mxu1 }
 0x4b3   : > { %14757 = vst [vmem:[#allocation136_spill] sm:$0xff] %v9503_v62  ;;  %14758 = vst [vmem:[#allocation137_spill] sm:$0xff] %v9505_v50  ;;  %v9507_v2 = vpop.f32.mrb[79].mxu0  ;;  %v9509_v57 = vpop.f32.mrb[77].mxu1 }
 0x4b4   : > { %14759 = vst [vmem:[#allocation138_spill] sm:$0xff] %v9507_v2  ;;  %14760 = vst [vmem:[#allocation139_spill] sm:$0xff] %v9509_v57  ;;  %v9511_v22 = vpop.f32.mrb[78].mxu1 }
 0x4b5   : > { %14761 = vst [vmem:[#allocation140_spill] sm:$0xff] %v9511_v22  ;;  %v9513_v30 = vpop.f32.mrb[79].mxu1  ;;  %v9531_v22 = vand.u32 127, %v3335_v24 }
 0x4b6   : > { %14762 = vst [vmem:[#allocation141_spill] sm:$0xff] %v9513_v30 }
 0x4b7   : > { %v3338_v24 = vadd.s32 256, %v9531_v22 }
 0x4b8   : > { %v9515_v37 = vpop.f32.mrb[80].mxu0 }
 0x4b9   : > { %14763 = vst [vmem:[#allocation142_spill] sm:$0xff] %v9515_v37  ;;  %v9517_v29 = vpop.f32.mrb[81].mxu0 }
 0x4ba   : > { %14764 = vst [vmem:[#allocation143_spill] sm:$0xff] %v9517_v29  ;;  %v9519_v52 = vpop.f32.mrb[82].mxu0  ;;  %v9521_v27 = vpop.f32.mrb[80].mxu1  ;;  %v3337_v29 = vadd.s32 128, %v9531_v22 }
 0x4bb   : > { %14765 = vst [vmem:[#allocation144_spill] sm:$0xff] %v9519_v52  ;;  %14766 = vst [vmem:[#allocation145_spill] sm:$0xff] %v9521_v27  ;;  %v9523_v62 = vpop.f32.mrb[83].mxu0  ;;  %v9525_v50 = vpop.f32.mrb[81].mxu1 }
 0x4bc   : > { %14767 = vst [vmem:[#allocation146_spill] sm:$0xff] %v9523_v62  ;;  %14768 = vst [vmem:[#allocation147_spill] sm:$0xff] %v9525_v50  ;;  %v9527_v2 = vpop.f32.mrb[82].mxu1  ;;  %v9543_v62 = vstv %s6760_s29 }
 0x4bd   : > { %14769 = vst [vmem:[#allocation148_spill] sm:$0xff] %v9527_v2  ;;  %v9529_v57 = vpop.f32.mrb[83].mxu1 }
 0x4be   : > { %14770 = vst [vmem:[#allocation149_spill] sm:$0xff] %v9529_v57 }
 0x4c0   : > { %v9534_v30 = vpop.f32.mrb[84].mxu0 }
 0x4c1   : > { %14771 = vst [vmem:[#allocation150_spill] sm:$0xff] %v9534_v30  ;;  %v9536_v37 = vpop.f32.mrb[85].mxu0  ;;  %v9564_v30 = vadd.s32 %v9543_v62, %v3338_v24 }
 0x4c2   : > { %14772 = vst [vmem:[#allocation151_spill] sm:$0xff] %v9536_v37  ;;  %v9539_v52 = vpop.f32.mrb[86].mxu0  ;;  %v9541_v27 = vpop.f32.mrb[84].mxu1  ;;  %v9556_v37 = vadd.s32 %v9543_v62, %v9531_v22 }
 0x4c3   : > { %14773 = vst [vmem:[#allocation152_spill] sm:$0xff] %v9539_v52  ;;  %14774 = vst [vmem:[#allocation153_spill] sm:$0xff] %v9541_v27  ;;  %v9545_v50 = vpop.f32.mrb[87].mxu0  ;;  %v9547_v2 = vpop.f32.mrb[85].mxu1  ;;  %v9559_v52 = vadd.s32 %v9543_v62, %v3337_v29  ;;  %vm3372_vm3 = vcmp.lt.s32.totalorder %v9564_v30, 30000 }
 0x4c4   : > { %14775 = vst [vmem:[#allocation154_spill] sm:$0xff] %v9545_v50  ;;  %14776 = vst [vmem:[#allocation155_spill] sm:$0xff] %v9547_v2  ;;  %v9549_v57 = vpop.f32.mrb[86].mxu1  ;;  %v3339_v2 = vadd.s32 384, %v9531_v22  ;;  %vm3370_vm1 = vcmp.lt.s32.totalorder %v9556_v37, 30000 }
 0x4c5   : > { %14777 = vst [vmem:[#allocation156_spill] sm:$0xff] %v9549_v57  ;;  %v9552_v9 = vpop.f32.mrb[87].mxu1  ;;  %vm3371_vm2 = vcmp.lt.s32.totalorder %v9559_v52, 30000  ;;  %v9584_v24 = vsel %vm3370_vm1, %v9081_v51, -1e+30 }
 0x4c6   : > { %14778 = vst [vmem:[#allocation157_spill] sm:$0xff] %v9552_v9  ;;  %14785 = vst [vmem:[#allocation164_spill] sm:$0xff] %v9584_v24  ;;  %v9605_v51 = vsel %vm3371_vm2, %v9090_v63, -1e+30  ;;  %v9625_v63 = vsel %vm3371_vm2, %v9111_v35, -1e+30 }
 0x4c7   : > { %14789 = vst [vmem:[#allocation168_spill] sm:$0xff] %v9605_v51  ;;  %14793 = vst [vmem:[#allocation172_spill] sm:$0xff] %v9625_v63  ;;  %v9644_v35 = vsel %vm3372_vm3, %v9096_v4, -1e+30  ;;  %v9662_v4 = vsel %vm3372_vm3, %v9117_v14, -1e+30 }
 0x4c8   : > { %v9561_v27 = vpop.f32.mrb[88].mxu0  ;;  %14796 = vst [vmem:[#allocation175_spill] sm:$0xff] %v9644_v35  ;;  %14800 = vst [vmem:[#allocation179_spill] sm:$0xff] %v9662_v4 }
 0x4c9   : > { %14779 = vst [vmem:[#allocation158_spill] sm:$0xff] %v9561_v27  ;;  %v9567_v50 = vpop.f32.mrb[89].mxu0 }
 0x4ca   : > { %14780 = vst [vmem:[#allocation159_spill] sm:$0xff] %v9567_v50  ;;  %v9571_v9 = vpop.f32.mrb[90].mxu0  ;;  %v9573_v57 = vpop.f32.mrb[88].mxu1  ;;  %v9589_v50 = vsel %vm3371_vm2, %v9083_v53, -1e+30 }
 0x4cb   : > { %14781 = vst [vmem:[#allocation160_spill] sm:$0xff] %v9573_v57  ;;  %v9575_v18 = vpop.f32.mrb[91].mxu0  ;;  %v9577_v29 = vpop.f32.mrb[89].mxu1  ;;  %14786 = vst [vmem:[#allocation165_spill] sm:$0xff] %v9589_v50  ;;  %v9593_v57 = vadd.s32 %v9543_v62, %v3339_v2  ;;  %v9610_v53 = vsel %vm3370_vm1, %v9101_v7, -1e+30  ;;  %v4523_v7 = vmax.f32 %v9584_v24, %v9589_v50 }
 0x4cc   : > { %14782 = vst [vmem:[#allocation161_spill] sm:$0xff] %v9575_v18  ;;  %14783 = vst [vmem:[#allocation162_spill] sm:$0xff] %v9577_v29  ;;  %v9579_v27 = vpop.f32.mrb[90].mxu1  ;;  %v9615_v2 = vsel %vm3371_vm2, %v9103_v8, -1e+30 }
 0x4cd   : > { %14784 = vst [vmem:[#allocation163_spill] sm:$0xff] %v9579_v27  ;;  %v9595_v18 = vpop.f32.mrb[91].mxu1  ;;  %v9600_v27 = vsel %vm3370_vm1, %v9085_v54, -1e+30  ;;  %14790 = vst [vmem:[#allocation169_spill] sm:$0xff] %v9610_v53  ;;  %vm3373_vm4 = vcmp.lt.s32.totalorder %v9593_v57, 30000  ;;  %v4557_v50 = vmax.f32 %v9610_v53, %v9615_v2 }
 0x4ce   : > { %14787 = vst [vmem:[#allocation166_spill] sm:$0xff] %v9595_v18  ;;  %14788 = vst [vmem:[#allocation167_spill] sm:$0xff] %v9600_v27  ;;  %v9620_v54 = vsel %vm3370_vm1, %v9106_v10, -1e+30  ;;  %v4540_v29 = vmax.f32 %v9600_v27, %v9605_v51  ;;  %v9639_v10 = vsel %vm3372_vm3, %v9087_v56, -1e+30 }
 0x4cf   : > { %14791 = vst [vmem:[#allocation170_spill] sm:$0xff] %v9615_v2  ;;  %14792 = vst [vmem:[#allocation171_spill] sm:$0xff] %v9620_v54  ;;  %v4574_v51 = vmax.f32 %v9620_v54, %v9625_v63  ;;  %v9657_v56 = vsel %vm3372_vm3, %v9108_v55, -1e+30  ;;  %v9671_v63 = vsel %vm3373_vm4, %v9093_v1, -1e+30  ;;  %v9679_v14 = vmax.f32 %v4523_v7, %v9639_v10 }
 0x4d0   : > { %v9627_v18 = vpop.f32.mrb[92].mxu0  ;;  %14795 = vst [vmem:[#allocation174_spill] sm:$0xff] %v9639_v10  ;;  %14799 = vst [vmem:[#allocation178_spill] sm:$0xff] %v9657_v56  ;;  %v3340_v54 = vadd.s32 512, %v9531_v22  ;;  %v3341_v53 = vadd.s32 640, %v9531_v22  ;;  %v3342_v55 = vadd.s32 768, %v9531_v22 }
 0x4d1   : > { %v9634_v8 = vpop.f32.mrb[93].mxu0  ;;  %14803 = vst [vmem:[#allocation182_spill] sm:$0xff] %v9671_v63  ;;  %v9692_v1 = vsel %vm3371_vm2, %v9123_v19, -1e+30  ;;  %v9700_v7 = vmax.f32 %v4574_v51, %v9662_v4  ;;  %v9715_v19 = vsel %vm3373_vm4, %v9114_v12, -1e+30 }
 0x4d2   : > { %14794 = vst [vmem:[#allocation173_spill] sm:$0xff] %v9634_v8  ;;  %v9650_v27 = vpop.f32.mrb[94].mxu0  ;;  %v9652_v24 = vpop.f32.mrb[92].mxu1  ;;  %14806 = vst [vmem:[#allocation185_spill] sm:$0xff] %v9692_v1  ;;  %v3343_v51 = vadd.s32 896, %v9531_v22  ;;  %v9731_v4 = vadd.s32 %v9543_v62, %v3340_v54  ;;  %v9734_v12 = vadd.s32 %v9543_v62, %v3341_v53 }
 0x4d3   : > { %14797 = vst [vmem:[#allocation176_spill] sm:$0xff] %v9650_v27  ;;  %14798 = vst [vmem:[#allocation177_spill] sm:$0xff] %v9652_v24  ;;  %v9664_v8 = vpop.f32.mrb[95].mxu0  ;;  %v9666_v2 = vpop.f32.mrb[93].mxu1  ;;  %v9772_v53 = vsel %vm3371_vm2, %v9143_v39, -1e+30 }
 0x4d4   : > { %14801 = vst [vmem:[#allocation180_spill] sm:$0xff] %v9664_v8  ;;  %14802 = vst [vmem:[#allocation181_spill] sm:$0xff] %v9666_v2  ;;  %v9676_v24 = vpop.f32.mrb[94].mxu1  ;;  %v9682_v8 = vmax.f32 %v4540_v29, %v9644_v35  ;;  %v9687_v2 = vsel %vm3370_vm1, %v9121_v17, -1e+30  ;;  %vm3374_vm5 = vcmp.lt.s32.totalorder %v9731_v4, 30000 }
 0x4d5   : > { %14804 = vst [vmem:[#allocation183_spill] sm:$0xff] %v9676_v24  ;;  %14805 = vst [vmem:[#allocation184_spill] sm:$0xff] %v9687_v2  ;;  %v9694_v27 = vpop.f32.mrb[95].mxu1  ;;  %v9697_v24 = vmax.f32 %v4557_v50, %v9657_v56  ;;  %v9705_v29 = vsel %vm3370_vm1, %v9126_v21, -1e+30  ;;  %v9757_v56 = vadd.s32 %v9543_v62, %v3342_v55  ;;  %vm3375_vm6 = vcmp.lt.s32.totalorder %v9734_v12, 30000 }
 0x4d6   : > { %14807 = vst [vmem:[#allocation186_spill] sm:$0xff] %v9705_v29  ;;  %v9710_v17 = vsel %vm3371_vm2, %v9131_v26, -1e+30  ;;  %14809 = vst [vmem:[#allocation188_spill] sm:$0xff] %v9715_v19  ;;  %v9720_v50 = vsel %vm3373_vm4, %v9119_v16, -1e+30  ;;  %v4591_v26 = vmax.f32 %v9687_v2, %v9692_v1 }
 0x4d7   : > { %14808 = vst [vmem:[#allocation187_spill] sm:$0xff] %v9710_v17  ;;  %14810 = vst [vmem:[#allocation189_spill] sm:$0xff] %v9720_v50  ;;  %v9726_v21 = vsel %vm3373_vm4, %v9099_v6, -1e+30  ;;  %v4608_v35 = vmax.f32 %v9705_v29, %v9710_v17  ;;  %v9745_v6 = vsel %vm3372_vm3, %v9128_v23, -1e+30 }
 0x4d8   : > { %14811 = vst [vmem:[#allocation190_spill] sm:$0xff] %v9726_v21  ;;  %14812 = vst [vmem:[#allocation191_spill] sm:$0xff] %v9731_v4  ;;  %v9754_v16 = vsel %vm3372_vm3, %v9137_v33, -1e+30  ;;  %v9762_v17 = vsel %vm3373_vm4, %v9134_v31, -1e+30  ;;  %v9775_v33 = vadd.s32 %v9543_v62, %v3343_v51  ;;  %v9778_v55 = vmax.f32 %v4591_v26, %v9745_v6 }
 0x4d9   : > { %14813 = vst [vmem:[#allocation192_spill] sm:$0xff] %v9734_v12  ;;  %14814 = vst [vmem:[#allocation193_spill] sm:$0xff] %v9745_v6  ;;  %v9767_v23 = vsel %vm3370_vm1, %v9141_v38, -1e+30  ;;  %v9783_v31 = vsel %vm3373_vm4, %v9139_v36, -1e+30  ;;  %v9796_v51 = vmax.f32 %v4608_v35, %v9754_v16 }
 0x4da   : > { %14815 = vst [vmem:[#allocation194_spill] sm:$0xff] %v9754_v16  ;;  %14816 = vst [vmem:[#allocation195_spill] sm:$0xff] %v9762_v17  ;;  %v9788_v38 = vsel %vm3370_vm1, %v9146_v44, -1e+30  ;;  %v9793_v39 = vsel %vm3371_vm2, %v9151_v49, -1e+30  ;;  %v4625_v49 = vmax.f32 %v9767_v23, %v9772_v53 }
 0x4db   : > { %14817 = vst [vmem:[#allocation196_spill] sm:$0xff] %v9767_v23  ;;  %14818 = vst [vmem:[#allocation197_spill] sm:$0xff] %v9772_v53  ;;  %v9801_v26 = vsel %vm3370_vm1, %v9161_v58, -1e+30  ;;  %v9806_v36 = vsel %vm3371_vm2, %v9163_v11, -1e+30 }
 0x4dc   : > { %14819 = vst [vmem:[#allocation198_spill] sm:$0xff] %v9783_v31  ;;  %14820 = vst [vmem:[#allocation199_spill] sm:$0xff] %v9788_v38  ;;  %v9811_v44 = vsel %vm3370_vm1, %v9166_v20, -1e+30  ;;  %v9818_v35 = vsel %vm3371_vm2, %v9171_v32, -1e+30  ;;  %v4642_v20 = vmax.f32 %v9788_v38, %v9793_v39 }
 0x4dd   : > { %14821 = vst [vmem:[#allocation200_spill] sm:$0xff] %v9793_v39  ;;  %14822 = vst [vmem:[#allocation201_spill] sm:$0xff] %v9801_v26  ;;  %v9823_v58 = vsel %vm3370_vm1, %v9181_v41, -1e+30  ;;  %v9828_v11 = vsel %vm3371_vm2, %v9183_v40, -1e+30 }
 0x4de   : > { %14823 = vst [vmem:[#allocation202_spill] sm:$0xff] %v9806_v36  ;;  %14824 = vst [vmem:[#allocation203_spill] sm:$0xff] %v9811_v44  ;;  %v9835_v54 = vsel %vm3372_vm3, %v9148_v46, -1e+30  ;;  %v9840_v32 = vsel %vm3370_vm1, %v9186_v59, -1e+30  ;;  %v4659_v46 = vmax.f32 %v9801_v26, %v9806_v36 }
 0x4df   : > { %14825 = vst [vmem:[#allocation204_spill] sm:$0xff] %v9818_v35  ;;  %14826 = vst [vmem:[#allocation205_spill] sm:$0xff] %v9823_v58  ;;  %v9845_v41 = vsel %vm3371_vm2, %v9191_v61, -1e+30  ;;  %v9851_v40 = vsel %vm3372_vm3, %v9156_v3, -1e+30  ;;  %v4676_v3 = vmax.f32 %v9811_v44, %v9818_v35 }
 0x4e0   : > { %14827 = vst [vmem:[#allocation206_spill] sm:$0xff] %v9828_v11  ;;  %14828 = vst [vmem:[#allocation207_spill] sm:$0xff] %v9835_v54  ;;  %v9858_v59 = vsel %vm3370_vm1, %v9205_v0, -1e+30  ;;  %v9863_v61 = vsel %vm3371_vm2, %v9207_v47, -1e+30  ;;  %v4693_v0 = vmax.f32 %v9823_v58, %v9828_v11  ;;  %v4710_v53 = vmax.f32 %v9840_v32, %v9845_v41 }
 0x4e1   : > { %14829 = vst [vmem:[#allocation208_spill] sm:$0xff] %v9840_v32  ;;  %14830 = vst [vmem:[#allocation209_spill] sm:$0xff] %v9845_v41  ;;  %v14834_v23 = vld [vmem:[#allocation35_spill] sm:$0xff]  ;;  %v14836_v39 = vld [vmem:[#allocation37_spill] sm:$0xff]  ;;  %v9894_v11 = vmax.f32 %v4642_v20, %v9851_v40  ;;  %vm3376_vm7 = vcmp.lt.s32.totalorder %v9757_v56, 30000  ;;  %vm3377_vm8 = vcmp.lt.s32.totalorder %v9775_v33, 30000 }
 0x4e2   : > { %14831 = vst [vmem:[#allocation210_spill] sm:$0xff] %v9851_v40  ;;  %14832 = vst [vmem:[#allocation211_spill] sm:$0xff] %v9858_v59  ;;  %v9872_v36 = vsel %vm3372_vm3, %v14834_v23, -1e+30  ;;  %v9881_v47 = vsel %vm3372_vm3, %v14836_v39, -1e+30  ;;  %v9891_v23 = vmax.f32 %v4625_v49, %v9835_v54  ;;  %v4727_v39 = vmax.f32 %v9858_v59, %v9863_v61 }
 0x4e3   : > { %14833 = vst [vmem:[#allocation212_spill] sm:$0xff] %v9863_v61  ;;  %14835 = vst [vmem:[#allocation35_spill] sm:$0xff] %v9872_v36  ;;  %v14838_v35 = vld [vmem:[#allocation39_spill] sm:$0xff]  ;;  %v14840_v26 = vld [vmem:[#allocation41_spill] sm:$0xff]  ;;  %v9915_v32 = vmax.f32 %v4659_v46, %v9872_v36  ;;  %v9923_v61 = vmax.f32 %v4676_v3, %v9881_v47 }
 0x4e4   : > { %14837 = vst [vmem:[#allocation37_spill] sm:$0xff] %v9881_v47  ;;  %v9888_v44 = vsel %vm3372_vm3, %v14838_v35, -1e+30  ;;  %v9899_v58 = vsel %vm3372_vm3, %v14840_v26, -1e+30  ;;  %v14842_v41 = vld [vmem:[#allocation33_spill] sm:$0xff] }
 0x4e5   : > { %14839 = vst [vmem:[#allocation39_spill] sm:$0xff] %v9888_v44  ;;  %14841 = vst [vmem:[#allocation41_spill] sm:$0xff] %v9899_v58  ;;  %v9907_v35 = vsel %vm3373_vm4, %v14842_v41, -1e+30  ;;  %v14844_v49 = vld [vmem:[#allocation34_spill] sm:$0xff]  ;;  %v14846_v26 = vld [vmem:[#allocation44_spill] sm:$0xff]  ;;  %v9926_v59 = vmax.f32 %v4693_v0, %v9888_v44  ;;  %v9954_v44 = vmax.f32 %v4710_v53, %v9899_v58 }
 0x4e6   : > { %14843 = vst [vmem:[#allocation33_spill] sm:$0xff] %v9907_v35  ;;  %v9912_v20 = vsel %vm3373_vm4, %v14844_v49, -1e+30  ;;  %v9920_v54 = vsel %vm3372_vm3, %v14846_v26, -1e+30  ;;  %v14848_v41 = vld [vmem:[#allocation43_spill] sm:$0xff] }
 0x4e7   : > { %14845 = vst [vmem:[#allocation34_spill] sm:$0xff] %v9912_v20  ;;  %14847 = vst [vmem:[#allocation44_spill] sm:$0xff] %v9920_v54  ;;  %v9931_v40 = vsel %vm3370_vm1, %v14848_v41, -1e+30  ;;  %v14850_v49 = vld [vmem:[#allocation45_spill] sm:$0xff]  ;;  %v14852_v36 = vld [vmem:[#allocation36_spill] sm:$0xff] }
 0x4e8   : > { %14849 = vst [vmem:[#allocation43_spill] sm:$0xff] %v9931_v40  ;;  %v9936_v46 = vsel %vm3371_vm2, %v14850_v49, -1e+30  ;;  %v9941_v26 = vsel %vm3373_vm4, %v14852_v36, -1e+30  ;;  %v14854_v3 = vld [vmem:[#allocation38_spill] sm:$0xff] }
 0x4e9   : > { %14851 = vst [vmem:[#allocation45_spill] sm:$0xff] %v9936_v46  ;;  %14853 = vst [vmem:[#allocation36_spill] sm:$0xff] %v9941_v26  ;;  %v9946_v0 = vsel %vm3373_vm4, %v14854_v3, -1e+30  ;;  %v14856_v47 = vld [vmem:[#allocation40_spill] sm:$0xff]  ;;  %v14858_v38 = vld [vmem:[#allocation42_spill] sm:$0xff]  ;;  %v9966_v3 = vmax.f32 %v4727_v39, %v9920_v54  ;;  %v4744_v53 = vmax.f32 %v9931_v40, %v9936_v46 }
 0x4ea   : > { %14855 = vst [vmem:[#allocation38_spill] sm:$0xff] %v9946_v0  ;;  %v9951_v41 = vsel %vm3373_vm4, %v14856_v47, -1e+30  ;;  %v9963_v16 = vsel %vm3373_vm4, %v14858_v38, -1e+30  ;;  %v14860_v47 = vld [vmem:[#allocation46_spill] sm:$0xff] }
 0x4eb   : > { %14857 = vst [vmem:[#allocation40_spill] sm:$0xff] %v9951_v41  ;;  %14859 = vst [vmem:[#allocation42_spill] sm:$0xff] %v9963_v16  ;;  %v9974_v49 = vsel %vm3373_vm4, %v14860_v47, -1e+30  ;;  %v9979_v36 = vsel %vm3370_vm1, %v9229_v15, -1e+30 }
 0x4ec   : > { %14861 = vst [vmem:[#allocation46_spill] sm:$0xff] %v9974_v49  ;;  %14862 = vst [vmem:[#allocation213_spill] sm:$0xff] %v9979_v36  ;;  %v9984_v38 = vsel %vm3371_vm2, %v9231_v5, -1e+30  ;;  %v14864_v40 = vld [vmem:[#allocation47_spill] sm:$0xff]  ;;  %v14869_v39 = vld [vmem:[#allocation48_spill] sm:$0xff] }
 0x4ed   : > { %14863 = vst [vmem:[#allocation214_spill] sm:$0xff] %v9984_v38  ;;  %v9995_v58 = vsel %vm3372_vm3, %v14864_v40, -1e+30  ;;  %v10002_v5 = vsel %vm3370_vm1, %v9234_v48, -1e+30  ;;  %v4761_v48 = vmax.f32 %v9979_v36, %v9984_v38  ;;  %v14872_v54 = vld [vmem:[#allocation49_spill] sm:$0xff] }
 0x4ee   : > { %14865 = vst [vmem:[#allocation47_spill] sm:$0xff] %v9995_v58  ;;  %14866 = vst [vmem:[#allocation215_spill] sm:$0xff] %v10002_v5  ;;  %v10007_v46 = vsel %vm3371_vm2, %v9239_v42, -1e+30  ;;  %v10012_v47 = vsel %vm3374_vm5, %v9305_v43, -1e+30  ;;  %v10030_v43 = vmax.f32 %v4744_v53, %v9995_v58 }
 0x4ef   : > { %14867 = vst [vmem:[#allocation216_spill] sm:$0xff] %v10007_v46  ;;  %14868 = vst [vmem:[#allocation217_spill] sm:$0xff] %v10012_v47  ;;  %v10019_v15 = vsel %vm3373_vm4, %v14869_v39, -1e+30  ;;  %v10026_v42 = vsel %vm3374_vm5, %v9309_v60, -1e+30  ;;  %v4778_v38 = vmax.f32 %v10002_v5, %v10007_v46 }
 0x4f0   : > { %14870 = vst [vmem:[#allocation48_spill] sm:$0xff] %v10019_v15  ;;  %14871 = vst [vmem:[#allocation218_spill] sm:$0xff] %v10026_v42  ;;  %v10035_v40 = vsel %vm3372_vm3, %v14872_v54, -1e+30  ;;  %v10040_v39 = vsel %vm3374_vm5, %v9325_v25, -1e+30  ;;  %v14878_v54 = vmax.f32 %v9679_v14, %v9671_v63  ;;  %v14883_v14 = vmax.f32 %v9682_v8, %v9726_v21 }
 0x4f1   : > { %14873 = vst [vmem:[#allocation49_spill] sm:$0xff] %v10035_v40  ;;  %14874 = vst [vmem:[#allocation219_spill] sm:$0xff] %v10040_v39  ;;  %v10045_v60 = vsel %vm3374_vm5, %v9329_v13, -1e+30  ;;  %v14876_v53 = vld [vmem:[#allocation50_spill] sm:$0xff]  ;;  %v14880_v13 = vld [vmem:[#allocation51_spill] sm:$0xff]  ;;  %v10083_v46 = vmax.f32 %v4761_v48, %v10035_v40  ;;  %v14888_v8 = vmax.f32 %v9700_v7, %v9720_v50  ;;  %v14895_v7 = vmax.f32 %v9778_v55, %v9762_v17 }
 0x4f2   : > { %14875 = vst [vmem:[#allocation220_spill] sm:$0xff] %v10045_v60  ;;  %v10052_v58 = vsel %vm3373_vm4, %v14876_v53, -1e+30  ;;  %v4526_v36 = vmax.f32 %v14878_v54, %v10012_v47  ;;  %v10061_v25 = vsel %vm3374_vm5, %v9345_v28, -1e+30  ;;  %v4543_v54 = vmax.f32 %v14883_v14, %v10026_v42  ;;  %v14891_v40 = vld [vmem:[#allocation58_spill] sm:$0xff] }
 0x4f3   : > { %14877 = vst [vmem:[#allocation50_spill] sm:$0xff] %v10052_v58  ;;  %14879 = vst [vmem:[#allocation221_spill] sm:$0xff] %v10061_v25  ;;  %v10066_v29 = vsel %vm3372_vm3, %v14880_v13, -1e+30  ;;  %v10071_v53 = vsel %vm3375_vm6, %v9307_v45, -1e+30  ;;  %v14887_v45 = vmax.f32 %v9697_v24, %v9715_v19  ;;  %v4577_v14 = vmax.f32 %v14888_v8, %v10045_v60 }
 0x4f4   : > { %14881 = vst [vmem:[#allocation51_spill] sm:$0xff] %v10066_v29  ;;  %14882 = vst [vmem:[#allocation222_spill] sm:$0xff] %v10071_v53  ;;  %v10080_v28 = vsel %vm3374_vm5, %v9349_v34, -1e+30  ;;  %v14885_v13 = vld [vmem:[#allocation54_spill] sm:$0xff]  ;;  %v14889_v34 = vld [vmem:[#allocation52_spill] sm:$0xff]  ;;  %v10118_v8 = vmax.f32 %v4778_v38, %v10066_v29 }
 0x4f5   : > { %14884 = vst [vmem:[#allocation223_spill] sm:$0xff] %v10080_v28  ;;  %v10088_v5 = vsel %vm3375_vm6, %v14885_v13, -1e+30  ;;  %v4560_v47 = vmax.f32 %v14887_v45, %v10040_v39  ;;  %v10101_v48 = vsel %vm3373_vm4, %v14889_v34, -1e+30  ;;  %v14893_v42 = vld [vmem:[#allocation60_spill] sm:$0xff]  ;;  %v4594_v45 = vmax.f32 %v14895_v7, %v10061_v25 }
 0x4f6   : > { %14886 = vst [vmem:[#allocation54_spill] sm:$0xff] %v10088_v5  ;;  %14890 = vst [vmem:[#allocation52_spill] sm:$0xff] %v10101_v48  ;;  %v10106_v13 = vsel %vm3375_vm6, %v14891_v40, -1e+30  ;;  %v10111_v24 = vsel %vm3375_vm6, %v14893_v42, -1e+30  ;;  %v4527_v34 = vmax.f32 %v4526_v36, %v10071_v53  ;;  %v14898_v42 = vmax.f32 %v9796_v51, %v9783_v31 }
 0x4f7   : > { %14892 = vst [vmem:[#allocation58_spill] sm:$0xff] %v10106_v13  ;;  %14894 = vst [vmem:[#allocation60_spill] sm:$0xff] %v10111_v24  ;;  %v14896_v60 = vld [vmem:[#allocation64_spill] sm:$0xff]  ;;  %v14899_v50 = vld [vmem:[#allocation53_spill] sm:$0xff]  ;;  %v4544_v38 = vmax.f32 %v4543_v54, %v10088_v5  ;;  %v4561_v51 = vmax.f32 %v4560_v47, %v10106_v13  ;;  %v3347_v53 = vadd.s32 1408, %v9531_v22  ;;  %vm4506_vm1 = vcmask 7168  }
 0x4f8   : > { %v10124_v40 = vsel %vm3375_vm6, %v14896_v60, -1e+30  ;;  %v4611_v39 = vmax.f32 %v14898_v42, %v10080_v28  ;;  %v10133_v55 = vsel %vm3376_vm7, %v14899_v50, -1e+30  ;;  %v14901_v7 = vld [vmem:[#allocation66_spill] sm:$0xff]  ;;  %v3344_v60 = vadd.s32 1024, %v9531_v22 }
 0x4f9   : > { %14897 = vst [vmem:[#allocation64_spill] sm:$0xff] %v10124_v40  ;;  %14900 = vst [vmem:[#allocation53_spill] sm:$0xff] %v10133_v55  ;;  %v10139_v36 = vsel %vm3375_vm6, %v14901_v7, -1e+30  ;;  %v14903_v29 = vld [vmem:[#allocation56_spill] sm:$0xff]  ;;  %v4578_v42 = vmax.f32 %v4577_v14, %v10111_v24  ;;  %v3345_v50 = vadd.s32 1152, %v9531_v22  ;;  %v10166_v14 = vmax.f32 %v4527_v34, %v10133_v55 }
 0x4fa   : > { %14902 = vst [vmem:[#allocation66_spill] sm:$0xff] %v10139_v36  ;;  %v10145_v25 = vsel %vm3376_vm7, %v14903_v29, -1e+30  ;;  %v14905_v28 = vld [vmem:[#allocation59_spill] sm:$0xff]  ;;  %v14907_v31 = vld [vmem:[#allocation62_spill] sm:$0xff]  ;;  %v4595_v29 = vmax.f32 %v4594_v45, %v10124_v40  ;;  %v4612_v54 = vmax.f32 %v4611_v39, %v10139_v36  ;;  %v14909_v24 = vld [vmem:[#allocation65_spill] sm:$0xff]  ;;  %v10196_v13 = vadd.s32 %v9543_v62, %v3344_v60 }
 0x4fb   : > { %14904 = vst [vmem:[#allocation56_spill] sm:$0xff] %v10145_v25  ;;  %v10155_v7 = vsel %vm3376_vm7, %v14905_v28, -1e+30  ;;  %v10160_v5 = vsel %vm3376_vm7, %v14907_v31, -1e+30  ;;  %v14911_v31 = vld [vmem:[#allocation55_spill] sm:$0xff]  ;;  %v10182_v47 = vmax.f32 %v4544_v38, %v10145_v25 }
 0x4fc   : > { %14906 = vst [vmem:[#allocation59_spill] sm:$0xff] %v10155_v7  ;;  %14908 = vst [vmem:[#allocation62_spill] sm:$0xff] %v10160_v5  ;;  %v10172_v28 = vsel %vm3376_vm7, %v14909_v24, -1e+30  ;;  %v10179_v45 = vsel %vm3377_vm8, %v14911_v31, -1e+30  ;;  %v10190_v36 = vmax.f32 %v4561_v51, %v10155_v7  ;;  %v10193_v24 = vmax.f32 %v4578_v42, %v10160_v5 }
 0x4fd   : > { %14910 = vst [vmem:[#allocation65_spill] sm:$0xff] %v10172_v28  ;;  %14912 = vst [vmem:[#allocation55_spill] sm:$0xff] %v10179_v45  ;;  %v14913_v34 = vld [vmem:[#allocation68_spill] sm:$0xff]  ;;  %v10199_v31 = vadd.s32 %v9543_v62, %v3345_v50  ;;  %v14915_v40 = vld [vmem:[#allocation61_spill] sm:$0xff]  ;;  %v10212_v51 = vmax.f32 %v4595_v29, %v10172_v28  ;;  %v3346_v42 = vadd.s32 1280, %v9531_v22  ;;  %vm3378_vm9 = vcmp.lt.s32.totalorder %v10196_v13, 30000 }
 0x4fe   : > { %v10187_v39 = vsel %vm3376_vm7, %v14913_v34, -1e+30  ;;  %v10204_v38 = vsel %vm3377_vm8, %v14915_v40, -1e+30  ;;  %v14917_v25 = vld [vmem:[#allocation63_spill] sm:$0xff]  ;;  %v14919_v50 = vld [vmem:[#allocation57_spill] sm:$0xff] }
 0x4ff   : > { %14914 = vst [vmem:[#allocation68_spill] sm:$0xff] %v10187_v39  ;;  %14916 = vst [vmem:[#allocation61_spill] sm:$0xff] %v10204_v38  ;;  %v10209_v34 = vsel %vm3377_vm8, %v14917_v25, -1e+30  ;;  %v10220_v5 = vsel %vm3377_vm8, %v14919_v50, -1e+30  ;;  %v10228_v25 = vmax.f32 %v4612_v54, %v10187_v39 }
 0x500   : > { %14918 = vst [vmem:[#allocation63_spill] sm:$0xff] %v10209_v34  ;;  %14920 = vst [vmem:[#allocation57_spill] sm:$0xff] %v10220_v5  ;;  %v14921_v40 = vld [vmem:[#allocation67_spill] sm:$0xff]  ;;  %v14923_v28 = vld [vmem:[#allocation70_spill] sm:$0xff]  ;;  %vm3379_vm10 = vcmp.lt.s32.totalorder %v10199_v31, 30000 }
 0x501   : > { %v10225_v7 = vsel %vm3377_vm8, %v14921_v40, -1e+30  ;;  %v10235_v60 = vsel %vm3374_vm5, %v14923_v28, -1e+30  ;;  %v14925_v55 = vld [vmem:[#allocation69_spill] sm:$0xff]  ;;  %v14927_v39 = vld [vmem:[#allocation72_spill] sm:$0xff] }
 0x502   : > { %14922 = vst [vmem:[#allocation67_spill] sm:$0xff] %v10225_v7  ;;  %14924 = vst [vmem:[#allocation70_spill] sm:$0xff] %v10235_v60  ;;  %v10240_v50 = vsel %vm3377_vm8, %v14925_v55, -1e+30  ;;  %v10250_v29 = vsel %vm3374_vm5, %v14927_v39, -1e+30  ;;  %v10270_v39 = vadd.s32 %v9543_v62, %v3346_v42 }
 0x503   : > { %14926 = vst [vmem:[#allocation69_spill] sm:$0xff] %v10240_v50  ;;  %14928 = vst [vmem:[#allocation72_spill] sm:$0xff] %v10250_v29  ;;  %v14929_v28 = vld [vmem:[#allocation78_spill] sm:$0xff]  ;;  %v14931_v21 = vld [vmem:[#allocation80_spill] sm:$0xff] }
 0x504   : > { %v10255_v17 = vsel %vm3374_vm5, %v14929_v28, -1e+30  ;;  %v10262_v40 = vsel %vm3374_vm5, %v14931_v21, -1e+30  ;;  %v14933_v6 = vld [vmem:[#allocation86_spill] sm:$0xff]  ;;  %v14935_v28 = vmax.f32 %v9891_v23, %v9907_v35  ;;  %v14936_v63 = vld [vmem:[#allocation71_spill] sm:$0xff]  ;;  %v14940_v23 = vmax.f32 %v9894_v11, %v9912_v20 }
 0x505   : > { %14930 = vst [vmem:[#allocation78_spill] sm:$0xff] %v10255_v17  ;;  %14932 = vst [vmem:[#allocation80_spill] sm:$0xff] %v10262_v40  ;;  %v10267_v54 = vsel %vm3374_vm5, %v14933_v6, -1e+30  ;;  %v10281_v21 = vsel %vm3375_vm6, %v14936_v63, -1e+30 }
 0x506   : > { %14934 = vst [vmem:[#allocation86_spill] sm:$0xff] %v10267_v54  ;;  %v4628_v19 = vmax.f32 %v14935_v28, %v10235_v60  ;;  %14937 = vst [vmem:[#allocation71_spill] sm:$0xff] %v10281_v21  ;;  %v14938_v1 = vld [vmem:[#allocation88_spill] sm:$0xff]  ;;  %v4645_v42 = vmax.f32 %v14940_v23, %v10250_v29  ;;  %v14941_v28 = vmax.f32 %v9915_v32, %v9941_v26  ;;  %v14942_v60 = vld [vmem:[#allocation94_spill] sm:$0xff]  ;;  %vm3380_vm11 = vcmp.lt.s32.totalorder %v10270_v39, 30000 }
 0x507   : > { %v10286_v6 = vsel %vm3374_vm5, %v14938_v1, -1e+30  ;;  %v10300_v63 = vsel %vm3374_vm5, %v14942_v60, -1e+30  ;;  %v10303_v1 = vadd.s32 %v9543_v62, %v3347_v53  ;;  %v14944_v35 = vld [vmem:[#allocation74_spill] sm:$0xff]  ;;  %v14946_v11 = vld [vmem:[#allocation79_spill] sm:$0xff]  ;;  %v14948_v32 = vmax.f32 %v9923_v61, %v9946_v0 }
 0x508   : > { %14939 = vst [vmem:[#allocation88_spill] sm:$0xff] %v10286_v6  ;;  %v4662_v55 = vmax.f32 %v14941_v28, %v10255_v17  ;;  %14943 = vst [vmem:[#allocation94_spill] sm:$0xff] %v10300_v63  ;;  %v10308_v2 = vsel %vm3375_vm6, %v14944_v35, -1e+30  ;;  %v10313_v23 = vsel %vm3375_vm6, %v14946_v11, -1e+30  ;;  %v14949_v53 = vmax.f32 %v9926_v59, %v9951_v41 }
 0x509   : > { %14945 = vst [vmem:[#allocation74_spill] sm:$0xff] %v10308_v2  ;;  %14947 = vst [vmem:[#allocation79_spill] sm:$0xff] %v10313_v23  ;;  %v4679_v28 = vmax.f32 %v14948_v32, %v10262_v40  ;;  %v14950_v17 = vld [vmem:[#allocation73_spill] sm:$0xff]  ;;  %v14952_v26 = vld [vmem:[#allocation82_spill] sm:$0xff]  ;;  %v14956_v59 = vmax.f32 %v9954_v44, %v9963_v16  ;;  %v4646_v44 = vmax.f32 %v4645_v42, %v10308_v2  ;;  %vm3381_vm12 = vcmp.lt.s32.totalorder %v10303_v1, 30000 }
 0x50a   : > { %v4696_v60 = vmax.f32 %v14949_v53, %v10267_v54  ;;  %v10326_v35 = vsel %vm3376_vm7, %v14950_v17, -1e+30  ;;  %v10331_v11 = vsel %vm3375_vm6, %v14952_v26, -1e+30  ;;  %v14954_v29 = vld [vmem:[#allocation87_spill] sm:$0xff]  ;;  %v4629_v53 = vmax.f32 %v4628_v19, %v10281_v21  ;;  %v14957_v40 = vld [vmem:[#allocation90_spill] sm:$0xff] }
 0x50b   : > { %14951 = vst [vmem:[#allocation73_spill] sm:$0xff] %v10326_v35  ;;  %14953 = vst [vmem:[#allocation82_spill] sm:$0xff] %v10331_v11  ;;  %v10336_v61 = vsel %vm3375_vm6, %v14954_v29, -1e+30  ;;  %v4713_v32 = vmax.f32 %v14956_v59, %v10286_v6  ;;  %v10346_v17 = vsel %vm3375_vm6, %v14957_v40, -1e+30  ;;  %v14959_v26 = vmax.f32 %v9966_v3, %v9974_v49 }
 0x50c   : > { %14955 = vst [vmem:[#allocation87_spill] sm:$0xff] %v10336_v61  ;;  %14958 = vst [vmem:[#allocation90_spill] sm:$0xff] %v10346_v17  ;;  %v14960_v54 = vld [vmem:[#allocation96_spill] sm:$0xff]  ;;  %v14962_v19 = vld [vmem:[#allocation75_spill] sm:$0xff]  ;;  %v4663_v40 = vmax.f32 %v4662_v55, %v10313_v23  ;;  %v4680_v16 = vmax.f32 %v4679_v28, %v10331_v11  ;;  %v14974_v28 = vmax.f32 %v10030_v43, %v10019_v15 }
 0x50d   : > { %v4730_v0 = vmax.f32 %v14959_v26, %v10300_v63  ;;  %v10355_v29 = vsel %vm3374_vm5, %v14960_v54, -1e+30  ;;  %v10362_v59 = vsel %vm3377_vm8, %v14962_v19, -1e+30  ;;  %v14964_v6 = vld [vmem:[#allocation95_spill] sm:$0xff]  ;;  %v14966_v26 = vld [vmem:[#allocation76_spill] sm:$0xff]  ;;  %v4697_v19 = vmax.f32 %v4696_v60, %v10336_v61 }
 0x50e   : > { %14961 = vst [vmem:[#allocation96_spill] sm:$0xff] %v10355_v29  ;;  %14963 = vst [vmem:[#allocation75_spill] sm:$0xff] %v10362_v59  ;;  %v10368_v3 = vsel %vm3375_vm6, %v14964_v6, -1e+30  ;;  %v10373_v54 = vsel %vm3376_vm7, %v14966_v26, -1e+30  ;;  %v4714_v6 = vmax.f32 %v4713_v32, %v10346_v17  ;;  %v10398_v11 = vmax.f32 %v4629_v53, %v10326_v35 }
 0x50f   : > { %14965 = vst [vmem:[#allocation95_spill] sm:$0xff] %v10368_v3  ;;  %14967 = vst [vmem:[#allocation76_spill] sm:$0xff] %v10373_v54  ;;  %v14968_v42 = vld [vmem:[#allocation81_spill] sm:$0xff]  ;;  %v14970_v55 = vld [vmem:[#allocation84_spill] sm:$0xff]  ;;  %v4731_v32 = vmax.f32 %v4730_v0, %v10368_v3  ;;  %v10413_v43 = vmax.f32 %v4646_v44, %v10373_v54 }
 0x510   : > { %v10379_v63 = vsel %vm3376_vm7, %v14968_v42, -1e+30  ;;  %v10385_v49 = vsel %vm3376_vm7, %v14970_v55, -1e+30  ;;  %v14972_v41 = vld [vmem:[#allocation89_spill] sm:$0xff]  ;;  %v4747_v42 = vmax.f32 %v14974_v28, %v10355_v29  ;;  %v14975_v60 = vld [vmem:[#allocation92_spill] sm:$0xff] }
 0x511   : > { %14969 = vst [vmem:[#allocation81_spill] sm:$0xff] %v10379_v63  ;;  %14971 = vst [vmem:[#allocation84_spill] sm:$0xff] %v10385_v49  ;;  %v10391_v26 = vsel %vm3376_vm7, %v14972_v41, -1e+30  ;;  %v10403_v55 = vsel %vm3376_vm7, %v14975_v60, -1e+30  ;;  %v10421_v60 = vmax.f32 %v4663_v40, %v10379_v63  ;;  %v10434_v44 = vmax.f32 %v4680_v16, %v10385_v49 }
 0x512   : > { %14973 = vst [vmem:[#allocation89_spill] sm:$0xff] %v10391_v26  ;;  %14976 = vst [vmem:[#allocation92_spill] sm:$0xff] %v10403_v55  ;;  %v14977_v17 = vld [vmem:[#allocation98_spill] sm:$0xff]  ;;  %v14979_v28 = vld [vmem:[#allocation77_spill] sm:$0xff]  ;;  %v10442_v40 = vmax.f32 %v4697_v19, %v10391_v26 }
 0x513   : > { %v10409_v41 = vsel %vm3375_vm6, %v14977_v17, -1e+30  ;;  %v10418_v53 = vsel %vm3377_vm8, %v14979_v28, -1e+30  ;;  %v14981_v29 = vld [vmem:[#allocation97_spill] sm:$0xff]  ;;  %v14983_v17 = vld [vmem:[#allocation83_spill] sm:$0xff] }
 0x514   : > { %14978 = vst [vmem:[#allocation98_spill] sm:$0xff] %v10409_v41  ;;  %14980 = vst [vmem:[#allocation77_spill] sm:$0xff] %v10418_v53  ;;  %v10426_v0 = vsel %vm3376_vm7, %v14981_v29, -1e+30  ;;  %v10431_v15 = vsel %vm3377_vm8, %v14983_v17, -1e+30  ;;  %v10451_v17 = vmax.f32 %v4714_v6, %v10403_v55  ;;  %v4748_v16 = vmax.f32 %v4747_v42, %v10409_v41 }
 0x515   : > { %14982 = vst [vmem:[#allocation97_spill] sm:$0xff] %v10426_v0  ;;  %14984 = vst [vmem:[#allocation83_spill] sm:$0xff] %v10431_v15  ;;  %v14985_v3 = vld [vmem:[#allocation85_spill] sm:$0xff]  ;;  %v14987_v29 = vld [vmem:[#allocation91_spill] sm:$0xff]  ;;  %v14999_v41 = vmax.f32 %v10166_v14, %v10179_v45 }
 0x516   : > { %v10439_v28 = vsel %vm3377_vm8, %v14985_v3, -1e+30  ;;  %v10448_v61 = vsel %vm3377_vm8, %v14987_v29, -1e+30  ;;  %v14989_v49 = vld [vmem:[#allocation110_spill] sm:$0xff]  ;;  %v14991_v26 = vld [vmem:[#allocation93_spill] sm:$0xff]  ;;  %v10467_v29 = vmax.f32 %v4731_v32, %v10426_v0 }
 0x517   : > { %14986 = vst [vmem:[#allocation85_spill] sm:$0xff] %v10439_v28  ;;  %14988 = vst [vmem:[#allocation91_spill] sm:$0xff] %v10448_v61  ;;  %v10457_v3 = vsel %vm3378_vm9, %v14989_v49, -1e+30  ;;  %v10464_v63 = vsel %vm3377_vm8, %v14991_v26, -1e+30 }
 0x518   : > { %14990 = vst [vmem:[#allocation110_spill] sm:$0xff] %v10457_v3  ;;  %14992 = vst [vmem:[#allocation93_spill] sm:$0xff] %v10464_v63  ;;  %v14993_v6 = vld [vmem:[#allocation100_spill] sm:$0xff]  ;;  %v14995_v19 = vld [vmem:[#allocation99_spill] sm:$0xff]  ;;  %v4530_v49 = vmax.f32 %v14999_v41, %v10457_v3  ;;  %v15006_v41 = vmax.f32 %v10083_v46, %v10052_v58  ;;  %v15013_v46 = vmax.f32 %v10182_v47, %v10220_v5  ;;  %v3350_v3 = vadd.s32 1792, %v9531_v22 }
 0x519   : > { %v10472_v42 = vsel %vm3376_vm7, %v14993_v6, -1e+30  ;;  %v10481_v55 = vsel %vm3377_vm8, %v14995_v19, -1e+30  ;;  %v14997_v26 = vld [vmem:[#allocation102_spill] sm:$0xff]  ;;  %v15000_v23 = vld [vmem:[#allocation112_spill] sm:$0xff] }
 0x51a   : > { %14994 = vst [vmem:[#allocation100_spill] sm:$0xff] %v10472_v42  ;;  %14996 = vst [vmem:[#allocation99_spill] sm:$0xff] %v10481_v55  ;;  %v10486_v32 = vsel %vm3374_vm5, %v14997_v26, -1e+30  ;;  %v10499_v19 = vsel %vm3378_vm9, %v15000_v23, -1e+30  ;;  %v10504_v35 = vmax.f32 %v4748_v16, %v10472_v42 }
 0x51b   : > { %14998 = vst [vmem:[#allocation102_spill] sm:$0xff] %v10486_v32  ;;  %15001 = vst [vmem:[#allocation112_spill] sm:$0xff] %v10499_v19  ;;  %v15002_v6 = vld [vmem:[#allocation111_spill] sm:$0xff]  ;;  %v15004_v21 = vld [vmem:[#allocation118_spill] sm:$0xff]  ;;  %v4764_v26 = vmax.f32 %v15006_v41, %v10486_v32  ;;  %v4547_v41 = vmax.f32 %v15013_v46, %v10499_v19 }
 0x51c   : > { %v10509_v0 = vsel %vm3379_vm10, %v15002_v6, -1e+30  ;;  %v10514_v14 = vsel %vm3378_vm9, %v15004_v21, -1e+30  ;;  %v15007_v16 = vld [vmem:[#allocation101_spill] sm:$0xff]  ;;  %v3348_v6 = vadd.s32 1536, %v9531_v22 }
 0x51d   : > { %15003 = vst [vmem:[#allocation111_spill] sm:$0xff] %v10509_v0  ;;  %15005 = vst [vmem:[#allocation118_spill] sm:$0xff] %v10514_v14  ;;  %v10525_v42 = vsel %vm3377_vm8, %v15007_v16, -1e+30  ;;  %v15009_v54 = vld [vmem:[#allocation103_spill] sm:$0xff]  ;;  %v15011_v2 = vld [vmem:[#allocation104_spill] sm:$0xff]  ;;  %v4531_v32 = vmax.f32 %v4530_v49, %v10509_v0 }
 0x51e   : > { %15008 = vst [vmem:[#allocation101_spill] sm:$0xff] %v10525_v42  ;;  %v10531_v21 = vsel %vm3375_vm6, %v15009_v54, -1e+30  ;;  %v10536_v23 = vsel %vm3374_vm5, %v15011_v2, -1e+30  ;;  %v3349_v16 = vadd.s32 1664, %v9531_v22  ;;  %v15016_v54 = vmax.f32 %v10190_v36, %v10204_v38 }
 0x51f   : > { %15010 = vst [vmem:[#allocation103_spill] sm:$0xff] %v10531_v21  ;;  %15012 = vst [vmem:[#allocation104_spill] sm:$0xff] %v10536_v23  ;;  %v15014_v58 = vld [vmem:[#allocation114_spill] sm:$0xff]  ;;  %v15017_v46 = vld [vmem:[#allocation113_spill] sm:$0xff] }
 0x520   : > { %v10547_v20 = vsel %vm3379_vm10, %v15014_v58, -1e+30  ;;  %v4564_v2 = vmax.f32 %v15016_v54, %v10514_v14  ;;  %v10559_v19 = vsel %vm3380_vm11, %v15017_v46, -1e+30  ;;  %v15019_v49 = vld [vmem:[#allocation119_spill] sm:$0xff]  ;;  %v15021_v0 = vld [vmem:[#allocation120_spill] sm:$0xff]  ;;  %v4765_v54 = vmax.f32 %v4764_v26, %v10531_v21 }
 0x521   : > { %15015 = vst [vmem:[#allocation114_spill] sm:$0xff] %v10547_v20  ;;  %15018 = vst [vmem:[#allocation113_spill] sm:$0xff] %v10559_v19  ;;  %v10564_v58 = vsel %vm3379_vm10, %v15019_v49, -1e+30  ;;  %v10569_v36 = vsel %vm3378_vm9, %v15021_v0, -1e+30  ;;  %v10583_v49 = vadd.s32 %v9543_v62, %v3348_v6  ;;  %v4548_v26 = vmax.f32 %v4547_v41, %v10547_v20 }
 0x522   : > { %15020 = vst [vmem:[#allocation119_spill] sm:$0xff] %v10564_v58  ;;  %15022 = vst [vmem:[#allocation120_spill] sm:$0xff] %v10569_v36  ;;  %v15023_v14 = vld [vmem:[#allocation106_spill] sm:$0xff]  ;;  %v15025_v38 = vld [vmem:[#allocation105_spill] sm:$0xff]  ;;  %v10597_v45 = vadd.s32 %v9543_v62, %v3349_v16  ;;  %v15033_v41 = vmax.f32 %v10193_v24, %v10209_v34  ;;  %v15038_v24 = vmax.f32 %v10118_v8, %v10101_v48 }
 0x523   : > { %v10575_v47 = vsel %vm3375_vm6, %v15023_v14, -1e+30  ;;  %v10580_v46 = vsel %vm3376_vm7, %v15025_v38, -1e+30  ;;  %v15027_v5 = vld [vmem:[#allocation107_spill] sm:$0xff]  ;;  %v4532_v38 = vmax.f32 %v4531_v32, %v10559_v19  ;;  %v15031_v12 = vld [vmem:[#allocation116_spill] sm:$0xff] }
 0x524   : > { %15024 = vst [vmem:[#allocation106_spill] sm:$0xff] %v10575_v47  ;;  %15026 = vst [vmem:[#allocation105_spill] sm:$0xff] %v10580_v46  ;;  %v10588_v0 = vsel %vm3377_vm8, %v15027_v5, -1e+30  ;;  %v15029_v21 = vld [vmem:[#allocation115_spill] sm:$0xff]  ;;  %v4565_v5 = vmax.f32 %v4564_v2, %v10564_v58  ;;  %v4581_v20 = vmax.f32 %v15033_v41, %v10569_v36  ;;  %v15034_v4 = vld [vmem:[#allocation122_spill] sm:$0xff]  ;;  %v10628_v41 = vmax.f32 %v15038_v24, %v10536_v23 }
 0x525   : > { %15028 = vst [vmem:[#allocation107_spill] sm:$0xff] %v10588_v0  ;;  %v10594_v14 = vsel %vm3381_vm12, %v15029_v21, -1e+30  ;;  %v10603_v6 = vsel %vm3380_vm11, %v15031_v12, -1e+30  ;;  %v15036_v16 = vld [vmem:[#allocation121_spill] sm:$0xff]  ;;  %v10621_v12 = vadd.s32 %v9543_v62, %v3350_v3 }
 0x526   : > { %15030 = vst [vmem:[#allocation115_spill] sm:$0xff] %v10594_v14  ;;  %15032 = vst [vmem:[#allocation116_spill] sm:$0xff] %v10603_v6  ;;  %v10613_v21 = vsel %vm3379_vm10, %v15034_v4, -1e+30  ;;  %v10618_v32 = vsel %vm3380_vm11, %v15036_v16, -1e+30 }
 0x527   : > { %15035 = vst [vmem:[#allocation122_spill] sm:$0xff] %v10613_v21  ;;  %15037 = vst [vmem:[#allocation121_spill] sm:$0xff] %v10618_v32  ;;  %v3351_v2 = vadd.s32 1920, %v9531_v22  ;;  %v15039_v19 = vld [vmem:[#allocation108_spill] sm:$0xff]  ;;  %v15041_v58 = vld [vmem:[#allocation109_spill] sm:$0xff]  ;;  %vm3382_vm13 = vcmp.lt.s32.totalorder %v10583_v49, 30000  ;;  %v4549_v22 = vmax.f32 %v4548_v26, %v10603_v6  ;;  %v4566_v48 = vmax.f32 %v4565_v5, %v10618_v32 }
 0x528   : > { %v10633_v4 = vsel %vm3376_vm7, %v15039_v19, -1e+30  ;;  %v10638_v16 = vsel %vm3377_vm8, %v15041_v58, -1e+30  ;;  %v15043_v3 = vld [vmem:[#allocation117_spill] sm:$0xff]  ;;  %v15045_v24 = vld [vmem:[#allocation126_spill] sm:$0xff]  ;;  %v4533_v19 = vmax.f32 %v4532_v38, %v10594_v14  ;;  %v4582_v58 = vmax.f32 %v4581_v20, %v10613_v21 }
 0x529   : > { %15040 = vst [vmem:[#allocation108_spill] sm:$0xff] %v10633_v4  ;;  %15042 = vst [vmem:[#allocation109_spill] sm:$0xff] %v10638_v16  ;;  %v10645_v8 = vsel %vm3381_vm12, %v15043_v3, -1e+30  ;;  %v10650_v23 = vsel %vm3378_vm9, %v15045_v24, -1e+30  ;;  %v10673_v20 = vadd.s32 %v9543_v62, %v3351_v2  ;;  %v10676_v5 = vmax.f32 %v4765_v54, %v10580_v46 }
 0x52a   : > { %15044 = vst [vmem:[#allocation117_spill] sm:$0xff] %v10645_v8  ;;  %15046 = vst [vmem:[#allocation126_spill] sm:$0xff] %v10650_v23  ;;  %vm3383_vm14 = vcmp.lt.s32.totalorder %v10597_v45, 30000  ;;  %v15047_v36 = vld [vmem:[#allocation123_spill] sm:$0xff]  ;;  %v15049_v3 = vld [vmem:[#allocation124_spill] sm:$0xff]  ;;  %v3127_v38 = vpop.f32.mrb[96].mxu0  ;;  %v4550_v62 = vmax.f32 %v4549_v22, %v10645_v8 }
 0x52b   : > { %v10659_v26 = vsel %vm3381_vm12, %v15047_v36, -1e+30  ;;  %v10664_v6 = vsel %vm3380_vm11, %v15049_v3, -1e+30  ;;  %v15051_v24 = vld [vmem:[#allocation125_spill] sm:$0xff]  ;;  %vm3384_vm15 = vcmp.lt.s32.totalorder %v10621_v12, 30000  ;;  %v15053_v36 = vmax.f32 %v10212_v51, %v10225_v7 }
 0x52c   : > { %15048 = vst [vmem:[#allocation123_spill] sm:$0xff] %v10659_v26  ;;  %15050 = vst [vmem:[#allocation124_spill] sm:$0xff] %v10664_v6  ;;  %v10669_v34 = vsel %vm3381_vm12, %v15051_v24, -1e+30  ;;  %v15054_v14 = vld [vmem:[#allocation127_spill] sm:$0xff]  ;;  %v3129_v21 = vpop.f32.mrb[97].mxu0 }
 0x52d   : > { %15052 = vst [vmem:[#allocation125_spill] sm:$0xff] %v10669_v34  ;;  %v4598_v3 = vmax.f32 %v15053_v36, %v10650_v23  ;;  %v10685_v32 = vsel %vm3379_vm10, %v15054_v14, -1e+30  ;;  %v10689_v24 = vsel %vm3382_vm13, %v3127_v38, -1e+30  ;;  %v15057_v2 = vld [vmem:[#allocation128_spill] sm:$0xff]  ;;  %v4567_v23 = vmax.f32 %v4566_v48, %v10659_v26 }
 0x52e   : > { %15055 = vst [vmem:[#allocation127_spill] sm:$0xff] %v10685_v32  ;;  %15056 = vst [vmem:[#allocation224_spill] sm:$0xff] %v10689_v24  ;;  %v10695_v54 = vsel %vm3378_vm9, %v15057_v2, -1e+30  ;;  %v4534_v51 = vmax.f32 %v4533_v19, %v10689_v24  ;;  %v10700_v36 = vsel %vm3383_vm14, %v3129_v21, -1e+30  ;;  %v4583_v38 = vmax.f32 %v4582_v58, %v10664_v6 }
 0x52f   : > { %15058 = vst [vmem:[#allocation128_spill] sm:$0xff] %v10695_v54  ;;  %15059 = vst [vmem:[#allocation225_spill] sm:$0xff] %v10700_v36  ;;  %v3240_v14 = vpop.f32.mrb[96].mxu1  ;;  %v3131_v46 = vpop.f32.mrb[98].mxu0  ;;  %v15062_v19 = vld [vmem:[#allocation134_spill] sm:$0xff]  ;;  %vm3385_vm0 = vcmp.lt.s32.totalorder %v10673_v20, 30000 }
 0x530   : > { %v10706_v22 = vsel %vm3384_vm15, %v3240_v14, -1e+30  ;;  %v10710_v2 = vsel %vm3382_vm13, %v3131_v46, -1e+30  ;;  %v3242_v8 = vpop.f32.mrb[97].mxu1  ;;  %v4535_v24 = vmax.f32 %v4534_v51, %v10700_v36  ;;  %v3133_v58 = vpop.f32.mrb[99].mxu0  ;;  %v4599_v14 = vmax.f32 %v4598_v3, %v10685_v32 }
 0x531   : > { %15060 = vst [vmem:[#allocation226_spill] sm:$0xff] %v10706_v22  ;;  %15061 = vst [vmem:[#allocation227_spill] sm:$0xff] %v10710_v2  ;;  %v10715_v21 = vsel %vm3378_vm9, %v15062_v19, -1e+30  ;;  %v4551_v48 = vmax.f32 %v4550_v62, %v10710_v2  ;;  %v3244_v26 = vpop.f32.mrb[98].mxu1  ;;  %v15064_v46 = vmax.f32 %v10228_v25, %v10240_v50  ;;  %v15065_v7 = vld [vmem:[#allocation130_spill] sm:$0xff]  ;;  %v15074_v50 = vmax.f32 %v10398_v11, %v10362_v59 }
 0x532   : > { %15063 = vst [vmem:[#allocation134_spill] sm:$0xff] %v10715_v21  ;;  %v10728_v19 = vsel %vm3379_vm10, %v15065_v7, -1e+30  ;;  %v10732_v51 = vsel %vm3383_vm14, %v3133_v58, -1e+30  ;;  %v3246_v62 = vpop.f32.mrb[99].mxu1 }
 0x533   : > { %v4615_v6 = vmax.f32 %v15064_v46, %v10695_v54  ;;  %15066 = vst [vmem:[#allocation130_spill] sm:$0xff] %v10728_v19  ;;  %15067 = vst [vmem:[#allocation228_spill] sm:$0xff] %v10732_v51  ;;  %v15068_v36 = vld [vmem:[#allocation129_spill] sm:$0xff]  ;;  %v15070_v3 = vld [vmem:[#allocation136_spill] sm:$0xff]  ;;  %v4536_v46 = vmax.f32 %v4535_v24, %v10706_v22  ;;  %v4552_v7 = vmax.f32 %v4551_v48, %v10732_v51  ;;  %v10757_v32 = vsel %vm3385_vm0, %v3242_v8, -1e+30 }
 0x534   : > { %v10737_v2 = vsel %vm3380_vm11, %v15068_v36, -1e+30  ;;  %v10742_v25 = vsel %vm3378_vm9, %v15070_v3, -1e+30  ;;  %v15072_v54 = vld [vmem:[#allocation131_spill] sm:$0xff]  ;;  %v4632_v36 = vmax.f32 %v15074_v50, %v10715_v21  ;;  %15075 = vst [vmem:[#allocation229_spill] sm:$0xff] %v10757_v32 }
 0x535   : > { %15069 = vst [vmem:[#allocation129_spill] sm:$0xff] %v10737_v2  ;;  %15071 = vst [vmem:[#allocation136_spill] sm:$0xff] %v10742_v25  ;;  %v10749_v58 = vsel %vm3381_vm12, %v15072_v54, -1e+30  ;;  %v10761_v3 = vsel %vm3384_vm15, %v3244_v26, -1e+30  ;;  %v4537_v8 = vmax.f32 %v4536_v46, %v10757_v32  ;;  %v4616_v21 = vmax.f32 %v4615_v6, %v10728_v19 }
 0x536   : > { %15073 = vst [vmem:[#allocation131_spill] sm:$0xff] %v10749_v58  ;;  %15076 = vst [vmem:[#allocation230_spill] sm:$0xff] %v10761_v3  ;;  %v15077_v24 = vld [vmem:[#allocation132_spill] sm:$0xff]  ;;  %v15079_v54 = vld [vmem:[#allocation135_spill] sm:$0xff]  ;;  %v4553_v50 = vmax.f32 %v4552_v7, %v10761_v3  ;;  %v3137_v11 = vpop.f32.mrb[100].mxu0  ;;  %v15081_v26 = vmax.f32 %v10413_v43, %v10418_v53 }
 0x537   : > { %v10766_v48 = vsel %vm3380_vm11, %v15077_v24, -1e+30  ;;  %v10771_v22 = vsel %vm3379_vm10, %v15079_v54, -1e+30  ;;  %v10782_v24 = vsel %vm3385_vm0, %v3246_v62, -1e+30  ;;  %4538 = vmax.xlane.f32.xlu1 %v4537_v8 }
 0x538   : > { %15078 = vst [vmem:[#allocation132_spill] sm:$0xff] %v10766_v48  ;;  %15080 = vst [vmem:[#allocation135_spill] sm:$0xff] %v10771_v22  ;;  %v4649_v59 = vmax.f32 %v15081_v26, %v10742_v25  ;;  %v10786_v54 = vsel %vm3382_vm13, %v3137_v11, -1e+30  ;;  %v3139_v51 = vpop.f32.mrb[101].mxu0  ;;  %v15084_v7 = vld [vmem:[#allocation138_spill] sm:$0xff]  ;;  %v4554_v25 = vmax.f32 %v4553_v50, %v10782_v24  ;;  %v4584_v11 = vmax.f32 %v4583_v38, %v10669_v34 }
 0x539   : > { %15082 = vst [vmem:[#allocation231_spill] sm:$0xff] %v10782_v24  ;;  %15083 = vst [vmem:[#allocation232_spill] sm:$0xff] %v10786_v54  ;;  %v10791_v46 = vsel %vm3379_vm10, %v15084_v7, -1e+30  ;;  %v4568_v6 = vmax.f32 %v4567_v23, %v10786_v54  ;;  %v10796_v43 = vsel %vm3383_vm14, %v3139_v51, -1e+30  ;;  %v4633_v53 = vmax.f32 %v4632_v36, %v10771_v22 }
 0x53a   : > { %15085 = vst [vmem:[#allocation138_spill] sm:$0xff] %v10791_v46  ;;  %15086 = vst [vmem:[#allocation233_spill] sm:$0xff] %v10796_v43  ;;  %v3250_v26 = vpop.f32.mrb[100].mxu1  ;;  %v3141_v62 = vpop.f32.mrb[102].mxu0  ;;  %v4600_v51 = vmax.f32 %v4599_v14, %v10737_v2  ;;  %v15089_v32 = vld [vmem:[#allocation133_spill] sm:$0xff]  ;;  %4555 = vmax.xlane.f32.xlu0 %v4554_v25  ;;  %v4650_v24 = vmax.f32 %v4649_v59, %v10791_v46  ;;  %v15094_v54 = vld [vmem:[#allocation139_spill] sm:$0xff] }
 0x53b   : > { %v10803_v19 = vsel %vm3384_vm15, %v3250_v26, -1e+30  ;;  %v3252_v7 = vpop.f32.mrb[101].mxu1  ;;  %v10807_v23 = vsel %vm3382_vm13, %v3141_v62, -1e+30  ;;  %v15091_v50 = vld [vmem:[#allocation137_spill] sm:$0xff]  ;;  %v4569_v36 = vmax.f32 %v4568_v6, %v10796_v43  ;;  %v4617_v62 = vmax.f32 %v4616_v21, %v10766_v48 }
 0x53c   : > { %15087 = vst [vmem:[#allocation234_spill] sm:$0xff] %v10803_v19  ;;  %15088 = vst [vmem:[#allocation235_spill] sm:$0xff] %v10807_v23  ;;  %v10813_v8 = vsel %vm3381_vm12, %v15089_v32, -1e+30  ;;  %v10818_v38 = vsel %vm3380_vm11, %v15091_v50, -1e+30  ;;  %v4585_v14 = vmax.f32 %v4584_v11, %v10807_v23  ;;  %v4601_v43 = vmax.f32 %v4600_v51, %v10749_v58 }
 0x53d   : > { %15090 = vst [vmem:[#allocation133_spill] sm:$0xff] %v10813_v8  ;;  %15092 = vst [vmem:[#allocation137_spill] sm:$0xff] %v10818_v38  ;;  %v3143_v26 = vpop.f32.mrb[103].mxu0  ;;  %v3254_v22 = vpop.f32.mrb[102].mxu1  ;;  %v10831_v50 = vsel %vm3381_vm12, %v15094_v54, -1e+30  ;;  %v4570_v11 = vmax.f32 %v4569_v36, %v10803_v19 }
 0x53e   : > { %v10826_v32 = vsel %vm3383_vm14, %v3143_v26, -1e+30  ;;  %v3256_v3 = vpop.f32.mrb[103].mxu1  ;;  %15095 = vst [vmem:[#allocation139_spill] sm:$0xff] %v10831_v50  ;;  %v15096_v6 = vld [vmem:[#allocation140_spill] sm:$0xff]  ;;  %v15098_v21 = vld [vmem:[#allocation142_spill] sm:$0xff]  ;;  %v4634_v26 = vmax.f32 %v4633_v53, %v10818_v38 }
 0x53f   : > { %15093 = vst [vmem:[#allocation236_spill] sm:$0xff] %v10826_v32  ;;  %v10836_v25 = vsel %vm3380_vm11, %v15096_v6, -1e+30  ;;  %v10841_v59 = vsel %vm3378_vm9, %v15098_v21, -1e+30  ;;  %v15100_v46 = vld [vmem:[#allocation141_spill] sm:$0xff]  ;;  %v4586_v6 = vmax.f32 %v4585_v14, %v10826_v32 }
 0x540   : > { %15097 = vst [vmem:[#allocation140_spill] sm:$0xff] %v10836_v25  ;;  %15099 = vst [vmem:[#allocation142_spill] sm:$0xff] %v10841_v59  ;;  %v10848_v48 = vsel %vm3381_vm12, %v15100_v46, -1e+30  ;;  %v10852_v54 = vsel %vm3385_vm0, %v3252_v7, -1e+30  ;;  %v10867_v38 = vmax.f32 %v4650_v24, %v10836_v25  ;;  %v15105_v7 = vmax.f32 %v10421_v60, %v10431_v15 }
 0x541   : > { %15101 = vst [vmem:[#allocation141_spill] sm:$0xff] %v10848_v48  ;;  %v15102_v23 = vld [vmem:[#allocation144_spill] sm:$0xff]  ;;  %v10863_v53 = vsel %vm3384_vm15, %v3254_v22, -1e+30  ;;  %v3147_v36 = vpop.f32.mrb[104].mxu0  ;;  %v4571_v46 = vmax.f32 %v4570_v11, %v10852_v54  ;;  %v4618_v22 = vmax.f32 %v4617_v62, %v10813_v8  ;;  %v15107_v32 = vld [vmem:[#allocation143_spill] sm:$0xff]  ;;  %v15109_v62 = vmax.f32 %v10434_v44, %v10439_v28 }
 0x542   : > { %v10859_v21 = vsel %vm3378_vm9, %v15102_v23, -1e+30  ;;  %15104 = vst [vmem:[#allocation237_spill] sm:$0xff] %v10863_v53  ;;  %v4666_v51 = vmax.f32 %v15105_v7, %v10841_v59  ;;  %v4587_v14 = vmax.f32 %v4586_v6, %v10863_v53  ;;  %v10876_v23 = vsel %vm3382_vm13, %v3147_v36, -1e+30  ;;  %v3149_v19 = vpop.f32.mrb[105].mxu0 }
 0x543   : > { %15103 = vst [vmem:[#allocation144_spill] sm:$0xff] %v10859_v21  ;;  %15106 = vst [vmem:[#allocation238_spill] sm:$0xff] %v10876_v23  ;;  %v10882_v11 = vsel %vm3379_vm10, %v15107_v32, -1e+30  ;;  %v4602_v24 = vmax.f32 %v4601_v43, %v10876_v23  ;;  %v10887_v60 = vsel %vm3383_vm14, %v3149_v19, -1e+30  ;;  %4572 = vmax.xlane.f32.xlu0 %v4571_v46  ;;  %v4635_v36 = vmax.f32 %v4634_v26, %v10831_v50 }
 0x544   : > { %15108 = vst [vmem:[#allocation143_spill] sm:$0xff] %v10882_v11  ;;  %v3260_v7 = vpop.f32.mrb[104].mxu1  ;;  %v3151_v6 = vpop.f32.mrb[106].mxu0  ;;  %v4683_v59 = vmax.f32 %v15109_v62, %v10859_v21  ;;  %v15112_v19 = vld [vmem:[#allocation146_spill] sm:$0xff]  ;;  %v10909_v26 = vsel %vm3385_vm0, %v3256_v3, -1e+30  ;;  %v4652_v28 = vmax.f32 %v10867_v38, %v10848_v48 }
 0x545   : > { %v10896_v32 = vsel %vm3384_vm15, %v3260_v7, -1e+30  ;;  %v3262_v15 = vpop.f32.mrb[105].mxu1  ;;  %v10900_v43 = vsel %vm3382_vm13, %v3151_v6, -1e+30  ;;  %15114 = vst [vmem:[#allocation241_spill] sm:$0xff] %v10909_v26  ;;  %v4603_v44 = vmax.f32 %v4602_v24, %v10887_v60  ;;  %v4667_v6 = vmax.f32 %v4666_v51, %v10882_v11 }
 0x546   : > { %15110 = vst [vmem:[#allocation239_spill] sm:$0xff] %v10896_v32  ;;  %15111 = vst [vmem:[#allocation240_spill] sm:$0xff] %v10900_v43  ;;  %v10905_v46 = vsel %vm3379_vm10, %v15112_v19, -1e+30  ;;  %v4619_v62 = vmax.f32 %v4618_v22, %v10900_v43  ;;  %v3153_v7 = vpop.f32.mrb[107].mxu0  ;;  %v3264_v21 = vpop.f32.mrb[106].mxu1  ;;  %v4588_v25 = vmax.f32 %v4587_v14, %v10909_v26 }
 0x547   : > { %15113 = vst [vmem:[#allocation146_spill] sm:$0xff] %v10905_v46  ;;  %v10918_v50 = vsel %vm3383_vm14, %v3153_v7, -1e+30  ;;  %v3266_v19 = vpop.f32.mrb[107].mxu1  ;;  %v15116_v3 = vld [vmem:[#allocation145_spill] sm:$0xff]  ;;  %v15118_v22 = vld [vmem:[#allocation150_spill] sm:$0xff]  ;;  %v4604_v38 = vmax.f32 %v4603_v44, %v10896_v32  ;;  %v4684_v7 = vmax.f32 %v4683_v59, %v10905_v46 }
 0x548   : > { %15115 = vst [vmem:[#allocation242_spill] sm:$0xff] %v10918_v50  ;;  %v10924_v24 = vsel %vm3380_vm11, %v15116_v3, -1e+30  ;;  %v10929_v43 = vsel %vm3378_vm9, %v15118_v22, -1e+30  ;;  %v4620_v51 = vmax.f32 %v4619_v62, %v10918_v50  ;;  %v15120_v11 = vld [vmem:[#allocation147_spill] sm:$0xff]  ;;  %4589 = vmax.xlane.f32.xlu1 %v4588_v25  ;;  %v15128_v25 = vmax.f32 %v10442_v40, %v10448_v61 }
 0x549   : > { %15117 = vst [vmem:[#allocation145_spill] sm:$0xff] %v10924_v24  ;;  %15119 = vst [vmem:[#allocation150_spill] sm:$0xff] %v10929_v43  ;;  %v10937_v14 = vsel %vm3381_vm12, %v15120_v11, -1e+30  ;;  %v10941_v3 = vsel %vm3385_vm0, %v3262_v15, -1e+30  ;;  %v4668_v50 = vmax.f32 %v4667_v6, %v10924_v24 }
 0x54a   : > { %15121 = vst [vmem:[#allocation147_spill] sm:$0xff] %v10937_v14  ;;  %15122 = vst [vmem:[#allocation243_spill] sm:$0xff] %v10941_v3  ;;  %v10945_v48 = vsel %vm3384_vm15, %v3264_v21, -1e+30  ;;  %v15124_v22 = vld [vmem:[#allocation148_spill] sm:$0xff]  ;;  %v15126_v59 = vld [vmem:[#allocation151_spill] sm:$0xff]  ;;  %v4605_v15 = vmax.f32 %v4604_v38, %v10941_v3  ;;  %v4700_v21 = vmax.f32 %v15128_v25, %v10929_v43 }
 0x54b   : > { %15123 = vst [vmem:[#allocation244_spill] sm:$0xff] %v10945_v48  ;;  %v10950_v44 = vsel %vm3380_vm11, %v15124_v22, -1e+30  ;;  %v10955_v62 = vsel %vm3379_vm10, %v15126_v59, -1e+30  ;;  %v4621_v11 = vmax.f32 %v4620_v51, %v10945_v48  ;;  %v3157_v46 = vpop.f32.mrb[108].mxu0 }
 0x54c   : > { %15125 = vst [vmem:[#allocation148_spill] sm:$0xff] %v10950_v44  ;;  %15127 = vst [vmem:[#allocation151_spill] sm:$0xff] %v10955_v62  ;;  %v10966_v22 = vsel %vm3385_vm0, %v3266_v19, -1e+30  ;;  %v10970_v59 = vsel %vm3382_vm13, %v3157_v46, -1e+30  ;;  %4606 = vmax.xlane.f32.xlu0 %v4605_v15  ;;  %v4782_v46 = vmax.f32 %v10628_v41, %v10575_v47  ;;  %v4685_v61 = vmax.f32 %v4684_v7, %v10950_v44 }
 0x54d   : > { %15129 = vst [vmem:[#allocation245_spill] sm:$0xff] %v10966_v22  ;;  %15130 = vst [vmem:[#allocation246_spill] sm:$0xff] %v10970_v59  ;;  %v3159_v8 = vpop.f32.mrb[109].mxu0  ;;  %v15131_v51 = vld [vmem:[#allocation152_spill] sm:$0xff]  ;;  %v4636_v6 = vmax.f32 %v4635_v36, %v10970_v59  ;;  %v3270_v25 = vpop.f32.mrb[108].mxu1  ;;  %v4622_v43 = vmax.f32 %v4621_v11, %v10966_v22  ;;  %v15136_v59 = vld [vmem:[#allocation149_spill] sm:$0xff]  ;;  %v4669_v47 = vmax.f32 %v4668_v50, %v10937_v14 }
 0x54e   : > { %v10975_v38 = vsel %vm3378_vm9, %v15131_v51, -1e+30  ;;  %v10980_v40 = vsel %vm3383_vm14, %v3159_v8, -1e+30  ;;  %v3161_v19 = vpop.f32.mrb[110].mxu0  ;;  %v3272_v24 = vpop.f32.mrb[109].mxu1  ;;  %v4701_v44 = vmax.f32 %v4700_v21, %v10955_v62 }
 0x54f   : > { %15132 = vst [vmem:[#allocation152_spill] sm:$0xff] %v10975_v38  ;;  %15133 = vst [vmem:[#allocation247_spill] sm:$0xff] %v10980_v40  ;;  %v10988_v51 = vsel %vm3384_vm15, %v3270_v25, -1e+30  ;;  %v10992_v36 = vsel %vm3382_vm13, %v3161_v19, -1e+30  ;;  %v4637_v11 = vmax.f32 %v4636_v6, %v10980_v40  ;;  %4623 = vmax.xlane.f32.xlu1 %v4622_v43 }
 0x550   : > { %15134 = vst [vmem:[#allocation248_spill] sm:$0xff] %v10988_v51  ;;  %15135 = vst [vmem:[#allocation249_spill] sm:$0xff] %v10992_v36  ;;  %v3163_v8 = vpop.f32.mrb[111].mxu0  ;;  %v10997_v15 = vsel %vm3381_vm12, %v15136_v59, -1e+30  ;;  %v4653_v41 = vmax.f32 %v4652_v28, %v10992_v36  ;;  %v3274_v25 = vpop.f32.mrb[110].mxu1  ;;  %v15139_v59 = vmax.f32 %v10451_v17, %v10464_v63 }
 0x551   : > { %15137 = vst [vmem:[#allocation149_spill] sm:$0xff] %v10997_v15  ;;  %v11003_v7 = vsel %vm3383_vm14, %v3163_v8, -1e+30  ;;  %v3276_v40 = vpop.f32.mrb[111].mxu1  ;;  %v15140_v28 = vld [vmem:[#allocation154_spill] sm:$0xff]  ;;  %v15142_v36 = vld [vmem:[#allocation153_spill] sm:$0xff]  ;;  %v4638_v50 = vmax.f32 %v4637_v11, %v10988_v51  ;;  %v4686_v19 = vmax.f32 %v4685_v61, %v10997_v15 }
 0x552   : > { %15138 = vst [vmem:[#allocation250_spill] sm:$0xff] %v11003_v7  ;;  %v4717_v6 = vmax.f32 %v15139_v59, %v10975_v38  ;;  %v11016_v8 = vsel %vm3379_vm10, %v15140_v28, -1e+30  ;;  %v11021_v43 = vsel %vm3380_vm11, %v15142_v36, -1e+30  ;;  %v4654_v21 = vmax.f32 %v4653_v41, %v11003_v7  ;;  %v15144_v62 = vld [vmem:[#allocation155_spill] sm:$0xff] }
 0x553   : > { %15141 = vst [vmem:[#allocation154_spill] sm:$0xff] %v11016_v8  ;;  %15143 = vst [vmem:[#allocation153_spill] sm:$0xff] %v11021_v43  ;;  %v11029_v17 = vsel %vm3381_vm12, %v15144_v62, -1e+30  ;;  %v11033_v59 = vsel %vm3385_vm0, %v3272_v24, -1e+30 }
 0x554   : > { %15145 = vst [vmem:[#allocation155_spill] sm:$0xff] %v11029_v17  ;;  %15146 = vst [vmem:[#allocation251_spill] sm:$0xff] %v11033_v59  ;;  %v11037_v28 = vsel %vm3384_vm15, %v3274_v25, -1e+30  ;;  %v15148_v36 = vld [vmem:[#allocation156_spill] sm:$0xff]  ;;  %v15150_v41 = vld [vmem:[#allocation158_spill] sm:$0xff]  ;;  %v4639_v24 = vmax.f32 %v4638_v50, %v11033_v59  ;;  %v4718_v63 = vmax.f32 %v4717_v6, %v11016_v8  ;;  %v4702_v25 = vmax.f32 %v4701_v44, %v11021_v43 }
 0x555   : > { %15147 = vst [vmem:[#allocation252_spill] sm:$0xff] %v11037_v28  ;;  %v11042_v11 = vsel %vm3380_vm11, %v15148_v36, -1e+30  ;;  %v11047_v61 = vsel %vm3378_vm9, %v15150_v41, -1e+30  ;;  %v4655_v62 = vmax.f32 %v4654_v21, %v11037_v28  ;;  %v3167_v38 = vpop.f32.mrb[112].mxu0  ;;  %v15156_v8 = vmax.f32 %v10467_v29, %v10481_v55 }
 0x556   : > { %15149 = vst [vmem:[#allocation156_spill] sm:$0xff] %v11042_v11  ;;  %15151 = vst [vmem:[#allocation158_spill] sm:$0xff] %v11047_v61  ;;  %v11055_v15 = vsel %vm3385_vm0, %v3276_v40, -1e+30  ;;  %v11059_v36 = vsel %vm3382_vm13, %v3167_v38, -1e+30  ;;  %4640 = vmax.xlane.f32.xlu0 %v4639_v24  ;;  %v4783_v38 = vmax.f32 %v4782_v46, %v10633_v4  ;;  %v4703_v4 = vmax.f32 %v4702_v25, %v11029_v17 }
 0x557   : > { %15152 = vst [vmem:[#allocation253_spill] sm:$0xff] %v11055_v15  ;;  %15153 = vst [vmem:[#allocation254_spill] sm:$0xff] %v11059_v36  ;;  %v3169_v14 = vpop.f32.mrb[113].mxu0  ;;  %v11064_v21 = vsel %vm3378_vm9, %v9571_v9, -1e+30  ;;  %v4670_v50 = vmax.f32 %v4669_v47, %v11059_v36  ;;  %v3280_v44 = vpop.f32.mrb[112].mxu1  ;;  %v4656_v41 = vmax.f32 %v4655_v62, %v11055_v15  ;;  %v4734_v43 = vmax.f32 %v15156_v8, %v11047_v61 }
 0x558   : > { %15154 = vst [vmem:[#allocation255_spill] sm:$0xff] %v11064_v21  ;;  %v11069_v6 = vsel %vm3383_vm14, %v3169_v14, -1e+30  ;;  %v3171_v40 = vpop.f32.mrb[114].mxu0  ;;  %v11079_v9 = vsel %vm3384_vm15, %v3280_v44, -1e+30 }
 0x559   : > { %15155 = vst [vmem:[#allocation256_spill] sm:$0xff] %v11069_v6  ;;  %15157 = vst [vmem:[#allocation257_spill] sm:$0xff] %v11079_v9  ;;  %v3282_v47 = vpop.f32.mrb[113].mxu1  ;;  %v11083_v14 = vsel %vm3382_vm13, %v3171_v40, -1e+30  ;;  %v3173_v24 = vpop.f32.mrb[115].mxu0  ;;  %v4671_v46 = vmax.f32 %v4670_v50, %v11069_v6  ;;  %4657 = vmax.xlane.f32.xlu1 %v4656_v41  ;;  %v4719_v40 = vmax.f32 %v4718_v63, %v11042_v11 }
 0x55a   : > { %15158 = vst [vmem:[#allocation258_spill] sm:$0xff] %v11083_v14  ;;  %v15159_v36 = vld [vmem:[#allocation159_spill] sm:$0xff]  ;;  %v4687_v29 = vmax.f32 %v4686_v19, %v11083_v14  ;;  %v11094_v8 = vsel %vm3383_vm14, %v3173_v24, -1e+30  ;;  %v3284_v44 = vpop.f32.mrb[114].mxu1  ;;  %v15162_v61 = vld [vmem:[#allocation157_spill] sm:$0xff] }
 0x55b   : > { %v11088_v62 = vsel %vm3379_vm10, %v15159_v36, -1e+30  ;;  %15161 = vst [vmem:[#allocation259_spill] sm:$0xff] %v11094_v8  ;;  %v11101_v55 = vsel %vm3381_vm12, %v15162_v61, -1e+30  ;;  %v15164_v36 = vmax.f32 %v10504_v35, %v10525_v42  ;;  %v3286_v50 = vpop.f32.mrb[115].mxu1  ;;  %v4672_v25 = vmax.f32 %v4671_v46, %v11079_v9 }
 0x55c   : > { %15160 = vst [vmem:[#allocation159_spill] sm:$0xff] %v11088_v62  ;;  %15163 = vst [vmem:[#allocation157_spill] sm:$0xff] %v11101_v55  ;;  %v15165_v14 = vld [vmem:[#allocation161_spill] sm:$0xff]  ;;  %v15167_v41 = vld [vmem:[#allocation160_spill] sm:$0xff]  ;;  %v4688_v61 = vmax.f32 %v4687_v29, %v11094_v8  ;;  %v4735_v11 = vmax.f32 %v4734_v43, %v11088_v62  ;;  %v11141_v43 = vsel %vm3378_vm9, %v9627_v18, -1e+30 }
 0x55d   : > { %v4751_v19 = vmax.f32 %v15164_v36, %v11064_v21  ;;  %v11110_v24 = vsel %vm3379_vm10, %v15165_v14, -1e+30  ;;  %v11115_v63 = vsel %vm3380_vm11, %v15167_v41, -1e+30  ;;  %v15169_v17 = vld [vmem:[#allocation162_spill] sm:$0xff]  ;;  %v15173_v41 = vld [vmem:[#allocation163_spill] sm:$0xff]  ;;  %v4720_v21 = vmax.f32 %v4719_v40, %v11101_v55 }
 0x55e   : > { %15166 = vst [vmem:[#allocation161_spill] sm:$0xff] %v11110_v24  ;;  %15168 = vst [vmem:[#allocation160_spill] sm:$0xff] %v11115_v63  ;;  %v11123_v35 = vsel %vm3381_vm12, %v15169_v17, -1e+30  ;;  %v11127_v14 = vsel %vm3385_vm0, %v3282_v47, -1e+30  ;;  %v4736_v55 = vmax.f32 %v4735_v11, %v11115_v63 }
 0x55f   : > { %15170 = vst [vmem:[#allocation162_spill] sm:$0xff] %v11123_v35  ;;  %15171 = vst [vmem:[#allocation260_spill] sm:$0xff] %v11127_v14  ;;  %v11131_v36 = vsel %vm3384_vm15, %v3284_v44, -1e+30  ;;  %v11136_v46 = vsel %vm3380_vm11, %v15173_v41, -1e+30  ;;  %v4673_v47 = vmax.f32 %v4672_v25, %v11127_v14  ;;  %v4752_v44 = vmax.f32 %v4751_v19, %v11110_v24 }
 0x560   : > { %15172 = vst [vmem:[#allocation261_spill] sm:$0xff] %v11131_v36  ;;  %15174 = vst [vmem:[#allocation163_spill] sm:$0xff] %v11136_v46  ;;  %v4689_v17 = vmax.f32 %v4688_v61, %v11131_v36  ;;  %v3177_v29 = vpop.f32.mrb[116].mxu0  ;;  %v11149_v42 = vsel %vm3385_vm0, %v3286_v50, -1e+30  ;;  %v15178_v18 = vld [vmem:[#allocation176_spill] sm:$0xff] }
 0x561   : > { %15175 = vst [vmem:[#allocation262_spill] sm:$0xff] %v11141_v43  ;;  %15176 = vst [vmem:[#allocation263_spill] sm:$0xff] %v11149_v42  ;;  %v11153_v41 = vsel %vm3382_vm13, %v3177_v29, -1e+30  ;;  %v3179_v62 = vpop.f32.mrb[117].mxu0  ;;  %v3290_v19 = vpop.f32.mrb[116].mxu1  ;;  %4674 = vmax.xlane.f32.xlu0 %v4673_v47  ;;  %v4784_v29 = vmax.f32 %v4783_v38, %v10638_v16  ;;  %v15183_v47 = vmax.f32 %v10676_v5, %v10588_v0 }
 0x562   : > { %15177 = vst [vmem:[#allocation264_spill] sm:$0xff] %v11153_v41  ;;  %v11158_v61 = vsel %vm3378_vm9, %v15178_v18, -1e+30  ;;  %v4704_v25 = vmax.f32 %v4703_v4, %v11153_v41  ;;  %v11163_v40 = vsel %vm3383_vm14, %v3179_v62, -1e+30  ;;  %v3181_v50 = vpop.f32.mrb[118].mxu0  ;;  %v4690_v24 = vmax.f32 %v4689_v17, %v11149_v42 }
 0x563   : > { %15179 = vst [vmem:[#allocation176_spill] sm:$0xff] %v11158_v61  ;;  %15180 = vst [vmem:[#allocation265_spill] sm:$0xff] %v11163_v40  ;;  %v11170_v36 = vsel %vm3384_vm15, %v3290_v19, -1e+30  ;;  %v3292_v18 = vpop.f32.mrb[117].mxu1  ;;  %v3183_v62 = vpop.f32.mrb[119].mxu0  ;;  %v4768_v8 = vmax.f32 %v15183_v47, %v11141_v43  ;;  %v4753_v16 = vmax.f32 %v4752_v44, %v11136_v46 }
 0x564   : > { %15181 = vst [vmem:[#allocation266_spill] sm:$0xff] %v11170_v36  ;;  %v11174_v4 = vsel %vm3382_vm13, %v3181_v50, -1e+30  ;;  %v4705_v17 = vmax.f32 %v4704_v25, %v11163_v40  ;;  %v11184_v11 = vsel %vm3383_vm14, %v3183_v62, -1e+30  ;;  %v3294_v19 = vpop.f32.mrb[118].mxu1  ;;  %4691 = vmax.xlane.f32.xlu1 %v4690_v24 }
 0x565   : > { %15182 = vst [vmem:[#allocation267_spill] sm:$0xff] %v11174_v4  ;;  %v4721_v38 = vmax.f32 %v4720_v21, %v11174_v4  ;;  %15184 = vst [vmem:[#allocation268_spill] sm:$0xff] %v11184_v11  ;;  %v15185_v50 = vld [vmem:[#allocation166_spill] sm:$0xff]  ;;  %v15187_v42 = vld [vmem:[#allocation173_spill] sm:$0xff]  ;;  %v3296_v25 = vpop.f32.mrb[119].mxu1  ;;  %v4785_v21 = vmax.f32 %v4784_v29, %v11158_v61  ;;  %v3187_v61 = vpop.f32.mrb[120].mxu0 }
 0x566   : > { %v11190_v63 = vsel %vm3381_vm12, %v15185_v50, -1e+30  ;;  %v11195_v5 = vsel %vm3379_vm10, %v15187_v42, -1e+30  ;;  %v15189_v47 = vld [vmem:[#allocation177_spill] sm:$0xff]  ;;  %v4706_v24 = vmax.f32 %v4705_v17, %v11170_v36  ;;  %v4737_v50 = vmax.f32 %v4736_v55, %v11123_v35  ;;  %v15191_v46 = vld [vmem:[#allocation180_spill] sm:$0xff] }
 0x567   : > { %15186 = vst [vmem:[#allocation166_spill] sm:$0xff] %v11190_v63  ;;  %15188 = vst [vmem:[#allocation173_spill] sm:$0xff] %v11195_v5  ;;  %v11201_v62 = vsel %vm3380_vm11, %v15189_v47, -1e+30  ;;  %v4722_v44 = vmax.f32 %v4721_v38, %v11184_v11  ;;  %v11209_v43 = vsel %vm3379_vm10, %v15191_v46, -1e+30  ;;  %v4769_v47 = vmax.f32 %v4768_v8, %v11195_v5 }
 0x568   : > { %15190 = vst [vmem:[#allocation177_spill] sm:$0xff] %v11201_v62  ;;  %15192 = vst [vmem:[#allocation180_spill] sm:$0xff] %v11209_v43  ;;  %v11213_v42 = vsel %vm3385_vm0, %v3292_v18, -1e+30  ;;  %v11217_v29 = vsel %vm3384_vm15, %v3294_v19, -1e+30  ;;  %v4754_v0 = vmax.f32 %v4753_v16, %v11190_v63  ;;  %v4786_v5 = vmax.f32 %v4785_v21, %v11209_v43 }
 0x569   : > { %15193 = vst [vmem:[#allocation269_spill] sm:$0xff] %v11213_v42  ;;  %15194 = vst [vmem:[#allocation270_spill] sm:$0xff] %v11217_v29  ;;  %v15195_v17 = vld [vmem:[#allocation183_spill] sm:$0xff]  ;;  %v4723_v55 = vmax.f32 %v4722_v44, %v11217_v29  ;;  %v4707_v46 = vmax.f32 %v4706_v24, %v11213_v42  ;;  %v11230_v18 = vsel %vm3385_vm0, %v3296_v25, -1e+30  ;;  %v3189_v8 = vpop.f32.mrb[121].mxu0 }
 0x56a   : > { %v11223_v38 = vsel %vm3380_vm11, %v15195_v17, -1e+30  ;;  %15197 = vst [vmem:[#allocation271_spill] sm:$0xff] %v11230_v18  ;;  %v11234_v19 = vsel %vm3382_vm13, %v3187_v61, -1e+30  ;;  %v3300_v24 = vpop.f32.mrb[120].mxu1 }
 0x56b   : > { %15196 = vst [vmem:[#allocation183_spill] sm:$0xff] %v11223_v38  ;;  %15198 = vst [vmem:[#allocation272_spill] sm:$0xff] %v11234_v19  ;;  %v4738_v17 = vmax.f32 %v4737_v50, %v11234_v19  ;;  %v11240_v44 = vsel %vm3383_vm14, %v3189_v8, -1e+30  ;;  %4708 = vmax.xlane.f32.xlu0 %v4707_v46  ;;  %v3191_v16 = vpop.f32.mrb[122].mxu0  ;;  %v4724_v63 = vmax.f32 %v4723_v55, %v11230_v18  ;;  %v3302_v61 = vpop.f32.mrb[121].mxu1 }
 0x56c   : > { %15199 = vst [vmem:[#allocation273_spill] sm:$0xff] %v11240_v44  ;;  %v11245_v25 = vsel %vm3384_vm15, %v3300_v24, -1e+30  ;;  %v11249_v29 = vsel %vm3382_vm13, %v3191_v16, -1e+30  ;;  %v3193_v21 = vpop.f32.mrb[123].mxu0  ;;  %v4770_v50 = vmax.f32 %v4769_v47, %v11201_v62  ;;  %v4787_v11 = vmax.f32 %v4786_v5, %v11223_v38 }
 0x56d   : > { %15200 = vst [vmem:[#allocation274_spill] sm:$0xff] %v11245_v25  ;;  %15201 = vst [vmem:[#allocation275_spill] sm:$0xff] %v11249_v29  ;;  %v4739_v8 = vmax.f32 %v4738_v17, %v11240_v44  ;;  %v4755_v43 = vmax.f32 %v4754_v0, %v11249_v29  ;;  %v11256_v46 = vsel %vm3383_vm14, %v3193_v21, -1e+30  ;;  %v3304_v55 = vpop.f32.mrb[122].mxu1  ;;  %4725 = vmax.xlane.f32.xlu1 %v4724_v63  ;;  %v15203_v24 = vld [vmem:[#allocation181_spill] sm:$0xff] }
 0x56e   : > { %15202 = vst [vmem:[#allocation276_spill] sm:$0xff] %v11256_v46  ;;  %v11261_v18 = vsel %vm3381_vm12, %v15203_v24, -1e+30  ;;  %v3306_v16 = vpop.f32.mrb[123].mxu1  ;;  %v11269_v0 = vsel %vm3381_vm12, %v9694_v27, -1e+30 }
 0x56f   : > { %15204 = vst [vmem:[#allocation181_spill] sm:$0xff] %v11261_v18  ;;  %v4740_v47 = vmax.f32 %v4739_v8, %v11245_v25  ;;  %v4756_v17 = vmax.f32 %v4755_v43, %v11256_v46  ;;  %15205 = vst [vmem:[#allocation277_spill] sm:$0xff] %v11269_v0  ;;  %v11273_v63 = vsel %vm3385_vm0, %v3302_v61, -1e+30  ;;  %v11277_v21 = vsel %vm3384_vm15, %v3304_v55, -1e+30 }
 0x570   : > { %15206 = vst [vmem:[#allocation278_spill] sm:$0xff] %v11273_v63  ;;  %15207 = vst [vmem:[#allocation279_spill] sm:$0xff] %v11277_v21  ;;  %v4771_v24 = vmax.f32 %v4770_v50, %v11261_v18  ;;  %v3197_v8 = vpop.f32.mrb[124].mxu0  ;;  %v11284_v38 = vsel %vm3385_vm0, %v3306_v16, -1e+30  ;;  %v4788_v46 = vmax.f32 %v4787_v11, %v11269_v0  ;;  %v15230_v18 = vld [vmem:[#allocation167_spill] sm:$0xff] }
 0x571   : > { %v4757_v5 = vmax.f32 %v4756_v17, %v11277_v21  ;;  %v4741_v43 = vmax.f32 %v4740_v47, %v11273_v63  ;;  %15208 = vst [vmem:[#allocation280_spill] sm:$0xff] %v11284_v38  ;;  %v11288_v27 = vsel %vm3382_vm13, %v3197_v8, -1e+30  ;;  %v3199_v61 = vpop.f32.mrb[125].mxu0  ;;  %v3310_v17 = vpop.f32.mrb[124].mxu1  ;;  %v15231_v4 = vld [vmem:[#allocation168_spill] sm:$0xff] }
 0x572   : > { %15209 = vst [vmem:[#allocation281_spill] sm:$0xff] %v11288_v27  ;;  %v4772_v55 = vmax.f32 %v4771_v24, %v11288_v27  ;;  %v11294_v50 = vsel %vm3383_vm14, %v3199_v61, -1e+30  ;;  %v3201_v47 = vpop.f32.mrb[126].mxu0  ;;  %v11299_v16 = vsel %vm3384_vm15, %v3310_v17, -1e+30 }
 0x573   : > { %15210 = vst [vmem:[#allocation282_spill] sm:$0xff] %v11294_v50  ;;  %4742 = vmax.xlane.f32.xlu0 %v4741_v43  ;;  %v4758_v21 = vmax.f32 %v4757_v5, %v11284_v38  ;;  %15211 = vst [vmem:[#allocation283_spill] sm:$0xff] %v11299_v16  ;;  %v3312_v8 = vpop.f32.mrb[125].mxu1  ;;  %v11303_v29 = vsel %vm3382_vm13, %v3201_v47, -1e+30  ;;  %v3203_v11 = vpop.f32.mrb[127].mxu0 }
 0x574   : > { %15212 = vst [vmem:[#allocation284_spill] sm:$0xff] %v11303_v29  ;;  %v4773_v24 = vmax.f32 %v4772_v55, %v11294_v50  ;;  %v4789_v61 = vmax.f32 %v4788_v46, %v11303_v29  ;;  %v11309_v43 = vsel %vm3383_vm14, %v3203_v11, -1e+30  ;;  %v3314_v5 = vpop.f32.mrb[126].mxu1  ;;  %v11315_v55 = vsel %vm3385_vm0, %v3312_v8, -1e+30 }
 0x575   : > { %15213 = vst [vmem:[#allocation285_spill] sm:$0xff] %v11309_v43  ;;  %4759 = vmax.xlane.f32.xlu1 %v4758_v21  ;;  %v3316_v17 = vpop.f32.mrb[127].mxu1  ;;  %15214 = vst [vmem:[#allocation286_spill] sm:$0xff] %v11315_v55  ;;  %v11319_v46 = vsel %vm3384_vm15, %v3314_v5, -1e+30  ;;  %v11333_v8 = vld [vmem:[%s8678_s21 + $0x30] sm:$0xff] }
 0x576   : > { %v4774_v0 = vmax.f32 %v4773_v24, %v11299_v16  ;;  %v4790_v47 = vmax.f32 %v4789_v61, %v11309_v43  ;;  %15215 = vst [vmem:[#allocation287_spill] sm:$0xff] %v11319_v46  ;;  %v11325_v21 = vsel %vm3385_vm0, %v3316_v17, -1e+30  ;;  %v11329_v61 = vld [vmem:[%s8678_s21 + $0x28] sm:$0xff]  ;;  %15218 = vst [vmem:[#allocation290_spill] sm:$0xff] %v11333_v8  ;;  %v11336_v5 = vld [vmem:[%s8678_s21 + $0x38] sm:$0xff]  ;;  %v11346_v17 = vpop.permute.xlu1 %3665 }
 0x577   : > { %15216 = vst [vmem:[#allocation288_spill] sm:$0xff] %v11325_v21  ;;  %15217 = vst [vmem:[#allocation289_spill] sm:$0xff] %v11329_v61  ;;  %vm3738_vm9 = vcmp.eq.s32.totalorder %v9556_v37, %v11346_v17  ;;  %vm3739_vm10 = vcmp.eq.s32.totalorder %v9559_v52, %v11346_v17  ;;  %v15229_v16 = vld [vmem:[#allocation165_spill] sm:$0xff]  ;;  %v11420_v44 = vld [vmem:[#allocation3 + $0x20] sm:$0xff]  ;;  %vm3740_vm14 = vcmp.eq.s32.totalorder %v9564_v30, %v11346_v17 }
 0x578   : > { %v4791_v11 = vmax.f32 %v4790_v47, %v11319_v46  ;;  %v4775_v29 = vmax.f32 %v4774_v0, %v11315_v55  ;;  %15219 = vst [vmem:[#allocation291_spill] sm:$0xff] %v11336_v5  ;;  %v11341_v0 = vld [vmem:[%s8678_s21 + $0x40] sm:$0xff]  ;;  %15233 = vst [vmem:[#allocation301_spill] sm:$0xff] %v11420_v44  ;;  %v15234_v19 = vld [vmem:[#allocation169_spill] sm:$0xff] }
 0x579   : > { %15220 = vst [vmem:[#allocation292_spill] sm:$0xff] %v11341_v0  ;;  %v3994_v35 = vsel %vm3738_vm9, %v15234_v19, 0.0  ;;  %v15235_v42 = vld [vmem:[#allocation170_spill] sm:$0xff] }
 0x57a   : > { %4776 = vmax.xlane.f32.xlu0 %v4775_v29  ;;  %v4792_v24 = vmax.f32 %v4791_v11, %v11325_v21  ;;  %v11344_v29 = vpop.permute.xlu0 %3659  ;;  %v11350_v11 = vpop.permute.xlu1 %3671  ;;  %v11356_v21 = vld [vmem:[#allocation3 + $0x8] sm:$0xff]  ;;  %v3995_v36 = vsel %vm3739_vm10, %v15235_v42, 0.0  ;;  %v15241_v14 = vld [vmem:[#allocation178_spill] sm:$0xff] }
 0x57b   : > { %15222 = vst [vmem:[#allocation294_spill] sm:$0xff] %v11356_v21  ;;  %vm3706_vm2 = vcmp.eq.s32.totalorder %v9556_v37, %v11344_v29  ;;  %vm3707_vm3 = vcmp.eq.s32.totalorder %v9559_v52, %v11344_v29  ;;  %vm3708_vm5 = vcmp.eq.s32.totalorder %v9564_v30, %v11344_v29  ;;  %vm3709_vm7 = vcmp.eq.s32.totalorder %v9593_v57, %v11344_v29  ;;  %v11439_v42 = vld [vmem:[#allocation3 + $0x28] sm:$0xff] }
 0x57c   : > { %4793 = vmax.xlane.f32.xlu1 %v4792_v24  ;;  %v3963_v50 = vsel %vm3707_vm3, %v15229_v16, 0.0  ;;  %vm3770_vm15 = vcmp.eq.s32.totalorder %v9556_v37, %v11350_v11  ;;  %v3964_v41 = vsel %vm3708_vm5, %v9639_v10, 0.0  ;;  %vm3771_vm0 = vcmp.eq.s32.totalorder %v9559_v52, %v11350_v11  ;;  %15236 = vst [vmem:[#allocation302_spill] sm:$0xff] %v11439_v42  ;;  %v15240_v16 = vld [vmem:[#allocation175_spill] sm:$0xff] }
 0x57d   : > { %vm3741_vm3 = vcmp.eq.s32.totalorder %v9593_v57, %v11346_v17 }
 0x57e   : > { %v11348_v47 = vpop.permute.xlu0 %3662 }
 0x57f   : > { %vm3722_vm4 = vcmp.eq.s32.totalorder %v9556_v37, %v11348_v47  ;;  %vm3723_vm6 = vcmp.eq.s32.totalorder %v9559_v52, %v11348_v47  ;;  %vm3724_vm8 = vcmp.eq.s32.totalorder %v9564_v30, %v11348_v47  ;;  %vm3725_vm11 = vcmp.eq.s32.totalorder %v9593_v57, %v11348_v47 }
 0x580   : > { %v3978_v62 = vsel %vm3722_vm4, %v15230_v18, 0.0  ;;  %v3979_v63 = vsel %vm3723_vm6, %v15231_v4, 0.0  ;;  %v15238_v18 = vld [vmem:[#allocation172_spill] sm:$0xff]  ;;  %vm3772_vm4 = vcmp.eq.s32.totalorder %v9564_v30, %v11350_v11  ;;  %vm3773_vm6 = vcmp.eq.s32.totalorder %v9593_v57, %v11350_v11 }
 0x582   : > { %v11352_v24 = vpop.permute.xlu0 %3668 }
 0x583   : > { %vm3754_vm12 = vcmp.eq.s32.totalorder %v9556_v37, %v11352_v24  ;;  %vm3755_vm13 = vcmp.eq.s32.totalorder %v9559_v52, %v11352_v24  ;;  %vm3757_vm5 = vcmp.eq.s32.totalorder %v9593_v57, %v11352_v24 }
 0x584   : > { %v4011_v10 = vsel %vm3755_vm13, %v15238_v18, 0.0  ;;  %v15243_v18 = vld [vmem:[#allocation185_spill] sm:$0xff]  ;;  %vm3712_vm13 = vcmp.eq.s32.totalorder %v9757_v56, %v11344_v29 }
 0x58d   : > { %3674 = vperm.xlu1 %7035, %v11329_v61   ;;  %v11354_v61 = vld [vmem:[#allocation3] sm:$0xff] }
 0x58e   : > { %15221 = vst [vmem:[#allocation293_spill] sm:$0xff] %v11354_v61 }
 0x590   : > { %3677 = vperm.xlu0 %7034, %v11333_v8  }
 0x591   : > { %3680 = vperm.xlu1 %7035, %v11336_v5  }
 0x594   : > { %3683 = vperm.xlu0 %7034, %v11341_v0  }
 0x5c4   : > { %v4539_v8 = vpop.xlane.xlu1 %4538 }
 0x5c5   : > { %v11359_v5 = vmax.f32 %v11354_v61, %v4539_v8  ;;  %v11374_v8 = vld [vmem:[#allocation3 + $0x10] sm:$0xff] }
 0x5c6   : > { %15225 = vst [vmem:[#allocation297_spill] sm:$0xff] %v11374_v8 }
 0x5c7   : > { %15223 = vst [vmem:[#allocation295_spill] sm:$0xff] %v11359_v5  ;;  %v4556_v0 = vpop.xlane.xlu0 %4555  ;;  %6059 = vst.msk [vmem:[#allocation3] sm:$0xff] %vm4506_vm1, %v11359_v5  ;;  %4909 = vperm.xlu0 %7034, %v11359_v5  }
 0x5c8   : > { %v11366_v43 = vmax.f32 %v11356_v21, %v4556_v0  ;;  %v15228_v0 = vld [vmem:[#allocation164_spill] sm:$0xff]  ;;  %v15270_v21 = vld [vmem:[#allocation53_spill] sm:$0xff] }
 0x5c9   : > { %v3962_v38 = vsel %vm3706_vm2, %v15228_v0, 0.0  ;;  %v3980_v0 = vsel %vm3724_vm8, %v15240_v16, 0.0  ;;  %vm3756_vm2 = vcmp.eq.s32.totalorder %v9564_v30, %v11352_v24  ;;  %v4027_v16 = vsel %vm3771_vm0, %v15243_v18, 0.0  ;;  %v15245_v18 = vld [vmem:[#allocation182_spill] sm:$0xff] }
 0x5ca   : > { %15224 = vst [vmem:[#allocation296_spill] sm:$0xff] %v11366_v43  ;;  %6060 = vst.msk [vmem:[#allocation3 + $0x8] sm:$0xff] %vm4506_vm1, %v11366_v43  ;;  %4914 = vperm.xlu1 %7035, %v11366_v43   ;;  %v4218_v40 = vadd.f32 %v3963_v50, %v3962_v38  ;;  %v4235_v38 = vadd.f32 %v3979_v63, %v3978_v62  ;;  %v15237_v50 = vld [vmem:[#allocation171_spill] sm:$0xff]  ;;  %v3996_v62 = vsel %vm3740_vm14, %v15241_v14, 0.0  ;;  %v3968_v5 = vsel %vm3712_vm13, %v15270_v21, 0.0 }
 0x5cb   : > { %v4010_v19 = vsel %vm3754_vm12, %v15237_v50, 0.0  ;;  %v4252_v63 = vadd.f32 %v3995_v36, %v3994_v35  ;;  %vm3713_vm0 = vcmp.eq.s32.totalorder %v9775_v33, %v11344_v29  ;;  %vm3715_vm13 = vcmp.eq.s32.totalorder %v10199_v31, %v11344_v29 }
 0x5cc   : > { %v4219_v36 = vadd.f32 %v4218_v40, %v3964_v41  ;;  %v4269_v14 = vadd.f32 %v4011_v10, %v4010_v19  ;;  %v11494_v40 = vld [vmem:[#allocation3 + $0x30] sm:$0xff]  ;;  %v15248_v19 = vld [vmem:[#allocation188_spill] sm:$0xff] }
 0x5cd   : > { %v4253_v10 = vadd.f32 %v4252_v63, %v3996_v62  ;;  %15247 = vst [vmem:[#allocation305_spill] sm:$0xff] %v11494_v40 }
 0x5d0   : > { %v4573_v55 = vpop.xlane.xlu0 %4572 }
 0x5d1   : > { %v11377_v46 = vmax.f32 %v11374_v8, %v4573_v55  ;;  %v11393_v55 = vld [vmem:[#allocation3 + $0x18] sm:$0xff] }
 0x5d2   : > { %15227 = vst [vmem:[#allocation299_spill] sm:$0xff] %v11393_v55 }
 0x5d3   : > { %15226 = vst [vmem:[#allocation298_spill] sm:$0xff] %v11377_v46  ;;  %6061 = vst.msk [vmem:[#allocation3 + $0x10] sm:$0xff] %vm4506_vm1, %v11377_v46  ;;  %4919 = vperm.xlu0 %7034, %v11377_v46  }
 0x5d5   : > { %v4590_v27 = vpop.xlane.xlu1 %4589 }
 0x5d6   : > { %v11418_v25 = vmax.f32 %v11393_v55, %v4590_v27  ;;  %v3965_v55 = vsel %vm3709_vm7, %v15245_v18, 0.0  ;;  %v3997_v18 = vsel %vm3741_vm3, %v15248_v19, 0.0  ;;  %v15254_v19 = vld [vmem:[#allocation189_spill] sm:$0xff] }
 0x5d8   : > { %15232 = vst [vmem:[#allocation300_spill] sm:$0xff] %v11418_v25  ;;  %6062 = vst.msk [vmem:[#allocation3 + $0x18] sm:$0xff] %vm4506_vm1, %v11418_v25  ;;  %4924 = vperm.xlu1 %7035, %v11418_v25   ;;  %v15242_v25 = vld [vmem:[#allocation184_spill] sm:$0xff] }
 0x5d9   : > { %v4607_v4 = vpop.xlane.xlu0 %4606 }
 0x5da   : > { %v11450_v27 = vmax.f32 %v11420_v44, %v4607_v4  ;;  %v4026_v4 = vsel %vm3770_vm15, %v15242_v25, 0.0  ;;  %v4236_v25 = vadd.f32 %v4235_v38, %v3980_v0  ;;  %v15246_v44 = vld [vmem:[#allocation179_spill] sm:$0xff]  ;;  %v15249_v0 = vld [vmem:[#allocation193_spill] sm:$0xff]  ;;  %vm3728_vm15 = vcmp.eq.s32.totalorder %v9757_v56, %v11348_v47 }
 0x5db   : > { %v4012_v46 = vsel %vm3756_vm2, %v15246_v44, 0.0  ;;  %v4286_v41 = vadd.f32 %v4027_v16, %v4026_v4  ;;  %v4028_v38 = vsel %vm3772_vm4, %v15249_v0, 0.0  ;;  %v15251_v44 = vld [vmem:[#allocation190_spill] sm:$0xff]  ;;  %v15252_v16 = vld [vmem:[#allocation192_spill] sm:$0xff]  ;;  %vm3744_vm4 = vcmp.eq.s32.totalorder %v9757_v56, %v11346_v17 }
 0x5dc   : > { %15239 = vst [vmem:[#allocation303_spill] sm:$0xff] %v11450_v27  ;;  %v4624_v50 = vpop.xlane.xlu1 %4623  ;;  %6063 = vst.msk [vmem:[#allocation3 + $0x20] sm:$0xff] %vm4506_vm1, %v11450_v27  ;;  %4929 = vperm.xlu0 %7034, %v11450_v27   ;;  %v3981_v62 = vsel %vm3725_vm11, %v15251_v44, 0.0  ;;  %v4270_v63 = vadd.f32 %v4269_v14, %v4012_v46  ;;  %vm3711_vm8 = vcmp.eq.s32.totalorder %v15252_v16, %v11344_v29  ;;  %v4013_v27 = vsel %vm3757_vm5, %v15254_v19, 0.0  ;;  %v15256_v46 = vld [vmem:[#allocation217_spill] sm:$0xff]  ;;  %v11562_v44 = vld [vmem:[#allocation3 + $0x40] sm:$0xff] }
 0x5dd   : > { %v11475_v35 = vmax.f32 %v11439_v42, %v4624_v50  ;;  %v15250_v50 = vld [vmem:[#allocation191_spill] sm:$0xff]  ;;  %v4220_v42 = vadd.f32 %v4219_v36, %v3965_v55  ;;  %v4237_v0 = vadd.f32 %v4236_v25, %v3981_v62  ;;  %v4254_v36 = vadd.f32 %v4253_v10, %v3997_v18  ;;  %15262 = vst [vmem:[#allocation307_spill] sm:$0xff] %v11562_v44 }
 0x5de   : > { %vm3710_vm7 = vcmp.eq.s32.totalorder %v15250_v50, %v11344_v29  ;;  %vm3726_vm9 = vcmp.eq.s32.totalorder %v15250_v50, %v11348_v47  ;;  %v4287_v8 = vadd.f32 %v4286_v41, %v4028_v38  ;;  %vm3727_vm10 = vcmp.eq.s32.totalorder %v15252_v16, %v11348_v47  ;;  %v15258_v41 = vld [vmem:[#allocation195_spill] sm:$0xff] }
 0x5df   : > { %15244 = vst [vmem:[#allocation304_spill] sm:$0xff] %v11475_v35  ;;  %6064 = vst.msk [vmem:[#allocation3 + $0x28] sm:$0xff] %vm4506_vm1, %v11475_v35  ;;  %4934 = vperm.xlu1 %7035, %v11475_v35   ;;  %v11508_v35 = vld [vmem:[#allocation3 + $0x38] sm:$0xff]  ;;  %vm3742_vm11 = vcmp.eq.s32.totalorder %v15250_v50, %v11346_v17  ;;  %v3966_v25 = vsel %vm3710_vm7, %v15256_v46, 0.0  ;;  %vm3758_vm12 = vcmp.eq.s32.totalorder %v15250_v50, %v11352_v24  ;;  %v4029_v38 = vsel %vm3773_vm6, %v15258_v41, 0.0  ;;  %v15261_v41 = vld [vmem:[#allocation220_spill] sm:$0xff] }
 0x5e0   : > { %15253 = vst [vmem:[#allocation191_spill] sm:$0xff] %v11508_v35  ;;  %v4271_v10 = vadd.f32 %v4270_v63, %v4013_v27  ;;  %vm3774_vm14 = vcmp.eq.s32.totalorder %v15250_v50, %v11350_v11  ;;  %v15260_v27 = vld [vmem:[#allocation219_spill] sm:$0xff]  ;;  %v4221_v19 = vadd.f32 %v4220_v42, %v3966_v25  ;;  %vm3743_vm2 = vcmp.eq.s32.totalorder %v15252_v16, %v11346_v17  ;;  %v15264_v42 = vld [vmem:[#allocation221_spill] sm:$0xff] }
 0x5e1   : > { %v3998_v63 = vsel %vm3742_vm11, %v15260_v27, 0.0  ;;  %v4288_v62 = vadd.f32 %v4287_v8, %v4029_v38  ;;  %vm3759_vm3 = vcmp.eq.s32.totalorder %v15252_v16, %v11352_v24  ;;  %v4030_v25 = vsel %vm3774_vm14, %v15264_v42, 0.0  ;;  %v11575_v8 = vld [vmem:[#allocation3 + $0x48] sm:$0xff]  ;;  %v15266_v38 = vld [vmem:[#allocation54_spill] sm:$0xff] }
 0x5e2   : > { %vm3775_vm5 = vcmp.eq.s32.totalorder %v15252_v16, %v11350_v11  ;;  %15265 = vst [vmem:[#allocation308_spill] sm:$0xff] %v11575_v8  ;;  %vm3760_vm6 = vcmp.eq.s32.totalorder %v9757_v56, %v11352_v24  ;;  %vm3729_vm7 = vcmp.eq.s32.totalorder %v9775_v33, %v11348_v47  ;;  %vm3777_vm11 = vcmp.eq.s32.totalorder %v9775_v33, %v11350_v11 }
 0x5e3   : > { %v4641_v4 = vpop.xlane.xlu0 %4640  ;;  %v4289_v42 = vadd.f32 %v4288_v62, %v4030_v25  ;;  %vm3730_vm14 = vcmp.eq.s32.totalorder %v10196_v13, %v11348_v47 }
 0x5e4   : > { %v11514_v55 = vmax.f32 %v11494_v40, %v4641_v4  ;;  %v15259_v4 = vld [vmem:[#allocation218_spill] sm:$0xff]  ;;  %v3983_v40 = vsel %vm3727_vm10, %v15266_v38, 0.0  ;;  %v15271_v38 = vld [vmem:[#allocation64_spill] sm:$0xff]  ;;  %vm3761_vm10 = vcmp.eq.s32.totalorder %v9775_v33, %v11352_v24 }
 0x5e5   : > { %v4031_v61 = vsel %vm3775_vm5, %v15271_v38, 0.0  ;;  %vm3732_vm5 = vcmp.eq.s32.totalorder %v10270_v39, %v11348_v47 }
 0x5e6   : > { %15255 = vst [vmem:[#allocation192_spill] sm:$0xff] %v11514_v55  ;;  %v4658_v14 = vpop.xlane.xlu1 %4657  ;;  %6065 = vst.msk [vmem:[#allocation3 + $0x30] sm:$0xff] %vm4506_vm1, %v11514_v55  ;;  %4939 = vperm.xlu0 %7034, %v11514_v55   ;;  %v4255_v55 = vadd.f32 %v4254_v36, %v3998_v63 }
 0x5e7   : > { %v11531_v18 = vmax.f32 %v11508_v35, %v4658_v14  ;;  %v3982_v14 = vsel %vm3726_vm9, %v15259_v4, 0.0  ;;  %v4014_v4 = vsel %vm3758_vm12, %v15261_v41, 0.0  ;;  %v15263_v35 = vld [vmem:[#allocation222_spill] sm:$0xff]  ;;  %vm3745_vm9 = vcmp.eq.s32.totalorder %v9775_v33, %v11346_v17 }
 0x5e8   : > { %v4238_v27 = vadd.f32 %v4237_v0, %v3982_v14  ;;  %v4272_v9 = vadd.f32 %v4271_v10, %v4014_v4  ;;  %v15269_v14 = vld [vmem:[#allocation60_spill] sm:$0xff]  ;;  %v15274_v10 = vld [vmem:[#allocation59_spill] sm:$0xff]  ;;  %vm3714_vm12 = vcmp.eq.s32.totalorder %v10196_v13, %v11344_v29 }
 0x5e9   : > { %15257 = vst [vmem:[#allocation306_spill] sm:$0xff] %v11531_v18  ;;  %6066 = vst.msk [vmem:[#allocation3 + $0x38] sm:$0xff] %vm4506_vm1, %v11531_v18  ;;  %4944 = vperm.xlu1 %7035, %v11531_v18   ;;  %v3967_v18 = vsel %vm3711_vm8, %v15263_v35, 0.0  ;;  %v15267_v35 = vld [vmem:[#allocation58_spill] sm:$0xff]  ;;  %v4015_v63 = vsel %vm3759_vm3, %v15269_v14, 0.0  ;;  %vm3776_vm8 = vcmp.eq.s32.totalorder %v9757_v56, %v11350_v11  ;;  %v15281_v14 = vld [vmem:[#allocation61_spill] sm:$0xff]  ;;  %vm3716_vm3 = vcmp.eq.s32.totalorder %v10270_v39, %v11344_v29 }
 0x5ea   : > { %v3999_v46 = vsel %vm3743_vm2, %v15267_v35, 0.0  ;;  %v4222_v36 = vadd.f32 %v4221_v19, %v3967_v18  ;;  %v4239_v62 = vadd.f32 %v4238_v27, %v3983_v40  ;;  %v4273_v25 = vadd.f32 %v4272_v9, %v4015_v63  ;;  %v11624_v63 = vld [vmem:[#allocation3 + $0x50] sm:$0xff]  ;;  %v15284_v35 = vld [vmem:[#allocation67_spill] sm:$0xff] }
 0x5eb   : > { %v4256_v18 = vadd.f32 %v4255_v55, %v3999_v46  ;;  %v15275_v46 = vld [vmem:[#allocation62_spill] sm:$0xff]  ;;  %v4290_v27 = vadd.f32 %v4289_v42, %v4031_v61  ;;  %15276 = vst [vmem:[#allocation311_spill] sm:$0xff] %v11624_v63  ;;  %v4001_v38 = vsel %vm3745_vm9, %v15281_v14, 0.0  ;;  %vm3778_vm2 = vcmp.eq.s32.totalorder %v10196_v13, %v11350_v11 }
 0x5ec   : > { %v4223_v55 = vadd.f32 %v4222_v36, %v3968_v5  ;;  %v4016_v9 = vsel %vm3760_vm6, %v15275_v46, 0.0  ;;  %v15278_v5 = vld [vmem:[#allocation65_spill] sm:$0xff]  ;;  %v11637_v42 = vld [vmem:[#allocation3 + $0x58] sm:$0xff]  ;;  %vm3747_vm6 = vcmp.eq.s32.totalorder %v10199_v31, %v11346_v17  ;;  %vm3779_vm9 = vcmp.eq.s32.totalorder %v10199_v31, %v11350_v11 }
 0x5ed   : > { %v4032_v36 = vsel %vm3776_vm8, %v15278_v5, 0.0  ;;  %15279 = vst [vmem:[#allocation312_spill] sm:$0xff] %v11637_v42  ;;  %vm3763_vm8 = vcmp.eq.s32.totalorder %v10199_v31, %v11352_v24 }
 0x5ee   : > { %v4675_v41 = vpop.xlane.xlu0 %4674  ;;  %v4291_v5 = vadd.f32 %v4290_v27, %v4032_v36  ;;  %v15286_v27 = vld [vmem:[#allocation110_spill] sm:$0xff] }
 0x5ef   : > { %v11583_v0 = vmax.f32 %v11562_v44, %v4675_v41  ;;  %v15273_v41 = vld [vmem:[#allocation56_spill] sm:$0xff]  ;;  %v15280_v44 = vld [vmem:[#allocation57_spill] sm:$0xff]  ;;  %v3970_v36 = vsel %vm3714_vm12, %v15286_v27, 0.0  ;;  %v15297_v27 = vld [vmem:[#allocation122_spill] sm:$0xff]  ;;  %vm3780_vm12 = vcmp.eq.s32.totalorder %v10270_v39, %v11350_v11 }
 0x5f0   : > { %v3984_v4 = vsel %vm3728_vm15, %v15273_v41, 0.0  ;;  %v3985_v46 = vsel %vm3729_vm7, %v15280_v44, 0.0  ;;  %v4274_v41 = vadd.f32 %v4273_v25, %v4016_v9  ;;  %vm3746_vm15 = vcmp.eq.s32.totalorder %v10196_v13, %v11346_v17 }
 0x5f1   : > { %15268 = vst [vmem:[#allocation309_spill] sm:$0xff] %v11583_v0  ;;  %v4692_v43 = vpop.xlane.xlu1 %4691  ;;  %6067 = vst.msk [vmem:[#allocation3 + $0x40] sm:$0xff] %vm4506_vm1, %v11583_v0  ;;  %4949 = vperm.xlu0 %7034, %v11583_v0   ;;  %v15277_v0 = vld [vmem:[#allocation55_spill] sm:$0xff]  ;;  %vm3717_vm7 = vcmp.eq.s32.totalorder %v10303_v1, %v11344_v29  ;;  %v4019_v21 = vsel %vm3763_vm8, %v15297_v27, 0.0  ;;  %vm3750_vm8 = vcmp.eq.s32.totalorder %v10583_v49, %v11346_v17 }
 0x5f2   : > { %v11598_v19 = vmax.f32 %v11575_v8, %v4692_v43  ;;  %v4000_v43 = vsel %vm3744_vm4, %v15274_v10, 0.0  ;;  %v3969_v40 = vsel %vm3713_vm0, %v15277_v0, 0.0  ;;  %v4033_v0 = vsel %vm3777_vm11, %v15284_v35, 0.0  ;;  %v15296_v35 = vld [vmem:[#allocation119_spill] sm:$0xff] }
 0x5f3   : > { %v4257_v8 = vadd.f32 %v4256_v18, %v4000_v43  ;;  %v4224_v18 = vadd.f32 %v4223_v55, %v3969_v40  ;;  %vm3762_vm0 = vcmp.eq.s32.totalorder %v10196_v13, %v11352_v24  ;;  %vm3731_vm4 = vcmp.eq.s32.totalorder %v10199_v31, %v11348_v47 }
 0x5f4   : > { %15272 = vst [vmem:[#allocation310_spill] sm:$0xff] %v11598_v19  ;;  %6068 = vst.msk [vmem:[#allocation3 + $0x48] sm:$0xff] %vm4506_vm1, %v11598_v19  ;;  %4954 = vperm.xlu1 %7035, %v11598_v19   ;;  %v4240_v19 = vadd.f32 %v4239_v62, %v3984_v4  ;;  %v15283_v4 = vld [vmem:[#allocation63_spill] sm:$0xff]  ;;  %vm3764_vm11 = vcmp.eq.s32.totalorder %v10270_v39, %v11352_v24 }
 0x5f5   : > { %v4017_v43 = vsel %vm3761_vm10, %v15283_v4, 0.0  ;;  %v4258_v55 = vadd.f32 %v4257_v8, %v4001_v38  ;;  %v4292_v8 = vadd.f32 %v4291_v5, %v4033_v0  ;;  %v15287_v38 = vld [vmem:[#allocation112_spill] sm:$0xff]  ;;  %vm3748_vm10 = vcmp.eq.s32.totalorder %v10270_v39, %v11346_v17 }
 0x5f6   : > { %v4241_v40 = vadd.f32 %v4240_v19, %v3985_v46  ;;  %v4275_v9 = vadd.f32 %v4274_v41, %v4017_v43  ;;  %v3986_v19 = vsel %vm3730_vm14, %v15287_v38, 0.0  ;;  %v11684_v41 = vld [vmem:[#allocation3 + $0x60] sm:$0xff]  ;;  %v15289_v46 = vld [vmem:[#allocation118_spill] sm:$0xff]  ;;  %v4225_v43 = vadd.f32 %v4224_v18, %v3970_v36 }
 0x5f7   : > { %15288 = vst [vmem:[#allocation315_spill] sm:$0xff] %v11684_v41  ;;  %v15290_v0 = vld [vmem:[#allocation120_spill] sm:$0xff]  ;;  %v4003_v38 = vsel %vm3747_vm6, %v15296_v35, 0.0  ;;  %vm3765_vm14 = vcmp.eq.s32.totalorder %v10303_v1, %v11352_v24  ;;  %vm3720_vm6 = vcmp.eq.s32.totalorder %v10621_v12, %v11344_v29 }
 0x5f8   : > { %v4709_v61 = vpop.xlane.xlu0 %4708  ;;  %v4018_v5 = vsel %vm3762_vm0, %v15290_v0, 0.0  ;;  %v4242_v18 = vadd.f32 %v4241_v40, %v3986_v19  ;;  %v15295_v0 = vld [vmem:[#allocation114_spill] sm:$0xff]  ;;  %vm3781_vm0 = vcmp.eq.s32.totalorder %v10303_v1, %v11350_v11 }
 0x5f9   : > { %v11645_v62 = vmax.f32 %v11624_v63, %v4709_v61  ;;  %v4002_v61 = vsel %vm3746_vm15, %v15289_v46, 0.0  ;;  %v3987_v4 = vsel %vm3731_vm4, %v15295_v0, 0.0  ;;  %v4276_v46 = vadd.f32 %v4275_v9, %v4018_v5  ;;  %v15300_v9 = vld [vmem:[#allocation113_spill] sm:$0xff] }
 0x5fa   : > { %v4726_v10 = vpop.xlane.xlu1 %4725  ;;  %vm3733_vm15 = vcmp.eq.s32.totalorder %v10303_v1, %v11348_v47  ;;  %vm3719_vm4 = vcmp.eq.s32.totalorder %v10597_v45, %v11344_v29 }
 0x5fb   : > { %15282 = vst [vmem:[#allocation313_spill] sm:$0xff] %v11645_v62  ;;  %6069 = vst.msk [vmem:[#allocation3 + $0x50] sm:$0xff] %vm4506_vm1, %v11645_v62  ;;  %v11658_v25 = vmax.f32 %v11637_v42, %v4726_v10  ;;  %4959 = vperm.xlu0 %7034, %v11645_v62   ;;  %v15291_v10 = vld [vmem:[#allocation126_spill] sm:$0xff]  ;;  %v11700_v42 = vld [vmem:[#allocation3 + $0x68] sm:$0xff]  ;;  %v4277_v40 = vadd.f32 %v4276_v46, %v4019_v21 }
 0x5fc   : > { %v4034_v44 = vsel %vm3778_vm2, %v15291_v10, 0.0  ;;  %15292 = vst [vmem:[#allocation316_spill] sm:$0xff] %v11700_v42  ;;  %v15293_v62 = vld [vmem:[#allocation111_spill] sm:$0xff]  ;;  %v4259_v10 = vadd.f32 %v4258_v55, %v4002_v61  ;;  %v15301_v61 = vld [vmem:[#allocation116_spill] sm:$0xff]  ;;  %vm3718_vm2 = vcmp.eq.s32.totalorder %v10583_v49, %v11344_v29 }
 0x5fd   : > { %15285 = vst [vmem:[#allocation314_spill] sm:$0xff] %v11658_v25  ;;  %6070 = vst.msk [vmem:[#allocation3 + $0x58] sm:$0xff] %vm4506_vm1, %v11658_v25  ;;  %4964 = vperm.xlu1 %7035, %v11658_v25   ;;  %v3971_v63 = vsel %vm3715_vm13, %v15293_v62, 0.0  ;;  %v4293_v62 = vadd.f32 %v4292_v8, %v4034_v44  ;;  %v15299_v55 = vld [vmem:[#allocation127_spill] sm:$0xff]  ;;  %v4243_v8 = vadd.f32 %v4242_v18, %v3987_v4  ;;  %v3988_v5 = vsel %vm3732_vm5, %v15301_v61, 0.0  ;;  %v11750_v4 = vld [vmem:[#allocation3 + $0x70] sm:$0xff] }
 0x5fe   : > { %v4226_v19 = vadd.f32 %v4225_v43, %v3971_v63  ;;  %v4035_v44 = vsel %vm3779_vm9, %v15299_v55, 0.0  ;;  %v4260_v43 = vadd.f32 %v4259_v10, %v4003_v38  ;;  %vm3749_vm13 = vcmp.eq.s32.totalorder %v10303_v1, %v11346_v17  ;;  %15302 = vst [vmem:[#allocation113_spill] sm:$0xff] %v11750_v4  ;;  %v15303_v18 = vld [vmem:[#allocation121_spill] sm:$0xff]  ;;  %v15304_v63 = vld [vmem:[#allocation124_spill] sm:$0xff]  ;;  %v11761_v38 = vld [vmem:[#allocation3 + $0x78] sm:$0xff] }
 0x5ff   : > { %v4036_v10 = vsel %vm3780_vm12, %v10737_v2, 0.0  ;;  %15305 = vst [vmem:[#allocation318_spill] sm:$0xff] %v11761_v38  ;;  %v15306_v46 = vld [vmem:[#allocation115_spill] sm:$0xff]  ;;  %v4244_v27 = vadd.f32 %v4243_v8, %v3988_v5  ;;  %v4021_v55 = vsel %vm3765_vm14, %v10669_v34, 0.0  ;;  %v4037_v5 = vsel %vm3781_vm0, %v10749_v58, 0.0  ;;  %v15322_v34 = vld [vmem:[#allocation186_spill] sm:$0xff] }
 0x600   : > { %v4743_v25 = vpop.xlane.xlu0 %4742  ;;  %vm3735_vm5 = vcmp.eq.s32.totalorder %v10597_v45, %v11348_v47  ;;  %vm3751_vm9 = vcmp.eq.s32.totalorder %v10597_v45, %v11346_v17  ;;  %vm3767_vm14 = vcmp.eq.s32.totalorder %v10597_v45, %v11352_v24  ;;  %vm3782_vm0 = vcmp.eq.s32.totalorder %v10583_v49, %v11350_v11 }
 0x601   : > { %v11709_v36 = vmax.f32 %v11684_v41, %v4743_v25 }
 0x602   : > { %v4760_v14 = vpop.xlane.xlu1 %4759 }
 0x603   : > { %15294 = vst [vmem:[#allocation317_spill] sm:$0xff] %v11709_v36  ;;  %6071 = vst.msk [vmem:[#allocation3 + $0x60] sm:$0xff] %vm4506_vm1, %v11709_v36  ;;  %v11722_v25 = vmax.f32 %v11700_v42, %v4760_v14  ;;  %4969 = vperm.xlu0 %7034, %v11709_v36   ;;  %v3972_v14 = vsel %vm3716_vm3, %v15300_v9, 0.0  ;;  %v4004_v36 = vsel %vm3748_vm10, %v15303_v18, 0.0  ;;  %v4020_v42 = vsel %vm3764_vm11, %v15304_v63, 0.0  ;;  %v15331_v18 = vld [vmem:[#allocation194_spill] sm:$0xff] }
 0x604   : > { %v4227_v41 = vadd.f32 %v4226_v19, %v3972_v14  ;;  %v3973_v63 = vsel %vm3717_vm7, %v15306_v46, 0.0  ;;  %v4261_v19 = vadd.f32 %v4260_v43, %v4004_v36  ;;  %v4278_v2 = vadd.f32 %v4277_v40, %v4020_v42  ;;  %v15310_v40 = vld [vmem:[#allocation117_spill] sm:$0xff]  ;;  %v11796_v43 = vld [vmem:[%s8678_s21 + $0x50] sm:$0xff] }
 0x605   : > { %15298 = vst [vmem:[#allocation119_spill] sm:$0xff] %v11722_v25  ;;  %6072 = vst.msk [vmem:[#allocation3 + $0x68] sm:$0xff] %vm4506_vm1, %v11722_v25  ;;  %4974 = vperm.xlu1 %7035, %v11722_v25   ;;  %v4294_v25 = vadd.f32 %v4293_v62, %v4035_v44  ;;  %v15308_v44 = vld [vmem:[#allocation123_spill] sm:$0xff]  ;;  %vm3734_vm3 = vcmp.eq.s32.totalorder %v10583_v49, %v11348_v47  ;;  %vm3736_vm7 = vcmp.eq.s32.totalorder %v10621_v12, %v11348_v47 }
 0x606   : > { %v4005_v14 = vsel %vm3749_vm13, %v15308_v44, 0.0  ;;  %v4228_v42 = vadd.f32 %v4227_v41, %v3973_v63  ;;  %15311 = vst [vmem:[#allocation320_spill] sm:$0xff] %v11796_v43  ;;  %v4279_v8 = vadd.f32 %v4278_v2, %v4021_v55  ;;  %vm3752_vm10 = vcmp.eq.s32.totalorder %v10621_v12, %v11346_v17  ;;  %v15316_v55 = vld [vmem:[#allocation225_spill] sm:$0xff] }
 0x607   : > { %v4777_v21 = vpop.xlane.xlu0 %4776  ;;  %v4295_v0 = vadd.f32 %v4294_v25, %v4036_v10  ;;  %v3989_v25 = vsel %vm3733_vm15, %v15310_v40, 0.0  ;;  %v4262_v63 = vadd.f32 %v4261_v19, %v4005_v14  ;;  %vm3766_vm11 = vcmp.eq.s32.totalorder %v10583_v49, %v11352_v24 }
 0x608   : > { %v11770_v62 = vmax.f32 %v11750_v4, %v4777_v21  ;;  %v4245_v10 = vadd.f32 %v4244_v27, %v3989_v25  ;;  %v15312_v21 = vld [vmem:[#allocation224_spill] sm:$0xff]  ;;  %v15313_v27 = vld [vmem:[#allocation227_spill] sm:$0xff]  ;;  %v11818_v4 = vld [vmem:[%s8678_s21 + $0x48] sm:$0xff]  ;;  %v3975_v19 = vsel %vm3719_vm4, %v15316_v55, 0.0  ;;  %vm3768_vm15 = vcmp.eq.s32.totalorder %v10621_v12, %v11352_v24 }
 0x609   : > { %v4794_v61 = vpop.xlane.xlu1 %4793  ;;  %v3990_v25 = vsel %vm3734_vm3, %v15313_v27, 0.0  ;;  %15314 = vst [vmem:[#allocation224_spill] sm:$0xff] %v11818_v4  ;;  %v11820_v41 = vadd.f32 %v4295_v0, %v4037_v5  ;;  %v11836_v0 = vld [vmem:[%s8678_s21 + $0x60] sm:$0xff]  ;;  %vm3721_vm3 = vcmp.eq.s32.totalorder %v10673_v20, %v11344_v29  ;;  %vm3753_vm4 = vcmp.eq.s32.totalorder %v10673_v20, %v11346_v17 }
 0x60a   : > { %15307 = vst [vmem:[#allocation115_spill] sm:$0xff] %v11770_v62  ;;  %6073 = vst.msk [vmem:[#allocation3 + $0x70] sm:$0xff] %vm4506_vm1, %v11770_v62  ;;  %v11784_v36 = vmax.f32 %v11761_v38, %v4794_v61  ;;  %4979 = vperm.xlu0 %7034, %v11770_v62   ;;  %v3974_v61 = vsel %vm3718_vm2, %v15312_v21, 0.0  ;;  %v4246_v14 = vadd.f32 %v4245_v10, %v3990_v25  ;;  %v11858_v10 = vld [vmem:[%s8678_s21 + $0x58] sm:$0xff]  ;;  %v11871_v38 = vld [vmem:[%s8678_s21 + $0x70] sm:$0xff] }
 0x60b   : > { %v4229_v2 = vadd.f32 %v4228_v42, %v3974_v61  ;;  %15315 = vst [vmem:[#allocation321_spill] sm:$0xff] %v11836_v0  ;;  %v15317_v42 = vld [vmem:[#allocation228_spill] sm:$0xff]  ;;  %15318 = vst [vmem:[#allocation225_spill] sm:$0xff] %v11858_v10  ;;  %vm3783_vm2 = vcmp.eq.s32.totalorder %v10597_v45, %v11350_v11 }
 0x60c   : > { %15309 = vst [vmem:[#allocation319_spill] sm:$0xff] %v11784_v36  ;;  %6074 = vst.msk [vmem:[#allocation3 + $0x78] sm:$0xff] %vm4506_vm1, %v11784_v36  ;;  %4984 = vperm.xlu1 %7035, %v11784_v36   ;;  %v3991_v5 = vsel %vm3735_vm5, %v15317_v42, 0.0  ;;  %v15319_v61 = vld [vmem:[#allocation232_spill] sm:$0xff]  ;;  %v15323_v42 = vld [vmem:[#allocation187_spill] sm:$0xff]  ;;  %vm3737_vm5 = vcmp.eq.s32.totalorder %v10673_v20, %v11348_v47 }
 0x60d   : > { %v11815_v62 = vpop.permute.xlu1 %3674  ;;  %v4006_v25 = vsel %vm3750_vm8, %v15319_v61, 0.0  ;;  %v4230_v36 = vadd.f32 %v4229_v2, %v3975_v19  ;;  %15321 = vst [vmem:[#allocation322_spill] sm:$0xff] %v11871_v38  ;;  %v4247_v61 = vadd.f32 %v4246_v14, %v3991_v5  ;;  %v15325_v2 = vld [vmem:[#allocation230_spill] sm:$0xff]  ;;  %v15327_v14 = vld [vmem:[#allocation233_spill] sm:$0xff] }
 0x60e   : > { %3689 = vperm.xlu0 %7034, %v11796_v43   ;;  %vm3786_vm12 = vcmp.eq.s32.totalorder %v9556_v37, %v11815_v62  ;;  %vm3787_vm13 = vcmp.eq.s32.totalorder %v9559_v52, %v11815_v62  ;;  %v15320_v43 = vld [vmem:[#allocation235_spill] sm:$0xff]  ;;  %vm3788_vm8 = vcmp.eq.s32.totalorder %v9564_v30, %v11815_v62  ;;  %v3992_v19 = vsel %vm3736_vm7, %v15325_v2, 0.0 }
 0x60f   : > { %v4042_v58 = vsel %vm3786_vm12, %v15322_v34, 0.0  ;;  %v4043_v27 = vsel %vm3787_vm13, %v15323_v42, 0.0  ;;  %v11891_v34 = vld [vmem:[%s8678_s21 + $0x68] sm:$0xff]  ;;  %v4007_v5 = vsel %vm3751_vm9, %v15327_v14, 0.0  ;;  %vm3784_vm7 = vcmp.eq.s32.totalorder %v10621_v12, %v11350_v11  ;;  %v15330_v14 = vld [vmem:[#allocation231_spill] sm:$0xff] }
 0x610   : > { %3686 = vperm.xlu1 %7035, %v11818_v4   ;;  %v4022_v4 = vsel %vm3766_vm11, %v15320_v43, 0.0  ;;  %v15324_v43 = vld [vmem:[#allocation226_spill] sm:$0xff]  ;;  %vm3789_vm11 = vcmp.eq.s32.totalorder %v9593_v57, %v11815_v62  ;;  %v4248_v29 = vadd.f32 %v4247_v61, %v3992_v19  ;;  %vm3790_vm9 = vcmp.eq.s32.totalorder %v15250_v50, %v11815_v62  ;;  %v15335_v19 = vld [vmem:[#allocation223_spill] sm:$0xff] }
 0x611   : > { %v3976_v40 = vsel %vm3720_vm6, %v15324_v43, 0.0  ;;  %v4280_v42 = vadd.f32 %v4279_v8, %v4022_v4  ;;  %15326 = vst [vmem:[#allocation226_spill] sm:$0xff] %v11891_v34  ;;  %vm3769_vm6 = vcmp.eq.s32.totalorder %v10673_v20, %v11352_v24  ;;  %v4303_v4 = vadd.f32 %v4043_v27, %v4042_v58  ;;  %v11908_v8 = vpop.permute.xlu1 %3680  ;;  %v15340_v24 = vld [vmem:[#allocation69_spill] sm:$0xff] }
 0x612   : > { %3695 = vperm.xlu0 %7034, %v11836_v0   ;;  %v4263_v0 = vadd.f32 %v4262_v63, %v4006_v25  ;;  %v15329_v63 = vld [vmem:[#allocation229_spill] sm:$0xff]  ;;  %v4231_v2 = vadd.f32 %v4230_v36, %v3976_v40  ;;  %v4038_v58 = vsel %vm3782_vm0, %v10876_v23, 0.0  ;;  %vm3785_vm12 = vcmp.eq.s32.totalorder %v10673_v20, %v11350_v11  ;;  %v15332_v40 = vld [vmem:[#allocation234_spill] sm:$0xff] }
 0x613   : > { %v3977_v25 = vsel %vm3721_vm3, %v15329_v63, 0.0  ;;  %v4008_v27 = vsel %vm3752_vm10, %v15332_v40, 0.0  ;;  %v15334_v23 = vld [vmem:[#allocation198_spill] sm:$0xff]  ;;  %vm3791_vm13 = vcmp.eq.s32.totalorder %v15252_v16, %v11815_v62  ;;  %vm3819_vm0 = vcmp.eq.s32.totalorder %v9559_v52, %v11908_v8 }
 0x614   : > { %3692 = vperm.xlu1 %7035, %v11858_v10   ;;  %v15328_v10 = vld [vmem:[#allocation236_spill] sm:$0xff]  ;;  %v4264_v47 = vadd.f32 %v4263_v0, %v4007_v5  ;;  %v4045_v61 = vsel %vm3789_vm11, %v15334_v23, 0.0  ;;  %v4297_v0 = vadd.f32 %v11820_v41, %v4038_v58  ;;  %v4046_v5 = vsel %vm3790_vm9, %v15335_v19, 0.0  ;;  %v15345_v11 = vld [vmem:[#allocation130_spill] sm:$0xff] }
 0x615   : > { %v4023_v44 = vsel %vm3767_vm14, %v15328_v10, 0.0  ;;  %v3993_v10 = vsel %vm3737_vm5, %v15330_v14, 0.0  ;;  %v11936_v14 = vld [vmem:[%s8678_s21 + $0x78] sm:$0xff]  ;;  %vm3818_vm14 = vcmp.eq.s32.totalorder %v9556_v37, %v11908_v8  ;;  %vm3792_vm10 = vcmp.eq.s32.totalorder %v9757_v56, %v11815_v62  ;;  %v15338_v19 = vld [vmem:[#allocation200_spill] sm:$0xff] }
 0x616   : > { %3701 = vperm.xlu0 %7034, %v11871_v38   ;;  %v4044_v38 = vsel %vm3788_vm8, %v15331_v18, 0.0  ;;  %v4281_v18 = vadd.f32 %v4280_v42, %v4023_v44  ;;  %15333 = vst [vmem:[#allocation229_spill] sm:$0xff] %v11936_v14  ;;  %v4024_v44 = vsel %vm3768_vm15, %v10863_v53, 0.0  ;;  %v11953_v42 = vadd.f32 %v4231_v2, %v3977_v25  ;;  %v15336_v25 = vld [vmem:[#allocation66_spill] sm:$0xff] }
 0x617   : > { %v4304_v36 = vadd.f32 %v4303_v4, %v4044_v38  ;;  %v4039_v4 = vsel %vm3783_vm2, %v10887_v60, 0.0  ;;  %v4265_v2 = vadd.f32 %v4264_v47, %v4008_v27  ;;  %v4047_v58 = vsel %vm3791_vm13, %v15336_v25, 0.0  ;;  %v15354_v25 = vld [vmem:[#allocation207_spill] sm:$0xff] }
 0x618   : > { %3698 = vperm.xlu1 %7035, %v11891_v34   ;;  %v4075_v23 = vsel %vm3819_vm0, %v15338_v19, 0.0  ;;  %v4282_v53 = vadd.f32 %v4281_v18, %v4024_v44  ;;  %vm3793_vm15 = vcmp.eq.s32.totalorder %v9775_v33, %v11815_v62  ;;  %vm3820_vm2 = vcmp.eq.s32.totalorder %v9564_v30, %v11908_v8 }
 0x619   : > { %v4305_v38 = vadd.f32 %v4304_v36, %v4045_v61  ;;  %v4009_v36 = vsel %vm3753_vm4, %v10852_v54, 0.0  ;;  %v15337_v61 = vld [vmem:[#allocation199_spill] sm:$0xff]  ;;  %v4298_v17 = vadd.f32 %v4297_v0, %v4039_v4  ;;  %v4025_v47 = vsel %vm3769_vm6, %v10909_v26, 0.0 }
 0x61a   : > { %v4074_v34 = vsel %vm3818_vm14, %v15337_v61, 0.0  ;;  %v11978_v27 = vadd.f32 %v4248_v29, %v3993_v10  ;;  %vm3794_vm3 = vcmp.eq.s32.totalorder %v10196_v13, %v11815_v62  ;;  %vm3821_vm4 = vcmp.eq.s32.totalorder %v9593_v57, %v11908_v8  ;;  %v15341_v29 = vld [vmem:[#allocation210_spill] sm:$0xff] }
 0x61b   : > { %v4306_v41 = vadd.f32 %v4305_v38, %v4046_v5  ;;  %v15339_v38 = vld [vmem:[#allocation68_spill] sm:$0xff]  ;;  %v4337_v44 = vadd.f32 %v4075_v23, %v4074_v34  ;;  %v4040_v0 = vsel %vm3784_vm7, %v10896_v32, 0.0  ;;  %v11989_v4 = vadd.f32 %v4265_v2, %v4009_v36  ;;  %v15343_v2 = vld [vmem:[#allocation34_spill] sm:$0xff] }
 0x61c   : > { %3704 = vperm.xlu1 %7035, %v11936_v14   ;;  %v4048_v5 = vsel %vm3792_vm10, %v15339_v38, 0.0  ;;  %v4049_v10 = vsel %vm3793_vm15, %v15340_v24, 0.0  ;;  %v11995_v19 = vadd.f32 %v4282_v53, %v4025_v47  ;;  %vm3822_vm5 = vcmp.eq.s32.totalorder %v15250_v50, %v11908_v8  ;;  %v15342_v23 = vld [vmem:[#allocation128_spill] sm:$0xff] }
 0x61d   : > { %v4307_v14 = vadd.f32 %v4306_v41, %v4047_v58  ;;  %v4076_v41 = vsel %vm3820_vm2, %v15341_v29, 0.0  ;;  %v11993_v58 = vpop.permute.xlu0 %3677  ;;  %vm3795_vm8 = vcmp.eq.s32.totalorder %v10199_v31, %v11815_v62  ;;  %v12006_v36 = vsel %vm3785_vm12, %v10941_v3, 0.0  ;;  %v15353_v38 = vld [vmem:[#allocation240_spill] sm:$0xff]  ;;  %v15360_v3 = vld [vmem:[#allocation70_spill] sm:$0xff] }
 0x61e   : > { %v4338_v34 = vadd.f32 %v4337_v44, %v4076_v41  ;;  %v4077_v29 = vsel %vm3821_vm4, %v15343_v2, 0.0  ;;  %v12009_v47 = vadd.f32 %v4298_v17, %v4040_v0  ;;  %vm3823_vm6 = vcmp.eq.s32.totalorder %v15252_v16, %v11908_v8  ;;  %v15344_v44 = vld [vmem:[#allocation72_spill] sm:$0xff]  ;;  %v15346_v41 = vld [vmem:[#allocation74_spill] sm:$0xff]  ;;  %v15348_v2 = vld [vmem:[#allocation197_spill] sm:$0xff] }
 0x61f   : > { %v4308_v18 = vadd.f32 %v4307_v14, %v4048_v5  ;;  %v4050_v5 = vsel %vm3794_vm3, %v15342_v23, 0.0  ;;  %vm3796_vm7 = vcmp.eq.s32.totalorder %v10270_v39, %v11815_v62  ;;  %vm3802_vm11 = vcmp.eq.s32.totalorder %v9556_v37, %v11993_v58  ;;  %v15352_v23 = vld [vmem:[#allocation77_spill] sm:$0xff] }
 0x620   : > { %vm3803_vm9 = vcmp.eq.s32.totalorder %v9559_v52, %v11993_v58  ;;  %vm3797_vm12 = vcmp.eq.s32.totalorder %v10303_v1, %v11815_v62  ;;  %v4051_v17 = vsel %vm3795_vm8, %v15345_v11, 0.0  ;;  %vm3824_vm13 = vcmp.eq.s32.totalorder %v9757_v56, %v11908_v8 }
 0x621   : > { %v4309_v14 = vadd.f32 %v4308_v18, %v4049_v10  ;;  %v4339_v18 = vadd.f32 %v4338_v34, %v4077_v29  ;;  %v4078_v10 = vsel %vm3822_vm5, %v15344_v44, 0.0  ;;  %vm3798_vm14 = vcmp.eq.s32.totalorder %v10583_v49, %v11815_v62 }
 0x622   : > { %vm3799_vm0 = vcmp.eq.s32.totalorder %v10597_v45, %v11815_v62  ;;  %vm3825_vm10 = vcmp.eq.s32.totalorder %v9775_v33, %v11908_v8  ;;  %v4059_v61 = vsel %vm3803_vm9, %v15348_v2, 0.0  ;;  %vm3800_vm15 = vcmp.eq.s32.totalorder %v10621_v12, %v11815_v62 }
 0x623   : > { %v4310_v53 = vadd.f32 %v4309_v14, %v4050_v5  ;;  %v4340_v0 = vadd.f32 %v4339_v18, %v4078_v10  ;;  %v4079_v14 = vsel %vm3823_vm6, %v15346_v41, 0.0  ;;  %v15347_v5 = vld [vmem:[#allocation196_spill] sm:$0xff]  ;;  %vm3801_vm2 = vcmp.eq.s32.totalorder %v10673_v20, %v11815_v62  ;;  %v15365_v62 = vld [vmem:[#allocation202_spill] sm:$0xff] }
 0x624   : > { %v4058_v44 = vsel %vm3802_vm11, %v15347_v5, 0.0  ;;  %v15349_v18 = vld [vmem:[#allocation76_spill] sm:$0xff]  ;;  %vm3804_vm3 = vcmp.eq.s32.totalorder %v9564_v30, %v11993_v58  ;;  %vm3826_vm4 = vcmp.eq.s32.totalorder %v10196_v13, %v11908_v8  ;;  %vm3805_vm5 = vcmp.eq.s32.totalorder %v9593_v57, %v11993_v58 }
 0x625   : > { %v4311_v29 = vadd.f32 %v4310_v53, %v4051_v17  ;;  %v4341_v34 = vadd.f32 %v4340_v0, %v4079_v14  ;;  %v4080_v10 = vsel %vm3824_vm13, %v15349_v18, 0.0  ;;  %v15350_v53 = vld [vmem:[#allocation132_spill] sm:$0xff]  ;;  %v15351_v0 = vld [vmem:[#allocation133_spill] sm:$0xff]  ;;  %v4081_v18 = vsel %vm3825_vm10, %v15352_v23, 0.0 }
 0x626   : > { %v4052_v17 = vsel %vm3796_vm7, %v15350_v53, 0.0  ;;  %v4053_v14 = vsel %vm3797_vm12, %v15351_v0, 0.0  ;;  %v4320_v24 = vadd.f32 %v4059_v61, %v4058_v44  ;;  %v4054_v53 = vsel %vm3798_vm14, %v15353_v38, 0.0  ;;  %v12066_v44 = vpop.permute.xlu0 %3683  ;;  %v15357_v23 = vld [vmem:[#allocation33_spill] sm:$0xff] }
 0x627   : > { %v4342_v41 = vadd.f32 %v4341_v34, %v4080_v10  ;;  %v4312_v11 = vadd.f32 %v4311_v29, %v4052_v17  ;;  %vm3827_vm8 = vcmp.eq.s32.totalorder %v10199_v31, %v11908_v8  ;;  %v4060_v2 = vsel %vm3804_vm3, %v15354_v25, 0.0  ;;  %v15355_v29 = vld [vmem:[#allocation136_spill] sm:$0xff]  ;;  %v15356_v10 = vld [vmem:[#allocation242_spill] sm:$0xff] }
 0x628   : > { %vm3828_vm6 = vcmp.eq.s32.totalorder %v10270_v39, %v11908_v8  ;;  %v4082_v34 = vsel %vm3826_vm4, %v15355_v29, 0.0  ;;  %vm3806_vm7 = vcmp.eq.s32.totalorder %v15250_v50, %v11993_v58  ;;  %v4321_v61 = vadd.f32 %v4320_v24, %v4060_v2  ;;  %v15358_v25 = vld [vmem:[#allocation138_spill] sm:$0xff]  ;;  %v15359_v2 = vld [vmem:[#allocation140_spill] sm:$0xff] }
 0x629   : > { %v4343_v0 = vadd.f32 %v4342_v41, %v4081_v18  ;;  %v4055_v17 = vsel %vm3799_vm0, %v15356_v10, 0.0  ;;  %v4056_v41 = vsel %vm3800_vm15, %v10945_v48, 0.0  ;;  %v4061_v38 = vsel %vm3805_vm5, %v15357_v23, 0.0  ;;  %v15364_v48 = vld [vmem:[#allocation201_spill] sm:$0xff] }
 0x62a   : > { %v4313_v29 = vadd.f32 %v4312_v11, %v4053_v14  ;;  %v4083_v5 = vsel %vm3827_vm8, %v15358_v25, 0.0  ;;  %vm3807_vm11 = vcmp.eq.s32.totalorder %v15252_v16, %v11993_v58  ;;  %v4322_v24 = vadd.f32 %v4321_v61, %v4061_v38  ;;  %v15362_v61 = vld [vmem:[#allocation141_spill] sm:$0xff] }
 0x62b   : > { %v4344_v18 = vadd.f32 %v4343_v0, %v4082_v34  ;;  %vm3829_vm9 = vcmp.eq.s32.totalorder %v10303_v1, %v11908_v8  ;;  %v4084_v10 = vsel %vm3828_vm6, %v15359_v2, 0.0  ;;  %v4062_v32 = vsel %vm3806_vm7, %v15360_v3, 0.0  ;;  %v15363_v2 = vld [vmem:[#allocation73_spill] sm:$0xff] }
 0x62c   : > { %vm3808_vm12 = vcmp.eq.s32.totalorder %v9757_v56, %v11993_v58  ;;  %v4323_v0 = vadd.f32 %v4322_v24, %v4062_v32  ;;  %vm3834_vm13 = vcmp.eq.s32.totalorder %v9556_v37, %v12066_v44  ;;  %vm3835_vm14 = vcmp.eq.s32.totalorder %v9559_v52, %v12066_v44 }
 0x62d   : > { %v4345_v26 = vadd.f32 %v4344_v18, %v4083_v5  ;;  %v4057_v38 = vsel %vm3801_vm2, %v10966_v22, 0.0  ;;  %vm3830_vm0 = vcmp.eq.s32.totalorder %v10583_v49, %v11908_v8  ;;  %v15361_v5 = vld [vmem:[#allocation71_spill] sm:$0xff]  ;;  %v4314_v34 = vadd.f32 %v4313_v29, %v4054_v53  ;;  %v15366_v53 = vld [vmem:[#allocation249_spill] sm:$0xff] }
 0x62e   : > { %v4063_v14 = vsel %vm3807_vm11, %v15361_v5, 0.0  ;;  %v4085_v32 = vsel %vm3829_vm9, %v15362_v61, 0.0  ;;  %vm3809_vm10 = vcmp.eq.s32.totalorder %v9775_v33, %v11993_v58  ;;  %v4064_v25 = vsel %vm3808_vm12, %v15363_v2, 0.0 }
 0x62f   : > { %v4346_v11 = vadd.f32 %v4345_v26, %v4084_v10  ;;  %v4324_v18 = vadd.f32 %v4323_v0, %v4063_v14  ;;  %v4090_v3 = vsel %vm3834_vm13, %v15364_v48, 0.0  ;;  %v4091_v22 = vsel %vm3835_vm14, %v15365_v62, 0.0  ;;  %v15367_v10 = vld [vmem:[#allocation75_spill] sm:$0xff] }
 0x630   : > { %vm3831_vm15 = vcmp.eq.s32.totalorder %v10597_v45, %v11908_v8  ;;  %vm3810_vm2 = vcmp.eq.s32.totalorder %v10196_v13, %v11993_v58  ;;  %vm3836_vm3 = vcmp.eq.s32.totalorder %v9564_v30, %v12066_v44  ;;  %v4086_v29 = vsel %vm3830_vm0, %v15366_v53, 0.0  ;;  %v15369_v53 = vld [vmem:[#allocation35_spill] sm:$0xff] }
 0x631   : > { %v4347_v24 = vadd.f32 %v4346_v11, %v4085_v32  ;;  %v4325_v26 = vadd.f32 %v4324_v18, %v4064_v25  ;;  %vm3811_vm4 = vcmp.eq.s32.totalorder %v10199_v31, %v11993_v58  ;;  %vm3837_vm5 = vcmp.eq.s32.totalorder %v9593_v57, %v12066_v44  ;;  %v15368_v18 = vld [vmem:[#allocation134_spill] sm:$0xff] }
 0x632   : > { %v4315_v0 = vadd.f32 %v4314_v34, %v4055_v17  ;;  %v4354_v25 = vadd.f32 %v4091_v22, %v4090_v3  ;;  %vm3832_vm8 = vcmp.eq.s32.totalorder %v10621_v12, %v11908_v8  ;;  %v4087_v32 = vsel %vm3831_vm15, %v11003_v7, 0.0  ;;  %v15370_v3 = vld [vmem:[#allocation135_spill] sm:$0xff] }
 0x633   : > { %v4348_v11 = vadd.f32 %v4347_v24, %v4086_v29  ;;  %v4066_v61 = vsel %vm3810_vm2, %v15368_v18, 0.0  ;;  %v4092_v62 = vsel %vm3836_vm3, %v15369_v53, 0.0  ;;  %vm3812_vm6 = vcmp.eq.s32.totalorder %v10270_v39, %v11993_v58 }
 0x634   : > { %vm3838_vm7 = vcmp.eq.s32.totalorder %v15250_v50, %v12066_v44  ;;  %v4355_v17 = vadd.f32 %v4354_v25, %v4092_v62  ;;  %vm3813_vm11 = vcmp.eq.s32.totalorder %v10303_v1, %v11993_v58  ;;  %v4067_v22 = vsel %vm3811_vm4, %v15370_v3, 0.0  ;;  %v15373_v25 = vld [vmem:[#allocation78_spill] sm:$0xff] }
 0x635   : > { %4233 = vadd.xlane.f32.xlu0 %v11953_v42  ;;  %v4065_v42 = vsel %vm3809_vm10, %v15367_v10, 0.0  ;;  %vm3839_vm9 = vcmp.eq.s32.totalorder %v15252_v16, %v12066_v44  ;;  %v4349_v24 = vadd.f32 %v4348_v11, %v4087_v32  ;;  %vm3833_vm12 = vcmp.eq.s32.totalorder %v10673_v20, %v11908_v8 }
 0x636   : > { %v4326_v14 = vadd.f32 %v4325_v26, %v4065_v42  ;;  %v4088_v29 = vsel %vm3832_vm8, %v11037_v28, 0.0  ;;  %v15372_v42 = vld [vmem:[#allocation137_spill] sm:$0xff]  ;;  %v4094_v7 = vsel %vm3838_vm7, %v15373_v25, 0.0  ;;  %vm3814_vm13 = vcmp.eq.s32.totalorder %v10583_v49, %v11993_v58 }
 0x637   : > { %vm3840_vm14 = vcmp.eq.s32.totalorder %v9757_v56, %v12066_v44  ;;  %vm3815_vm0 = vcmp.eq.s32.totalorder %v10597_v45, %v11993_v58  ;;  %vm3841_vm10 = vcmp.eq.s32.totalorder %v9775_v33, %v12066_v44  ;;  %v15377_v28 = vld [vmem:[#allocation81_spill] sm:$0xff]  ;;  %vm3816_vm15 = vcmp.eq.s32.totalorder %v10621_v12, %v11993_v58 }
 0x638   : > { %v4327_v48 = vadd.f32 %v4326_v14, %v4066_v61  ;;  %v4316_v61 = vadd.f32 %v4315_v0, %v4056_v41  ;;  %v4068_v14 = vsel %vm3812_vm6, %v15372_v42, 0.0  ;;  %v15374_v0 = vld [vmem:[#allocation139_spill] sm:$0xff]  ;;  %v4096_v25 = vsel %vm3840_vm14, %v15377_v28, 0.0 }
 0x639   : > { %4267 = vadd.xlane.f32.xlu0 %v11989_v4  ;;  %v15371_v4 = vld [vmem:[#allocation36_spill] sm:$0xff]  ;;  %v4069_v11 = vsel %vm3813_vm11, %v15374_v0, 0.0  ;;  %vm3842_vm2 = vcmp.eq.s32.totalorder %v10196_v13, %v12066_v44  ;;  %vm3817_vm3 = vcmp.eq.s32.totalorder %v10673_v20, %v11993_v58  ;;  %vm3843_vm4 = vcmp.eq.s32.totalorder %v10199_v31, %v12066_v44 }
 0x63a   : > { %v4093_v34 = vsel %vm3837_vm5, %v15371_v4, 0.0  ;;  %v4328_v26 = vadd.f32 %v4327_v48, %v4067_v22  ;;  %v4350_v22 = vadd.f32 %v4349_v24, %v4088_v29  ;;  %vm3844_vm5 = vcmp.eq.s32.totalorder %v10270_v39, %v12066_v44 }
 0x63b   : > { %v4356_v62 = vadd.f32 %v4355_v17, %v4093_v34  ;;  %v4317_v17 = vadd.f32 %v4316_v61, %v4057_v38  ;;  %v15379_v61 = vld [vmem:[#allocation83_spill] sm:$0xff]  ;;  %vm3845_vm8 = vcmp.eq.s32.totalorder %v10303_v1, %v12066_v44  ;;  %vm3846_vm6 = vcmp.eq.s32.totalorder %v10583_v49, %v12066_v44 }
 0x63c   : > { %v4329_v41 = vadd.f32 %v4328_v26, %v4068_v14  ;;  %v4300_v26 = vadd.f32 %v12009_v47, %v12006_v36  ;;  %v15378_v36 = vld [vmem:[#allocation247_spill] sm:$0xff]  ;;  %v4097_v24 = vsel %vm3841_vm10, %v15379_v61, 0.0  ;;  %vm3847_vm7 = vcmp.eq.s32.totalorder %v10597_v45, %v12066_v44 }
 0x63d   : > { %4284 = vadd.xlane.f32.xlu0 %v11995_v19  ;;  %v4357_v48 = vadd.f32 %v4356_v62, %v4094_v7  ;;  %v15375_v19 = vld [vmem:[#allocation79_spill] sm:$0xff]  ;;  %v15376_v62 = vld [vmem:[#allocation246_spill] sm:$0xff]  ;;  %v4071_v47 = vsel %vm3815_vm0, %v15378_v36, 0.0  ;;  %vm3848_vm11 = vcmp.eq.s32.totalorder %v10621_v12, %v12066_v44 }
 0x63e   : > { %v4095_v32 = vsel %vm3839_vm9, %v15375_v19, 0.0  ;;  %v4330_v34 = vadd.f32 %v4329_v41, %v4069_v11  ;;  %v4070_v14 = vsel %vm3814_vm13, %v15376_v62, 0.0  ;;  %v4072_v41 = vsel %vm3816_vm15, %v10988_v51, 0.0 }
 0x63f   : > { %v4358_v7 = vadd.f32 %v4357_v48, %v4095_v32  ;;  %v15380_v48 = vld [vmem:[#allocation142_spill] sm:$0xff]  ;;  %vm3849_vm9 = vcmp.eq.s32.totalorder %v10673_v20, %v12066_v44  ;;  %v15399_v44 = vld [vmem:[#allocation164_spill] sm:$0xff] }
 0x640   : > { %4250 = vadd.xlane.f32.xlu1 %v11978_v27  ;;  %v4331_v4 = vadd.f32 %v4330_v34, %v4070_v14  ;;  %v4089_v27 = vsel %vm3833_vm12, %v11055_v15, 0.0  ;;  %v4098_v11 = vsel %vm3842_vm2, %v15380_v48, 0.0  ;;  %v15381_v34 = vld [vmem:[#allocation143_spill] sm:$0xff]  ;;  %v15396_v48 = vld [vmem:[#allocation300_spill] sm:$0xff] }
 0x641   : > { %4318 = vadd.xlane.f32.xlu0 %v4317_v17  ;;  %v4359_v38 = vadd.f32 %v4358_v7, %v4096_v25  ;;  %v4351_v29 = vadd.f32 %v4350_v22, %v4089_v27  ;;  %v4073_v17 = vsel %vm3817_vm3, %v11033_v59, 0.0  ;;  %v4099_v22 = vsel %vm3843_vm4, %v15381_v34, 0.0  ;;  %v15383_v27 = vld [vmem:[#allocation147_spill] sm:$0xff] }
 0x642   : > { %v4332_v25 = vadd.f32 %v4331_v4, %v4071_v47  ;;  %v4101_v47 = vsel %vm3845_vm8, %v15383_v27, 0.0  ;;  %v15393_v27 = vld [vmem:[#allocation298_spill] sm:$0xff]  ;;  %v15395_v34 = vld [vmem:[#allocation299_spill] sm:$0xff] }
 0x643   : > { %v4360_v8 = vadd.f32 %v4359_v38, %v4097_v24 }
 0x644   : > { %4301 = vadd.xlane.f32.xlu1 %v4300_v26  ;;  %v4333_v32 = vadd.f32 %v4332_v25, %v4072_v41  ;;  %v15382_v26 = vld [vmem:[#allocation145_spill] sm:$0xff]  ;;  %v4103_v41 = vsel %vm3847_vm7, %v11069_v6, 0.0 }
 0x645   : > { %4352 = vadd.xlane.f32.xlu0 %v4351_v29  ;;  %v4361_v58 = vadd.f32 %v4360_v8, %v4098_v11  ;;  %v4100_v14 = vsel %vm3844_vm5, %v15382_v26, 0.0  ;;  %v15384_v29 = vld [vmem:[#allocation254_spill] sm:$0xff]  ;;  %v15385_v11 = vld [vmem:[#allocation293_spill] sm:$0xff] }
 0x646   : > { %v4334_v4 = vadd.f32 %v4333_v32, %v4073_v17  ;;  %v4102_v25 = vsel %vm3846_vm6, %v15384_v29, 0.0  ;;  %v15386_v32 = vld [vmem:[#allocation295_spill] sm:$0xff]  ;;  %v15392_v29 = vld [vmem:[#allocation297_spill] sm:$0xff]  ;;  %v4910_v6 = vpop.permute.xlu0 %4909 }
 0x647   : > { %v4362_v7 = vadd.f32 %v4361_v58, %v4099_v22  ;;  %v15387_v58 = vsub.f32 %v15385_v11, %v15386_v32  ;;  %v15394_v26 = vsub.f32 %v15392_v29, %v15393_v27  ;;  %v15397_v11 = vsub.f32 %v15395_v34, %v15396_v48  ;;  %v15404_v27 = vld [vmem:[#allocation174_spill] sm:$0xff]  ;;  %v15406_v34 = vld [vmem:[#allocation217_spill] sm:$0xff] }
 0x648   : > { %4335 = vadd.xlane.f32.xlu1 %v4334_v4  ;;  %v15388_v4 = vld [vmem:[#allocation294_spill] sm:$0xff]  ;;  %v4991_v29 = vsub.f32 %v15406_v34, %v4910_v6 }
 0x649   : > { %v4363_v38 = vadd.f32 %v4362_v7, %v4100_v14  ;;  %v4843_v17 = vmul.f32 1.442695, %v15387_v58  ;;  %v15389_v7 = vld [vmem:[#allocation296_spill] sm:$0xff]  ;;  %v4849_v32 = vmul.f32 1.442695, %v15397_v11 }
 0x64a   : > { %v15390_v14 = vsub.f32 %v15388_v4, %v15389_v7  ;;  %v15398_v58 = vld [vmem:[#allocation260_spill] sm:$0xff]  ;;  %v15401_v4 = vld [vmem:[#allocation301_spill] sm:$0xff]  ;;  %v15402_v7 = vld [vmem:[#allocation303_spill] sm:$0xff]  ;;  %v5251_v34 = vmul.f32 1.442695, %v4991_v29 }
 0x64b   : > { %v4364_v24 = vadd.f32 %v4363_v38, %v4101_v47  ;;  %v15391_v47 = vld [vmem:[#allocation257_spill] sm:$0xff]  ;;  %v4105_v61 = vsel %vm3849_vm9, %v15398_v58, 0.0  ;;  %7420 = vpow2.f32 %v4843_v17 }
 0x64c   : > { %v4845_v38 = vmul.f32 1.442695, %v15390_v14  ;;  %v4104_v15 = vsel %vm3848_vm11, %v15391_v47, 0.0  ;;  %v15403_v14 = vsub.f32 %v15401_v4, %v15402_v7  ;;  %v15408_v58 = vld [vmem:[#allocation305_spill] sm:$0xff]  ;;  %v15409_v4 = vld [vmem:[#allocation192_spill] sm:$0xff] }
 0x64d   : > { %v4365_v8 = vadd.f32 %v4364_v24, %v4102_v25  ;;  %v4847_v24 = vmul.f32 1.442695, %v15394_v26  ;;  %v4989_v26 = vsub.f32 %v15404_v27, %v4910_v6  ;;  %v15410_v7 = vsub.f32 %v15408_v58, %v15409_v4 }
 0x64e   : > { %v4851_v47 = vmul.f32 1.442695, %v15403_v14  ;;  %7422 = vpow2.f32 %v4845_v38  ;;  %v15412_v38 = vld [vmem:[#allocation55_spill] sm:$0xff]  ;;  %v4999_v58 = vsub.f32 %v15312_v21, %v4910_v6  ;;  %v5001_v4 = vsub.f32 %v15324_v43, %v4910_v6 }
 0x64f   : > { %v4366_v22 = vadd.f32 %v4365_v8, %v4103_v41  ;;  %v4987_v8 = vsub.f32 %v15399_v44, %v4910_v6  ;;  %v15400_v41 = vld [vmem:[#allocation165_spill] sm:$0xff]  ;;  %7424 = vpow2.f32 %v4847_v24  ;;  %v15407_v44 = vld [vmem:[#allocation222_spill] sm:$0xff] }
 0x650   : > { %v4988_v28 = vsub.f32 %v15400_v41, %v4910_v6  ;;  %7426 = vpow2.f32 %v4849_v32  ;;  %v4992_v17 = vsub.f32 %v15407_v44, %v4910_v6  ;;  %v5247_v41 = vmul.f32 1.442695, %v4989_v26  ;;  %v15413_v24 = vld [vmem:[#allocation110_spill] sm:$0xff] }
 0x651   : > { %v4367_v25 = vadd.f32 %v4366_v22, %v4104_v15  ;;  %v15405_v15 = vld [vmem:[#allocation182_spill] sm:$0xff]  ;;  %v5243_v22 = vmul.f32 1.442695, %v4987_v8  ;;  %7428 = vpow2.f32 %v4851_v47  ;;  %v4995_v27 = vsub.f32 %v15413_v24, %v4910_v6  ;;  %v15420_v24 = vld [vmem:[#allocation169_spill] sm:$0xff] }
 0x652   : > { %v4990_v48 = vsub.f32 %v15405_v15, %v4910_v6  ;;  %v5245_v11 = vmul.f32 1.442695, %v4988_v28  ;;  %v12240_v15 = vpop.permute.xlu1 %4914  ;;  %v15414_v28 = vld [vmem:[#allocation111_spill] sm:$0xff]  ;;  %v4997_v8 = vsub.f32 %v15300_v9, %v4910_v6  ;;  %v4998_v26 = vsub.f32 %v15306_v46, %v4910_v6 }
 0x653   : > { %v4368_v19 = vadd.f32 %v4367_v25, %v4105_v61  ;;  %v4855_v61 = vmul.f32 1.442695, %v15410_v7  ;;  %v15411_v25 = vld [vmem:[#allocation53_spill] sm:$0xff]  ;;  %7430 = vpow2.f32 %v5243_v22  ;;  %v4996_v47 = vsub.f32 %v15414_v28, %v4910_v6  ;;  %v15416_v46 = vld [vmem:[#allocation167_spill] sm:$0xff] }
 0x654   : > { %v4993_v14 = vsub.f32 %v15411_v25, %v4910_v6  ;;  %7432 = vpow2.f32 %v5245_v11  ;;  %v5249_v32 = vmul.f32 1.442695, %v4990_v48  ;;  %v5000_v44 = vsub.f32 %v15316_v55, %v4910_v6  ;;  %v12251_v25 = vpop.permute.xlu0 %4919 }
 0x655   : > { %4369 = vadd.xlane.f32.xlu1 %v4368_v19  ;;  %v4994_v19 = vsub.f32 %v15412_v38, %v4910_v6  ;;  %7434 = vpow2.f32 %v5247_v41  ;;  %v5253_v22 = vmul.f32 1.442695, %v4992_v17  ;;  %v5002_v48 = vsub.f32 %v15329_v63, %v4910_v6  ;;  %v12249_v7 = vpop.eup %7420 }
 0x656   : > { %7436 = vpow2.f32 %v4855_v61  ;;  %v5255_v11 = vmul.f32 1.442695, %v4993_v14  ;;  %15415 = vst [vmem:[#allocation234_spill] sm:$0xff] %v12249_v7  ;;  %v5259_v55 = vmul.f32 1.442695, %v4995_v27  ;;  %v15422_v27 = vld [vmem:[#allocation170_spill] sm:$0xff] }
 0x657   : > { %7438 = vpow2.f32 %v5249_v32  ;;  %v5257_v9 = vmul.f32 1.442695, %v4994_v19  ;;  %v5261_v17 = vmul.f32 1.442695, %v4996_v47  ;;  %v5263_v41 = vmul.f32 1.442695, %v4997_v8 }
 0x658   : > { %v12255_v21 = vpop.eup %7422  ;;  %7440 = vpow2.f32 %v5251_v34  ;;  %v5265_v6 = vmul.f32 1.442695, %v4998_v26  ;;  %v5267_v43 = vmul.f32 1.442695, %v4999_v58  ;;  %v5269_v63 = vmul.f32 1.442695, %v5000_v44 }
 0x659   : > { %15417 = vst [vmem:[#allocation293_spill] sm:$0xff] %v12255_v21  ;;  %v12257_v61 = vpop.eup %7424  ;;  %7442 = vpow2.f32 %v5253_v22  ;;  %v5271_v38 = vmul.f32 1.442695, %v5001_v4  ;;  %v5273_v19 = vmul.f32 1.442695, %v5002_v48  ;;  %v5019_v32 = vsub.f32 %v15420_v24, %v12251_v25  ;;  %v15423_v8 = vld [vmem:[#allocation178_spill] sm:$0xff] }
 0x65a   : > { %15418 = vst [vmem:[#allocation295_spill] sm:$0xff] %v12257_v61  ;;  %v12259_v14 = vpop.eup %7426  ;;  %7444 = vpow2.f32 %v5255_v11  ;;  %v5020_v47 = vsub.f32 %v15422_v27, %v12251_v25  ;;  %v5021_v34 = vsub.f32 %v15423_v8, %v12251_v25  ;;  %v15424_v26 = vld [vmem:[#allocation188_spill] sm:$0xff]  ;;  %v15425_v22 = vld [vmem:[#allocation219_spill] sm:$0xff]  ;;  %v15426_v48 = vld [vmem:[#allocation58_spill] sm:$0xff] }
 0x65b   : > { %15419 = vst [vmem:[#allocation294_spill] sm:$0xff] %v12259_v14  ;;  %v12263_v28 = vpop.eup %7428  ;;  %7446 = vpow2.f32 %v5257_v9  ;;  %v5022_v58 = vsub.f32 %v15424_v26, %v12251_v25  ;;  %v5023_v4 = vsub.f32 %v15425_v22, %v12251_v25  ;;  %v5024_v11 = vsub.f32 %v15426_v48, %v12251_v25  ;;  %v15427_v24 = vld [vmem:[#allocation59_spill] sm:$0xff]  ;;  %v15428_v27 = vld [vmem:[#allocation61_spill] sm:$0xff]  ;;  %v15429_v8 = vld [vmem:[#allocation118_spill] sm:$0xff] }
 0x65c   : > { %15421 = vst [vmem:[#allocation296_spill] sm:$0xff] %v12263_v28  ;;  %7448 = vpow2.f32 %v5259_v55  ;;  %v5025_v9 = vsub.f32 %v15427_v24, %v12251_v25  ;;  %v5026_v14 = vsub.f32 %v15428_v27, %v12251_v25  ;;  %v5027_v28 = vsub.f32 %v15429_v8, %v12251_v25  ;;  %v15430_v22 = vld [vmem:[#allocation121_spill] sm:$0xff]  ;;  %v15431_v24 = vld [vmem:[#allocation123_spill] sm:$0xff]  ;;  %v15432_v7 = vld [vmem:[#allocation232_spill] sm:$0xff] }
 0x65d   : > { %v7431_v44 = vpop.eup %7430  ;;  %7450 = vpow2.f32 %v5261_v17  ;;  %v5028_v55 = vsub.f32 %v15296_v35, %v12251_v25  ;;  %v5029_v21 = vsub.f32 %v15430_v22, %v12251_v25  ;;  %v5307_v48 = vmul.f32 1.442695, %v5019_v32  ;;  %v15434_v35 = vld [vmem:[#allocation233_spill] sm:$0xff] }
 0x65e   : > { %v7433_v29 = vpop.eup %7432  ;;  %7452 = vpow2.f32 %v5263_v41  ;;  %v5030_v17 = vsub.f32 %v15431_v24, %v12251_v25  ;;  %v5031_v27 = vsub.f32 %v15432_v7, %v12251_v25  ;;  %v5309_v53 = vmul.f32 1.442695, %v5020_v47 }
 0x65f   : > { %v5755_v26 = vadd.f32 %v7433_v29, %v7431_v44  ;;  %v7435_v61 = vpop.eup %7434  ;;  %7454 = vpow2.f32 %v5265_v6  ;;  %v5032_v29 = vsub.f32 %v15434_v35, %v12251_v25  ;;  %v5033_v41 = vsub.f32 %v15332_v40, %v12251_v25 }
 0x660   : > { %v12289_v59 = vpop.eup %7436  ;;  %7456 = vpow2.f32 %v5267_v43  ;;  %v5034_v6 = vsub.f32 %v10852_v54, %v12251_v25  ;;  %v5311_v44 = vmul.f32 1.442695, %v5021_v34  ;;  %v5313_v22 = vmul.f32 1.442695, %v5022_v58 }
 0x661   : > { %15433 = vst [vmem:[#allocation297_spill] sm:$0xff] %v12289_v59  ;;  %v5756_v8 = vadd.f32 %v7435_v61, %v5755_v26  ;;  %v7439_v32 = vpop.eup %7438  ;;  %7458 = vpow2.f32 %v5269_v63  ;;  %v5315_v47 = vmul.f32 1.442695, %v5023_v4  ;;  %v5317_v59 = vmul.f32 1.442695, %v5024_v11 }
 0x662   : > { %v7441_v24 = vpop.eup %7440  ;;  %7460 = vpow2.f32 %v5307_v48  ;;  %v5319_v61 = vmul.f32 1.442695, %v5025_v9  ;;  %v5321_v26 = vmul.f32 1.442695, %v5026_v14  ;;  %v5323_v35 = vmul.f32 1.442695, %v5027_v28 }
 0x663   : > { %v5757_v7 = vadd.f32 %v7439_v32, %v5756_v8  ;;  %v7443_v43 = vpop.eup %7442  ;;  %7462 = vpow2.f32 %v5309_v53  ;;  %v5325_v36 = vmul.f32 1.442695, %v5028_v55  ;;  %v5327_v63 = vmul.f32 1.442695, %v5029_v21  ;;  %v15436_v21 = vld [vmem:[#allocation175_spill] sm:$0xff]  ;;  %v15437_v55 = vld [vmem:[#allocation190_spill] sm:$0xff] }
 0x664   : > { %v7445_v51 = vpop.eup %7444  ;;  %7464 = vpow2.f32 %v5271_v38  ;;  %v5329_v54 = vmul.f32 1.442695, %v5030_v17  ;;  %v5331_v25 = vmul.f32 1.442695, %v5031_v27  ;;  %v12297_v34 = vmul.f32 1.442695, %v5032_v29 }
 0x665   : > { %v5758_v40 = vadd.f32 %v7441_v24, %v5757_v7  ;;  %v7447_v62 = vpop.eup %7446  ;;  %7466 = vpow2.f32 %v5311_v44  ;;  %v12299_v11 = vmul.f32 1.442695, %v5033_v41  ;;  %v12301_v53 = vmul.f32 1.442695, %v5034_v6  ;;  %v15435_v38 = vld [vmem:[#allocation168_spill] sm:$0xff]  ;;  %v15439_v29 = vld [vmem:[#allocation54_spill] sm:$0xff] }
 0x666   : > { %v7449_v58 = vpop.eup %7448  ;;  %7468 = vpow2.f32 %v5273_v19  ;;  %v5004_v28 = vsub.f32 %v15435_v38, %v12240_v15  ;;  %v5005_v9 = vsub.f32 %v15436_v21, %v12240_v15  ;;  %v5006_v48 = vsub.f32 %v15437_v55, %v12240_v15  ;;  %v15438_v19 = vld [vmem:[#allocation218_spill] sm:$0xff]  ;;  %v15440_v32 = vld [vmem:[#allocation56_spill] sm:$0xff] }
 0x667   : > { %v5759_v4 = vadd.f32 %v7443_v43, %v5758_v40  ;;  %v7451_v14 = vpop.eup %7450  ;;  %7470 = vpow2.f32 %v5313_v22  ;;  %v5007_v8 = vsub.f32 %v15438_v19, %v12240_v15  ;;  %v5008_v41 = vsub.f32 %v15439_v29, %v12240_v15  ;;  %v15441_v22 = vld [vmem:[#allocation57_spill] sm:$0xff]  ;;  %v15442_v7 = vld [vmem:[#allocation112_spill] sm:$0xff]  ;;  %v15443_v40 = vld [vmem:[#allocation114_spill] sm:$0xff] }
 0x668   : > { %v7453_v17 = vpop.eup %7452  ;;  %v5009_v6 = vsub.f32 %v15440_v32, %v12240_v15  ;;  %7472 = vpow2.f32 %v5315_v47  ;;  %v5010_v24 = vsub.f32 %v15441_v22, %v12240_v15  ;;  %v5011_v43 = vsub.f32 %v15442_v7, %v12240_v15  ;;  %v15444_v21 = vld [vmem:[#allocation116_spill] sm:$0xff]  ;;  %v15445_v19 = vld [vmem:[#allocation117_spill] sm:$0xff]  ;;  %v15446_v47 = vld [vmem:[#allocation227_spill] sm:$0xff] }
 0x669   : > { %v5760_v27 = vadd.f32 %v7445_v51, %v5759_v4  ;;  %v7455_v44 = vpop.eup %7454  ;;  %v5012_v51 = vsub.f32 %v15443_v40, %v12240_v15  ;;  %7474 = vpow2.f32 %v5317_v59  ;;  %v5013_v55 = vsub.f32 %v15444_v21, %v12240_v15  ;;  %v15447_v7 = vld [vmem:[#allocation228_spill] sm:$0xff]  ;;  %v15448_v40 = vld [vmem:[#allocation230_spill] sm:$0xff] }
 0x66a   : > { %v7457_v4 = vpop.eup %7456  ;;  %v5014_v29 = vsub.f32 %v15445_v19, %v12240_v15  ;;  %7476 = vpow2.f32 %v5319_v61  ;;  %v5015_v22 = vsub.f32 %v15446_v47, %v12240_v15  ;;  %v5016_v0 = vsub.f32 %v15447_v7, %v12240_v15 }
 0x66b   : > { %v5761_v38 = vadd.f32 %v7447_v62, %v5760_v27  ;;  %v12325_v32 = vpop.eup %7458  ;;  %v5017_v42 = vsub.f32 %v15448_v40, %v12240_v15  ;;  %7478 = vpow2.f32 %v5321_v26  ;;  %v15449_v27 = vld [vmem:[#allocation231_spill] sm:$0xff]  ;;  %v15450_v19 = vsub.f32 %v15416_v46, %v12240_v15 }
 0x66c   : > { %v7461_v62 = vpop.eup %7460  ;;  %v5018_v21 = vsub.f32 %v15449_v27, %v12240_v15  ;;  %7480 = vpow2.f32 %v5323_v35  ;;  %v5277_v18 = vmul.f32 1.442695, %v5004_v28  ;;  %v5279_v47 = vmul.f32 1.442695, %v5005_v9  ;;  %v15454_v27 = vld [vmem:[#allocation185_spill] sm:$0xff] }
 0x66d   : > { %v5762_v59 = vadd.f32 %v7449_v58, %v5761_v38  ;;  %v5275_v3 = vmul.f32 1.442695, %v15450_v19  ;;  %v7463_v61 = vpop.eup %7462  ;;  %v5281_v10 = vmul.f32 1.442695, %v5006_v48  ;;  %7482 = vpow2.f32 %v5325_v36  ;;  %v12342_v58 = vpop.permute.xlu0 %4929 }
 0x66e   : > { %v12338_v2 = vpop.eup %7464  ;;  %v5789_v40 = vadd.f32 %v7463_v61, %v7461_v62  ;;  %v12340_v5 = vmul.f32 1.442695, %v5007_v8  ;;  %7484 = vpow2.f32 %v5327_v63  ;;  %v12344_v38 = vmul.f32 1.442695, %v5008_v41  ;;  %v12360_v41 = vpop.permute.xlu1 %4924 }
 0x66f   : > { %v5763_v7 = vadd.f32 %v7451_v14, %v5762_v59  ;;  %v7467_v26 = vpop.eup %7466  ;;  %v12346_v15 = vmul.f32 1.442695, %v5009_v6  ;;  %v12348_v46 = vmul.f32 1.442695, %v5010_v24  ;;  %7486 = vpow2.f32 %v5329_v54  ;;  %15451 = vst [vmem:[#allocation298_spill] sm:$0xff] %v12360_v41 }
 0x670   : > { %v12350_v35 = vpop.eup %7468  ;;  %v5790_v9 = vadd.f32 %v7467_v26, %v5789_v40  ;;  %v12352_v14 = vmul.f32 1.442695, %v5011_v43  ;;  %7488 = vpow2.f32 %v5331_v25  ;;  %v12354_v48 = vmul.f32 1.442695, %v5012_v51 }
 0x671   : > { %v5764_v28 = vadd.f32 %v7453_v17, %v5763_v7  ;;  %v7471_v36 = vpop.eup %7470  ;;  %v12356_v8 = vmul.f32 1.442695, %v5013_v55  ;;  %v12358_v63 = vmul.f32 1.442695, %v5014_v29  ;;  %7490 = vpow2.f32 %v5275_v3  ;;  %v12364_v54 = vpop.permute.xlu0 %4939 }
 0x672   : > { %v5791_v24 = vadd.f32 %v7471_v36, %v5790_v9  ;;  %v12362_v62 = vmul.f32 1.442695, %v5015_v22  ;;  %v7473_v17 = vpop.eup %7472  ;;  %15452 = vst [vmem:[#allocation299_spill] sm:$0xff] %v12364_v54  ;;  %7492 = vpow2.f32 %v5277_v18  ;;  %v12366_v43 = vmul.f32 1.442695, %v5016_v0  ;;  %v15455_v18 = vld [vmem:[#allocation193_spill] sm:$0xff]  ;;  %v12381_v7 = vpop.permute.xlu1 %4934 }
 0x673   : > { %v5765_v6 = vadd.f32 %v7455_v44, %v5764_v28  ;;  %v12368_v25 = vmul.f32 1.442695, %v5017_v42  ;;  %v12370_v51 = vmul.f32 1.442695, %v5018_v21  ;;  %v7475_v55 = vpop.eup %7474  ;;  %7494 = vpow2.f32 %v12297_v34  ;;  %v15453_v44 = vld [vmem:[#allocation184_spill] sm:$0xff]  ;;  %v15456_v42 = vld [vmem:[#allocation195_spill] sm:$0xff] }
 0x674   : > { %v5792_v59 = vadd.f32 %v7473_v17, %v5791_v24  ;;  %v5051_v3 = vsub.f32 %v15453_v44, %v12342_v58  ;;  %v7477_v22 = vpop.eup %7476  ;;  %7496 = vpow2.f32 %v5279_v47  ;;  %v5052_v19 = vsub.f32 %v15454_v27, %v12342_v58  ;;  %15457 = vst [vmem:[#allocation300_spill] sm:$0xff] %v12381_v7  ;;  %v15459_v47 = vld [vmem:[#allocation64_spill] sm:$0xff]  ;;  %v15461_v36 = vld [vmem:[#allocation65_spill] sm:$0xff]  ;;  %v15462_v24 = vld [vmem:[#allocation67_spill] sm:$0xff] }
 0x675   : > { %v5766_v29 = vadd.f32 %v7457_v4, %v5765_v6  ;;  %v5053_v0 = vsub.f32 %v15455_v18, %v12342_v58  ;;  %v5054_v21 = vsub.f32 %v15456_v42, %v12342_v58  ;;  %v7479_v61 = vpop.eup %7478  ;;  %7498 = vpow2.f32 %v12299_v11  ;;  %v15458_v4 = vld [vmem:[#allocation221_spill] sm:$0xff]  ;;  %v12388_v9 = vpop.permute.xlu0 %4949  ;;  %v15463_v11 = vld [vmem:[#allocation126_spill] sm:$0xff]  ;;  %v15464_v18 = vld [vmem:[#allocation127_spill] sm:$0xff] }
 0x676   : > { %v5793_v34 = vadd.f32 %v7475_v55, %v5792_v59  ;;  %v5055_v40 = vsub.f32 %v15458_v4, %v12342_v58  ;;  %v5056_v26 = vsub.f32 %v15459_v47, %v12342_v58  ;;  %v7481_v28 = vpop.eup %7480  ;;  %15460 = vst [vmem:[#allocation164_spill] sm:$0xff] %v12388_v9  ;;  %7500 = vpow2.f32 %v12301_v53  ;;  %v15465_v53 = vld [vmem:[#allocation129_spill] sm:$0xff] }
 0x677   : > { %v5057_v6 = vsub.f32 %v15461_v36, %v12342_v58  ;;  %v5058_v17 = vsub.f32 %v15462_v24, %v12342_v58  ;;  %v5059_v55 = vsub.f32 %v15463_v11, %v12342_v58  ;;  %v7483_v59 = vpop.eup %7482  ;;  %v5767_v44 = vadd.f32 %v12325_v32, %v5766_v29  ;;  %v15466_v36 = vld [vmem:[#allocation131_spill] sm:$0xff]  ;;  %v15467_v24 = vld [vmem:[#allocation238_spill] sm:$0xff]  ;;  %v12408_v32 = vpop.permute.xlu1 %4944 }
 0x678   : > { %v5794_v27 = vadd.f32 %v7477_v22, %v5793_v34  ;;  %7502 = vpow2.f32 %v5281_v10  ;;  %v5060_v42 = vsub.f32 %v15464_v18, %v12342_v58  ;;  %v7485_v4 = vpop.eup %7484  ;;  %v5061_v47 = vsub.f32 %v15465_v53, %v12342_v58  ;;  %15468 = vst [vmem:[#allocation165_spill] sm:$0xff] %v12408_v32  ;;  %v15469_v29 = vld [vmem:[#allocation239_spill] sm:$0xff] }
 0x679   : > { %v5062_v9 = vsub.f32 %v15466_v36, %v12342_v58  ;;  %v5063_v7 = vsub.f32 %v15467_v24, %v12342_v58  ;;  %v5064_v11 = vsub.f32 %v10887_v60, %v12342_v58  ;;  %v7487_v23 = vpop.eup %7486  ;;  %7504 = vpow2.f32 %v12340_v5  ;;  %v15470_v34 = vld [vmem:[#allocation243_spill] sm:$0xff] }
 0x67a   : > { %v5795_v10 = vadd.f32 %v7479_v61, %v5794_v27  ;;  %v5065_v22 = vsub.f32 %v15469_v29, %v12342_v58  ;;  %v5066_v18 = vsub.f32 %v15470_v34, %v12342_v58  ;;  %v12415_v53 = vpop.eup %7488  ;;  %v12417_v36 = vpop.permute.xlu0 %4959  ;;  %7506 = vpow2.f32 %v12344_v38  ;;  %v15472_v32 = vld [vmem:[#allocation171_spill] sm:$0xff] }
 0x67b   : > { %15471 = vst [vmem:[#allocation301_spill] sm:$0xff] %v12417_v36  ;;  %v5371_v24 = vmul.f32 1.442695, %v5051_v3  ;;  %v12420_v60 = vmul.f32 1.442695, %v5052_v19  ;;  %v7491_v27 = vpop.eup %7490  ;;  %v5768_v5 = vadd.f32 %v12338_v2, %v5767_v44  ;;  %7508 = vpow2.f32 %v12346_v15  ;;  %v12435_v19 = vpop.permute.xlu1 %4954 }
 0x67c   : > { %v5796_v54 = vadd.f32 %v7481_v28, %v5795_v10  ;;  %v5375_v29 = vmul.f32 1.442695, %v5053_v0  ;;  %v7493_v58 = vpop.eup %7492  ;;  %7510 = vpow2.f32 %v12348_v46  ;;  %v12427_v34 = vmul.f32 1.442695, %v5054_v21  ;;  %15473 = vst [vmem:[#allocation303_spill] sm:$0xff] %v12435_v19 }
 0x67d   : > { %v12429_v36 = vmul.f32 1.442695, %v5055_v40  ;;  %v12431_v38 = vmul.f32 1.442695, %v5056_v26  ;;  %v12433_v3 = vpop.eup %7494  ;;  %7512 = vpow2.f32 %v12352_v14  ;;  %v5772_v2 = vadd.f32 %v7493_v58, %v7491_v27 }
 0x67e   : > { %v5797_v61 = vadd.f32 %v7483_v59, %v5796_v54  ;;  %v12438_v28 = vmul.f32 1.442695, %v5057_v6  ;;  %v7497_v15 = vpop.eup %7496  ;;  %7514 = vpow2.f32 %v12354_v48  ;;  %v12443_v46 = vmul.f32 1.442695, %v5058_v17 }
 0x67f   : > { %v12445_v21 = vmul.f32 1.442695, %v5059_v55  ;;  %v12447_v40 = vmul.f32 1.442695, %v5060_v42  ;;  %v12449_v26 = vpop.eup %7498  ;;  %v12452_v54 = vadd.f32 %v12350_v35, %v5768_v5  ;;  %7516 = vpow2.f32 %v12356_v8  ;;  %v12464_v42 = vpop.permute.xlu1 %4964 }
 0x680   : > { %v5798_v14 = vadd.f32 %v7485_v4, %v5797_v61  ;;  %v5773_v6 = vadd.f32 %v7497_v15, %v5772_v2  ;;  %v12455_v59 = vpop.eup %7500  ;;  %7518 = vpow2.f32 %v12358_v63  ;;  %v12458_v48 = vmul.f32 1.442695, %v5061_v47  ;;  %15479 = vst [vmem:[#allocation192_spill] sm:$0xff] %v12464_v42  ;;  %v15489_v2 = vld [vmem:[#allocation62_spill] sm:$0xff] }
 0x681   : > { %15475 = vst [vmem:[#allocation182_spill] sm:$0xff] %v12452_v54  ;;  %15476 = vst [vmem:[#allocation217_spill] sm:$0xff] %v12455_v59  ;;  %v12460_v17 = vmul.f32 1.442695, %v5062_v9  ;;  %v12462_v55 = vmul.f32 1.442695, %v5063_v7  ;;  %7520 = vpow2.f32 %v12362_v62  ;;  %v5041_v15 = vsub.f32 %v15489_v2, %v12360_v41 }
 0x682   : > { %v12440_v0 = vpop.permute.xlu0 %4969  ;;  %v7503_v44 = vpop.eup %7502  ;;  %v12467_v35 = vmul.f32 1.442695, %v5064_v11  ;;  %v12469_v4 = vmul.f32 1.442695, %v5065_v22  ;;  %v12471_v8 = vmul.f32 1.442695, %v5066_v18  ;;  %v5799_v63 = vadd.f32 %v7487_v23, %v5798_v14 }
 0x683   : > { %15474 = vst [vmem:[#allocation174_spill] sm:$0xff] %v12440_v0  ;;  %15477 = vst [vmem:[#allocation222_spill] sm:$0xff] %v12460_v17  ;;  %7522 = vpow2.f32 %v12366_v43  ;;  %v5774_v9 = vadd.f32 %v7503_v44, %v5773_v6  ;;  %v15484_v7 = vld [vmem:[#allocation172_spill] sm:$0xff]  ;;  %v7505_v61 = vpop.eup %7504  ;;  %v15485_v62 = vld [vmem:[#allocation179_spill] sm:$0xff] }
 0x684   : > { %15478 = vst [vmem:[#allocation305_spill] sm:$0xff] %v12462_v55  ;;  %15480 = vst [vmem:[#allocation53_spill] sm:$0xff] %v12467_v35  ;;  %v5036_v47 = vsub.f32 %v15484_v7, %v12360_v41  ;;  %7524 = vpow2.f32 %v12368_v25  ;;  %v5037_v11 = vsub.f32 %v15485_v62, %v12360_v41  ;;  %v15486_v22 = vld [vmem:[#allocation189_spill] sm:$0xff]  ;;  %v15487_v18 = vld [vmem:[#allocation220_spill] sm:$0xff]  ;;  %v7507_v58 = vpop.eup %7506  ;;  %v12494_v44 = vpop.permute.xlu1 %4974 }
 0x685   : > { %15481 = vst [vmem:[#allocation55_spill] sm:$0xff] %v12469_v4  ;;  %15482 = vst [vmem:[#allocation110_spill] sm:$0xff] %v12471_v8  ;;  %v5038_v27 = vsub.f32 %v15486_v22, %v12360_v41  ;;  %v5039_v5 = vsub.f32 %v15487_v18, %v12360_v41  ;;  %7526 = vpow2.f32 %v12370_v51  ;;  %v15488_v23 = vld [vmem:[#allocation60_spill] sm:$0xff]  ;;  %v15490_v25 = vld [vmem:[#allocation63_spill] sm:$0xff]  ;;  %v12492_v6 = vpop.eup %7508  ;;  %v5775_v42 = vadd.f32 %v7505_v61, %v5774_v9 }
 0x686   : > { %v5040_v43 = vsub.f32 %v15488_v23, %v12360_v41  ;;  %v5042_v14 = vsub.f32 %v15490_v25, %v12360_v41  ;;  %15491 = vst [vmem:[#allocation167_spill] sm:$0xff] %v12494_v44  ;;  %7528 = vpow2.f32 %v5371_v24  ;;  %v5800_v25 = vadd.f32 %v12415_v53, %v5799_v63  ;;  %v15519_v53 = vld [vmem:[#allocation86_spill] sm:$0xff]  ;;  %v15521_v23 = vld [vmem:[#allocation89_spill] sm:$0xff]  ;;  %v15524_v24 = vld [vmem:[#allocation151_spill] sm:$0xff] }
 0x687   : > { %7530 = vpow2.f32 %v12420_v60  ;;  %v15500_v63 = vsub.f32 %v15472_v32, %v12360_v41  ;;  %v12528_v9 = vmul.f32 1.442695, %v5036_v47  ;;  %v12540_v60 = vmul.f32 1.442695, %v5038_v27  ;;  %v15529_v8 = vld [vmem:[#allocation266_spill] sm:$0xff]  ;;  %v15533_v4 = vld [vmem:[#allocation204_spill] sm:$0xff] }
 0x688   : > { %7532 = vpow2.f32 %v5375_v29  ;;  %v12545_v32 = vadd.f32 %v12433_v3, %v5800_v25  ;;  %v12547_v47 = vadd.f32 %v7507_v58, %v5775_v42  ;;  %v12555_v44 = vmul.f32 1.442695, %v5040_v43  ;;  %v15539_v35 = vld [vmem:[#allocation85_spill] sm:$0xff]  ;;  %v15541_v54 = vld [vmem:[#allocation146_spill] sm:$0xff] }
 0x689   : > { %v12473_v10 = vpop.permute.xlu0 %4979  ;;  %7534 = vpow2.f32 %v12427_v34  ;;  %v12526_v29 = vmul.f32 1.442695, %v15500_v63  ;;  %15502 = vst [vmem:[#allocation170_spill] sm:$0xff] %v12528_v9  ;;  %v12538_v34 = vmul.f32 1.442695, %v5037_v11  ;;  %15505 = vst [vmem:[#allocation219_spill] sm:$0xff] %v12540_v60 }
 0x68a   : > { %15483 = vst [vmem:[#allocation111_spill] sm:$0xff] %v12473_v10  ;;  %v12502_v10 = vpop.eup %7510  ;;  %7536 = vpow2.f32 %v12429_v36  ;;  %v12550_v63 = vmul.f32 1.442695, %v5039_v5  ;;  %15509 = vst [vmem:[#allocation118_spill] sm:$0xff] %v12555_v44  ;;  %v12557_v11 = vmul.f32 1.442695, %v5041_v15 }
 0x68b   : > { %v12510_v0 = vpop.eup %7512  ;;  %15501 = vst [vmem:[#allocation169_spill] sm:$0xff] %v12526_v29  ;;  %v12532_v19 = vpop.permute.xlu1 %4984  ;;  %15504 = vst [vmem:[#allocation188_spill] sm:$0xff] %v12538_v34  ;;  %7538 = vpow2.f32 %v12431_v38  ;;  %v12559_v27 = vmul.f32 1.442695, %v5042_v14  ;;  %v15513_v36 = vld [vmem:[#allocation205_spill] sm:$0xff]  ;;  %v15514_v38 = vld [vmem:[#allocation206_spill] sm:$0xff] }
 0x68c   : > { %v12518_v7 = vpop.eup %7514  ;;  %15503 = vst [vmem:[#allocation178_spill] sm:$0xff] %v12532_v19  ;;  %15507 = vst [vmem:[#allocation59_spill] sm:$0xff] %v12550_v63  ;;  %v15528_v60 = vld [vmem:[#allocation265_spill] sm:$0xff]  ;;  %7540 = vpow2.f32 %v12438_v28 }
 0x68d   : > { %v12504_v2 = vpop.permute.xlu0 %3689  ;;  %v12530_v61 = vpop.eup %7516  ;;  %15510 = vst [vmem:[#allocation121_spill] sm:$0xff] %v12557_v11  ;;  %15511 = vst [vmem:[#allocation123_spill] sm:$0xff] %v12559_v27  ;;  %v15520_v27 = vld [vmem:[#allocation87_spill] sm:$0xff]  ;;  %v15530_v34 = vld [vmem:[#allocation269_spill] sm:$0xff]  ;;  %7542 = vpow2.f32 %v12443_v46 }
 0x68e   : > { %vm3866_vm12 = vcmp.eq.s32.totalorder %v9556_v37, %v12504_v2  ;;  %vm3867_vm13 = vcmp.eq.s32.totalorder %v9559_v52, %v12504_v2  ;;  %v12542_v22 = vpop.eup %7518  ;;  %vm3868_vm14 = vcmp.eq.s32.totalorder %v9564_v30, %v12504_v2  ;;  %vm3869_vm0 = vcmp.eq.s32.totalorder %v9593_v57, %v12504_v2  ;;  %v15522_v11 = vld [vmem:[#allocation91_spill] sm:$0xff] }
 0x68f   : > { %15506 = vst [vmem:[#allocation58_spill] sm:$0xff] %v12542_v22  ;;  %v12552_v62 = vpop.eup %7520  ;;  %v4122_v3 = vsel %vm3866_vm12, %v15513_v36, 0.0  ;;  %v4123_v42 = vsel %vm3867_vm13, %v15514_v38, 0.0  ;;  %vm3870_vm10 = vcmp.eq.s32.totalorder %v15250_v50, %v12504_v2  ;;  %vm3871_vm15 = vcmp.eq.s32.totalorder %v15252_v16, %v12504_v2  ;;  %v12597_v15 = vpop.permute.xlu1 %3686  ;;  %v15517_v38 = vld [vmem:[#allocation39_spill] sm:$0xff]  ;;  %v15540_v22 = vld [vmem:[#allocation144_spill] sm:$0xff] }
 0x690   : > { %15508 = vst [vmem:[#allocation61_spill] sm:$0xff] %v12552_v62  ;;  %v12561_v19 = vpop.eup %7522  ;;  %vm3872_vm2 = vcmp.eq.s32.totalorder %v9757_v56, %v12504_v2  ;;  %vm3873_vm3 = vcmp.eq.s32.totalorder %v9775_v33, %v12504_v2  ;;  %vm3874_vm4 = vcmp.eq.s32.totalorder %v10196_v13, %v12504_v2  ;;  %vm3875_vm5 = vcmp.eq.s32.totalorder %v10199_v31, %v12504_v2 }
 0x691   : > { %15512 = vst [vmem:[#allocation232_spill] sm:$0xff] %v12561_v19  ;;  %v12575_v5 = vpop.eup %7524  ;;  %vm3876_vm8 = vcmp.eq.s32.totalorder %v10270_v39, %v12504_v2  ;;  %vm3877_vm6 = vcmp.eq.s32.totalorder %v10303_v1, %v12504_v2  ;;  %vm3878_vm7 = vcmp.eq.s32.totalorder %v10583_v49, %v12504_v2  ;;  %vm3879_vm11 = vcmp.eq.s32.totalorder %v10597_v45, %v12504_v2 }
 0x692   : > { %15515 = vst [vmem:[#allocation233_spill] sm:$0xff] %v12575_v5  ;;  %v12585_v58 = vpop.eup %7526  ;;  %vm3880_vm9 = vcmp.eq.s32.totalorder %v10621_v12, %v12504_v2  ;;  %v4388_v14 = vadd.f32 %v4123_v42, %v4122_v3  ;;  %vm3881_vm12 = vcmp.eq.s32.totalorder %v10673_v20, %v12504_v2  ;;  %v4124_v36 = vsel %vm3868_vm14, %v15517_v38, 0.0 }
 0x693   : > { %15516 = vst [vmem:[#allocation168_spill] sm:$0xff] %v12585_v58  ;;  %v12595_v43 = vpop.eup %7528  ;;  %v15518_v58 = vld [vmem:[#allocation40_spill] sm:$0xff]  ;;  %v4126_v3 = vsel %vm3870_vm10, %v15519_v53, 0.0  ;;  %v4127_v18 = vsel %vm3871_vm15, %v15520_v27, 0.0  ;;  %v4128_v38 = vsel %vm3872_vm2, %v15521_v23, 0.0  ;;  %v15523_v53 = vld [vmem:[#allocation150_spill] sm:$0xff]  ;;  %vm3850_vm13 = vcmp.eq.s32.totalorder %v9556_v37, %v12597_v15 }
 0x694   : > { %v12605_v25 = vpop.eup %7530  ;;  %v4125_v5 = vsel %vm3869_vm0, %v15518_v58, 0.0  ;;  %v4129_v58 = vsel %vm3873_vm3, %v15522_v11, 0.0  ;;  %v4389_v51 = vadd.f32 %v4388_v14, %v4124_v36  ;;  %v4130_v19 = vsel %vm3874_vm4, %v15523_v53, 0.0  ;;  %v15525_v11 = vld [vmem:[#allocation153_spill] sm:$0xff]  ;;  %v15526_v14 = vld [vmem:[#allocation155_spill] sm:$0xff]  ;;  %v15527_v23 = vld [vmem:[#allocation264_spill] sm:$0xff] }
 0x695   : > { %v12621_v42 = vpop.eup %7532  ;;  %v4131_v27 = vsel %vm3875_vm5, %v15524_v24, 0.0  ;;  %vm3851_vm14 = vcmp.eq.s32.totalorder %v9559_v52, %v12597_v15  ;;  %v4132_v36 = vsel %vm3876_vm8, %v15525_v11, 0.0  ;;  %v12657_v53 = vsel %vm3877_vm6, %v15526_v14, 0.0 }
 0x696   : > { %v12635_v44 = vpop.eup %7534  ;;  %v12663_v24 = vsel %vm3878_vm7, %v15527_v23, 0.0  ;;  %v4390_v63 = vadd.f32 %v4389_v51, %v4125_v5  ;;  %v12671_v11 = vsel %vm3879_vm11, %v15528_v60, 0.0  ;;  %v12677_v14 = vsel %vm3880_vm9, %v15529_v8, 0.0  ;;  %v15532_v60 = vld [vmem:[#allocation203_spill] sm:$0xff] }
 0x697   : > { %v12665_v41 = vpop.eup %7536  ;;  %v12683_v23 = vsel %vm3881_vm12, %v15530_v34, 0.0  ;;  %vm3852_vm0 = vcmp.eq.s32.totalorder %v9564_v30, %v12597_v15  ;;  %vm3853_vm10 = vcmp.eq.s32.totalorder %v9593_v57, %v12597_v15  ;;  %v4106_v62 = vsel %vm3850_vm13, %v15532_v60, 0.0  ;;  %v12721_v34 = vpop.permute.xlu0 %3695 }
 0x698   : > { %v12687_v51 = vpop.eup %7538  ;;  %v4391_v5 = vadd.f32 %v4390_v63, %v4126_v3  ;;  %v4107_v8 = vsel %vm3851_vm14, %v15533_v4, 0.0  ;;  %vm3854_vm15 = vcmp.eq.s32.totalorder %v15250_v50, %v12597_v15  ;;  %vm3855_vm2 = vcmp.eq.s32.totalorder %v15252_v16, %v12597_v15  ;;  %v15534_v3 = vld [vmem:[#allocation37_spill] sm:$0xff]  ;;  %v15535_v4 = vld [vmem:[#allocation38_spill] sm:$0xff] }
 0x699   : > { %15531 = vst [vmem:[#allocation175_spill] sm:$0xff] %v12687_v51  ;;  %vm3856_vm3 = vcmp.eq.s32.totalorder %v9757_v56, %v12597_v15  ;;  %vm3857_vm4 = vcmp.eq.s32.totalorder %v9775_v33, %v12597_v15  ;;  %vm3858_vm5 = vcmp.eq.s32.totalorder %v10196_v13, %v12597_v15  ;;  %vm3859_vm8 = vcmp.eq.s32.totalorder %v10199_v31, %v12597_v15  ;;  %v15544_v51 = vld [vmem:[#allocation258_spill] sm:$0xff] }
 0x69a   : > { %v4392_v2 = vadd.f32 %v4391_v5, %v4127_v18  ;;  %vm3860_vm6 = vcmp.eq.s32.totalorder %v10270_v39, %v12597_v15  ;;  %vm3861_vm7 = vcmp.eq.s32.totalorder %v10303_v1, %v12597_v15  ;;  %vm3862_vm11 = vcmp.eq.s32.totalorder %v10583_v49, %v12597_v15 }
 0x69b   : > { %vm3863_vm9 = vcmp.eq.s32.totalorder %v10597_v45, %v12597_v15  ;;  %v4371_v63 = vadd.f32 %v4107_v8, %v4106_v62  ;;  %vm3864_vm12 = vcmp.eq.s32.totalorder %v10621_v12, %v12597_v15  ;;  %vm3865_vm13 = vcmp.eq.s32.totalorder %v10673_v20, %v12597_v15  ;;  %v15536_v8 = vld [vmem:[#allocation80_spill] sm:$0xff] }
 0x69c   : > { %v4393_v18 = vadd.f32 %v4392_v2, %v4128_v38  ;;  %v4108_v5 = vsel %vm3852_vm0, %v15534_v3, 0.0  ;;  %v4109_v60 = vsel %vm3853_vm10, %v15535_v4, 0.0  ;;  %v4110_v62 = vsel %vm3854_vm15, %v15536_v8, 0.0  ;;  %v15537_v38 = vld [vmem:[#allocation82_spill] sm:$0xff]  ;;  %v15538_v3 = vld [vmem:[#allocation84_spill] sm:$0xff] }
 0x69d   : > { %v4111_v2 = vsel %vm3855_vm2, %v15537_v38, 0.0  ;;  %v4372_v9 = vadd.f32 %v4371_v63, %v4108_v5  ;;  %v4112_v29 = vsel %vm3856_vm3, %v15538_v3, 0.0  ;;  %v4113_v4 = vsel %vm3857_vm4, %v15539_v35, 0.0  ;;  %v15542_v63 = vld [vmem:[#allocation148_spill] sm:$0xff]  ;;  %v15543_v5 = vld [vmem:[#allocation149_spill] sm:$0xff] }
 0x69e   : > { %v4394_v59 = vadd.f32 %v4393_v18, %v4129_v58  ;;  %v4114_v8 = vsel %vm3858_vm5, %v15540_v22, 0.0  ;;  %v4115_v58 = vsel %vm3859_vm8, %v15541_v54, 0.0  ;;  %v4116_v18 = vsel %vm3860_vm6, %v15542_v63, 0.0  ;;  %v15545_v63 = vld [vmem:[#allocation259_spill] sm:$0xff]  ;;  %v15549_v15 = vld [vmem:[#allocation212_spill] sm:$0xff] }
 0x69f   : > { %v12759_v35 = vsel %vm3861_vm7, %v15543_v5, 0.0  ;;  %v4373_v3 = vadd.f32 %v4372_v9, %v4109_v60  ;;  %v12765_v22 = vsel %vm3862_vm11, %v15544_v51, 0.0  ;;  %vm3898_vm14 = vcmp.eq.s32.totalorder %v9556_v37, %v12721_v34  ;;  %v15546_v60 = vld [vmem:[#allocation261_spill] sm:$0xff] }
 0x6a0   : > { %v4395_v38 = vadd.f32 %v4394_v59, %v4130_v19  ;;  %vm3899_vm0 = vcmp.eq.s32.totalorder %v9559_v52, %v12721_v34  ;;  %v12775_v5 = vsel %vm3863_vm9, %v15545_v63, 0.0  ;;  %v12781_v19 = vsel %vm3864_vm12, %v15546_v60, 0.0  ;;  %v15547_v59 = vld [vmem:[#allocation263_spill] sm:$0xff] }
 0x6a1   : > { %v12787_v9 = vsel %vm3865_vm13, %v15547_v59, 0.0  ;;  %v4374_v51 = vadd.f32 %v4373_v3, %v4110_v62  ;;  %vm3900_vm10 = vcmp.eq.s32.totalorder %v9564_v30, %v12721_v34  ;;  %vm3901_vm15 = vcmp.eq.s32.totalorder %v9593_v57, %v12721_v34  ;;  %v15548_v60 = vld [vmem:[#allocation211_spill] sm:$0xff] }
 0x6a2   : > { %v4396_v54 = vadd.f32 %v4395_v38, %v4131_v27  ;;  %vm3902_vm2 = vcmp.eq.s32.totalorder %v15250_v50, %v12721_v34  ;;  %vm3903_vm3 = vcmp.eq.s32.totalorder %v15252_v16, %v12721_v34  ;;  %v4154_v55 = vsel %vm3898_vm14, %v15548_v60, 0.0 }
 0x6a3   : > { %v4375_v63 = vadd.f32 %v4374_v51, %v4111_v2  ;;  %v4155_v59 = vsel %vm3899_vm0, %v15549_v15, 0.0  ;;  %vm3904_vm4 = vcmp.eq.s32.totalorder %v9757_v56, %v12721_v34  ;;  %vm3905_vm5 = vcmp.eq.s32.totalorder %v9775_v33, %v12721_v34  ;;  %v12833_v2 = vpop.permute.xlu1 %3692 }
 0x6a4   : > { %v4397_v17 = vadd.f32 %v4396_v54, %v4132_v36  ;;  %vm3906_vm8 = vcmp.eq.s32.totalorder %v10196_v13, %v12721_v34  ;;  %vm3907_vm6 = vcmp.eq.s32.totalorder %v10199_v31, %v12721_v34  ;;  %vm3908_vm7 = vcmp.eq.s32.totalorder %v10270_v39, %v12721_v34 }
 0x6a5   : > { %v4376_v27 = vadd.f32 %v4375_v63, %v4112_v29  ;;  %vm3909_vm11 = vcmp.eq.s32.totalorder %v10303_v1, %v12721_v34  ;;  %vm3910_vm9 = vcmp.eq.s32.totalorder %v10583_v49, %v12721_v34  ;;  %vm3911_vm12 = vcmp.eq.s32.totalorder %v10597_v45, %v12721_v34  ;;  %v15550_v29 = vld [vmem:[#allocation44_spill] sm:$0xff] }
 0x6a6   : > { %v4398_v54 = vadd.f32 %v4397_v17, %v12657_v53  ;;  %v4422_v36 = vadd.f32 %v4155_v59, %v4154_v55  ;;  %vm3912_vm13 = vcmp.eq.s32.totalorder %v10621_v12, %v12721_v34  ;;  %vm3913_vm14 = vcmp.eq.s32.totalorder %v10673_v20, %v12721_v34  ;;  %v15551_v53 = vld [vmem:[#allocation46_spill] sm:$0xff]  ;;  %v15553_v59 = vld [vmem:[#allocation95_spill] sm:$0xff] }
 0x6a7   : > { %v4377_v51 = vadd.f32 %v4376_v27, %v4113_v4  ;;  %v4156_v3 = vsel %vm3900_vm10, %v15550_v29, 0.0  ;;  %v4157_v62 = vsel %vm3901_vm15, %v15551_v53, 0.0  ;;  %v15552_v55 = vld [vmem:[#allocation94_spill] sm:$0xff]  ;;  %v4159_v27 = vsel %vm3903_vm3, %v15553_v59, 0.0  ;;  %v15555_v53 = vld [vmem:[#allocation99_spill] sm:$0xff] }
 0x6a8   : > { %v4399_v17 = vadd.f32 %v4398_v54, %v12663_v24  ;;  %v4158_v4 = vsel %vm3902_vm2, %v15552_v55, 0.0  ;;  %v4423_v38 = vadd.f32 %v4422_v36, %v4156_v3  ;;  %v15554_v24 = vld [vmem:[#allocation97_spill] sm:$0xff]  ;;  %v4161_v29 = vsel %vm3905_vm5, %v15555_v53, 0.0  ;;  %v15556_v3 = vld [vmem:[#allocation158_spill] sm:$0xff] }
 0x6a9   : > { %v4378_v63 = vadd.f32 %v4377_v51, %v4114_v8  ;;  %v4160_v54 = vsel %vm3904_vm4, %v15554_v24, 0.0  ;;  %v4162_v8 = vsel %vm3906_vm8, %v15556_v3, 0.0  ;;  %v15557_v51 = vld [vmem:[#allocation159_spill] sm:$0xff]  ;;  %v15558_v24 = vld [vmem:[#allocation160_spill] sm:$0xff]  ;;  %v15559_v53 = vld [vmem:[#allocation162_spill] sm:$0xff]  ;;  %vm3882_vm0 = vcmp.eq.s32.totalorder %v9556_v37, %v12833_v2 }
 0x6aa   : > { %v4400_v36 = vadd.f32 %v4399_v17, %v12671_v11  ;;  %v4163_v59 = vsel %vm3907_vm6, %v15557_v51, 0.0  ;;  %v4424_v55 = vadd.f32 %v4423_v38, %v4157_v62  ;;  %v4164_v60 = vsel %vm3908_vm7, %v15558_v24, 0.0  ;;  %v15560_v17 = vld [vmem:[#allocation272_spill] sm:$0xff]  ;;  %v15561_v38 = vld [vmem:[#allocation273_spill] sm:$0xff] }
 0x6ab   : > { %v4379_v15 = vadd.f32 %v4378_v63, %v4115_v58  ;;  %v4165_v11 = vsel %vm3909_vm11, %v15559_v53, 0.0  ;;  %v12868_v3 = vsel %vm3910_vm9, %v15560_v17, 0.0  ;;  %vm3883_vm10 = vcmp.eq.s32.totalorder %v9559_v52, %v12833_v2  ;;  %v15562_v53 = vld [vmem:[#allocation274_spill] sm:$0xff] }
 0x6ac   : > { %v4401_v51 = vadd.f32 %v4400_v36, %v12677_v14  ;;  %v4425_v62 = vadd.f32 %v4424_v55, %v4158_v4  ;;  %v12879_v63 = vsel %vm3911_vm12, %v15561_v38, 0.0  ;;  %v12885_v17 = vsel %vm3912_vm13, %v15562_v53, 0.0  ;;  %v15563_v14 = vld [vmem:[#allocation278_spill] sm:$0xff]  ;;  %v15564_v36 = vld [vmem:[#allocation208_spill] sm:$0xff]  ;;  %v15565_v38 = vld [vmem:[#allocation209_spill] sm:$0xff] }
 0x6ad   : > { %v4380_v58 = vadd.f32 %v4379_v15, %v4116_v18  ;;  %v12891_v55 = vsel %vm3913_vm14, %v15563_v14, 0.0  ;;  %vm3884_vm15 = vcmp.eq.s32.totalorder %v9564_v30, %v12833_v2  ;;  %vm3885_vm2 = vcmp.eq.s32.totalorder %v9593_v57, %v12833_v2 }
 0x6ae   : > { %v4402_v18 = vadd.f32 %v4401_v51, %v12683_v23  ;;  %v4426_v15 = vadd.f32 %v4425_v62, %v4159_v27  ;;  %vm3886_vm3 = vcmp.eq.s32.totalorder %v15250_v50, %v12833_v2  ;;  %v4138_v53 = vsel %vm3882_vm0, %v15564_v36, 0.0  ;;  %v15567_v62 = vld [vmem:[#allocation42_spill] sm:$0xff] }
 0x6af   : > { %v4381_v4 = vadd.f32 %v4380_v58, %v12759_v35  ;;  %v4139_v34 = vsel %vm3883_vm10, %v15565_v38, 0.0  ;;  %vm3887_vm4 = vcmp.eq.s32.totalorder %v15252_v16, %v12833_v2  ;;  %vm3888_vm5 = vcmp.eq.s32.totalorder %v9757_v56, %v12833_v2  ;;  %v12935_v58 = vpop.permute.xlu0 %3701 }
 0x6b0   : > { %4403 = vadd.xlane.f32.xlu1 %v4402_v18  ;;  %v4427_v14 = vadd.f32 %v4426_v15, %v4160_v54  ;;  %vm3889_vm8 = vcmp.eq.s32.totalorder %v9775_v33, %v12833_v2  ;;  %vm3890_vm6 = vcmp.eq.s32.totalorder %v10196_v13, %v12833_v2  ;;  %vm3891_vm7 = vcmp.eq.s32.totalorder %v10199_v31, %v12833_v2  ;;  %v15568_v18 = vld [vmem:[#allocation88_spill] sm:$0xff] }
 0x6b1   : > { %v4382_v35 = vadd.f32 %v4381_v4, %v12765_v22  ;;  %vm3892_vm11 = vcmp.eq.s32.totalorder %v10270_v39, %v12833_v2  ;;  %vm3893_vm9 = vcmp.eq.s32.totalorder %v10303_v1, %v12833_v2  ;;  %vm3894_vm12 = vcmp.eq.s32.totalorder %v10583_v49, %v12833_v2  ;;  %v15566_v22 = vld [vmem:[#allocation41_spill] sm:$0xff]  ;;  %v15569_v4 = vld [vmem:[#allocation90_spill] sm:$0xff] }
 0x6b2   : > { %v4428_v23 = vadd.f32 %v4427_v14, %v4161_v29  ;;  %v4405_v27 = vadd.f32 %v4139_v34, %v4138_v53  ;;  %vm3895_vm13 = vcmp.eq.s32.totalorder %v10597_v45, %v12833_v2  ;;  %vm3896_vm14 = vcmp.eq.s32.totalorder %v10621_v12, %v12833_v2  ;;  %v15570_v34 = vld [vmem:[#allocation92_spill] sm:$0xff] }
 0x6b3   : > { %v4383_v54 = vadd.f32 %v4382_v35, %v12775_v5  ;;  %v4140_v29 = vsel %vm3884_vm15, %v15566_v22, 0.0  ;;  %vm3897_vm0 = vcmp.eq.s32.totalorder %v10673_v20, %v12833_v2  ;;  %v4141_v5 = vsel %vm3885_vm2, %v15567_v62, 0.0 }
 0x6b4   : > { %v4429_v51 = vadd.f32 %v4428_v23, %v4162_v8  ;;  %v4406_v53 = vadd.f32 %v4405_v27, %v4140_v29  ;;  %v4142_v15 = vsel %vm3886_vm3, %v15568_v18, 0.0  ;;  %v4143_v8 = vsel %vm3887_vm4, %v15569_v4, 0.0  ;;  %v15571_v27 = vld [vmem:[#allocation93_spill] sm:$0xff]  ;;  %v15573_v4 = vld [vmem:[#allocation154_spill] sm:$0xff] }
 0x6b5   : > { %v4384_v14 = vadd.f32 %v4383_v54, %v12781_v19  ;;  %v4144_v35 = vsel %vm3888_vm5, %v15570_v34, 0.0  ;;  %v4145_v19 = vsel %vm3889_vm8, %v15571_v27, 0.0  ;;  %v15572_v54 = vld [vmem:[#allocation152_spill] sm:$0xff]  ;;  %v4147_v22 = vsel %vm3891_vm7, %v15573_v4, 0.0 }
 0x6b6   : > { %v4430_v23 = vadd.f32 %v4429_v51, %v4163_v59  ;;  %v4146_v29 = vsel %vm3890_vm6, %v15572_v54, 0.0  ;;  %v4407_v18 = vadd.f32 %v4406_v53, %v4141_v5  ;;  %v15574_v34 = vld [vmem:[#allocation156_spill] sm:$0xff]  ;;  %v15575_v51 = vld [vmem:[#allocation157_spill] sm:$0xff]  ;;  %vm3930_vm10 = vcmp.eq.s32.totalorder %v9556_v37, %v12935_v58 }
 0x6b7   : > { %v4385_v62 = vadd.f32 %v4384_v14, %v12787_v9  ;;  %v4148_v59 = vsel %vm3892_vm11, %v15574_v34, 0.0  ;;  %v4149_v27 = vsel %vm3893_vm9, %v15575_v51, 0.0  ;;  %vm3931_vm15 = vcmp.eq.s32.totalorder %v9559_v52, %v12935_v58  ;;  %v15576_v9 = vld [vmem:[#allocation267_spill] sm:$0xff]  ;;  %v15577_v53 = vld [vmem:[#allocation268_spill] sm:$0xff]  ;;  %v15581_v51 = vld [vmem:[#allocation214_spill] sm:$0xff] }
 0x6b8   : > { %v4431_v38 = vadd.f32 %v4430_v23, %v4164_v60  ;;  %v4408_v54 = vadd.f32 %v4407_v18, %v4142_v15  ;;  %v4150_v5 = vsel %vm3894_vm12, %v15576_v9, 0.0  ;;  %v12983_v14 = vsel %vm3895_vm13, %v15577_v53, 0.0  ;;  %v15578_v60 = vld [vmem:[#allocation270_spill] sm:$0xff]  ;;  %v15579_v15 = vld [vmem:[#allocation271_spill] sm:$0xff] }
 0x6b9   : > { %4386 = vadd.xlane.f32.xlu0 %v4385_v62  ;;  %v12989_v18 = vsel %vm3896_vm14, %v15578_v60, 0.0  ;;  %v12995_v62 = vsel %vm3897_vm0, %v15579_v15, 0.0  ;;  %vm3932_vm2 = vcmp.eq.s32.totalorder %v9564_v30, %v12935_v58  ;;  %vm3933_vm3 = vcmp.eq.s32.totalorder %v9593_v57, %v12935_v58  ;;  %v15580_v60 = vld [vmem:[#allocation213_spill] sm:$0xff] }
 0x6ba   : > { %v4432_v23 = vadd.f32 %v4431_v38, %v4165_v11  ;;  %v4409_v9 = vadd.f32 %v4408_v54, %v4143_v8  ;;  %vm3934_vm4 = vcmp.eq.s32.totalorder %v15250_v50, %v12935_v58  ;;  %vm3935_vm5 = vcmp.eq.s32.totalorder %v15252_v16, %v12935_v58 }
 0x6bb   : > { %v4186_v53 = vsel %vm3930_vm10, %v15580_v60, 0.0  ;;  %v4187_v2 = vsel %vm3931_vm15, %v15581_v51, 0.0  ;;  %vm3936_vm8 = vcmp.eq.s32.totalorder %v9757_v56, %v12935_v58  ;;  %vm3937_vm6 = vcmp.eq.s32.totalorder %v9775_v33, %v12935_v58  ;;  %v15585_v51 = vld [vmem:[#allocation103_spill] sm:$0xff]  ;;  %v15586_v60 = vld [vmem:[#allocation105_spill] sm:$0xff] }
 0x6bc   : > { %v4433_v15 = vadd.f32 %v4432_v23, %v12868_v3  ;;  %v4410_v11 = vadd.f32 %v4409_v9, %v4144_v35  ;;  %vm3938_vm7 = vcmp.eq.s32.totalorder %v10196_v13, %v12935_v58  ;;  %vm3939_vm11 = vcmp.eq.s32.totalorder %v10199_v31, %v12935_v58  ;;  %v15582_v35 = vld [vmem:[#allocation49_spill] sm:$0xff] }
 0x6bd   : > { %vm3940_vm9 = vcmp.eq.s32.totalorder %v10270_v39, %v12935_v58  ;;  %vm3941_vm12 = vcmp.eq.s32.totalorder %v10303_v1, %v12935_v58  ;;  %vm3942_vm13 = vcmp.eq.s32.totalorder %v10583_v49, %v12935_v58  ;;  %v4456_v8 = vadd.f32 %v4187_v2, %v4186_v53  ;;  %v15583_v53 = vld [vmem:[#allocation50_spill] sm:$0xff] }
 0x6be   : > { %v4434_v3 = vadd.f32 %v4433_v15, %v12879_v63  ;;  %v4411_v38 = vadd.f32 %v4410_v11, %v4145_v19  ;;  %vm3943_vm14 = vcmp.eq.s32.totalorder %v10597_v45, %v12935_v58  ;;  %vm3944_vm0 = vcmp.eq.s32.totalorder %v10621_v12, %v12935_v58  ;;  %v13033_v63 = vpop.permute.xlu1 %3698  ;;  %v15584_v2 = vld [vmem:[#allocation102_spill] sm:$0xff] }
 0x6bf   : > { %vm3945_vm10 = vcmp.eq.s32.totalorder %v10673_v20, %v12935_v58  ;;  %v4188_v54 = vsel %vm3932_vm2, %v15582_v35, 0.0  ;;  %v4189_v15 = vsel %vm3933_vm3, %v15583_v53, 0.0  ;;  %v4190_v11 = vsel %vm3934_vm4, %v15584_v2, 0.0 }
 0x6c0   : > { %v4435_v19 = vadd.f32 %v4434_v3, %v12885_v17  ;;  %v4412_v9 = vadd.f32 %v4411_v38, %v4146_v29  ;;  %v4457_v23 = vadd.f32 %v4456_v8, %v4188_v54  ;;  %v4191_v35 = vsel %vm3935_vm5, %v15585_v51, 0.0  ;;  %v15587_v29 = vld [vmem:[#allocation107_spill] sm:$0xff]  ;;  %v15588_v54 = vld [vmem:[#allocation262_spill] sm:$0xff]  ;;  %v15589_v51 = vld [vmem:[#allocation173_spill] sm:$0xff] }
 0x6c1   : > { %v4192_v17 = vsel %vm3936_vm8, %v15586_v60, 0.0  ;;  %v4193_v3 = vsel %vm3937_vm6, %v15587_v29, 0.0  ;;  %v4194_v2 = vsel %vm3938_vm7, %v15588_v54, 0.0  ;;  %v4195_v34 = vsel %vm3939_vm11, %v15589_v51, 0.0  ;;  %v15590_v60 = vld [vmem:[#allocation177_spill] sm:$0xff] }
 0x6c2   : > { %v4436_v38 = vadd.f32 %v4435_v19, %v12891_v55  ;;  %v4413_v8 = vadd.f32 %v4412_v9, %v4147_v22  ;;  %v4458_v53 = vadd.f32 %v4457_v23, %v4189_v15  ;;  %v4196_v4 = vsel %vm3940_vm9, %v15590_v60, 0.0  ;;  %v15591_v22 = vld [vmem:[#allocation181_spill] sm:$0xff]  ;;  %v15593_v60 = vld [vmem:[#allocation282_spill] sm:$0xff] }
 0x6c3   : > { %vm3914_vm15 = vcmp.eq.s32.totalorder %v9556_v37, %v13033_v63  ;;  %vm3915_vm2 = vcmp.eq.s32.totalorder %v9559_v52, %v13033_v63  ;;  %v4197_v19 = vsel %vm3941_vm12, %v15591_v22, 0.0  ;;  %v15592_v9 = vld [vmem:[#allocation281_spill] sm:$0xff]  ;;  %v13087_v51 = vsel %vm3943_vm14, %v15593_v60, 0.0 }
 0x6c4   : > { %4437 = vadd.xlane.f32.xlu1 %v4436_v38  ;;  %v4414_v55 = vadd.f32 %v4413_v8, %v4148_v59  ;;  %v13081_v15 = vsel %vm3942_vm13, %v15592_v9, 0.0  ;;  %v4459_v23 = vadd.f32 %v4458_v53, %v4190_v11  ;;  %v15594_v38 = vld [vmem:[#allocation283_spill] sm:$0xff]  ;;  %v15595_v8 = vld [vmem:[#allocation286_spill] sm:$0xff]  ;;  %vm3916_vm3 = vcmp.eq.s32.totalorder %v9564_v30, %v13033_v63  ;;  %v15597_v54 = vld [vmem:[#allocation45_spill] sm:$0xff] }
 0x6c5   : > { %v13093_v59 = vsel %vm3944_vm0, %v15594_v38, 0.0  ;;  %v13099_v22 = vsel %vm3945_vm10, %v15595_v8, 0.0  ;;  %v15596_v9 = vld [vmem:[#allocation43_spill] sm:$0xff]  ;;  %v4171_v29 = vsel %vm3915_vm2, %v15597_v54, 0.0  ;;  %vm3917_vm4 = vcmp.eq.s32.totalorder %v9593_v57, %v13033_v63 }
 0x6c6   : > { %v4415_v53 = vadd.f32 %v4414_v55, %v4149_v27  ;;  %v4460_v11 = vadd.f32 %v4459_v23, %v4191_v35  ;;  %v4170_v60 = vsel %vm3914_vm15, %v15596_v9, 0.0  ;;  %vm3918_vm5 = vcmp.eq.s32.totalorder %v15250_v50, %v13033_v63  ;;  %v15599_v23 = vld [vmem:[#allocation48_spill] sm:$0xff] }
 0x6c7   : > { %vm3919_vm8 = vcmp.eq.s32.totalorder %v15252_v16, %v13033_v63  ;;  %vm3920_vm6 = vcmp.eq.s32.totalorder %v9757_v56, %v13033_v63  ;;  %vm3921_vm7 = vcmp.eq.s32.totalorder %v9775_v33, %v13033_v63  ;;  %vm3922_vm11 = vcmp.eq.s32.totalorder %v10196_v13, %v13033_v63 }
 0x6c8   : > { %v4416_v58 = vadd.f32 %v4415_v53, %v4150_v5  ;;  %v4461_v8 = vadd.f32 %v4460_v11, %v4192_v17  ;;  %vm3923_vm9 = vcmp.eq.s32.totalorder %v10199_v31, %v13033_v63  ;;  %vm3924_vm12 = vcmp.eq.s32.totalorder %v10270_v39, %v13033_v63  ;;  %v15598_v17 = vld [vmem:[#allocation47_spill] sm:$0xff]  ;;  %v15600_v53 = vld [vmem:[#allocation96_spill] sm:$0xff] }
 0x6c9   : > { %vm3925_vm13 = vcmp.eq.s32.totalorder %v10303_v1, %v13033_v63  ;;  %v4439_v27 = vadd.f32 %v4171_v29, %v4170_v60  ;;  %vm3926_vm14 = vcmp.eq.s32.totalorder %v10583_v49, %v13033_v63  ;;  %v4172_v55 = vsel %vm3916_vm3, %v15598_v17, 0.0 }
 0x6ca   : > { %v4417_v35 = vadd.f32 %v4416_v58, %v12983_v14  ;;  %v4462_v5 = vadd.f32 %v4461_v8, %v4193_v3  ;;  %vm3927_vm0 = vcmp.eq.s32.totalorder %v10597_v45, %v13033_v63  ;;  %vm3928_vm10 = vcmp.eq.s32.totalorder %v10621_v12, %v13033_v63  ;;  %v13136_v14 = vpop.permute.xlu1 %3704  ;;  %v15601_v58 = vld [vmem:[#allocation98_spill] sm:$0xff] }
 0x6cb   : > { %vm3929_vm15 = vcmp.eq.s32.totalorder %v10673_v20, %v13033_v63  ;;  %v4440_v60 = vadd.f32 %v4439_v27, %v4172_v55  ;;  %v4173_v8 = vsel %vm3917_vm4, %v15599_v23, 0.0  ;;  %v4174_v11 = vsel %vm3918_vm5, %v15600_v53, 0.0  ;;  %v15602_v55 = vld [vmem:[#allocation100_spill] sm:$0xff]  ;;  %v15604_v53 = vld [vmem:[#allocation255_spill] sm:$0xff] }
 0x6cc   : > { %v4418_v29 = vadd.f32 %v4417_v35, %v12989_v18  ;;  %v4463_v3 = vadd.f32 %v4462_v5, %v4194_v2  ;;  %v4175_v27 = vsel %vm3919_vm8, %v15601_v58, 0.0  ;;  %v4176_v18 = vsel %vm3920_vm6, %v15602_v55, 0.0  ;;  %v15603_v2 = vld [vmem:[#allocation101_spill] sm:$0xff]  ;;  %v15606_v55 = vld [vmem:[#allocation163_spill] sm:$0xff] }
 0x6cd   : > { %v4177_v35 = vsel %vm3921_vm7, %v15603_v2, 0.0  ;;  %v4441_v5 = vadd.f32 %v4440_v60, %v4173_v8  ;;  %v4178_v54 = vsel %vm3922_vm11, %v15604_v53, 0.0  ;;  %v15605_v58 = vld [vmem:[#allocation161_spill] sm:$0xff]  ;;  %v4180_v9 = vsel %vm3924_vm12, %v15606_v55, 0.0  ;;  %v15609_v8 = vld [vmem:[#allocation276_spill] sm:$0xff] }
 0x6ce   : > { %v4419_v23 = vadd.f32 %v4418_v29, %v12995_v62  ;;  %v4464_v17 = vadd.f32 %v4463_v3, %v4195_v34  ;;  %v4179_v38 = vsel %vm3923_vm9, %v15605_v58, 0.0  ;;  %vm3946_vm2 = vcmp.eq.s32.totalorder %v9556_v37, %v13136_v14  ;;  %v15607_v62 = vld [vmem:[#allocation166_spill] sm:$0xff]  ;;  %v15608_v29 = vld [vmem:[#allocation275_spill] sm:$0xff] }
 0x6cf   : > { %v4442_v2 = vadd.f32 %v4441_v5, %v4174_v11  ;;  %vm3947_vm3 = vcmp.eq.s32.totalorder %v9559_v52, %v13136_v14  ;;  %v4181_v60 = vsel %vm3925_vm13, %v15607_v62, 0.0  ;;  %v13184_v3 = vsel %vm3926_vm14, %v15608_v29, 0.0  ;;  %v15610_v52 = vld [vmem:[#allocation279_spill] sm:$0xff]  ;;  %v15613_v62 = vld [vmem:[#allocation216_spill] sm:$0xff] }
 0x6d0   : > { %4420 = vadd.xlane.f32.xlu0 %v4419_v23  ;;  %v4465_v34 = vadd.f32 %v4464_v17, %v4196_v4  ;;  %v13190_v37 = vsel %vm3927_vm0, %v15609_v8, 0.0  ;;  %v13196_v4 = vsel %vm3928_vm10, %v15610_v52, 0.0  ;;  %v15611_v17 = vld [vmem:[#allocation280_spill] sm:$0xff]  ;;  %vm3948_vm4 = vcmp.eq.s32.totalorder %v9564_v30, %v13136_v14  ;;  %v15612_v8 = vld [vmem:[#allocation215_spill] sm:$0xff] }
 0x6d1   : > { %v13202_v23 = vsel %vm3929_vm15, %v15611_v17, 0.0  ;;  %v4443_v11 = vadd.f32 %v4442_v2, %v4175_v27  ;;  %vm3949_vm5 = vcmp.eq.s32.totalorder %v9593_v57, %v13136_v14  ;;  %v4202_v29 = vsel %vm3946_vm2, %v15612_v8, 0.0  ;;  %v3642_v63 = vld [vmem:[#allocation5] sm:$0xff]  ;;  %v4234_v27 = vpop.xlane.xlu0 %4233 }
 0x6d2   : > { %v4466_v5 = vadd.f32 %v4465_v34, %v4197_v19  ;;  %v4203_v55 = vsel %vm3947_vm3, %v15613_v62, 0.0  ;;  %vm3950_vm8 = vcmp.eq.s32.totalorder %v15250_v50, %v13136_v14  ;;  %vm3951_vm6 = vcmp.eq.s32.totalorder %v15252_v16, %v13136_v14  ;;  %v15617_v50 = vld [vmem:[#allocation106_spill] sm:$0xff] }
 0x6d3   : > { %v4444_v52 = vadd.f32 %v4443_v11, %v4176_v18  ;;  %vm3952_vm7 = vcmp.eq.s32.totalorder %v9757_v56, %v13136_v14  ;;  %vm3953_vm11 = vcmp.eq.s32.totalorder %v9775_v33, %v13136_v14  ;;  %vm3954_vm9 = vcmp.eq.s32.totalorder %v10196_v13, %v13136_v14 }
 0x6d4   : > { %v4467_v19 = vadd.f32 %v4466_v5, %v13081_v15  ;;  %vm3955_vm12 = vcmp.eq.s32.totalorder %v10199_v31, %v13136_v14  ;;  %vm3956_vm13 = vcmp.eq.s32.totalorder %v10270_v39, %v13136_v14  ;;  %vm3957_vm14 = vcmp.eq.s32.totalorder %v10303_v1, %v13136_v14  ;;  %v15614_v15 = vld [vmem:[#allocation51_spill] sm:$0xff]  ;;  %v15631_v39 = vld [vmem:[#allocation169_spill] sm:$0xff]  ;;  %v15633_v1 = vld [vmem:[#allocation170_spill] sm:$0xff] }
 0x6d5   : > { %v4445_v18 = vadd.f32 %v4444_v52, %v4177_v35  ;;  %v4473_v2 = vadd.f32 %v4203_v55, %v4202_v29  ;;  %vm3958_vm0 = vcmp.eq.s32.totalorder %v10583_v49, %v13136_v14  ;;  %v4204_v11 = vsel %vm3948_vm4, %v15614_v15, 0.0  ;;  %v15615_v29 = vld [vmem:[#allocation52_spill] sm:$0xff]  ;;  %v15626_v31 = vld [vmem:[#allocation183_spill] sm:$0xff] }
 0x6d6   : > { %v4468_v34 = vadd.f32 %v4467_v19, %v13087_v51  ;;  %v5777_v35 = vadd.f32 %v12492_v6, %v12547_v47  ;;  %v4490_v52 = vadd.f32 %v4234_v27, %v3642_v63  ;;  %v5823_v55 = vadd.f32 %v12605_v25, %v12595_v43  ;;  %v15616_v19 = vld [vmem:[#allocation104_spill] sm:$0xff]  ;;  %v15635_v49 = vld [vmem:[#allocation55_spill] sm:$0xff] }
 0x6d7   : > { %v4446_v5 = vadd.f32 %v4445_v18, %v4178_v54  ;;  %v4474_v17 = vadd.f32 %v4473_v2, %v4204_v11  ;;  %vm3959_vm10 = vcmp.eq.s32.totalorder %v10597_v45, %v13136_v14  ;;  %v4205_v30 = vsel %vm3949_vm5, %v15615_v29, 0.0  ;;  %v15618_v54 = vld [vmem:[#allocation108_spill] sm:$0xff]  ;;  %v15622_v2 = vld [vmem:[#allocation222_spill] sm:$0xff]  ;;  %v4268_v11 = vpop.xlane.xlu0 %4267 }
 0x6d8   : > { %v4469_v51 = vadd.f32 %v4468_v34, %v13093_v59  ;;  %v4206_v6 = vsel %vm3950_vm8, %v15616_v19, 0.0  ;;  %v5778_v28 = vadd.f32 %v12502_v10, %v5777_v35  ;;  %4507 = vst.msk [vmem:[#allocation5] sm:$0xff] %vm4506_vm1, %v4490_v52  ;;  %vm3960_vm15 = vcmp.eq.s32.totalorder %v10621_v12, %v13136_v14  ;;  %v15620_v63 = vld [vmem:[#allocation176_spill] sm:$0xff]  ;;  %v15625_v35 = vld [vmem:[#allocation182_spill] sm:$0xff] }
 0x6d9   : > { %v4447_v47 = vadd.f32 %v4446_v5, %v4179_v38  ;;  %v4475_v43 = vadd.f32 %v4474_v17, %v4205_v30  ;;  %v5824_v25 = vadd.f32 %v12621_v42, %v5823_v55  ;;  %vm3961_vm2 = vcmp.eq.s32.totalorder %v10673_v20, %v13136_v14  ;;  %v15629_v5 = vld [vmem:[#allocation53_spill] sm:$0xff]  ;;  %v7541_v55 = vpop.eup %7540  ;;  %v15630_v30 = vld [vmem:[#allocation284_spill] sm:$0xff]  ;;  %v15647_v20 = vld [vmem:[#allocation59_spill] sm:$0xff] }
 0x6da   : > { %v4470_v57 = vadd.f32 %v4469_v51, %v13099_v22  ;;  %v4207_v10 = vsel %vm3951_vm6, %v15617_v50, 0.0  ;;  %v4208_v38 = vsel %vm3952_vm7, %v15618_v54, 0.0  ;;  %v5779_v59 = vadd.f32 %v12510_v0, %v5778_v28  ;;  %v15619_v22 = vld [vmem:[#allocation109_spill] sm:$0xff]  ;;  %v15648_v14 = vld [vmem:[#allocation124_spill] sm:$0xff] }
 0x6db   : > { %v4448_v46 = vadd.f32 %v4447_v47, %v4180_v9  ;;  %v4476_v17 = vadd.f32 %v4475_v43, %v4206_v6  ;;  %7544 = vpow2.f32 %v12445_v21  ;;  %v5825_v42 = vadd.f32 %v12635_v44, %v5824_v25  ;;  %v15621_v44 = vld [vmem:[#allocation180_spill] sm:$0xff]  ;;  %v15632_v47 = vld [vmem:[#allocation217_spill] sm:$0xff] }
 0x6dc   : > { %4471 = vadd.xlane.f32.xlu1 %v4470_v57  ;;  %v4209_v16 = vsel %vm3953_vm11, %v15619_v22, 0.0  ;;  %v4210_v56 = vsel %vm3954_vm9, %v15620_v63, 0.0  ;;  %v5780_v27 = vadd.f32 %v12518_v7, %v5779_v59  ;;  %7546 = vpow2.f32 %v12447_v40  ;;  %v15634_v59 = vld [vmem:[#allocation285_spill] sm:$0xff] }
 0x6dd   : > { %v4449_v0 = vadd.f32 %v4448_v46, %v4181_v60  ;;  %v4477_v9 = vadd.f32 %v4476_v17, %v4207_v10  ;;  %7548 = vpow2.f32 %v12458_v48  ;;  %v5826_v21 = vadd.f32 %v12665_v41, %v5825_v42  ;;  %v15623_v60 = vld [vmem:[#allocation305_spill] sm:$0xff]  ;;  %v15624_v48 = vld [vmem:[#allocation175_spill] sm:$0xff]  ;;  %v7543_v10 = vpop.eup %7542 }
 0x6de   : > { %v4211_v33 = vsel %vm3955_vm12, %v15621_v44, 0.0  ;;  %v5802_v18 = vadd.f32 %v12449_v26, %v12545_v32  ;;  %v5781_v13 = vadd.f32 %v12530_v61, %v5780_v27  ;;  %7550 = vpow2.f32 %v15622_v2  ;;  %v3644_v41 = vld [vmem:[#allocation5 + $0x10] sm:$0xff]  ;;  %v15636_v17 = vld [vmem:[#allocation287_spill] sm:$0xff] }
 0x6df   : > { %v4450_v40 = vadd.f32 %v4449_v0, %v13184_v3  ;;  %v4478_v7 = vadd.f32 %v4477_v9, %v4208_v38  ;;  %7552 = vpow2.f32 %v15623_v60  ;;  %v5827_v34 = vadd.f32 %v15624_v48, %v5826_v21  ;;  %v15627_v32 = vld [vmem:[#allocation277_spill] sm:$0xff]  ;;  %v15628_v3 = vld [vmem:[#allocation58_spill] sm:$0xff]  ;;  %v15638_v9 = vld [vmem:[#allocation188_spill] sm:$0xff] }
 0x6e0   : > { %5770 = vadd.xlane.f32.xlu1 %v15625_v35  ;;  %v4212_v26 = vsel %vm3956_vm13, %v15626_v31, 0.0  ;;  %v4213_v61 = vsel %vm3957_vm14, %v15627_v32, 0.0  ;;  %v5782_v52 = vadd.f32 %v15628_v3, %v5781_v13  ;;  %7554 = vpow2.f32 %v15629_v5  ;;  %v15639_v21 = vld [vmem:[#allocation288_spill] sm:$0xff]  ;;  %v15640_v13 = vld [vmem:[#allocation110_spill] sm:$0xff]  ;;  %v15650_v5 = vld [vmem:[#allocation125_spill] sm:$0xff] }
 0x6e1   : > { %v4451_v51 = vadd.f32 %v4450_v40, %v13190_v37  ;;  %v4214_v6 = vsel %vm3958_vm0, %v15630_v30, 0.0  ;;  %v4479_v28 = vadd.f32 %v4478_v7, %v4209_v16  ;;  %7556 = vpow2.f32 %v15631_v39  ;;  %v15637_v16 = vld [vmem:[#allocation61_spill] sm:$0xff]  ;;  %v15641_v40 = vld [vmem:[#allocation219_spill] sm:$0xff]  ;;  %v15642_v7 = vld [vmem:[#allocation120_spill] sm:$0xff] }
 0x6e2   : > { %v5803_v43 = vadd.f32 %v15632_v47, %v5802_v18  ;;  %v5828_v25 = vadd.f32 %v7541_v55, %v5827_v34  ;;  %7558 = vpow2.f32 %v15633_v1  ;;  %v4492_v57 = vadd.f32 %v4268_v11, %v3644_v41  ;;  %v15643_v60 = vld [vmem:[#allocation298_spill] sm:$0xff]  ;;  %v15652_v39 = vld [vmem:[#allocation232_spill] sm:$0xff]  ;;  %v15654_v1 = vld [vmem:[#allocation235_spill] sm:$0xff] }
 0x6e3   : > { %v4452_v38 = vadd.f32 %v4451_v51, %v13196_v4  ;;  %v4215_v37 = vsel %vm3959_vm10, %v15634_v59, 0.0  ;;  %v4480_v46 = vadd.f32 %v4479_v28, %v4210_v56  ;;  %7560 = vpow2.f32 %v15635_v49  ;;  %v15645_v41 = vld [vmem:[#allocation122_spill] sm:$0xff]  ;;  %v15657_v49 = vld [vmem:[#allocation236_spill] sm:$0xff] }
 0x6e4   : > { %v4216_v42 = vsel %vm3960_vm15, %v15636_v17, 0.0  ;;  %5804 = vadd.xlane.f32.xlu1 %v5803_v43  ;;  %v5783_v27 = vadd.f32 %v15637_v16, %v5782_v52  ;;  %v5829_v0 = vadd.f32 %v7543_v10, %v5828_v25  ;;  %7562 = vpow2.f32 %v15638_v9  ;;  %4509 = vst.msk [vmem:[#allocation5 + $0x10] sm:$0xff] %vm4506_vm1, %v4492_v57  ;;  %v15653_v25 = vld [vmem:[#allocation118_spill] sm:$0xff]  ;;  %v15659_v9 = vld [vmem:[#allocation237_spill] sm:$0xff] }
 0x6e5   : > { %v7545_v4 = vpop.eup %7544  ;;  %v4453_v45 = vadd.f32 %v4452_v38, %v13202_v23  ;;  %v4217_v56 = vsel %vm3961_vm2, %v15639_v21, 0.0  ;;  %v4481_v18 = vadd.f32 %v4480_v46, %v4211_v33  ;;  %7564 = vpow2.f32 %v15640_v13  ;;  %v15656_v46 = vld [vmem:[#allocation121_spill] sm:$0xff]  ;;  %v15661_v13 = vld [vmem:[#allocation123_spill] sm:$0xff] }
 0x6e6   : > { %v7547_v12 = vpop.eup %7546  ;;  %v5830_v2 = vadd.f32 %v7545_v4, %v5829_v0  ;;  %7566 = vpow2.f32 %v15641_v40  ;;  %v15644_v48 = vsub.f32 %v15642_v7, %v15643_v60  ;;  %v15646_v11 = vsub.f32 %v15645_v41, %v15643_v60  ;;  %v15664_v7 = vld [vmem:[#allocation197_spill] sm:$0xff] }
 0x6e7   : > { %v7549_v35 = vpop.eup %7548  ;;  %4454 = vadd.xlane.f32.xlu0 %v4453_v45  ;;  %v4482_v3 = vadd.f32 %v4481_v18, %v4212_v26  ;;  %7568 = vpow2.f32 %v15647_v20  ;;  %v15649_v33 = vsub.f32 %v15648_v14, %v15643_v60  ;;  %v15651_v55 = vsub.f32 %v15650_v5, %v15643_v60  ;;  %v15667_v14 = vld [vmem:[#allocation207_spill] sm:$0xff] }
 0x6e8   : > { %v5355_v34 = vmul.f32 1.442695, %v15644_v48  ;;  %v5357_v23 = vmul.f32 1.442695, %v15646_v11  ;;  %v7551_v28 = vpop.eup %7550  ;;  %v5784_v47 = vadd.f32 %v15652_v39, %v5783_v27  ;;  %v5831_v43 = vadd.f32 %v7547_v12, %v5830_v2  ;;  %v15662_v12 = vld [vmem:[#allocation299_spill] sm:$0xff]  ;;  %v15663_v2 = vld [vmem:[#allocation196_spill] sm:$0xff] }
 0x6e9   : > { %v5359_v52 = vmul.f32 1.442695, %v15649_v33  ;;  %v5361_v51 = vmul.f32 1.442695, %v15651_v55  ;;  %7570 = vpow2.f32 %v15653_v25  ;;  %v15655_v57 = vsub.f32 %v15654_v1, %v15643_v60  ;;  %v7553_v10 = vpop.eup %7552  ;;  %v15665_v11 = vld [vmem:[#allocation241_spill] sm:$0xff] }
 0x6ea   : > { %v4483_v38 = vadd.f32 %v4482_v3, %v4213_v61  ;;  %7572 = vpow2.f32 %v15656_v46  ;;  %v15658_v16 = vsub.f32 %v15657_v49, %v15643_v60  ;;  %v15660_v4 = vsub.f32 %v15659_v9, %v15643_v60  ;;  %v7555_v27 = vpop.eup %7554 }
 0x6eb   : > { %v5363_v26 = vmul.f32 1.442695, %v15655_v57  ;;  %v5832_v18 = vadd.f32 %v7549_v35, %v5831_v43  ;;  %7574 = vpow2.f32 %v15661_v13  ;;  %v5083_v40 = vsub.f32 %v15663_v2, %v15662_v12  ;;  %v7557_v48 = vpop.eup %7556  ;;  %v15668_v35 = vld [vmem:[#allocation233_spill] sm:$0xff]  ;;  %v15672_v13 = vld [vmem:[#allocation168_spill] sm:$0xff] }
 0x6ec   : > { %v5365_v0 = vmul.f32 1.442695, %v15658_v16  ;;  %v5367_v45 = vmul.f32 1.442695, %v15660_v4  ;;  %v5084_v61 = vsub.f32 %v15664_v7, %v15662_v12  ;;  %v4484_v41 = vadd.f32 %v4483_v38, %v4214_v6  ;;  %v7559_v5 = vpop.eup %7558  ;;  %v15669_v43 = vld [vmem:[#allocation33_spill] sm:$0xff] }
 0x6ed   : > { %7576 = vpow2.f32 %v5355_v34  ;;  %v15666_v3 = vsub.f32 %v15665_v11, %v15643_v60  ;;  %v5085_v33 = vsub.f32 %v15667_v14, %v15662_v12  ;;  %v5785_v55 = vadd.f32 %v15668_v35, %v5784_v47  ;;  %v7561_v1 = vpop.eup %7560  ;;  %v15670_v34 = vld [vmem:[#allocation70_spill] sm:$0xff]  ;;  %v15676_v35 = vld [vmem:[#allocation135_spill] sm:$0xff] }
 0x6ee   : > { %v5833_v39 = vadd.f32 %v7551_v28, %v5832_v18  ;;  %7578 = vpow2.f32 %v5357_v23  ;;  %v5086_v25 = vsub.f32 %v15669_v43, %v15662_v12  ;;  %v4485_v57 = vadd.f32 %v4484_v41, %v4215_v37  ;;  %v7563_v60 = vpop.eup %7562  ;;  %v15671_v23 = vld [vmem:[#allocation71_spill] sm:$0xff] }
 0x6ef   : > { %v5369_v20 = vmul.f32 1.442695, %v15666_v3  ;;  %7580 = vpow2.f32 %v5359_v52  ;;  %v5806_v6 = vadd.f32 %v7559_v5, %v7557_v48  ;;  %v5087_v38 = vsub.f32 %v15670_v34, %v15662_v12  ;;  %v7565_v9 = vpop.eup %7564  ;;  %v15678_v34 = vld [vmem:[#allocation139_spill] sm:$0xff] }
 0x6f0   : > { %v5834_v46 = vadd.f32 %v7553_v10, %v5833_v39  ;;  %7582 = vpow2.f32 %v5361_v51  ;;  %v5435_v49 = vmul.f32 1.442695, %v5083_v40  ;;  %v5437_v16 = vmul.f32 1.442695, %v5084_v61  ;;  %v7567_v18 = vpop.eup %7566  ;;  %v15673_v51 = vld [vmem:[#allocation73_spill] sm:$0xff] }
 0x6f1   : > { %v4486_v4 = vadd.f32 %v4485_v57, %v4216_v42  ;;  %7584 = vpow2.f32 %v5363_v26  ;;  %v5807_v28 = vadd.f32 %v7563_v60, %v5806_v6  ;;  %v5088_v47 = vsub.f32 %v15671_v23, %v15662_v12  ;;  %v7569_v7 = vpop.eup %7568  ;;  %v15674_v26 = vld [vmem:[#allocation75_spill] sm:$0xff] }
 0x6f2   : > { %v5786_v37 = vadd.f32 %v15672_v13, %v5785_v55  ;;  %v5835_v52 = vadd.f32 %v7555_v27, %v5834_v46  ;;  %7586 = vpow2.f32 %v5365_v0  ;;  %v5439_v2 = vmul.f32 1.442695, %v5085_v33  ;;  %v15675_v0 = vld [vmem:[#allocation134_spill] sm:$0xff] }
 0x6f3   : > { %v4487_v48 = vadd.f32 %v4486_v4, %v4217_v56  ;;  %v5808_v41 = vadd.f32 %v7567_v18, %v5807_v28  ;;  %v5089_v10 = vsub.f32 %v15673_v51, %v15662_v12  ;;  %7588 = vpow2.f32 %v5435_v49  ;;  %v7571_v40 = vpop.eup %7570  ;;  %v15680_v28 = vld [vmem:[#allocation247_spill] sm:$0xff] }
 0x6f4   : > { %v5836_v42 = vadd.f32 %v7561_v1, %v5835_v52  ;;  %v5090_v61 = vsub.f32 %v15674_v26, %v15662_v12  ;;  %7590 = vpow2.f32 %v5437_v16  ;;  %v5441_v11 = vmul.f32 1.442695, %v5086_v25  ;;  %v7573_v3 = vpop.eup %7572  ;;  %v15677_v25 = vld [vmem:[#allocation137_spill] sm:$0xff]  ;;  %v15679_v16 = vld [vmem:[#allocation246_spill] sm:$0xff]  ;;  %v15683_v51 = vld [vmem:[#allocation187_spill] sm:$0xff] }
 0x6f5   : > { %4488 = vadd.xlane.f32.xlu0 %v4487_v48  ;;  %7592 = vpow2.f32 %v5367_v45  ;;  %v5809_v27 = vadd.f32 %v7569_v7, %v5808_v41  ;;  %v5091_v14 = vsub.f32 %v15675_v0, %v15662_v12  ;;  %v5443_v56 = vmul.f32 1.442695, %v5087_v38  ;;  %v7575_v33 = vpop.eup %7574  ;;  %v15682_v7 = vld [vmem:[#allocation186_spill] sm:$0xff]  ;;  %v15684_v26 = vld [vmem:[#allocation248_spill] sm:$0xff] }
 0x6f6   : > { %v5837_v5 = vadd.f32 %v7565_v9, %v5836_v42  ;;  %v5092_v55 = vsub.f32 %v15676_v35, %v15662_v12  ;;  %7594 = vpow2.f32 %v5439_v2  ;;  %v5445_v39 = vmul.f32 1.442695, %v5088_v47  ;;  %v15681_v2 = vld [vmem:[#allocation300_spill] sm:$0xff]  ;;  %v15685_v0 = vld [vmem:[#allocation194_spill] sm:$0xff] }
 0x6f7   : > { %v7577_v43 = vpop.eup %7576  ;;  %7596 = vpow2.f32 %v5369_v20  ;;  %v5810_v1 = vadd.f32 %v7571_v40, %v5809_v27  ;;  %v5093_v57 = vsub.f32 %v15677_v25, %v15662_v12  ;;  %v5447_v6 = vmul.f32 1.442695, %v5089_v10 }
 0x6f8   : > { %v7579_v45 = vpop.eup %7578  ;;  %5838 = vadd.xlane.f32.xlu1 %v5837_v5  ;;  %v5094_v60 = vsub.f32 %v15678_v34, %v15662_v12  ;;  %7598 = vpow2.f32 %v5441_v11  ;;  %v5449_v38 = vmul.f32 1.442695, %v5090_v61  ;;  %v5095_v9 = vsub.f32 %v15679_v16, %v15662_v12 }
 0x6f9   : > { %v7581_v46 = vpop.eup %7580  ;;  %5787 = vadd.xlane.f32.xlu0 %v5786_v37  ;;  %v5811_v49 = vadd.f32 %v7573_v3, %v5810_v1  ;;  %7600 = vpow2.f32 %v5443_v56  ;;  %v5451_v20 = vmul.f32 1.442695, %v5091_v14  ;;  %v5096_v23 = vsub.f32 %v15680_v28, %v15662_v12  ;;  %v15687_v1 = vld [vmem:[#allocation198_spill] sm:$0xff] }
 0x6fa   : > { %v7583_v4 = vpop.eup %7582  ;;  %7602 = vpow2.f32 %v5445_v39  ;;  %v5453_v47 = vmul.f32 1.442695, %v5092_v55  ;;  %v5455_v52 = vmul.f32 1.442695, %v5093_v57  ;;  %v5067_v48 = vsub.f32 %v15682_v7, %v15681_v2  ;;  %v15686_v39 = vld [vmem:[#allocation251_spill] sm:$0xff] }
 0x6fb   : > { %v7585_v18 = vpop.eup %7584  ;;  %v5812_v13 = vadd.f32 %v7575_v33, %v5811_v49  ;;  %7604 = vpow2.f32 %v5447_v6  ;;  %v5457_v41 = vmul.f32 1.442695, %v5094_v60  ;;  %v5068_v10 = vsub.f32 %v15683_v51, %v15681_v2  ;;  %v4285_v51 = vpop.xlane.xlu0 %4284 }
 0x6fc   : > { %v7587_v37 = vpop.eup %7586  ;;  %7606 = vpow2.f32 %v5449_v38  ;;  %v5097_v61 = vsub.f32 %v15684_v26, %v15662_v12  ;;  %v5459_v11 = vmul.f32 1.442695, %v5095_v9  ;;  %v5461_v27 = vmul.f32 1.442695, %v5096_v23 }
 0x6fd   : > { %v7589_v40 = vpop.eup %7588  ;;  %v5813_v42 = vadd.f32 %v7577_v43, %v5812_v13  ;;  %7608 = vpow2.f32 %v5451_v20  ;;  %v5069_v14 = vsub.f32 %v15685_v0, %v15681_v2  ;;  %v5403_v35 = vmul.f32 1.442695, %v5067_v48 }
 0x6fe   : > { %v7591_v3 = vpop.eup %7590  ;;  %7610 = vpow2.f32 %v5453_v47  ;;  %v5098_v43 = vsub.f32 %v15686_v39, %v15662_v12  ;;  %v5070_v25 = vsub.f32 %v15687_v1, %v15681_v2  ;;  %v5405_v57 = vmul.f32 1.442695, %v5068_v10  ;;  %v15689_v12 = vld [vmem:[#allocation66_spill] sm:$0xff] }
 0x6ff   : > { %v7593_v56 = vpop.eup %7592  ;;  %v5814_v33 = vadd.f32 %v7579_v45, %v5813_v42  ;;  %7612 = vpow2.f32 %v5455_v52  ;;  %v5857_v5 = vadd.f32 %v7591_v3, %v7589_v40  ;;  %v5463_v60 = vmul.f32 1.442695, %v5097_v61  ;;  %v15688_v45 = vld [vmem:[#allocation223_spill] sm:$0xff] }
 0x700   : > { %v7595_v55 = vpop.eup %7594  ;;  %7614 = vpow2.f32 %v5457_v41  ;;  %v5071_v16 = vsub.f32 %v15688_v45, %v15681_v2  ;;  %v5407_v9 = vmul.f32 1.442695, %v5069_v14  ;;  %v5072_v47 = vsub.f32 %v15689_v12, %v15681_v2  ;;  %v3645_v41 = vld [vmem:[#allocation5 + $0x18] sm:$0xff] }
 0x701   : > { %v7597_v6 = vpop.eup %7596  ;;  %v5815_v34 = vadd.f32 %v7581_v46, %v5814_v33  ;;  %7616 = vpow2.f32 %v5459_v11  ;;  %v5858_v38 = vadd.f32 %v7595_v55, %v5857_v5  ;;  %v5465_v52 = vmul.f32 1.442695, %v5098_v43  ;;  %v15690_v46 = vld [vmem:[#allocation68_spill] sm:$0xff] }
 0x702   : > { %v7599_v49 = vpop.eup %7598  ;;  %7618 = vpow2.f32 %v5461_v27  ;;  %v5073_v7 = vsub.f32 %v15690_v46, %v15681_v2  ;;  %v5409_v48 = vmul.f32 1.442695, %v5070_v25  ;;  %v15692_v11 = vld [vmem:[#allocation128_spill] sm:$0xff]  ;;  %v15693_v27 = vld [vmem:[#allocation130_spill] sm:$0xff]  ;;  %v5411_v14 = vmul.f32 1.442695, %v5071_v16 }
 0x703   : > { %v7601_v20 = vpop.eup %7600  ;;  %v5816_v28 = vadd.f32 %v7583_v4, %v5815_v34  ;;  %v5859_v23 = vadd.f32 %v7599_v49, %v5858_v38  ;;  %7620 = vpow2.f32 %v5403_v35  ;;  %v15691_v4 = vld [vmem:[#allocation69_spill] sm:$0xff]  ;;  %v5075_v3 = vsub.f32 %v15692_v11, %v15681_v2  ;;  %v15694_v43 = vld [vmem:[#allocation132_spill] sm:$0xff] }
 0x704   : > { %v7603_v13 = vpop.eup %7602  ;;  %7622 = vpow2.f32 %v5405_v57  ;;  %v5074_v26 = vsub.f32 %v15691_v4, %v15681_v2  ;;  %v5076_v0 = vsub.f32 %v15693_v27, %v15681_v2  ;;  %v5413_v55 = vmul.f32 1.442695, %v5072_v47  ;;  %v15695_v25 = vld [vmem:[#allocation133_spill] sm:$0xff]  ;;  %v15696_v16 = vld [vmem:[#allocation240_spill] sm:$0xff] }
 0x705   : > { %v7605_v10 = vpop.eup %7604  ;;  %v5817_v40 = vadd.f32 %v7585_v18, %v5816_v28  ;;  %7624 = vpow2.f32 %v5463_v60  ;;  %v5860_v42 = vadd.f32 %v7601_v20, %v5859_v23  ;;  %v4493_v39 = vadd.f32 %v4285_v51, %v3645_v41  ;;  %v15698_v46 = vld [vmem:[#allocation201_spill] sm:$0xff] }
 0x706   : > { %v7607_v61 = vpop.eup %7606  ;;  %7626 = vpow2.f32 %v5407_v9  ;;  %v5077_v1 = vsub.f32 %v15694_v43, %v15681_v2  ;;  %v5078_v57 = vsub.f32 %v15695_v25, %v15681_v2  ;;  %v5415_v34 = vmul.f32 1.442695, %v5073_v7  ;;  %v15704_v43 = vld [vmem:[#allocation36_spill] sm:$0xff] }
 0x707   : > { %v7609_v33 = vpop.eup %7608  ;;  %v5818_v5 = vadd.f32 %v7587_v37, %v5817_v40  ;;  %v5861_v35 = vadd.f32 %v7603_v13, %v5860_v42  ;;  %7628 = vpow2.f32 %v5409_v48  ;;  %v5417_v45 = vmul.f32 1.442695, %v5074_v26  ;;  %4510 = vst.msk [vmem:[#allocation5 + $0x18] sm:$0xff] %vm4506_vm1, %v4493_v39  ;;  %v15697_v13 = vld [vmem:[#allocation164_spill] sm:$0xff]  ;;  %v15699_v48 = vld [vmem:[#allocation202_spill] sm:$0xff] }
 0x708   : > { %v7611_v18 = vpop.eup %7610  ;;  %7630 = vpow2.f32 %v5465_v52  ;;  %v5079_v9 = vsub.f32 %v15696_v16, %v15681_v2  ;;  %v5419_v20 = vmul.f32 1.442695, %v5075_v3  ;;  %v5421_v28 = vmul.f32 1.442695, %v5076_v0  ;;  %v15700_v40 = vld [vmem:[#allocation242_spill] sm:$0xff]  ;;  %v15701_v26 = vld [vmem:[#allocation244_spill] sm:$0xff] }
 0x709   : > { %v7613_v60 = vpop.eup %7612  ;;  %v5819_v38 = vadd.f32 %v7593_v56, %v5818_v5  ;;  %v5862_v49 = vadd.f32 %v7605_v10, %v5861_v35  ;;  %7632 = vpow2.f32 %v5411_v14  ;;  %v5115_v7 = vsub.f32 %v15698_v46, %v15697_v13  ;;  %v15702_v3 = vld [vmem:[#allocation35_spill] sm:$0xff] }
 0x70a   : > { %v7615_v37 = vpop.eup %7614  ;;  %7634 = vpow2.f32 %v5413_v55  ;;  %v5423_v52 = vmul.f32 1.442695, %v5077_v1  ;;  %v5116_v41 = vsub.f32 %v15699_v48, %v15697_v13  ;;  %v5080_v42 = vsub.f32 %v15700_v40, %v15681_v2  ;;  %v15703_v55 = vld [vmem:[#allocation245_spill] sm:$0xff]  ;;  %v15708_v40 = vld [vmem:[#allocation83_spill] sm:$0xff] }
 0x70b   : > { %v7617_v23 = vpop.eup %7616  ;;  %v5820_v12 = vadd.f32 %v7597_v6, %v5819_v38  ;;  %v5863_v47 = vadd.f32 %v7607_v61, %v5862_v49  ;;  %7636 = vpow2.f32 %v5415_v34  ;;  %v5425_v4 = vmul.f32 1.442695, %v5078_v57 }
 0x70c   : > { %v7619_v56 = vpop.eup %7618  ;;  %7638 = vpow2.f32 %v5417_v45  ;;  %v5081_v61 = vsub.f32 %v15701_v26, %v15681_v2  ;;  %v5427_v11 = vmul.f32 1.442695, %v5079_v9  ;;  %v5117_v27 = vsub.f32 %v15702_v3, %v15697_v13  ;;  %v15710_v26 = vld [vmem:[#allocation143_spill] sm:$0xff] }
 0x70d   : > { %v7621_v51 = vpop.eup %7620  ;;  %5821 = vadd.xlane.f32.xlu0 %v5820_v12  ;;  %v5864_v10 = vadd.f32 %v7609_v33, %v5863_v47  ;;  %7640 = vpow2.f32 %v5419_v20  ;;  %v5499_v35 = vmul.f32 1.442695, %v5115_v7  ;;  %v5082_v39 = vsub.f32 %v15703_v55, %v15681_v2  ;;  %v15706_v2 = vld [vmem:[#allocation79_spill] sm:$0xff] }
 0x70e   : > { %v7623_v6 = vpop.eup %7622  ;;  %7642 = vpow2.f32 %v5421_v28  ;;  %v5118_v1 = vsub.f32 %v15704_v43, %v15697_v13  ;;  %v5501_v25 = vmul.f32 1.442695, %v5116_v41  ;;  %v5429_v34 = vmul.f32 1.442695, %v5080_v42  ;;  %v15712_v55 = vld [vmem:[#allocation147_spill] sm:$0xff] }
 0x70f   : > { %v7625_v0 = vpop.eup %7624  ;;  %v5865_v14 = vadd.f32 %v7611_v18, %v5864_v10  ;;  %v5840_v5 = vadd.f32 %v7623_v6, %v7621_v51  ;;  %7644 = vpow2.f32 %v5423_v52  ;;  %v5431_v45 = vmul.f32 1.442695, %v5081_v61  ;;  %v15705_v18 = vld [vmem:[#allocation78_spill] sm:$0xff] }
 0x710   : > { %v7627_v33 = vpop.eup %7626  ;;  %7646 = vpow2.f32 %v5425_v4  ;;  %v5119_v16 = vsub.f32 %v15705_v18, %v15697_v13  ;;  %v5503_v9 = vmul.f32 1.442695, %v5117_v27  ;;  %v5120_v47 = vsub.f32 %v15706_v2, %v15697_v13  ;;  %v15709_v4 = vld [vmem:[#allocation142_spill] sm:$0xff]  ;;  %v15715_v2 = vld [vmem:[#allocation199_spill] sm:$0xff] }
 0x711   : > { %v5866_v57 = vadd.f32 %v7613_v60, %v5865_v14  ;;  %v5841_v38 = vadd.f32 %v7627_v33, %v5840_v5  ;;  %v7629_v49 = vpop.eup %7628  ;;  %7648 = vpow2.f32 %v5427_v11  ;;  %v5433_v7 = vmul.f32 1.442695, %v5082_v39  ;;  %v15707_v60 = vld [vmem:[#allocation81_spill] sm:$0xff] }
 0x712   : > { %v7631_v20 = vpop.eup %7630  ;;  %7650 = vpow2.f32 %v5499_v35  ;;  %v5121_v52 = vsub.f32 %v15707_v60, %v15697_v13  ;;  %v5505_v48 = vmul.f32 1.442695, %v5118_v1  ;;  %v5122_v42 = vsub.f32 %v15708_v40, %v15697_v13  ;;  %v15711_v35 = vld [vmem:[#allocation145_spill] sm:$0xff] }
 0x713   : > { %v5867_v28 = vadd.f32 %v7615_v37, %v5866_v57  ;;  %v5842_v12 = vadd.f32 %v7629_v49, %v5841_v38  ;;  %v7633_v46 = vpop.eup %7632  ;;  %7652 = vpow2.f32 %v5501_v25  ;;  %v5123_v6 = vsub.f32 %v15709_v4, %v15697_v13 }
 0x714   : > { %v7635_v41 = vpop.eup %7634  ;;  %7654 = vpow2.f32 %v5429_v34  ;;  %v5124_v61 = vsub.f32 %v15710_v26, %v15697_v13  ;;  %v5507_v11 = vmul.f32 1.442695, %v5119_v16  ;;  %v5509_v5 = vmul.f32 1.442695, %v5120_v47  ;;  %v15720_v26 = vld [vmem:[#allocation210_spill] sm:$0xff] }
 0x715   : > { %v5868_v51 = vadd.f32 %v7617_v23, %v5867_v28  ;;  %v5843_v10 = vadd.f32 %v7633_v46, %v5842_v12  ;;  %v7637_v37 = vpop.eup %7636  ;;  %7656 = vpow2.f32 %v5503_v9  ;;  %v5125_v33 = vsub.f32 %v15711_v35, %v15697_v13  ;;  %v15714_v12 = vld [vmem:[#allocation165_spill] sm:$0xff]  ;;  %v15721_v35 = vld [vmem:[#allocation34_spill] sm:$0xff] }
 0x716   : > { %v7639_v3 = vpop.eup %7638  ;;  %7658 = vpow2.f32 %v5431_v45  ;;  %v5126_v39 = vsub.f32 %v15712_v55, %v15697_v13  ;;  %v5511_v43 = vmul.f32 1.442695, %v5121_v52  ;;  %v5513_v34 = vmul.f32 1.442695, %v5122_v42  ;;  %v15717_v52 = vld [vmem:[#allocation200_spill] sm:$0xff] }
 0x717   : > { %v5869_v27 = vadd.f32 %v7619_v56, %v5868_v51  ;;  %v5844_v14 = vadd.f32 %v7635_v41, %v5843_v10  ;;  %v7641_v23 = vpop.eup %7640  ;;  %7660 = vpow2.f32 %v5505_v48  ;;  %v15713_v56 = vld [vmem:[#allocation254_spill] sm:$0xff]  ;;  %v5515_v45 = vmul.f32 1.442695, %v5123_v6  ;;  %v15718_v10 = vld [vmem:[#allocation257_spill] sm:$0xff] }
 0x718   : > { %v7643_v1 = vpop.eup %7642  ;;  %7662 = vpow2.f32 %v5433_v7  ;;  %v5127_v49 = vsub.f32 %v15713_v56, %v15697_v13  ;;  %v5517_v18 = vmul.f32 1.442695, %v5124_v61  ;;  %v5099_v47 = vsub.f32 %v15715_v2, %v15714_v12 }
 0x719   : > { %v5870_v25 = vadd.f32 %v7625_v0, %v5869_v27  ;;  %v5845_v57 = vadd.f32 %v7637_v37, %v5844_v14  ;;  %v7645_v38 = vpop.eup %7644  ;;  %7664 = vpow2.f32 %v5507_v11  ;;  %v15716_v0 = vld [vmem:[#allocation256_spill] sm:$0xff]  ;;  %v5519_v60 = vmul.f32 1.442695, %v5125_v33 }
 0x71a   : > { %v7647_v16 = vpop.eup %7646  ;;  %7666 = vpow2.f32 %v5509_v5  ;;  %v5128_v7 = vsub.f32 %v15716_v0, %v15697_v13  ;;  %v5100_v48 = vsub.f32 %v15717_v52, %v15714_v12  ;;  %v5521_v40 = vmul.f32 1.442695, %v5126_v39  ;;  %v15719_v37 = vld [vmem:[#allocation260_spill] sm:$0xff]  ;;  %v4251_v0 = vpop.xlane.xlu1 %4250  ;;  %v15725_v52 = vld [vmem:[#allocation77_spill] sm:$0xff] }
 0x71b   : > { %v5871_v9 = vadd.f32 %v7631_v20, %v5870_v25  ;;  %v5846_v28 = vadd.f32 %v7639_v3, %v5845_v57  ;;  %v7649_v46 = vpop.eup %7648  ;;  %7668 = vpow2.f32 %v5511_v43  ;;  %v5129_v20 = vsub.f32 %v15718_v10, %v15697_v13 }
 0x71c   : > { %v7651_v41 = vpop.eup %7650  ;;  %7670 = vpow2.f32 %v5513_v34  ;;  %v5130_v4 = vsub.f32 %v15719_v37, %v15697_v13  ;;  %v5523_v6 = vmul.f32 1.442695, %v5127_v49  ;;  %v5101_v61 = vsub.f32 %v15720_v26, %v15714_v12  ;;  %v15727_v37 = vld [vmem:[#allocation138_spill] sm:$0xff] }
 0x71d   : > { %5872 = vadd.xlane.f32.xlu1 %v5871_v9  ;;  %v5847_v51 = vadd.f32 %v7641_v23, %v5846_v28  ;;  %v7653_v42 = vpop.eup %7652  ;;  %7672 = vpow2.f32 %v5515_v45  ;;  %v5467_v14 = vmul.f32 1.442695, %v5099_v47  ;;  %v5525_v23 = vmul.f32 1.442695, %v5128_v7  ;;  %v15723_v28 = vld [vmem:[#allocation74_spill] sm:$0xff]  ;;  %v3643_v47 = vld [vmem:[#allocation5 + $0x8] sm:$0xff] }
 0x71e   : > { %v7655_v11 = vpop.eup %7654  ;;  %7674 = vpow2.f32 %v5517_v18  ;;  %v5891_v27 = vadd.f32 %v7653_v42, %v7651_v41  ;;  %v5102_v33 = vsub.f32 %v15721_v35, %v15714_v12  ;;  %v5469_v55 = vmul.f32 1.442695, %v5100_v48  ;;  %v15724_v7 = vld [vmem:[#allocation76_spill] sm:$0xff]  ;;  %v15729_v35 = vld [vmem:[#allocation141_spill] sm:$0xff] }
 0x71f   : > { %v5848_v3 = vadd.f32 %v7643_v1, %v5847_v51  ;;  %v7657_v5 = vpop.eup %7656  ;;  %7676 = vpow2.f32 %v5519_v60  ;;  %v5527_v13 = vmul.f32 1.442695, %v5129_v20  ;;  %v5529_v34 = vmul.f32 1.442695, %v5130_v4  ;;  %v15722_v1 = vld [vmem:[#allocation72_spill] sm:$0xff] }
 0x720   : > { %v7659_v39 = vpop.eup %7658  ;;  %7678 = vpow2.f32 %v5521_v40  ;;  %v5892_v25 = vadd.f32 %v7657_v5, %v5891_v27  ;;  %v5103_v56 = vsub.f32 %v15722_v1, %v15714_v12  ;;  %v5471_v49 = vmul.f32 1.442695, %v5101_v61  ;;  %v15726_v20 = vld [vmem:[#allocation136_spill] sm:$0xff] }
 0x721   : > { %v5849_v43 = vadd.f32 %v7645_v38, %v5848_v3  ;;  %v7661_v57 = vpop.eup %7660  ;;  %7680 = vpow2.f32 %v5523_v6  ;;  %v5104_v2 = vsub.f32 %v15723_v28, %v15714_v12  ;;  %v5105_v60 = vsub.f32 %v15724_v7, %v15714_v12 }
 0x722   : > { %v7663_v45 = vpop.eup %7662  ;;  %v5893_v9 = vadd.f32 %v7661_v57, %v5892_v25  ;;  %7682 = vpow2.f32 %v5467_v14  ;;  %v5106_v48 = vsub.f32 %v15725_v52, %v15714_v12  ;;  %v5473_v41 = vmul.f32 1.442695, %v5102_v33  ;;  %v15734_v52 = vld [vmem:[#allocation206_spill] sm:$0xff] }
 0x723   : > { %v5850_v18 = vadd.f32 %v7647_v16, %v5849_v43  ;;  %v7665_v38 = vpop.eup %7664  ;;  %7684 = vpow2.f32 %v5469_v55  ;;  %v5107_v40 = vsub.f32 %v15726_v20, %v15714_v12  ;;  %v5108_v4 = vsub.f32 %v15727_v37, %v15714_v12 }
 0x724   : > { %v7667_v51 = vpop.eup %7666  ;;  %7686 = vpow2.f32 %v5525_v23  ;;  %v5894_v16 = vadd.f32 %v7665_v38, %v5893_v9  ;;  %v5475_v6 = vmul.f32 1.442695, %v5103_v56  ;;  %v4491_v26 = vadd.f32 %v4251_v0, %v3643_v47  ;;  %v15731_v47 = vld [vmem:[#allocation301_spill] sm:$0xff] }
 0x725   : > { %v5851_v10 = vadd.f32 %v7649_v46, %v5850_v18  ;;  %v7669_v42 = vpop.eup %7668  ;;  %7688 = vpow2.f32 %v5471_v49  ;;  %v5477_v14 = vmul.f32 1.442695, %v5104_v2  ;;  %v15728_v46 = vld [vmem:[#allocation140_spill] sm:$0xff]  ;;  %v5110_v33 = vsub.f32 %v15729_v35, %v15714_v12  ;;  %v15732_v0 = vld [vmem:[#allocation205_spill] sm:$0xff] }
 0x726   : > { %v7671_v61 = vpop.eup %7670  ;;  %7690 = vpow2.f32 %v5527_v13  ;;  %v5895_v27 = vadd.f32 %v7667_v51, %v5894_v16  ;;  %v5109_v23 = vsub.f32 %v15728_v46, %v15714_v12  ;;  %v5479_v55 = vmul.f32 1.442695, %v5105_v60  ;;  %4508 = vst.msk [vmem:[#allocation5 + $0x8] sm:$0xff] %vm4506_vm1, %v4491_v26  ;;  %v15730_v13 = vld [vmem:[#allocation249_spill] sm:$0xff]  ;;  %v15738_v46 = vld [vmem:[#allocation40_spill] sm:$0xff] }
 0x727   : > { %v5852_v3 = vadd.f32 %v7655_v11, %v5851_v10  ;;  %v7673_v5 = vpop.eup %7672  ;;  %7692 = vpow2.f32 %v5473_v41  ;;  %v5481_v1 = vmul.f32 1.442695, %v5106_v48  ;;  %v5111_v56 = vsub.f32 %v15730_v13, %v15714_v12  ;;  %v15735_v10 = vld [vmem:[#allocation252_spill] sm:$0xff] }
 0x728   : > { %v7675_v43 = vpop.eup %7674  ;;  %7694 = vpow2.f32 %v5529_v34  ;;  %v5896_v57 = vadd.f32 %v7669_v42, %v5895_v27  ;;  %v5483_v49 = vmul.f32 1.442695, %v5107_v40  ;;  %v5485_v18 = vmul.f32 1.442695, %v5108_v4  ;;  %v15736_v40 = vld [vmem:[#allocation253_spill] sm:$0xff]  ;;  %v15737_v4 = vld [vmem:[#allocation39_spill] sm:$0xff] }
 0x729   : > { %v5853_v25 = vadd.f32 %v7659_v39, %v5852_v3  ;;  %v7677_v11 = vpop.eup %7676  ;;  %7696 = vpow2.f32 %v5475_v6  ;;  %v5147_v38 = vsub.f32 %v15732_v0, %v15731_v47  ;;  %v15733_v39 = vld [vmem:[#allocation250_spill] sm:$0xff]  ;;  %v5487_v60 = vmul.f32 1.442695, %v5109_v23 }
 0x72a   : > { %v7679_v9 = vpop.eup %7678  ;;  %v5897_v2 = vadd.f32 %v7671_v61, %v5896_v57  ;;  %7698 = vpow2.f32 %v5477_v14  ;;  %v5112_v34 = vsub.f32 %v15733_v39, %v15714_v12  ;;  %v5148_v48 = vsub.f32 %v15734_v52, %v15731_v47  ;;  %v4319_v39 = vpop.xlane.xlu0 %4318  ;;  %v15742_v52 = vld [vmem:[#allocation91_spill] sm:$0xff] }
 0x72b   : > { %v5854_v28 = vadd.f32 %v7663_v45, %v5853_v25  ;;  %v7681_v7 = vpop.eup %7680  ;;  %7700 = vpow2.f32 %v5479_v55  ;;  %v5113_v45 = vsub.f32 %v15735_v10, %v15714_v12  ;;  %v5489_v16 = vmul.f32 1.442695, %v5110_v33 }
 0x72c   : > { %v7683_v41 = vpop.eup %7682  ;;  %v5898_v51 = vadd.f32 %v7673_v5, %v5897_v2  ;;  %7702 = vpow2.f32 %v5481_v1  ;;  %v5114_v42 = vsub.f32 %v15736_v40, %v15714_v12  ;;  %v5491_v37 = vmul.f32 1.442695, %v5111_v56  ;;  %v15740_v2 = vld [vmem:[#allocation87_spill] sm:$0xff] }
 0x72d   : > { %5855 = vadd.xlane.f32.xlu0 %v5854_v28  ;;  %v7685_v20 = vpop.eup %7684  ;;  %7704 = vpow2.f32 %v5483_v49  ;;  %v5149_v6 = vsub.f32 %v15737_v4, %v15731_v47  ;;  %v5563_v27 = vmul.f32 1.442695, %v5147_v38  ;;  %v5493_v5 = vmul.f32 1.442695, %v5112_v34  ;;  %v3647_v38 = vld [vmem:[#allocation5 + $0x28] sm:$0xff]  ;;  %v15744_v40 = vld [vmem:[#allocation151_spill] sm:$0xff] }
 0x72e   : > { %v7687_v26 = vpop.eup %7686  ;;  %v5899_v61 = vadd.f32 %v7675_v43, %v5898_v51  ;;  %7706 = vpow2.f32 %v5485_v18  ;;  %v5874_v3 = vadd.f32 %v7685_v20, %v7683_v41  ;;  %v5150_v23 = vsub.f32 %v15738_v46, %v15731_v47  ;;  %v15739_v43 = vld [vmem:[#allocation86_spill] sm:$0xff]  ;;  %v15741_v34 = vld [vmem:[#allocation89_spill] sm:$0xff]  ;;  %v15746_v46 = vld [vmem:[#allocation155_spill] sm:$0xff] }
 0x72f   : > { %v7689_v14 = vpop.eup %7688  ;;  %7708 = vpow2.f32 %v5487_v60  ;;  %v5565_v35 = vmul.f32 1.442695, %v5148_v48  ;;  %v5495_v12 = vmul.f32 1.442695, %v5113_v45  ;;  %v5497_v1 = vmul.f32 1.442695, %v5114_v42 }
 0x730   : > { %v7691_v33 = vpop.eup %7690  ;;  %v5900_v55 = vadd.f32 %v7677_v11, %v5899_v61  ;;  %7710 = vpow2.f32 %v5489_v16  ;;  %v5875_v25 = vadd.f32 %v7689_v14, %v5874_v3  ;;  %v5151_v13 = vsub.f32 %v15739_v43, %v15731_v47  ;;  %v15743_v45 = vld [vmem:[#allocation150_spill] sm:$0xff] }
 0x731   : > { %v7693_v57 = vpop.eup %7692  ;;  %7712 = vpow2.f32 %v5491_v37  ;;  %v5567_v56 = vmul.f32 1.442695, %v5149_v6  ;;  %v5152_v0 = vsub.f32 %v15740_v2, %v15731_v47  ;;  %v5153_v60 = vsub.f32 %v15741_v34, %v15731_v47 }
 0x732   : > { %v7695_v49 = vpop.eup %7694  ;;  %v5901_v18 = vadd.f32 %v7679_v9, %v5900_v55  ;;  %v5876_v28 = vadd.f32 %v7693_v57, %v5875_v25  ;;  %7714 = vpow2.f32 %v5563_v27  ;;  %v5154_v48 = vsub.f32 %v15742_v52, %v15731_v47  ;;  %v15751_v52 = vld [vmem:[#allocation204_spill] sm:$0xff] }
 0x733   : > { %v7697_v11 = vpop.eup %7696  ;;  %7716 = vpow2.f32 %v5565_v35  ;;  %v5569_v41 = vmul.f32 1.442695, %v5150_v23  ;;  %v5155_v16 = vsub.f32 %v15743_v45, %v15731_v47  ;;  %v5156_v42 = vsub.f32 %v15744_v40, %v15731_v47 }
 0x734   : > { %v7699_v51 = vpop.eup %7698  ;;  %v5902_v10 = vadd.f32 %v7681_v7, %v5901_v18  ;;  %7718 = vpow2.f32 %v5493_v5  ;;  %v5877_v9 = vadd.f32 %v7697_v11, %v5876_v28  ;;  %v5571_v37 = vmul.f32 1.442695, %v5151_v13  ;;  %v15745_v7 = vld [vmem:[#allocation153_spill] sm:$0xff] }
 0x735   : > { %v7701_v20 = vpop.eup %7700  ;;  %7720 = vpow2.f32 %v5567_v56  ;;  %v4495_v4 = vadd.f32 %v4319_v39, %v3647_v38  ;;  %v5573_v27 = vmul.f32 1.442695, %v5152_v0  ;;  %v5157_v5 = vsub.f32 %v15745_v7, %v15731_v47  ;;  %v15748_v38 = vld [vmem:[#allocation303_spill] sm:$0xff]  ;;  %v15755_v7 = vld [vmem:[#allocation38_spill] sm:$0xff] }
 0x736   : > { %v7703_v6 = vpop.eup %7702  ;;  %v5903_v61 = vadd.f32 %v7687_v26, %v5902_v10  ;;  %7722 = vpow2.f32 %v5495_v12  ;;  %v5878_v3 = vadd.f32 %v7699_v51, %v5877_v9  ;;  %v5158_v23 = vsub.f32 %v15746_v46, %v15731_v47  ;;  %v15747_v12 = vld [vmem:[#allocation264_spill] sm:$0xff]  ;;  %v15749_v39 = vld [vmem:[#allocation203_spill] sm:$0xff]  ;;  %v15752_v10 = vld [vmem:[#allocation266_spill] sm:$0xff] }
 0x737   : > { %v7705_v14 = vpop.eup %7704  ;;  %7724 = vpow2.f32 %v5569_v41  ;;  %v5575_v35 = vmul.f32 1.442695, %v5153_v60  ;;  %4512 = vst.msk [vmem:[#allocation5 + $0x28] sm:$0xff] %vm4506_vm1, %v4495_v4  ;;  %v5577_v43 = vmul.f32 1.442695, %v5154_v48  ;;  %v5159_v13 = vsub.f32 %v15747_v12, %v15731_v47 }
 0x738   : > { %v7707_v55 = vpop.eup %7706  ;;  %v5904_v25 = vadd.f32 %v7691_v33, %v5903_v61  ;;  %7726 = vpow2.f32 %v5497_v1  ;;  %v5879_v57 = vadd.f32 %v7701_v20, %v5878_v3  ;;  %v5579_v56 = vmul.f32 1.442695, %v5155_v16  ;;  %v15750_v33 = vld [vmem:[#allocation265_spill] sm:$0xff] }
 0x739   : > { %v7709_v26 = vpop.eup %7708  ;;  %7728 = vpow2.f32 %v5571_v37  ;;  %v5581_v18 = vmul.f32 1.442695, %v5156_v42  ;;  %v5131_v11 = vsub.f32 %v15749_v39, %v15748_v38  ;;  %v5160_v1 = vsub.f32 %v15750_v33, %v15731_v47  ;;  %v15753_v16 = vld [vmem:[#allocation269_spill] sm:$0xff]  ;;  %v4302_v33 = vpop.xlane.xlu1 %4301 }
 0x73a   : > { %v7711_v28 = vpop.eup %7710  ;;  %v5905_v2 = vadd.f32 %v7695_v49, %v5904_v25  ;;  %v5880_v0 = vadd.f32 %v7703_v6, %v5879_v57  ;;  %7730 = vpow2.f32 %v5573_v27  ;;  %v5583_v60 = vmul.f32 1.442695, %v5157_v5  ;;  %v15754_v42 = vld [vmem:[#allocation37_spill] sm:$0xff] }
 0x73b   : > { %v7713_v34 = vpop.eup %7712  ;;  %7732 = vpow2.f32 %v5575_v35  ;;  %v5132_v48 = vsub.f32 %v15751_v52, %v15748_v38  ;;  %v5161_v49 = vsub.f32 %v15752_v10, %v15731_v47  ;;  %v5585_v9 = vmul.f32 1.442695, %v5158_v23  ;;  %v15759_v52 = vld [vmem:[#allocation85_spill] sm:$0xff] }
 0x73c   : > { %v7715_v41 = vpop.eup %7714  ;;  %5906 = vadd.xlane.f32.xlu1 %v5905_v2  ;;  %v5881_v51 = vadd.f32 %v7705_v14, %v5880_v0  ;;  %7734 = vpow2.f32 %v5577_v43  ;;  %v5162_v20 = vsub.f32 %v15753_v16, %v15731_v47  ;;  %v5587_v40 = vmul.f32 1.442695, %v5159_v13  ;;  %v15757_v0 = vld [vmem:[#allocation82_spill] sm:$0xff] }
 0x73d   : > { %v7717_v45 = vpop.eup %7716  ;;  %7736 = vpow2.f32 %v5579_v56  ;;  %v5133_v37 = vsub.f32 %v15754_v42, %v15748_v38  ;;  %v5531_v3 = vmul.f32 1.442695, %v5131_v11  ;;  %v5589_v14 = vmul.f32 1.442695, %v5160_v1  ;;  %v3646_v11 = vld [vmem:[#allocation5 + $0x20] sm:$0xff]  ;;  %v15761_v16 = vld [vmem:[#allocation146_spill] sm:$0xff] }
 0x73e   : > { %v7719_v4 = vpop.eup %7718  ;;  %v5882_v6 = vadd.f32 %v7707_v55, %v5881_v51  ;;  %7738 = vpow2.f32 %v5581_v18  ;;  %v5925_v61 = vadd.f32 %v7717_v45, %v7715_v41  ;;  %v5134_v5 = vsub.f32 %v15755_v7, %v15748_v38  ;;  %v15756_v55 = vld [vmem:[#allocation80_spill] sm:$0xff]  ;;  %v15763_v7 = vld [vmem:[#allocation149_spill] sm:$0xff] }
 0x73f   : > { %v7721_v27 = vpop.eup %7720  ;;  %7740 = vpow2.f32 %v5583_v60  ;;  %v5533_v46 = vmul.f32 1.442695, %v5132_v48  ;;  %v5591_v47 = vmul.f32 1.442695, %v5161_v49  ;;  %v5593_v43 = vmul.f32 1.442695, %v5162_v20 }
 0x740   : > { %v7723_v23 = vpop.eup %7722  ;;  %v5883_v35 = vadd.f32 %v7709_v26, %v5882_v6  ;;  %7742 = vpow2.f32 %v5585_v9  ;;  %v5926_v25 = vadd.f32 %v7721_v27, %v5925_v61  ;;  %v5135_v12 = vsub.f32 %v15756_v55, %v15748_v38  ;;  %v15758_v1 = vld [vmem:[#allocation84_spill] sm:$0xff] }
 0x741   : > { %v7725_v57 = vpop.eup %7724  ;;  %7744 = vpow2.f32 %v5587_v40  ;;  %v5535_v13 = vmul.f32 1.442695, %v5133_v37  ;;  %v5136_v39 = vsub.f32 %v15757_v0, %v15748_v38  ;;  %v5137_v60 = vsub.f32 %v15758_v1, %v15748_v38  ;;  %v15760_v49 = vld [vmem:[#allocation144_spill] sm:$0xff] }
 0x742   : > { %v7727_v56 = vpop.eup %7726  ;;  %v5884_v18 = vadd.f32 %v7711_v28, %v5883_v35  ;;  %v5927_v2 = vadd.f32 %v7725_v57, %v5926_v25  ;;  %7746 = vpow2.f32 %v5531_v3  ;;  %v5138_v48 = vsub.f32 %v15759_v52, %v15748_v38  ;;  %v15768_v52 = vld [vmem:[#allocation212_spill] sm:$0xff] }
 0x743   : > { %v7729_v26 = vpop.eup %7728  ;;  %7748 = vpow2.f32 %v5533_v46  ;;  %v5537_v41 = vmul.f32 1.442695, %v5134_v5  ;;  %v5139_v9 = vsub.f32 %v15760_v49, %v15748_v38  ;;  %v5140_v20 = vsub.f32 %v15761_v16, %v15748_v38 }
 0x744   : > { %v7731_v51 = vpop.eup %7730  ;;  %v5885_v10 = vadd.f32 %v7713_v34, %v5884_v18  ;;  %7750 = vpow2.f32 %v5589_v14  ;;  %v5928_v28 = vadd.f32 %v7729_v26, %v5927_v2  ;;  %v5539_v40 = vmul.f32 1.442695, %v5135_v12  ;;  %v15762_v34 = vld [vmem:[#allocation148_spill] sm:$0xff] }
 0x745   : > { %v7733_v45 = vpop.eup %7732  ;;  %7752 = vpow2.f32 %v5535_v13  ;;  %v4494_v42 = vadd.f32 %v4302_v33, %v3646_v11  ;;  %v5541_v3 = vmul.f32 1.442695, %v5136_v39  ;;  %v5141_v14 = vsub.f32 %v15762_v34, %v15748_v38  ;;  %v15765_v11 = vld [vmem:[#allocation174_spill] sm:$0xff]  ;;  %v15766_v33 = vld [vmem:[#allocation211_spill] sm:$0xff] }
 0x746   : > { %v7735_v37 = vpop.eup %7734  ;;  %v5886_v6 = vadd.f32 %v7719_v4, %v5885_v10  ;;  %7754 = vpow2.f32 %v5591_v47  ;;  %v5929_v61 = vadd.f32 %v7731_v51, %v5928_v28  ;;  %v5142_v5 = vsub.f32 %v15763_v7, %v15748_v38  ;;  %v15764_v47 = vld [vmem:[#allocation258_spill] sm:$0xff]  ;;  %v15769_v10 = vld [vmem:[#allocation261_spill] sm:$0xff] }
 0x747   : > { %v7737_v27 = vpop.eup %7736  ;;  %7756 = vpow2.f32 %v5537_v41  ;;  %v5543_v46 = vmul.f32 1.442695, %v5137_v60  ;;  %4511 = vst.msk [vmem:[#allocation5 + $0x20] sm:$0xff] %vm4506_vm1, %v4494_v42  ;;  %v5545_v55 = vmul.f32 1.442695, %v5138_v48  ;;  %v5143_v12 = vsub.f32 %v15764_v47, %v15748_v38  ;;  %v15772_v34 = vld [vmem:[#allocation46_spill] sm:$0xff] }
 0x748   : > { %v7739_v35 = vpop.eup %7738  ;;  %v5887_v25 = vadd.f32 %v7723_v23, %v5886_v6  ;;  %7758 = vpow2.f32 %v5593_v43  ;;  %v5930_v57 = vadd.f32 %v7733_v45, %v5929_v61  ;;  %v5547_v13 = vmul.f32 1.442695, %v5139_v9  ;;  %v15767_v23 = vld [vmem:[#allocation259_spill] sm:$0xff] }
 0x749   : > { %v7741_v4 = vpop.eup %7740  ;;  %7760 = vpow2.f32 %v5539_v40  ;;  %v5549_v18 = vmul.f32 1.442695, %v5140_v20  ;;  %v5179_v26 = vsub.f32 %v15766_v33, %v15765_v11  ;;  %v5144_v43 = vsub.f32 %v15767_v23, %v15748_v38  ;;  %v15770_v9 = vld [vmem:[#allocation263_spill] sm:$0xff]  ;;  %v15771_v20 = vld [vmem:[#allocation44_spill] sm:$0xff]  ;;  %v4353_v23 = vpop.xlane.xlu0 %4352 }
 0x74a   : > { %v7743_v2 = vpop.eup %7742  ;;  %v5888_v0 = vadd.f32 %v7727_v56, %v5887_v25  ;;  %v5931_v39 = vadd.f32 %v7735_v37, %v5930_v57  ;;  %7762 = vpow2.f32 %v5541_v3  ;;  %v5551_v60 = vmul.f32 1.442695, %v5141_v14 }
 0x74b   : > { %v7745_v1 = vpop.eup %7744  ;;  %7764 = vpow2.f32 %v5543_v46  ;;  %v5180_v48 = vsub.f32 %v15768_v52, %v15765_v11  ;;  %v5145_v56 = vsub.f32 %v15769_v10, %v15748_v38  ;;  %v5553_v28 = vmul.f32 1.442695, %v5142_v5  ;;  %v15776_v52 = vld [vmem:[#allocation99_spill] sm:$0xff] }
 0x74c   : > { %v7747_v41 = vpop.eup %7746  ;;  %5889 = vadd.xlane.f32.xlu0 %v5888_v0  ;;  %v5932_v51 = vadd.f32 %v7737_v27, %v5931_v39  ;;  %7766 = vpow2.f32 %v5545_v55  ;;  %v5146_v45 = vsub.f32 %v15770_v9, %v15748_v38  ;;  %v5555_v16 = vmul.f32 1.442695, %v5143_v12  ;;  %v15774_v39 = vld [vmem:[#allocation95_spill] sm:$0xff] }
 0x74d   : > { %v7749_v49 = vpop.eup %7748  ;;  %7768 = vpow2.f32 %v5547_v13  ;;  %v5181_v40 = vsub.f32 %v15771_v20, %v15765_v11  ;;  %v5627_v61 = vmul.f32 1.442695, %v5179_v26  ;;  %v5557_v27 = vmul.f32 1.442695, %v5144_v43  ;;  %v3649_v26 = vld [vmem:[#allocation5 + $0x38] sm:$0xff]  ;;  %v15775_v43 = vld [vmem:[#allocation97_spill] sm:$0xff] }
 0x74e   : > { %v7751_v42 = vpop.eup %7750  ;;  %v5933_v37 = vadd.f32 %v7739_v35, %v5932_v51  ;;  %7770 = vpow2.f32 %v5549_v18  ;;  %v5908_v6 = vadd.f32 %v7749_v49, %v7747_v41  ;;  %v5182_v14 = vsub.f32 %v15772_v34, %v15765_v11  ;;  %v15773_v35 = vld [vmem:[#allocation94_spill] sm:$0xff]  ;;  %v15778_v9 = vld [vmem:[#allocation159_spill] sm:$0xff] }
 0x74f   : > { %v7753_v3 = vpop.eup %7752  ;;  %7772 = vpow2.f32 %v5551_v60  ;;  %v5629_v7 = vmul.f32 1.442695, %v5180_v48  ;;  %v5559_v38 = vmul.f32 1.442695, %v5145_v56  ;;  %v5561_v55 = vmul.f32 1.442695, %v5146_v45 }
 0x750   : > { %v7755_v5 = vpop.eup %7754  ;;  %v5934_v46 = vadd.f32 %v7741_v4, %v5933_v37  ;;  %7774 = vpow2.f32 %v5553_v28  ;;  %v5909_v25 = vadd.f32 %v7753_v3, %v5908_v6  ;;  %v5183_v47 = vsub.f32 %v15773_v35, %v15765_v11  ;;  %v15777_v56 = vld [vmem:[#allocation158_spill] sm:$0xff] }
 0x751   : > { %v7757_v57 = vpop.eup %7756  ;;  %7776 = vpow2.f32 %v5555_v16  ;;  %v5631_v12 = vmul.f32 1.442695, %v5181_v40  ;;  %v5184_v33 = vsub.f32 %v15774_v39, %v15765_v11  ;;  %v5185_v60 = vsub.f32 %v15775_v43, %v15765_v11  ;;  %v15781_v39 = vld [vmem:[#allocation192_spill] sm:$0xff] }
 0x752   : > { %v7759_v13 = vpop.eup %7758  ;;  %v5935_v18 = vadd.f32 %v7743_v2, %v5934_v46  ;;  %v5910_v0 = vadd.f32 %v7757_v57, %v5909_v25  ;;  %7778 = vpow2.f32 %v5627_v61  ;;  %v5186_v48 = vsub.f32 %v15776_v52, %v15765_v11 }
 0x753   : > { %v7761_v4 = vpop.eup %7760  ;;  %7780 = vpow2.f32 %v5629_v7  ;;  %v5633_v41 = vmul.f32 1.442695, %v5182_v14  ;;  %v5187_v28 = vsub.f32 %v15777_v56, %v15765_v11  ;;  %v5188_v45 = vsub.f32 %v15778_v9, %v15765_v11  ;;  %v15786_v56 = vld [vmem:[#allocation41_spill] sm:$0xff] }
 0x754   : > { %v7763_v51 = vpop.eup %7762  ;;  %v5936_v10 = vadd.f32 %v7745_v1, %v5935_v18  ;;  %7782 = vpow2.f32 %v5557_v27  ;;  %v5911_v2 = vadd.f32 %v7761_v4, %v5910_v0  ;;  %v5635_v16 = vmul.f32 1.442695, %v5183_v47  ;;  %v15779_v27 = vld [vmem:[#allocation162_spill] sm:$0xff]  ;;  %v15783_v4 = vld [vmem:[#allocation209_spill] sm:$0xff] }
 0x755   : > { %v7765_v49 = vpop.eup %7764  ;;  %7784 = vpow2.f32 %v5631_v12  ;;  %v4497_v20 = vadd.f32 %v4353_v23, %v3649_v26  ;;  %v5637_v61 = vmul.f32 1.442695, %v5184_v33  ;;  %v5189_v1 = vsub.f32 %v15558_v24, %v15765_v11 }
 0x756   : > { %v7767_v40 = vpop.eup %7766  ;;  %v5937_v37 = vadd.f32 %v7751_v42, %v5936_v10  ;;  %7786 = vpow2.f32 %v5559_v38  ;;  %v5912_v6 = vadd.f32 %v7763_v51, %v5911_v2  ;;  %v5190_v34 = vsub.f32 %v15779_v27, %v15765_v11  ;;  %v15780_v38 = vld [vmem:[#allocation272_spill] sm:$0xff] }
 0x757   : > { %v7769_v3 = vpop.eup %7768  ;;  %7788 = vpow2.f32 %v5633_v41  ;;  %v5639_v14 = vmul.f32 1.442695, %v5185_v60  ;;  %4514 = vst.msk [vmem:[#allocation5 + $0x38] sm:$0xff] %vm4506_vm1, %v4497_v20  ;;  %v5641_v57 = vmul.f32 1.442695, %v5186_v48  ;;  %v5191_v35 = vsub.f32 %v15780_v38, %v15765_v11  ;;  %v15784_v48 = vld [vmem:[#allocation274_spill] sm:$0xff] }
 0x758   : > { %v7771_v7 = vpop.eup %7770  ;;  %v5938_v46 = vadd.f32 %v7755_v5, %v5937_v37  ;;  %7790 = vpow2.f32 %v5561_v55  ;;  %v5913_v25 = vadd.f32 %v7765_v49, %v5912_v6  ;;  %v5643_v47 = vmul.f32 1.442695, %v5187_v28  ;;  %v15782_v5 = vld [vmem:[#allocation273_spill] sm:$0xff]  ;;  %v15787_v37 = vld [vmem:[#allocation42_spill] sm:$0xff] }
 0x759   : > { %v7773_v42 = vpop.eup %7772  ;;  %7792 = vpow2.f32 %v5635_v16  ;;  %v5645_v12 = vmul.f32 1.442695, %v5188_v45  ;;  %v5163_v33 = vsub.f32 %v15564_v36, %v15781_v39  ;;  %v5192_v55 = vsub.f32 %v15782_v5, %v15765_v11  ;;  %v15785_v36 = vld [vmem:[#allocation278_spill] sm:$0xff] }
 0x75a   : > { %v7775_v24 = vpop.eup %7774  ;;  %v5939_v18 = vadd.f32 %v7759_v13, %v5938_v46  ;;  %v5914_v0 = vadd.f32 %v7767_v40, %v5913_v25  ;;  %7794 = vpow2.f32 %v5637_v61  ;;  %v5647_v23 = vmul.f32 1.442695, %v5189_v1 }
 0x75b   : > { %v7777_v26 = vpop.eup %7776  ;;  %7796 = vpow2.f32 %v5639_v14  ;;  %v5164_v43 = vsub.f32 %v15783_v4, %v15781_v39  ;;  %v5193_v13 = vsub.f32 %v15784_v48, %v15765_v11  ;;  %v5649_v41 = vmul.f32 1.442695, %v5190_v34 }
 0x75c   : > { %v7779_v60 = vpop.eup %7778  ;;  %5940 = vadd.xlane.f32.xlu1 %v5939_v18  ;;  %v5915_v52 = vadd.f32 %v7769_v3, %v5914_v0  ;;  %7798 = vpow2.f32 %v5641_v57  ;;  %v5194_v10 = vsub.f32 %v15785_v36, %v15765_v11  ;;  %v5651_v2 = vmul.f32 1.442695, %v5191_v35  ;;  %v3648_v18 = vld [vmem:[#allocation5 + $0x30] sm:$0xff]  ;;  %v4336_v0 = vpop.xlane.xlu1 %4335 }
 0x75d   : > { %v7781_v51 = vpop.eup %7780  ;;  %7800 = vpow2.f32 %v5643_v47  ;;  %v5165_v28 = vsub.f32 %v15786_v56, %v15781_v39  ;;  %v5595_v16 = vmul.f32 1.442695, %v5163_v33  ;;  %v5653_v40 = vmul.f32 1.442695, %v5192_v55  ;;  %v15789_v47 = vld [vmem:[#allocation90_spill] sm:$0xff]  ;;  %v15790_v33 = vld [vmem:[#allocation92_spill] sm:$0xff] }
 0x75e   : > { %v7783_v49 = vpop.eup %7782  ;;  %v5916_v9 = vadd.f32 %v7771_v7, %v5915_v52  ;;  %7802 = vpow2.f32 %v5645_v12  ;;  %v5959_v45 = vadd.f32 %v7781_v51, %v7779_v60  ;;  %v5166_v6 = vsub.f32 %v15787_v37, %v15781_v39  ;;  %v15788_v7 = vld [vmem:[#allocation88_spill] sm:$0xff]  ;;  %v15791_v55 = vld [vmem:[#allocation93_spill] sm:$0xff] }
 0x75f   : > { %v7785_v20 = vpop.eup %7784  ;;  %7804 = vpow2.f32 %v5647_v23  ;;  %v5597_v61 = vmul.f32 1.442695, %v5164_v43  ;;  %v5655_v11 = vmul.f32 1.442695, %v5193_v13  ;;  %v5657_v14 = vmul.f32 1.442695, %v5194_v10 }
 0x760   : > { %v7787_v3 = vpop.eup %7786  ;;  %v5917_v1 = vadd.f32 %v7773_v42, %v5916_v9  ;;  %7806 = vpow2.f32 %v5649_v41  ;;  %v5960_v27 = vadd.f32 %v7785_v20, %v5959_v45  ;;  %v5167_v46 = vsub.f32 %v15788_v7, %v15781_v39  ;;  %v15792_v52 = vld [vmem:[#allocation152_spill] sm:$0xff]  ;;  %v15793_v41 = vld [vmem:[#allocation154_spill] sm:$0xff]  ;;  %v15795_v20 = vld [vmem:[#allocation157_spill] sm:$0xff] }
 0x761   : > { %v7789_v34 = vpop.eup %7788  ;;  %7808 = vpow2.f32 %v5651_v2  ;;  %v5599_v25 = vmul.f32 1.442695, %v5165_v28  ;;  %v5168_v12 = vsub.f32 %v15789_v47, %v15781_v39  ;;  %v5169_v5 = vsub.f32 %v15790_v33, %v15781_v39  ;;  %v15797_v47 = vld [vmem:[#allocation111_spill] sm:$0xff]  ;;  %v15800_v33 = vld [vmem:[#allocation214_spill] sm:$0xff] }
 0x762   : > { %v7791_v57 = vpop.eup %7790  ;;  %v5918_v38 = vadd.f32 %v7775_v24, %v5917_v1  ;;  %v5961_v35 = vadd.f32 %v7789_v34, %v5960_v27  ;;  %7810 = vpow2.f32 %v5595_v16  ;;  %v5170_v23 = vsub.f32 %v15791_v55, %v15781_v39 }
 0x763   : > { %v7793_v42 = vpop.eup %7792  ;;  %7812 = vpow2.f32 %v5597_v61  ;;  %v5601_v4 = vmul.f32 1.442695, %v5166_v6  ;;  %v5171_v48 = vsub.f32 %v15792_v52, %v15781_v39  ;;  %v5172_v51 = vsub.f32 %v15793_v41, %v15781_v39 }
 0x764   : > { %v7795_v43 = vpop.eup %7794  ;;  %v5919_v60 = vadd.f32 %v7777_v26, %v5918_v38  ;;  %7814 = vpow2.f32 %v5653_v40  ;;  %v5962_v24 = vadd.f32 %v7793_v42, %v5961_v35  ;;  %v5603_v36 = vmul.f32 1.442695, %v5167_v46  ;;  %v15794_v26 = vld [vmem:[#allocation156_spill] sm:$0xff] }
 0x765   : > { %v7797_v13 = vpop.eup %7796  ;;  %7816 = vpow2.f32 %v5599_v25  ;;  %v4496_v10 = vadd.f32 %v4336_v0, %v3648_v18  ;;  %v5605_v9 = vmul.f32 1.442695, %v5168_v12  ;;  %v5173_v16 = vsub.f32 %v15794_v26, %v15781_v39  ;;  %v15798_v12 = vld [vmem:[#allocation213_spill] sm:$0xff] }
 0x766   : > { %v7799_v2 = vpop.eup %7798  ;;  %v5920_v56 = vadd.f32 %v7783_v49, %v5919_v60  ;;  %7818 = vpow2.f32 %v5655_v11  ;;  %v5963_v28 = vadd.f32 %v7795_v43, %v5962_v24  ;;  %v5174_v40 = vsub.f32 %v15795_v20, %v15781_v39  ;;  %v15796_v11 = vld [vmem:[#allocation267_spill] sm:$0xff] }
 0x767   : > { %v7801_v45 = vpop.eup %7800  ;;  %7820 = vpow2.f32 %v5601_v4  ;;  %v5607_v37 = vmul.f32 1.442695, %v5169_v5  ;;  %4513 = vst.msk [vmem:[#allocation5 + $0x30] sm:$0xff] %vm4506_vm1, %v4496_v10  ;;  %v5609_v27 = vmul.f32 1.442695, %v5170_v23  ;;  %v5175_v34 = vsub.f32 %v15796_v11, %v15781_v39  ;;  %v15801_v4 = vld [vmem:[#allocation270_spill] sm:$0xff] }
 0x768   : > { %v7803_v6 = vpop.eup %7802  ;;  %v5921_v61 = vadd.f32 %v7787_v3, %v5920_v56  ;;  %7822 = vpow2.f32 %v5657_v14  ;;  %v5964_v1 = vadd.f32 %v7797_v13, %v5963_v28  ;;  %v5611_v7 = vmul.f32 1.442695, %v5171_v48  ;;  %v15799_v3 = vld [vmem:[#allocation268_spill] sm:$0xff]  ;;  %v15802_v24 = vld [vmem:[#allocation271_spill] sm:$0xff]  ;;  %v15803_v13 = vld [vmem:[#allocation49_spill] sm:$0xff] }
 0x769   : > { %v7805_v49 = vpop.eup %7804  ;;  %7824 = vpow2.f32 %v5603_v36  ;;  %v5613_v46 = vmul.f32 1.442695, %v5172_v51  ;;  %v5211_v18 = vsub.f32 %v15798_v12, %v15797_v47  ;;  %v5176_v14 = vsub.f32 %v15799_v3, %v15781_v39 }
 0x76a   : > { %v7807_v25 = vpop.eup %7806  ;;  %v5922_v38 = vadd.f32 %v7791_v57, %v5921_v61  ;;  %v5965_v35 = vadd.f32 %v7799_v2, %v5964_v1  ;;  %7826 = vpow2.f32 %v5605_v9  ;;  %v5615_v42 = vmul.f32 1.442695, %v5173_v16  ;;  %v15804_v9 = vld [vmem:[#allocation50_spill] sm:$0xff] }
 0x76b   : > { %v7809_v0 = vpop.eup %7808  ;;  %7828 = vpow2.f32 %v5607_v37  ;;  %v5212_v5 = vsub.f32 %v15800_v33, %v15797_v47  ;;  %v5177_v57 = vsub.f32 %v15801_v4, %v15781_v39  ;;  %v5617_v43 = vmul.f32 1.442695, %v5174_v40  ;;  %v15810_v4 = vld [vmem:[#allocation173_spill] sm:$0xff] }
 0x76c   : > { %v7811_v55 = vpop.eup %7810  ;;  %5923 = vadd.xlane.f32.xlu0 %v5922_v38  ;;  %v5966_v23 = vadd.f32 %v7801_v45, %v5965_v35  ;;  %7830 = vpow2.f32 %v5609_v27  ;;  %v5178_v52 = vsub.f32 %v15802_v24, %v15781_v39  ;;  %v5619_v48 = vmul.f32 1.442695, %v5175_v34 }
 0x76d   : > { %v7813_v60 = vpop.eup %7812  ;;  %7832 = vpow2.f32 %v5611_v7  ;;  %v5213_v41 = vsub.f32 %v15803_v13, %v15797_v47  ;;  %v5691_v2 = vmul.f32 1.442695, %v5211_v18  ;;  %v5621_v28 = vmul.f32 1.442695, %v5176_v14  ;;  %v15808_v18 = vld [vmem:[#allocation107_spill] sm:$0xff] }
 0x76e   : > { %v7815_v51 = vpop.eup %7814  ;;  %v5967_v36 = vadd.f32 %v7803_v6, %v5966_v23  ;;  %7834 = vpow2.f32 %v5613_v46  ;;  %v5942_v10 = vadd.f32 %v7813_v60, %v7811_v55  ;;  %v5214_v45 = vsub.f32 %v15804_v9, %v15797_v47  ;;  %v15805_v6 = vld [vmem:[#allocation102_spill] sm:$0xff]  ;;  %v15806_v46 = vld [vmem:[#allocation103_spill] sm:$0xff] }
 0x76f   : > { %v7817_v56 = vpop.eup %7816  ;;  %7836 = vpow2.f32 %v5615_v42  ;;  %v5693_v26 = vmul.f32 1.442695, %v5212_v5  ;;  %v5623_v39 = vmul.f32 1.442695, %v5177_v57  ;;  %v5625_v61 = vmul.f32 1.442695, %v5178_v52 }
 0x770   : > { %v7819_v16 = vpop.eup %7818  ;;  %v5968_v20 = vadd.f32 %v7805_v49, %v5967_v36  ;;  %7838 = vpow2.f32 %v5617_v43  ;;  %v5943_v40 = vadd.f32 %v7817_v56, %v5942_v10  ;;  %v5215_v1 = vsub.f32 %v15805_v6, %v15797_v47  ;;  %v15807_v49 = vld [vmem:[#allocation105_spill] sm:$0xff] }
 0x771   : > { %v7821_v37 = vpop.eup %7820  ;;  %7840 = vpow2.f32 %v5619_v48  ;;  %v5695_v27 = vmul.f32 1.442695, %v5213_v41  ;;  %v5216_v38 = vsub.f32 %v15806_v46, %v15797_v47  ;;  %v5217_v12 = vsub.f32 %v15807_v49, %v15797_v47  ;;  %v15811_v43 = vld [vmem:[#allocation177_spill] sm:$0xff]  ;;  %v15815_v46 = vld [vmem:[#allocation167_spill] sm:$0xff] }
 0x772   : > { %v7823_v11 = vpop.eup %7822  ;;  %v5969_v34 = vadd.f32 %v7807_v25, %v5968_v20  ;;  %v5944_v7 = vadd.f32 %v7821_v37, %v5943_v40  ;;  %7842 = vpow2.f32 %v5691_v2  ;;  %v5218_v3 = vsub.f32 %v15808_v18, %v15797_v47  ;;  %v15809_v25 = vld [vmem:[#allocation262_spill] sm:$0xff]  ;;  %v15812_v36 = vld [vmem:[#allocation181_spill] sm:$0xff]  ;;  %v13651_v40 = vpop.xlane.xlu1 %4369 }
 0x773   : > { %v7825_v35 = vpop.eup %7824  ;;  %7844 = vpow2.f32 %v5693_v26  ;;  %v5697_v14 = vmul.f32 1.442695, %v5214_v45  ;;  %v5219_v55 = vsub.f32 %v15809_v25, %v15797_v47  ;;  %v5220_v57 = vsub.f32 %v15810_v4, %v15797_v47  ;;  %v15813_v2 = vld [vmem:[#allocation281_spill] sm:$0xff] }
 0x774   : > { %v7827_v42 = vpop.eup %7826  ;;  %v5970_v33 = vadd.f32 %v7809_v0, %v5969_v34  ;;  %7846 = vpow2.f32 %v5621_v28  ;;  %v5945_v5 = vadd.f32 %v7825_v35, %v5944_v7  ;;  %v5221_v60 = vsub.f32 %v15811_v43, %v15797_v47  ;;  %v15818_v18 = vld [vmem:[#allocation45_spill] sm:$0xff] }
 0x775   : > { %v7829_v23 = vpop.eup %7828  ;;  %7848 = vpow2.f32 %v5695_v27  ;;  %v5699_v24 = vmul.f32 1.442695, %v5215_v1  ;;  %v5701_v41 = vmul.f32 1.442695, %v5216_v38  ;;  %v5222_v10 = vsub.f32 %v15812_v36, %v15797_v47  ;;  %v15816_v38 = vld [vmem:[#allocation43_spill] sm:$0xff] }
 0x776   : > { %v7831_v52 = vpop.eup %7830  ;;  %v5971_v48 = vadd.f32 %v7815_v51, %v5970_v33  ;;  %7850 = vpow2.f32 %v5623_v39  ;;  %v5946_v13 = vadd.f32 %v7827_v42, %v5945_v5  ;;  %v5223_v56 = vsub.f32 %v15813_v2, %v15797_v47  ;;  %v15814_v39 = vld [vmem:[#allocation282_spill] sm:$0xff]  ;;  %v13663_v25 = vpop.xlane.xlu1 %4403 }
 0x777   : > { %v7833_v0 = vpop.eup %7832  ;;  %7852 = vpow2.f32 %v5697_v14  ;;  %v5703_v28 = vmul.f32 1.442695, %v5217_v12  ;;  %v5705_v20 = vmul.f32 1.442695, %v5218_v3  ;;  %v5224_v37 = vsub.f32 %v15814_v39, %v15797_v47  ;;  %v15819_v33 = vld [vmem:[#allocation286_spill] sm:$0xff] }
 0x778   : > { %v7835_v9 = vpop.eup %7834  ;;  %v5972_v45 = vadd.f32 %v7819_v16, %v5971_v48  ;;  %7854 = vpow2.f32 %v5625_v61  ;;  %v5947_v26 = vadd.f32 %v7829_v23, %v5946_v13  ;;  %v5707_v6 = vmul.f32 1.442695, %v5219_v55  ;;  %v15817_v61 = vld [vmem:[#allocation283_spill] sm:$0xff]  ;;  %v15823_v39 = vld [vmem:[#allocation98_spill] sm:$0xff] }
 0x779   : > { %v7837_v51 = vpop.eup %7836  ;;  %7856 = vpow2.f32 %v5699_v24  ;;  %v5709_v1 = vmul.f32 1.442695, %v5220_v57  ;;  %v5195_v35 = vsub.f32 %v15816_v38, %v15815_v46  ;;  %v5225_v49 = vsub.f32 %v15817_v61, %v15797_v47  ;;  %v15820_v57 = vld [vmem:[#allocation47_spill] sm:$0xff]  ;;  %v15824_v38 = vld [vmem:[#allocation100_spill] sm:$0xff] }
 0x77a   : > { %v7839_v27 = vpop.eup %7838  ;;  %v5973_v34 = vadd.f32 %v7823_v11, %v5972_v45  ;;  %v5948_v7 = vadd.f32 %v7831_v52, %v5947_v26  ;;  %7858 = vpow2.f32 %v5701_v41  ;;  %v5711_v12 = vmul.f32 1.442695, %v5221_v60  ;;  %v13667_v60 = vpop.xlane.xlu0 %4386 }
 0x77b   : > { %v7841_v16 = vpop.eup %7840  ;;  %7860 = vpow2.f32 %v5703_v28  ;;  %v5196_v3 = vsub.f32 %v15818_v18, %v15815_v46  ;;  %v5226_v11 = vsub.f32 %v15819_v33, %v15797_v47  ;;  %v5713_v5 = vmul.f32 1.442695, %v5222_v10  ;;  %v13677_v61 = vpop.xlane.xlu1 %4437 }
 0x77c   : > { %v7843_v14 = vpop.eup %7842  ;;  %5974 = vadd.xlane.f32.xlu1 %v5973_v34  ;;  %v5949_v42 = vadd.f32 %v7833_v0, %v5948_v7  ;;  %7862 = vpow2.f32 %v5705_v20  ;;  %v5715_v23 = vmul.f32 1.442695, %v5223_v56  ;;  %v5717_v4 = vmul.f32 1.442695, %v5224_v37  ;;  %v15821_v0 = vld [vmem:[#allocation48_spill] sm:$0xff] }
 0x77d   : > { %v7845_v55 = vpop.eup %7844  ;;  %7864 = vpow2.f32 %v5707_v6  ;;  %v5197_v43 = vsub.f32 %v15820_v57, %v15815_v46  ;;  %v5659_v13 = vmul.f32 1.442695, %v5195_v35  ;;  %v5719_v47 = vmul.f32 1.442695, %v5225_v49  ;;  %v15822_v20 = vld [vmem:[#allocation96_spill] sm:$0xff] }
 0x77e   : > { %v7847_v24 = vpop.eup %7846  ;;  %v5950_v52 = vadd.f32 %v7835_v9, %v5949_v42  ;;  %7866 = vpow2.f32 %v5709_v1  ;;  %v5993_v48 = vadd.f32 %v7845_v55, %v7843_v14  ;;  %v5198_v36 = vsub.f32 %v15821_v0, %v15815_v46  ;;  %v13683_v42 = vpop.xlane.xlu0 %4420 }
 0x77f   : > { %v7849_v41 = vpop.eup %7848  ;;  %7868 = vpow2.f32 %v5711_v12  ;;  %v5661_v10 = vmul.f32 1.442695, %v5196_v3  ;;  %v5721_v28 = vmul.f32 1.442695, %v5226_v11  ;;  %v5199_v9 = vsub.f32 %v15822_v20, %v15815_v46  ;;  %v15825_v12 = vld [vmem:[#allocation101_spill] sm:$0xff]  ;;  %v15829_v20 = vld [vmem:[#allocation276_spill] sm:$0xff] }
 0x780   : > { %v7851_v2 = vpop.eup %7850  ;;  %v5951_v56 = vadd.f32 %v7837_v51, %v5950_v52  ;;  %7870 = vpow2.f32 %v5713_v5  ;;  %v5994_v45 = vadd.f32 %v7849_v41, %v5993_v48  ;;  %v5200_v37 = vsub.f32 %v15823_v39, %v15815_v46  ;;  %v3650_v51 = vld [vmem:[#allocation5 + $0x40] sm:$0xff] }
 0x781   : > { %v7853_v26 = vpop.eup %7852  ;;  %7872 = vpow2.f32 %v5715_v23  ;;  %v5663_v6 = vmul.f32 1.442695, %v5197_v43  ;;  %v5201_v35 = vsub.f32 %v15824_v38, %v15815_v46  ;;  %v5202_v18 = vsub.f32 %v15825_v12, %v15815_v46  ;;  %v15826_v23 = vld [vmem:[#allocation163_spill] sm:$0xff] }
 0x782   : > { %v7855_v1 = vpop.eup %7854  ;;  %v5952_v34 = vadd.f32 %v7839_v27, %v5951_v56  ;;  %v5995_v7 = vadd.f32 %v7853_v26, %v5994_v45  ;;  %7874 = vpow2.f32 %v5659_v13  ;;  %v5203_v3 = vsub.f32 %v15604_v53, %v15815_v46 }
 0x783   : > { %v7857_v49 = vpop.eup %7856  ;;  %7876 = vpow2.f32 %v5661_v10  ;;  %v5665_v14 = vmul.f32 1.442695, %v5198_v36  ;;  %v5204_v5 = vsub.f32 %v15605_v58, %v15815_v46  ;;  %v5205_v57 = vsub.f32 %v15826_v23, %v15815_v46  ;;  %v15828_v36 = vld [vmem:[#allocation275_spill] sm:$0xff] }
 0x784   : > { %v7859_v27 = vpop.eup %7858  ;;  %v5953_v33 = vadd.f32 %v7841_v16, %v5952_v34  ;;  %7878 = vpow2.f32 %v5717_v4  ;;  %v5996_v11 = vadd.f32 %v7857_v49, %v5995_v7  ;;  %v5667_v43 = vmul.f32 1.442695, %v5199_v9  ;;  %v15827_v16 = vld [vmem:[#allocation166_spill] sm:$0xff] }
 0x785   : > { %v7861_v55 = vpop.eup %7860  ;;  %7880 = vpow2.f32 %v5663_v6  ;;  %v4498_v52 = vadd.f32 %v13651_v40, %v3650_v51  ;;  %v5669_v41 = vmul.f32 1.442695, %v5200_v37  ;;  %v5206_v4 = vsub.f32 %v15827_v16, %v15815_v46  ;;  %v13699_v6 = vpop.xlane.xlu0 %4454  ;;  %v15831_v51 = vld [vmem:[#allocation279_spill] sm:$0xff] }
 0x786   : > { %v7863_v53 = vpop.eup %7862  ;;  %v5954_v48 = vadd.f32 %v7847_v24, %v5953_v33  ;;  %7882 = vpow2.f32 %v5719_v47  ;;  %v5997_v13 = vadd.f32 %v7859_v27, %v5996_v11  ;;  %v5207_v58 = vsub.f32 %v15828_v36, %v15815_v46  ;;  %v13695_v24 = vpop.xlane.xlu1 %4471  ;;  %v15832_v27 = vld [vmem:[#allocation280_spill] sm:$0xff] }
 0x787   : > { %v7865_v0 = vpop.eup %7864  ;;  %7884 = vpow2.f32 %v5665_v14  ;;  %v5671_v10 = vmul.f32 1.442695, %v5201_v35  ;;  %4515 = vst.msk [vmem:[#allocation5 + $0x40] sm:$0xff] %vm4506_vm1, %v4498_v52  ;;  %v5673_v26 = vmul.f32 1.442695, %v5202_v18  ;;  %v5208_v9 = vsub.f32 %v15829_v20, %v15815_v46  ;;  %v15830_v35 = vld [vmem:[#allocation178_spill] sm:$0xff] }
 0x788   : > { %v7867_v56 = vpop.eup %7866  ;;  %v5955_v45 = vadd.f32 %v7851_v2, %v5954_v48  ;;  %7886 = vpow2.f32 %v5721_v28  ;;  %v5998_v40 = vadd.f32 %v7861_v55, %v5997_v13  ;;  %v5675_v39 = vmul.f32 1.442695, %v5203_v3  ;;  %v3651_v20 = vld [vmem:[#allocation5 + $0x48] sm:$0xff] }
 0x789   : > { %v7869_v47 = vpop.eup %7868  ;;  %7888 = vpow2.f32 %v5667_v43  ;;  %v5677_v37 = vmul.f32 1.442695, %v5204_v5  ;;  %v5227_v2 = vsub.f32 %v15612_v8, %v15830_v35  ;;  %v5209_v49 = vsub.f32 %v15831_v51, %v15815_v46  ;;  %v3656_v51 = vld [vmem:[#allocation5 + $0x70] sm:$0xff] }
 0x78a   : > { %v7871_v34 = vpop.eup %7870  ;;  %v5956_v7 = vadd.f32 %v7855_v1, %v5955_v45  ;;  %v5999_v38 = vadd.f32 %v7863_v53, %v5998_v40  ;;  %7890 = vpow2.f32 %v5669_v41  ;;  %v5679_v12 = vmul.f32 1.442695, %v5205_v57  ;;  %v13711_v52 = vpop.xlane.xlu1 %5770 }
 0x78b   : > { %v7873_v28 = vpop.eup %7872  ;;  %7892 = vpow2.f32 %v5671_v10  ;;  %v5228_v18 = vsub.f32 %v15613_v62, %v15830_v35  ;;  %v5210_v1 = vsub.f32 %v15832_v27, %v15815_v46  ;;  %v5681_v33 = vmul.f32 1.442695, %v5206_v4  ;;  %v13717_v41 = vpop.xlane.xlu0 %4488  ;;  %v4875_v27 = vld [vmem:[#allocation4] sm:$0xff] }
 0x78c   : > { %v7875_v3 = vpop.eup %7874  ;;  %5957 = vadd.xlane.f32.xlu0 %v5956_v7  ;;  %v6000_v14 = vadd.f32 %v7865_v0, %v5999_v38  ;;  %7894 = vpow2.f32 %v5673_v26  ;;  %v5683_v8 = vmul.f32 1.442695, %v5207_v58  ;;  %v5685_v5 = vmul.f32 1.442695, %v5208_v9 }
 0x78d   : > { %v7877_v11 = vpop.eup %7876  ;;  %7896 = vpow2.f32 %v5675_v39  ;;  %v5229_v55 = vsub.f32 %v15614_v15, %v15830_v35  ;;  %v5723_v62 = vmul.f32 1.442695, %v5227_v2  ;;  %v13713_v48 = vmul.f32 1.442695, %v5209_v49  ;;  %v3653_v2 = vld [vmem:[#allocation5 + $0x58] sm:$0xff]  ;;  %v3655_v49 = vld [vmem:[#allocation5 + $0x68] sm:$0xff] }
 0x78e   : > { %v7879_v23 = vpop.eup %7878  ;;  %v6001_v57 = vadd.f32 %v7867_v56, %v6000_v14  ;;  %7898 = vpow2.f32 %v5677_v37  ;;  %v5976_v43 = vadd.f32 %v7877_v11, %v7875_v3  ;;  %v5230_v46 = vsub.f32 %v15615_v29, %v15830_v35 }
 0x78f   : > { %v7881_v53 = vpop.eup %7880  ;;  %7900 = vpow2.f32 %v5679_v12  ;;  %v5725_v13 = vmul.f32 1.442695, %v5228_v18  ;;  %v13719_v15 = vmul.f32 1.442695, %v5210_v1  ;;  %v5231_v58 = vsub.f32 %v15616_v19, %v15830_v35  ;;  %v5805_v12 = vpop.xlane.xlu1 %5804 }
 0x790   : > { %v7883_v0 = vpop.eup %7882  ;;  %v6002_v16 = vadd.f32 %v7869_v47, %v6001_v57  ;;  %7902 = vpow2.f32 %v5681_v33  ;;  %v5977_v4 = vadd.f32 %v7881_v53, %v5976_v43  ;;  %v5232_v10 = vsub.f32 %v15617_v50, %v15830_v35  ;;  %v3652_v47 = vld [vmem:[#allocation5 + $0x50] sm:$0xff]  ;;  %v3654_v50 = vld [vmem:[#allocation5 + $0x60] sm:$0xff]  ;;  %v5788_v1 = vpop.xlane.xlu0 %5787  ;;  %v4876_v43 = vld [vmem:[#allocation4 + $0x8] sm:$0xff] }
 0x791   : > { %v7885_v36 = vpop.eup %7884  ;;  %7904 = vpow2.f32 %v5683_v8  ;;  %v5727_v56 = vmul.f32 1.442695, %v5229_v55  ;;  %v5233_v26 = vsub.f32 %v15618_v54, %v15830_v35  ;;  %v5234_v39 = vsub.f32 %v15619_v22, %v15830_v35  ;;  %v3657_v55 = vld [vmem:[#allocation5 + $0x78] sm:$0xff]  ;;  %v4877_v57 = vld [vmem:[#allocation4 + $0x10] sm:$0xff] }
 0x792   : > { %v7887_v45 = vpop.eup %7886  ;;  %v6003_v29 = vadd.f32 %v7871_v34, %v6002_v16  ;;  %v5978_v40 = vadd.f32 %v7885_v36, %v5977_v4  ;;  %7906 = vpow2.f32 %v5723_v62  ;;  %v5235_v19 = vsub.f32 %v15620_v63, %v15830_v35  ;;  %v4879_v36 = vld [vmem:[#allocation4 + $0x20] sm:$0xff] }
 0x793   : > { %v7889_v9 = vpop.eup %7888  ;;  %7908 = vpow2.f32 %v5725_v13  ;;  %v5729_v37 = vmul.f32 1.442695, %v5230_v46  ;;  %v5236_v54 = vsub.f32 %v15621_v44, %v15830_v35  ;;  %v5731_v22 = vmul.f32 1.442695, %v5231_v58 }
 0x794   : > { %v7891_v7 = vpop.eup %7890  ;;  %v6004_v38 = vadd.f32 %v7873_v28, %v6003_v29  ;;  %7910 = vpow2.f32 %v5685_v5  ;;  %v5979_v34 = vadd.f32 %v7889_v9, %v5978_v40  ;;  %v4500_v3 = vadd.f32 %v13663_v25, %v3652_v47  ;;  %v5839_v9 = vpop.xlane.xlu1 %5838 }
 0x795   : > { %v7893_v18 = vpop.eup %7892  ;;  %7912 = vpow2.f32 %v5727_v56  ;;  %v4499_v14 = vadd.f32 %v13667_v60, %v3651_v20  ;;  %v5733_v8 = vmul.f32 1.442695, %v5232_v10  ;;  %v4502_v5 = vadd.f32 %v13677_v61, %v3654_v50  ;;  %v15833_v61 = vld [vmem:[#allocation234_spill] sm:$0xff] }
 0x796   : > { %v7895_v33 = vpop.eup %7894  ;;  %v6005_v28 = vadd.f32 %v7879_v23, %v6004_v38  ;;  %v5980_v11 = vadd.f32 %v7891_v7, %v5979_v34  ;;  %7914 = vpow2.f32 %v5729_v37  ;;  %4517 = vst.msk [vmem:[#allocation5 + $0x50] sm:$0xff] %vm4506_vm1, %v4500_v3  ;;  %v4501_v25 = vadd.f32 %v13683_v42, %v3653_v2  ;;  %v4878_v56 = vld [vmem:[#allocation4 + $0x18] sm:$0xff]  ;;  %v15836_v38 = vld [vmem:[#allocation296_spill] sm:$0xff] }
 0x797   : > { %v7897_v62 = vpop.eup %7896  ;;  %4516 = vst.msk [vmem:[#allocation5 + $0x48] sm:$0xff] %vm4506_vm1, %v4499_v14  ;;  %v4504_v60 = vadd.f32 %v13695_v24, %v3656_v51  ;;  %v4503_v53 = vadd.f32 %v13699_v6, %v3655_v49  ;;  %v5735_v16 = vmul.f32 1.442695, %v5233_v26  ;;  %4519 = vst.msk [vmem:[#allocation5 + $0x60] sm:$0xff] %vm4506_vm1, %v4502_v5  ;;  %v4891_v4 = vmul.f32 %v15833_v61, %v4875_v27  ;;  %v15834_v24 = vld [vmem:[#allocation295_spill] sm:$0xff] }
 0x798   : > { %v7899_v23 = vpop.eup %7898  ;;  %v6006_v46 = vadd.f32 %v7883_v0, %v6005_v28  ;;  %v5981_v13 = vadd.f32 %v7893_v18, %v5980_v11  ;;  %7916 = vpow2.f32 %v5731_v22  ;;  %4518 = vst.msk [vmem:[#allocation5 + $0x58] sm:$0xff] %vm4506_vm1, %v4501_v25  ;;  %v4505_v42 = vadd.f32 %v13717_v41, %v3657_v55  ;;  %v15835_v0 = vld [vmem:[#allocation293_spill] sm:$0xff] }
 0x799   : > { %v7901_v58 = vpop.eup %7900  ;;  %4521 = vst.msk [vmem:[#allocation5 + $0x70] sm:$0xff] %vm4506_vm1, %v4504_v60  ;;  %4520 = vst.msk [vmem:[#allocation5 + $0x68] sm:$0xff] %vm4506_vm1, %v4503_v53  ;;  %v4893_v6 = vmul.f32 %v15834_v24, %v4877_v57  ;;  %v4892_v10 = vmul.f32 %v15835_v0, %v4876_v43  ;;  %v5737_v47 = vmul.f32 1.442695, %v5234_v39  ;;  %v6027_v20 = vadd.f32 %v13711_v52, %v4891_v4  ;;  %v4881_v25 = vld [vmem:[#allocation4 + $0x30] sm:$0xff]  ;;  %v15839_v53 = vld [vmem:[#allocation304_spill] sm:$0xff] }
 0x79a   : > { %v7903_v29 = vpop.eup %7902  ;;  %v6007_v40 = vadd.f32 %v7887_v45, %v6006_v46  ;;  %v5982_v26 = vadd.f32 %v7895_v33, %v5981_v13  ;;  %7918 = vpow2.f32 %v5733_v8  ;;  %4522 = vst.msk [vmem:[#allocation5 + $0x78] sm:$0xff] %vm4506_vm1, %v4505_v42  ;;  %v4895_v41 = vmul.f32 %v15836_v38, %v4879_v36  ;;  %v5822_v34 = vpop.xlane.xlu0 %5821  ;;  %v15837_v45 = vld [vmem:[#allocation294_spill] sm:$0xff] }
 0x79b   : > { %v7905_v37 = vpop.eup %7904  ;;  %v6029_v50 = vadd.f32 %v5805_v12, %v4893_v6  ;;  %v6028_v7 = vadd.f32 %v5788_v1, %v4892_v10  ;;  %7920 = vpow2.f32 %v13713_v48  ;;  %6043 = vst.msk [vmem:[#allocation4] sm:$0xff] %vm4506_vm1, %v6027_v20  ;;  %v4894_v39 = vmul.f32 %v15837_v45, %v4878_v56  ;;  %v15838_v60 = vld [vmem:[#allocation302_spill] sm:$0xff] }
 0x79c   : > { %v7907_v2 = vpop.eup %7906  ;;  %6008 = vadd.xlane.f32.xlu1 %v6007_v40  ;;  %v5983_v51 = vadd.f32 %v7897_v62, %v5982_v26  ;;  %v5237_v49 = vsub.f32 %v15626_v31, %v15830_v35  ;;  %7922 = vpow2.f32 %v5735_v16  ;;  %v5739_v12 = vmul.f32 1.442695, %v5235_v19 }
 0x79d   : > { %v7909_v52 = vpop.eup %7908  ;;  %6045 = vst.msk [vmem:[#allocation4 + $0x10] sm:$0xff] %vm4506_vm1, %v6029_v50  ;;  %6044 = vst.msk [vmem:[#allocation4 + $0x8] sm:$0xff] %vm4506_vm1, %v6028_v7  ;;  %v6031_v18 = vadd.f32 %v5839_v9, %v4895_v41  ;;  %7924 = vpow2.f32 %v13719_v15  ;;  %v6030_v14 = vadd.f32 %v5822_v34, %v4894_v39  ;;  %v5238_v31 = vsub.f32 %v15627_v32, %v15830_v35 }
 0x79e   : > { %v7911_v48 = vpop.eup %7910  ;;  %v5984_v22 = vadd.f32 %v7899_v23, %v5983_v51  ;;  %v6010_v3 = vadd.f32 %v7909_v52, %v7907_v2  ;;  %7926 = vpow2.f32 %v5737_v47  ;;  %v5741_v63 = vmul.f32 1.442695, %v5236_v54  ;;  %v4880_v51 = vld [vmem:[#allocation4 + $0x28] sm:$0xff]  ;;  %v15842_v52 = vld [vmem:[#allocation307_spill] sm:$0xff] }
 0x79f   : > { %v7913_v27 = vpop.eup %7912  ;;  %6047 = vst.msk [vmem:[#allocation4 + $0x20] sm:$0xff] %vm4506_vm1, %v6031_v18  ;;  %6046 = vst.msk [vmem:[#allocation4 + $0x18] sm:$0xff] %vm4506_vm1, %v6030_v14  ;;  %v5239_v15 = vsub.f32 %v15630_v30, %v15830_v35  ;;  %7928 = vpow2.f32 %v5739_v12  ;;  %v5743_v28 = vmul.f32 1.442695, %v5237_v49  ;;  %v5240_v5 = vsub.f32 %v15634_v59, %v15830_v35  ;;  %v15843_v49 = vld [vmem:[#allocation309_spill] sm:$0xff] }
 0x7a0   : > { %v5985_v19 = vadd.f32 %v7901_v58, %v5984_v22  ;;  %v6011_v1 = vadd.f32 %v7913_v27, %v6010_v3  ;;  %v7915_v33 = vpop.eup %7914  ;;  %7930 = vpow2.f32 %v5741_v63  ;;  %v5745_v44 = vmul.f32 1.442695, %v5238_v31 }
 0x7a1   : > { %v5241_v43 = vsub.f32 %v15636_v17, %v15830_v35  ;;  %7932 = vpow2.f32 %v5743_v28  ;;  %v5747_v62 = vmul.f32 1.442695, %v5239_v15  ;;  %v15840_v23 = vsub.f32 %v15838_v60, %v15839_v53  ;;  %v15841_v17 = vld [vmem:[#allocation297_spill] sm:$0xff] }
 0x7a2   : > { %v5986_v11 = vadd.f32 %v7903_v29, %v5985_v19  ;;  %v6012_v8 = vadd.f32 %v7915_v33, %v6011_v1  ;;  %v7917_v32 = vpop.eup %7916  ;;  %v5242_v59 = vsub.f32 %v15639_v21, %v15830_v35  ;;  %7934 = vpow2.f32 %v5745_v44  ;;  %v4883_v19 = vld [vmem:[#allocation4 + $0x40] sm:$0xff]  ;;  %v15846_v33 = vld [vmem:[#allocation306_spill] sm:$0xff] }
 0x7a3   : > { %v4853_v46 = vmul.f32 1.442695, %v15840_v23  ;;  %v5749_v4 = vmul.f32 1.442695, %v5240_v5  ;;  %v4897_v24 = vmul.f32 %v15841_v17, %v4881_v25  ;;  %7936 = vpow2.f32 %v5747_v62  ;;  %v15845_v1 = vld [vmem:[#allocation191_spill] sm:$0xff]  ;;  %v4885_v53 = vld [vmem:[#allocation4 + $0x50] sm:$0xff] }
 0x7a4   : > { %v5987_v54 = vadd.f32 %v7905_v37, %v5986_v11  ;;  %v6013_v55 = vadd.f32 %v7917_v32, %v6012_v8  ;;  %v7919_v57 = vpop.eup %7918  ;;  %v5751_v0 = vmul.f32 1.442695, %v5241_v43  ;;  %v5753_v47 = vmul.f32 1.442695, %v5242_v59  ;;  %v4882_v44 = vld [vmem:[#allocation4 + $0x38] sm:$0xff]  ;;  %v15851_v23 = vld [vmem:[#allocation308_spill] sm:$0xff] }
 0x7a5   : > { %v7921_v30 = vpop.eup %7920  ;;  %7938 = vpow2.f32 %v4853_v46  ;;  %v15844_v12 = vsub.f32 %v15842_v52, %v15843_v49  ;;  %v15847_v15 = vsub.f32 %v15845_v1, %v15846_v33  ;;  %v15852_v46 = vld [vmem:[#allocation310_spill] sm:$0xff]  ;;  %v15855_v17 = vld [vmem:[#allocation317_spill] sm:$0xff]  ;;  %v15867_v1 = vld [vmem:[#allocation319_spill] sm:$0xff] }
 0x7a6   : > { %v5988_v13 = vadd.f32 %v7911_v48, %v5987_v54  ;;  %v6014_v16 = vadd.f32 %v7919_v57, %v6013_v55  ;;  %v7923_v61 = vpop.eup %7922  ;;  %7940 = vpow2.f32 %v5749_v4  ;;  %v15848_v54 = vld [vmem:[#allocation311_spill] sm:$0xff]  ;;  %v15849_v55 = vld [vmem:[#allocation313_spill] sm:$0xff] }
 0x7a7   : > { %v7925_v36 = vpop.eup %7924  ;;  %7942 = vpow2.f32 %v5751_v0  ;;  %v4859_v18 = vmul.f32 1.442695, %v15844_v12  ;;  %v4857_v28 = vmul.f32 1.442695, %v15847_v15  ;;  %v15850_v57 = vsub.f32 %v15848_v54, %v15849_v55  ;;  %v4889_v49 = vld [vmem:[#allocation4 + $0x70] sm:$0xff]  ;;  %v15863_v12 = vld [vmem:[#allocation316_spill] sm:$0xff] }
 0x7a8   : > { %v5989_v58 = vadd.f32 %v7921_v30, %v5988_v13  ;;  %v6015_v42 = vadd.f32 %v7923_v61, %v6014_v16  ;;  %v7927_v6 = vpop.eup %7926  ;;  %7944 = vpow2.f32 %v5753_v47  ;;  %v15853_v13 = vsub.f32 %v15851_v23, %v15852_v46  ;;  %v15858_v47 = vld [vmem:[#allocation314_spill] sm:$0xff] }
 0x7a9   : > { %v7929_v26 = vpop.eup %7928  ;;  %7946 = vpow2.f32 %v4859_v18  ;;  %v4863_v43 = vmul.f32 1.442695, %v15850_v57  ;;  %v15864_v18 = vld [vmem:[#allocation119_spill] sm:$0xff]  ;;  %v15871_v46 = vld [vmem:[#allocation30_spill] sm:$0xff] (!%p6761_p3) }
 0x7aa   : > { %v5873_v10 = vpop.xlane.xlu1 %5872  ;;  %v5990_v56 = vadd.f32 %v7925_v36, %v5989_v58  ;;  %v6016_v29 = vadd.f32 %v7927_v6, %v6015_v42  ;;  %v7931_v35 = vpop.eup %7930  ;;  %7948 = vpow2.f32 %v4857_v28  ;;  %v4861_v16 = vmul.f32 1.442695, %v15853_v13  ;;  %v4884_v58 = vld [vmem:[#allocation4 + $0x48] sm:$0xff]  ;;  %v15854_v42 = vld [vmem:[#allocation315_spill] sm:$0xff] }
 0x7ab   : > { %v6033_v40 = vadd.f32 %v5873_v10, %v4897_v24  ;;  %v7933_v9 = vpop.eup %7932  ;;  %7950 = vpow2.f32 %v4863_v43  ;;  %v15856_v24 = vsub.f32 %v15854_v42, %v15855_v17  ;;  %v6095_v57 = vld [vmem:[#allocation4] sm:$0xff] (!%p6761_p3)  ;;  %v6096_v43 = vld [vmem:[#allocation4 + $0x8] sm:$0xff] (!%p6761_p3)  ;;  %vm6161_vm5 = vcmp.ne.s32.totalorder (!%p6761_p3), %v15871_v46, 4294967196  ;;  %v15875_v17 = vld [vmem:[#allocation290_spill] sm:$0xff] (!%p6761_p3) }
 0x7ac   : > { %5991 = vadd.xlane.f32.xlu0 %v5990_v56  ;;  %v6017_v21 = vadd.f32 %v7929_v26, %v6016_v29  ;;  %v7935_v50 = vpop.eup %7934  ;;  %7952 = vpow2.f32 %v4861_v16  ;;  %v15857_v26 = vld [vmem:[#allocation312_spill] sm:$0xff]  ;;  %v15872_v13 = vld [vmem:[#allocation31_spill] sm:$0xff] (!%p6761_p3)  ;;  %v15874_v42 = vld [vmem:[#allocation289_spill] sm:$0xff] (!%p6761_p3)  ;;  %vm6165_vm11 = vcmp.ne.s32.totalorder (!%p6761_p3), %v15875_v17, 4294967196 }
 0x7ad   : > { %6049 = vst.msk [vmem:[#allocation4 + $0x30] sm:$0xff] %vm4506_vm1, %v6033_v40  ;;  %v7937_v38 = vpop.eup %7936  ;;  %v4867_v6 = vmul.f32 1.442695, %v15856_v24  ;;  %v4887_v40 = vld [vmem:[#allocation4 + $0x60] sm:$0xff]  ;;  %vm6162_vm8 = vcmp.ne.s32.totalorder (!%p6761_p3), %v15872_v13, 4294967196  ;;  %vm6164_vm7 = vcmp.ne.s32.totalorder (!%p6761_p3), %v15874_v42, 4294967196 }
 0x7ae   : > { %v6018_v20 = vadd.f32 %v7931_v35, %v6017_v21  ;;  %v15859_v21 = vsub.f32 %v15857_v26, %v15858_v47  ;;  %v15876_v24 = vld [vmem:[#allocation291_spill] sm:$0xff] (!%p6761_p3)  ;;  %v15878_v26 = vld [vmem:[#allocation224_spill] sm:$0xff] (!%p6761_p3)  ;;  %v6085_v46 = vld [vmem:[#allocation3 + $0x30] sm:$0xff] (!%p6761_p3) }
 0x7af   : > { %v7939_v41 = vpop.eup %7938  ;;  %7954 = vpow2.f32 %v4867_v6  ;;  %vm6166_vm9 = vcmp.ne.s32.totalorder (!%p6761_p3), %v15876_v24, 4294967196  ;;  %vm6168_vm13 = vcmp.ne.s32.totalorder (!%p6761_p3), %v15878_v26, 4294967196  ;;  %v6212_v24 = vld [vmem:[#allocation5 + $0x28] sm:$0xff] (!%p6761_p3) }
 0x7b0   : > { %v6019_v37 = vadd.f32 %v7933_v9, %v6018_v20  ;;  %v7941_v2 = vpop.eup %7940  ;;  %v4896_v22 = vmul.f32 %v7939_v41, %v4880_v51  ;;  %v4865_v35 = vmul.f32 1.442695, %v15859_v21  ;;  %v15861_v41 = vld [vmem:[#allocation115_spill] sm:$0xff]  ;;  %v15879_v21 = vld [vmem:[#allocation320_spill] sm:$0xff] (!%p6761_p3) }
 0x7b1   : > { %v7943_v39 = vpop.eup %7942  ;;  %vm6169_vm14 = vcmp.ne.s32.totalorder (!%p6761_p3), %v15879_v21, 4294967196 }
 0x7b2   : > { %v6020_v7 = vadd.f32 %v7935_v50, %v6019_v37  ;;  %v7945_v3 = vpop.eup %7944  ;;  %7956 = vpow2.f32 %v4865_v35 }
 0x7b3   : > { %v7947_v63 = vpop.eup %7946 }
 0x7b4   : > { %v6021_v34 = vadd.f32 %v7937_v38, %v6020_v7  ;;  %v4899_v11 = vmul.f32 %v7947_v63, %v4883_v19  ;;  %v7949_v5 = vpop.eup %7948  ;;  %v4886_v7 = vld [vmem:[#allocation4 + $0x58] sm:$0xff]  ;;  %v15860_v38 = vld [vmem:[#allocation113_spill] sm:$0xff] }
 0x7b5   : > { %v4898_v62 = vmul.f32 %v7949_v5, %v4882_v44  ;;  %v7951_v60 = vpop.eup %7950  ;;  %v4888_v63 = vld [vmem:[#allocation4 + $0x68] sm:$0xff]  ;;  %v15866_v19 = vld [vmem:[#allocation318_spill] sm:$0xff] }
 0x7b6   : > { %v6022_v45 = vadd.f32 %v7941_v2, %v6021_v34  ;;  %v4901_v61 = vmul.f32 %v7951_v60, %v4885_v53  ;;  %v7953_v36 = vpop.eup %7952  ;;  %v15862_v34 = vsub.f32 %v15860_v38, %v15861_v41  ;;  %v15868_v33 = vsub.f32 %v15866_v19, %v15867_v1  ;;  %v4890_v5 = vld [vmem:[#allocation4 + $0x78] sm:$0xff]  ;;  %v15870_v60 = vld [vmem:[#allocation29_spill] sm:$0xff] (!%p6761_p3)  ;;  %v6099_v53 = vld [vmem:[#allocation4 + $0x20] sm:$0xff] (!%p6761_p3) }
 0x7b7   : > { %v4900_v0 = vmul.f32 %v7953_v36, %v4884_v58  ;;  %vm6160_vm4 = vcmp.ne.s32.totalorder (!%p6761_p3), %v15870_v60, 4294967196  ;;  %v6101_v16 = vld [vmem:[#allocation4 + $0x30] sm:$0xff] (!%p6761_p3)  ;;  %v15873_v36 = vld [vmem:[#allocation32_spill] sm:$0xff] (!%p6761_p3) }
 0x7b8   : > { %v6023_v48 = vadd.f32 %v7943_v39, %v6022_v45  ;;  %v4871_v2 = vmul.f32 1.442695, %v15862_v34  ;;  %v4873_v15 = vmul.f32 1.442695, %v15868_v33  ;;  %vm6163_vm6 = vcmp.ne.s32.totalorder (!%p6761_p3), %v15873_v36, 4294967196  ;;  %v15881_v19 = vld [vmem:[#allocation321_spill] sm:$0xff] (!%p6761_p3) }
 0x7b9   : > { %v7955_v29 = vpop.eup %7954  ;;  %vm6171_vm10 = vcmp.ne.s32.totalorder (!%p6761_p3), %v15881_v19, 4294967196 }
 0x7ba   : > { %v5856_v14 = vpop.xlane.xlu0 %5855  ;;  %v6024_v27 = vadd.f32 %v7945_v3, %v6023_v48  ;;  %v4903_v20 = vmul.f32 %v7955_v29, %v4887_v40  ;;  %7958 = vpow2.f32 %v4871_v2  ;;  %v15865_v48 = vsub.f32 %v15863_v12, %v15864_v18  ;;  %v6080_v2 = vld [vmem:[#allocation3 + $0x8] sm:$0xff] (!%p6761_p3)  ;;  %v6081_v12 = vld [vmem:[#allocation3 + $0x10] sm:$0xff] (!%p6761_p3) }
 0x7bb   : > { %v6032_v31 = vadd.f32 %v5856_v14, %v4896_v22 }
 0x7bc   : > { %6025 = vadd.xlane.f32.xlu0 %v6024_v27  ;;  %v7957_v50 = vpop.eup %7956  ;;  %v4869_v22 = vmul.f32 1.442695, %v15865_v48 }
 0x7bd   : > { %6048 = vst.msk [vmem:[#allocation4 + $0x28] sm:$0xff] %vm4506_vm1, %v6032_v31  ;;  %v4902_v51 = vmul.f32 %v7957_v50, %v4886_v7 }
 0x7be   : > { %7960 = vpow2.f32 %v4869_v22 }
 0x7bf   : > { %7962 = vpow2.f32 %v4873_v15 }
 0x7c0   : > { %7980 = vlog2.f32 (!%p6761_p3), %v6095_v57  ;;  %v6210_v57 = vld [vmem:[#allocation5 + $0x18] sm:$0xff] (!%p6761_p3) }
 0x7c1   : > { %7982 = vlog2.f32 (!%p6761_p3), %v6096_v43 }
 0x7c4   : > { %v7959_v52 = vpop.eup %7958  ;;  %v6100_v23 = vld [vmem:[#allocation4 + $0x28] sm:$0xff] (!%p6761_p3) }
 0x7c5   : > { %v4905_v3 = vmul.f32 %v7959_v52, %v4889_v49 }
 0x7c8   : > { %v7961_v31 = vpop.eup %7960 }
 0x7c9   : > { %v5907_v8 = vpop.xlane.xlu1 %5906  ;;  %v4904_v28 = vmul.f32 %v7961_v31, %v4888_v63  ;;  %v6082_v63 = vld [vmem:[#allocation3 + $0x18] sm:$0xff] (!%p6761_p3) }
 0x7ca   : > { %v6035_v32 = vadd.f32 %v5907_v8, %v4899_v11 }
 0x7cc   : > { %6051 = vst.msk [vmem:[#allocation4 + $0x40] sm:$0xff] %vm4506_vm1, %v6035_v32  ;;  %v7963_v32 = vpop.eup %7962 }
 0x7cd   : > { %v4906_v44 = vmul.f32 %v7963_v32, %v4890_v5  ;;  %v7981_v35 = vpop.eup (!%p6761_p3), %7980 }
 0x7ce   : > { %v7983_v41 = vpop.eup (!%p6761_p3), %7982  ;;  %v6112_v34 = vmul.f32 (!%p6761_p3), 0.6931472, %v7981_v35 }
 0x7cf   : > { %v6114_v49 = vmul.f32 (!%p6761_p3), 0.6931472, %v7983_v41  ;;  %v15884_v41 = vld [vmem:[#allocation229_spill] sm:$0xff] (!%p6761_p3) }
 0x7d1   : > { %v6144_v15 = vadd.f32 (!%p6761_p3), %v6114_v49, %v6080_v2  ;;  %v6088_v49 = vld [vmem:[#allocation3 + $0x48] sm:$0xff] (!%p6761_p3) }
 0x7d3   : > { %v6103_v6 = vld [vmem:[#allocation4 + $0x40] sm:$0xff] (!%p6761_p3) }
 0x7d9   : > { %v5890_v25 = vpop.xlane.xlu0 %5889 }
 0x7da   : > { %v6034_v30 = vadd.f32 %v5890_v25, %v4898_v62  ;;  %v6097_v62 = vld [vmem:[#allocation4 + $0x10] sm:$0xff] (!%p6761_p3)  ;;  %v6098_v25 = vld [vmem:[#allocation4 + $0x18] sm:$0xff] (!%p6761_p3) }
 0x7db   : > { %7984 = vlog2.f32 (!%p6761_p3), %v6097_v62  ;;  %v6084_v62 = vld [vmem:[#allocation3 + $0x28] sm:$0xff] (!%p6761_p3) }
 0x7dc   : > { %6050 = vst.msk [vmem:[#allocation4 + $0x38] sm:$0xff] %vm4506_vm1, %v6034_v30  ;;  %v15869_v30 = vld [vmem:[#allocation28_spill] sm:$0xff] (!%p6761_p3)  ;;  %7986 = vlog2.f32 (!%p6761_p3), %v6098_v25 }
 0x7dd   : > { %vm6159_vm3 = vcmp.ne.s32.totalorder (!%p6761_p3), %v15869_v30, 4294967196  ;;  %7988 = vlog2.f32 (!%p6761_p3), %v6099_v53  ;;  %v6211_v53 = vld [vmem:[#allocation5 + $0x20] sm:$0xff] (!%p6761_p3) }
 0x7de   : > { %7990 = vlog2.f32 (!%p6761_p3), %v6100_v23 }
 0x7df   : > { %7992 = vlog2.f32 (!%p6761_p3), %v6101_v16  ;;  %v15882_v16 = vld [vmem:[#allocation226_spill] sm:$0xff] (!%p6761_p3) }
 0x7e0   : > { %vm6172_vm15 = vcmp.ne.s32.totalorder (!%p6761_p3), %v15882_v16, 4294967196 }
 0x7e3   : > { %v6102_v58 = vld [vmem:[#allocation4 + $0x38] sm:$0xff] (!%p6761_p3) }
 0x7e4   : > { %7994 = vlog2.f32 (!%p6761_p3), %v6102_v58 }
 0x7e5   : > { %7996 = vlog2.f32 (!%p6761_p3), %v6103_v6  ;;  %v7985_v52 = vpop.eup (!%p6761_p3), %7984 }
 0x7e6   : > { %v6116_v31 = vmul.f32 (!%p6761_p3), 0.6931472, %v7985_v52 }
 0x7e9   : > { %v5941_v59 = vpop.xlane.xlu1 %5940 }
 0x7ea   : > { %v6037_v4 = vadd.f32 %v5941_v59, %v4901_v61  ;;  %v8304_v61 = vmov (!%p6761_p3), 0.0  }
 0x7eb   : > { %v13826_v59 = vsel (!%p6761_p3), %vm6159_vm3, 1.0, %v8304_v61  ;;  %v13843_v40 = vsel (!%p6761_p3), %vm6163_vm6, 1.0, %v8304_v61  ;;  %v13855_v50 = vsel (!%p6761_p3), %vm6165_vm11, 1.0, %v8304_v61  ;;  %v13860_v7 = vsel (!%p6761_p3), %vm6166_vm9, 1.0, %v8304_v61 }
 0x7ec   : > { %6053 = vst.msk [vmem:[#allocation4 + $0x50] sm:$0xff] %vm4506_vm1, %v6037_v4  ;;  %v13829_v4 = vsel (!%p6761_p3), %vm6160_vm4, 1.0, %v8304_v61  ;;  %v13871_v18 = vsel (!%p6761_p3), %vm6168_vm13, 1.0, %v8304_v61  ;;  %v13876_v48 = vsel (!%p6761_p3), %vm6169_vm14, 1.0, %v8304_v61  ;;  %v13887_v13 = vsel (!%p6761_p3), %vm6171_vm10, 1.0, %v8304_v61 }
 0x7ed   : > { %vm6174_vm3 = vcmp.ne.s32.totalorder (!%p6761_p3), %v15884_v41, 4294967196 }
 0x7f3   : > { %v6105_v47 = vld [vmem:[#allocation4 + $0x50] sm:$0xff] (!%p6761_p3) }
 0x7f9   : > { %v5924_v10 = vpop.xlane.xlu0 %5923 }
 0x7fa   : > { %v6036_v56 = vadd.f32 %v5924_v10, %v4900_v0  ;;  %v13836_v0 = vsel (!%p6761_p3), %vm6161_vm5, 1.0, %v8304_v61  ;;  %v13839_v10 = vsel (!%p6761_p3), %vm6162_vm8, 1.0, %v8304_v61 }
 0x7fc   : > { %6052 = vst.msk [vmem:[#allocation4 + $0x48] sm:$0xff] %vm4506_vm1, %v6036_v56  ;;  %v15877_v56 = vld [vmem:[#allocation292_spill] sm:$0xff] (!%p6761_p3) }
 0x7fd   : > { %vm6167_vm12 = vcmp.ne.s32.totalorder (!%p6761_p3), %v15877_v56, 4294967196  ;;  %v6086_v56 = vld [vmem:[#allocation3 + $0x38] sm:$0xff] (!%p6761_p3) }
 0x803   : > { %v6104_v29 = vld [vmem:[#allocation4 + $0x48] sm:$0xff] (!%p6761_p3) }
 0x804   : > { %7998 = vlog2.f32 (!%p6761_p3), %v6104_v29  ;;  %v15883_v29 = vld [vmem:[#allocation322_spill] sm:$0xff] (!%p6761_p3) }
 0x805   : > { %8000 = vlog2.f32 (!%p6761_p3), %v6105_v47  ;;  %vm6173_vm2 = vcmp.ne.s32.totalorder (!%p6761_p3), %v15883_v29, 4294967196 }
 0x809   : > { %v5975_v9 = vpop.xlane.xlu1 %5974 }
 0x80a   : > { %v6039_v37 = vadd.f32 %v5975_v9, %v4903_v20  ;;  %v6079_v20 = vld [vmem:[#allocation3] sm:$0xff] (!%p6761_p3) }
 0x80b   : > { %v6207_v9 = vld [vmem:[#allocation5] sm:$0xff] (!%p6761_p3) }
 0x80c   : > { %6055 = vst.msk [vmem:[#allocation4 + $0x60] sm:$0xff] %vm4506_vm1, %v6039_v37  ;;  %v13850_v37 = vsel (!%p6761_p3), %vm6164_vm7, 1.0, %v8304_v61 }
 0x819   : > { %v5958_v45 = vpop.xlane.xlu0 %5957 }
 0x81a   : > { %v6038_v39 = vadd.f32 %v5958_v45, %v4902_v51  ;;  %v13865_v51 = vsel (!%p6761_p3), %vm6167_vm12, 1.0, %v8304_v61  ;;  %v15880_v45 = vld [vmem:[#allocation225_spill] sm:$0xff] (!%p6761_p3) }
 0x81b   : > { %vm6170_vm0 = vcmp.ne.s32.totalorder (!%p6761_p3), %v15880_v45, 4294967196 }
 0x81c   : > { %6054 = vst.msk [vmem:[#allocation4 + $0x58] sm:$0xff] %vm4506_vm1, %v6038_v39  ;;  %v6107_v39 = vld [vmem:[#allocation4 + $0x60] sm:$0xff] (!%p6761_p3)  ;;  %v13882_v32 = vsel (!%p6761_p3), %vm6170_vm0, 1.0, %v8304_v61 }
 0x823   : > { %v6106_v38 = vld [vmem:[#allocation4 + $0x58] sm:$0xff] (!%p6761_p3) }
 0x824   : > { %8002 = vlog2.f32 (!%p6761_p3), %v6106_v38  ;;  %v6087_v38 = vld [vmem:[#allocation3 + $0x40] sm:$0xff] (!%p6761_p3) }
 0x825   : > { %8004 = vlog2.f32 (!%p6761_p3), %v6107_v39  ;;  %v6214_v39 = vld [vmem:[#allocation5 + $0x38] sm:$0xff] (!%p6761_p3) }
 0x829   : > { %v6009_v14 = vpop.xlane.xlu1 %6008 }
 0x82a   : > { %v6041_v27 = vadd.f32 %v6009_v14, %v4905_v3  ;;  %v7987_v3 = vpop.eup (!%p6761_p3), %7986  ;;  %v6143_v14 = vadd.f32 (!%p6761_p3), %v6112_v34, %v6079_v20  ;;  %v6213_v20 = vld [vmem:[#allocation5 + $0x30] sm:$0xff] (!%p6761_p3) }
 0x82b   : > { %v7989_v33 = vpop.eup (!%p6761_p3), %7988 }
 0x82c   : > { %6057 = vst.msk [vmem:[#allocation4 + $0x70] sm:$0xff] %vm4506_vm1, %v6041_v27  ;;  %v6208_v27 = vld [vmem:[#allocation5 + $0x8] sm:$0xff] (!%p6761_p3)  ;;  %v6120_v43 = vmul.f32 (!%p6761_p3), 0.6931472, %v7989_v33 }
 0x82d   : > { %v6224_v30 = vsub.f32 (!%p6761_p3), %v6144_v15, %v6208_v27  ;;  %v6216_v33 = vld [vmem:[#allocation5 + $0x48] sm:$0xff] (!%p6761_p3) }
 0x82f   : > { %v6240_v47 = vmul.f32 (!%p6761_p3), %v13829_v4, %v6224_v30 }
 0x831   : > { %6256 = vst.msk [vmem:[%s8684_s12 + $0x8] sm:$0xff] (!%p6761_p3), %vm4506_vm1, %v6240_v47  ;;  %v6094_v47 = vld [vmem:[#allocation3 + $0x78] sm:$0xff] (!%p6761_p3) }
 0x833   : > { %v6109_v1 = vld [vmem:[#allocation4 + $0x70] sm:$0xff] (!%p6761_p3) }
 0x839   : > { %v5992_v11 = vpop.xlane.xlu0 %5991 }
 0x83a   : > { %v6040_v8 = vadd.f32 %v5992_v11, %v4904_v28  ;;  %v6209_v28 = vld [vmem:[#allocation5 + $0x10] sm:$0xff] (!%p6761_p3)  ;;  %v6118_v11 = vmul.f32 (!%p6761_p3), 0.6931472, %v7987_v3 }
 0x83c   : > { %6056 = vst.msk [vmem:[#allocation4 + $0x68] sm:$0xff] %vm4506_vm1, %v6040_v8  ;;  %v6083_v8 = vld [vmem:[#allocation3 + $0x20] sm:$0xff] (!%p6761_p3)  ;;  %v6146_v60 = vadd.f32 (!%p6761_p3), %v6118_v11, %v6082_v63 }
 0x83d   : > { %v6147_v17 = vadd.f32 (!%p6761_p3), %v6120_v43, %v6083_v8 }
 0x83e   : > { %v6226_v21 = vsub.f32 (!%p6761_p3), %v6146_v60, %v6210_v57  ;;  %v6092_v60 = vld [vmem:[#allocation3 + $0x68] sm:$0xff] (!%p6761_p3) }
 0x83f   : > { %v6227_v2 = vsub.f32 (!%p6761_p3), %v6147_v17, %v6211_v53 }
 0x843   : > { %v6108_v22 = vld [vmem:[#allocation4 + $0x68] sm:$0xff] (!%p6761_p3) }
 0x844   : > { %8006 = vlog2.f32 (!%p6761_p3), %v6108_v22 }
 0x845   : > { %8008 = vlog2.f32 (!%p6761_p3), %v6109_v1 }
 0x846   : > { %6078 = sbr.rel (%p6761_p3) target bundleno = 2152 (0x868), region = 68 }
 0x849   : > { %v6026_v54 = vpop.xlane.xlu0 %6025 }
 0x84a   : > { %v6042_v55 = vadd.f32 %v6026_v54, %v4906_v44  ;;  %v7991_v44 = vpop.eup (!%p6761_p3), %7990  ;;  %v6223_v54 = vsub.f32 (!%p6761_p3), %v6143_v14, %v6207_v9  ;;  %v6215_v14 = vld [vmem:[#allocation5 + $0x40] sm:$0xff] (!%p6761_p3) }
 0x84b   : > { %v7993_v25 = vpop.eup (!%p6761_p3), %7992  ;;  %v6122_v23 = vmul.f32 (!%p6761_p3), 0.6931472, %v7991_v44  ;;  %v6217_v44 = vld [vmem:[#allocation5 + $0x50] sm:$0xff] (!%p6761_p3) }
 0x84c   : > { %6058 = vst.msk [vmem:[#allocation4 + $0x78] sm:$0xff] %vm4506_vm1, %v6042_v55  ;;  %v6145_v55 = vadd.f32 (!%p6761_p3), %v6116_v31, %v6081_v12  ;;  %v7995_v36 = vpop.eup (!%p6761_p3), %7994  ;;  %v6239_v58 = vmul.f32 (!%p6761_p3), %v13826_v59, %v6223_v54  ;;  %v6124_v6 = vmul.f32 (!%p6761_p3), 0.6931472, %v7993_v25  ;;  %v6242_v12 = vmul.f32 (!%p6761_p3), %v13839_v10, %v6226_v21  ;;  %v6089_v31 = vld [vmem:[#allocation3 + $0x50] sm:$0xff] (!%p6761_p3)  ;;  %v6218_v25 = vld [vmem:[#allocation5 + $0x58] sm:$0xff] (!%p6761_p3) }
 0x84d   : > { %v7997_v26 = vpop.eup %7996  ;;  %v6148_v35 = vadd.f32 %v6122_v23, %v6084_v62  ;;  %v6126_v9 = vmul.f32 0.6931472, %v7995_v36  ;;  %v6219_v36 = vld [vmem:[#allocation5 + $0x60] sm:$0xff] }
 0x84e   : > { %v6225_v42 = vsub.f32 %v6145_v55, %v6209_v28  ;;  %v7999_v59 = vpop.eup %7998  ;;  %6255 = vst.msk [vmem:[%s8684_s12] sm:$0xff] %vm4506_vm1, %v6239_v58  ;;  %v6149_v45 = vadd.f32 %v6124_v6, %v6085_v46  ;;  %v6128_v52 = vmul.f32 0.6931472, %v7997_v26  ;;  %v6090_v28 = vld [vmem:[#allocation3 + $0x58] sm:$0xff]  ;;  %6258 = vst.msk [vmem:[%s8684_s12 + $0x18] sm:$0xff] %vm4506_vm1, %v6242_v12  ;;  %v6091_v55 = vld [vmem:[#allocation3 + $0x60] sm:$0xff] }
 0x84f   : > { %v8001_v4 = vpop.eup %8000  ;;  %v6228_v22 = vsub.f32 %v6148_v35, %v6212_v24  ;;  %v6150_v3 = vadd.f32 %v6126_v9, %v6086_v56  ;;  %v6130_v27 = vmul.f32 0.6931472, %v7999_v59  ;;  %v6220_v56 = vld [vmem:[#allocation5 + $0x68] sm:$0xff]  ;;  %v6775_v59 = vsel %vm6172_vm15, 1.0, %v8304_v61 }
 0x850   : > { %v6241_v34 = vmul.f32 %v13836_v0, %v6225_v42  ;;  %v8003_v63 = vpop.eup %8002  ;;  %v6243_v0 = vmul.f32 %v13843_v40, %v6227_v2  ;;  %v6229_v19 = vsub.f32 %v6149_v45, %v6213_v20  ;;  %v6151_v1 = vadd.f32 %v6128_v52, %v6087_v38  ;;  %v6093_v42 = vld [vmem:[#allocation3 + $0x70] sm:$0xff]  ;;  %v6222_v2 = vld [vmem:[#allocation5 + $0x78] sm:$0xff] }
 0x851   : > { %v6132_v15 = vmul.f32 0.6931472, %v8001_v4  ;;  %v8005_v11 = vpop.eup %8004  ;;  %v6244_v10 = vmul.f32 %v13850_v37, %v6228_v22  ;;  %v6230_v8 = vsub.f32 %v6150_v3, %v6214_v39  ;;  %v6134_v54 = vmul.f32 0.6931472, %v8003_v63  ;;  %v6221_v20 = vld [vmem:[#allocation5 + $0x70] sm:$0xff] }
 0x852   : > { %6257 = vst.msk [vmem:[%s8684_s12 + $0x10] sm:$0xff] %vm4506_vm1, %v6241_v34  ;;  %v8007_v57 = vpop.eup %8006  ;;  %6259 = vst.msk [vmem:[%s8684_s12 + $0x20] sm:$0xff] %vm4506_vm1, %v6243_v0  ;;  %v6245_v40 = vmul.f32 %v13855_v50, %v6229_v19  ;;  %v6231_v43 = vsub.f32 %v6151_v1, %v6215_v14  ;;  %v6136_v30 = vmul.f32 0.6931472, %v8005_v11 }
 0x853   : > { %v6110_v5 = vld [vmem:[#allocation4 + $0x78] sm:$0xff]  ;;  %v6153_v62 = vadd.f32 %v6132_v15, %v6089_v31  ;;  %v8009_v53 = vpop.eup %8008  ;;  %6260 = vst.msk [vmem:[%s8684_s12 + $0x28] sm:$0xff] %vm4506_vm1, %v6244_v10  ;;  %v6246_v37 = vmul.f32 %v13860_v7, %v6230_v8  ;;  %v6154_v46 = vadd.f32 %v6134_v54, %v6090_v28  ;;  %v6138_v58 = vmul.f32 0.6931472, %v8007_v57 }
 0x854   : > { %8010 = vlog2.f32 %v6110_v5  ;;  %v6152_v5 = vadd.f32 %v6130_v27, %v6088_v49  ;;  %6261 = vst.msk [vmem:[%s8684_s12 + $0x30] sm:$0xff] %vm4506_vm1, %v6245_v40  ;;  %v6247_v50 = vmul.f32 %v13865_v51, %v6231_v43  ;;  %v6155_v6 = vadd.f32 %v6136_v30, %v6091_v55 }
 0x855   : > { %v6233_v24 = vsub.f32 %v6153_v62, %v6217_v44  ;;  %v6140_v26 = vmul.f32 0.6931472, %v8009_v53  ;;  %6262 = vst.msk [vmem:[%s8684_s12 + $0x38] sm:$0xff] %vm4506_vm1, %v6246_v37  ;;  %v6234_v21 = vsub.f32 %v6154_v46, %v6218_v25  ;;  %v6156_v35 = vadd.f32 %v6138_v58, %v6092_v60 }
 0x856   : > { %v6232_v23 = vsub.f32 %v6152_v5, %v6216_v33  ;;  %6263 = vst.msk [vmem:[%s8684_s12 + $0x40] sm:$0xff] %vm4506_vm1, %v6247_v50  ;;  %v6235_v38 = vsub.f32 %v6155_v6, %v6219_v36  ;;  %v6777_v49 = vsel %vm6174_vm3, 1.0, %v8304_v61 }
 0x857   : > { %v6249_v51 = vmul.f32 %v13876_v48, %v6233_v24  ;;  %v6157_v34 = vadd.f32 %v6140_v26, %v6093_v42  ;;  %v6236_v45 = vsub.f32 %v6156_v35, %v6220_v56  ;;  %v6776_v48 = vsel %vm6173_vm2, 1.0, %v8304_v61 }
 0x858   : > { %v6248_v7 = vmul.f32 %v13871_v18, %v6232_v23  ;;  %v6250_v18 = vmul.f32 %v13882_v32, %v6234_v21  ;;  %v6251_v16 = vmul.f32 %v13887_v13, %v6235_v38 }
 0x859   : > { %6265 = vst.msk [vmem:[%s8684_s12 + $0x50] sm:$0xff] %vm4506_vm1, %v6249_v51  ;;  %v6237_v52 = vsub.f32 %v6157_v34, %v6221_v20  ;;  %v6252_v4 = vmul.f32 %v6775_v59, %v6236_v45 }
 0x85a   : > { %6264 = vst.msk [vmem:[%s8684_s12 + $0x48] sm:$0xff] %vm4506_vm1, %v6248_v7  ;;  %6266 = vst.msk [vmem:[%s8684_s12 + $0x58] sm:$0xff] %vm4506_vm1, %v6250_v18 }
 0x85b   : > { %6267 = vst.msk [vmem:[%s8684_s12 + $0x60] sm:$0xff] %vm4506_vm1, %v6251_v16  ;;  %v6253_v12 = vmul.f32 %v6776_v48, %v6237_v52  ;;  %6268 = vst.msk [vmem:[%s8684_s12 + $0x68] sm:$0xff] %vm4506_vm1, %v6252_v4 }
 0x85d   : > { %6269 = vst.msk [vmem:[%s8684_s12 + $0x70] sm:$0xff] %vm4506_vm1, %v6253_v12 }
 0x85e   : > { %v8011_v17 = vpop.eup %8010 }
 0x85f   : > { %v6142_v9 = vmul.f32 0.6931472, %v8011_v17 }
 0x861   : > { %v6158_v39 = vadd.f32 %v6142_v9, %v6094_v47 }
 0x863   : > { %v6238_v32 = vsub.f32 %v6158_v39, %v6222_v2 }
 0x865   : > { %v6254_v29 = vmul.f32 %v6777_v49, %v6238_v32 }
 0x867   : > { %6270 = vst.msk [vmem:[%s8684_s12 + $0x78] sm:$0xff] %vm4506_vm1, %v6254_v29 }
 0x868 PF: > { %s6788_s24 = sshll.u32 %s8280_s25, 11  ;;  %s15885_s20 = sld [smem:[#allocation326_spill]] }
 0x869   : > { %s6285_s3 = sshll.u32 %s8684_s12, 4  ;;  %s6272_s26 = scalar_lea.sflag [#allocation8], %s8656_s14  ;;  %s13953_s3 = int_to_ptr.vmem [resolvable:$true] %s6285_s3 }
 0x86a   : > { %s8158_s8 = scalar_lea.vmem %s13953_s3, 2048  ;;  %s8305_s5 = smov [#allocation15]  }
 0x86b   : > { %p8159_p8 = scmp.ne.s32.totalorder %s13953_s3, %s8158_s8  ;;  %s8162_s18 = sshll.u32 %s8305_s5, 4  ;;  %s8163_s18 = int_to_ptr.vmem [resolvable:$false] %s8162_s18 }
 0x86c   : > { %s8164_s25 = scalar_lea.vmem %s8163_s18, 4096  ;;  %p8165_p9 = scmp.lt.s32.totalorder %s13953_s3, %s8163_s18 }
 0x86d   : > { %p8160_p0 = pnand %p8159_p8, %p8555_p10  ;;  %p8166_p12 = scmp.lt.s32.totalorder %s8164_s25, %s8158_s8 }
 0x86e   : > { %s15886_s2 = smov %s15885_s20  ;;  %s13950_s15 = scalar_lea.hbm %s15885_s20, %s6788_s24 }
 0x86f   : > { %p8161_p5 = pneg %p8160_p0  ;;  %p8167_p2 = por %p8166_p12, %p8165_p9 }
 0x871   : > { %p8168_p4 = pnand %p8167_p2, %p8161_p5 }
 0x873   : > { %8171 = shalt.err (!%p8168_p4)
}
 0x874   : > { %s8172_s30 = scalar_lea.hbm %s13950_s15, 2048  ;;  %s8176_s13 = scalar_lea.hbm %s15886_s2, 4096 }
 0x875   : > { %p8173_p13 = scmp.ne.s32.totalorder %s13950_s15, %s8172_s30  ;;  %p8177_p6 = scmp.lt.u32.totalorder %s13950_s15, %s15886_s2 }
 0x876   : > { %p8178_p1 = scmp.lt.u32.totalorder %s8176_s13, %s8172_s30  ;;  %p8180_p8 = scmp.lt.u32.totalorder %s8172_s30, %s13950_s15 }
 0x877   : > { %p8174_p7 = pnand %p8173_p13, %p8555_p10 }
 0x878   : > { %p8179_p3 = por %p8178_p1, %p8177_p6 }
 0x879   : > { %p8175_p11 = pneg %p8174_p7 }
 0x87a   : > { %p8181_p0 = por %p8180_p8, %p8179_p3 }
 0x87c   : > { %p8182_p5 = pnand %p8181_p0, %p8175_p11 }
 0x87e   : > { %8185 = shalt.err (!%p8182_p5)
}
 0x87f   : > { %s8306_s21 = smov 128   ;;  %s8307_s12 = smov 8  }
 0x880   : > { %6835 = dma.vmem_to_hbm [thread:$0]  (%p8555_p10), %s13953_s3, 2048, %s13950_s15, %s6272_s26, %s8306_s21, %s8306_s21, %s8307_s12  }
 0x881 PF: > { %s15887_s29 = sld [smem:[#allocation22_spill]]  ;;  %s15888_s24 = sld [smem:[#allocation24_spill]] }
 0x882   : > { %p6863_p9 = scmp.ge.s32.totalorder %s8292_s28, 2 }
 0x887   : > { %s6300_s6 = sand.u32 1, %s15887_s29   ;;  %p15889_p12 = scmp.ne.s32.totalorder %s15888_s24, 0 }
 0x888   : > { %s6301_s7 = scalar_lea.sflag [#allocation8], %s6300_s6 }
 0x889   : > { %p6855_p2 = pnand %p6863_p9, %p15889_p12 }
 0x88b   : > { %8247 = dma.done.wait (!%p6855_p2), %s6301_s7, 2048  }
 0x88c   : > { %8249 = vsyncadd (!%p6855_p2), %s6301_s7, 4294965248  ;;  %s25_s28 = sadd.s32 1, %s8292_s28   ;;  %s15890_s20 = sld [smem:[#allocation21_spill]] }
 0x88d   : > { %p22_p4 = scmp.ge.s32.totalorder %s25_s28, 32   ;;  %s15891_s8 = sld [smem:[#allocation26_spill]] }
 0x88e   : > { %s15892_s24 = sld [smem:[#allocation23_spill]]  ;;  %s15893_s26 = sld [smem:[#allocation25_spill]] }
 0x88f   : > { %s15894_s10 = sld [smem:[#allocation27_spill]]  ;;  %s15895_s18 = smov %s8256_s19 }
 0x890   : > { %s15898_s21 = smov %s8268_s22  ;;  %s15899_s22 = smov %s8272_s23 }
 0x891   : > { %s15900_s23 = smov %s8581_s17  ;;  %s15901_s25 = smov %s8288_s27 }
 0x892   : > { %s15896_s19 = smov %s15890_s20  ;;  %24 = sbr.rel (!%p22_p4) target bundleno = 17 (0x11), region = 125 }
 0x893   : > { %s15897_s20 = smov %s15891_s8 }
 0x895   : > { %s15902_s27 = smov %s15894_s10 }
 0x899   :  { %6306 = vsyncpa [#allocation7], 1 }
 0x89a   :  { %6308 = vsyncpa [#allocation7 + $0x1], 1 }
 0x89b   :  { %6309 = vsyncpa [#allocation10], 1 }
 0x89c   :  { %6310 = vsyncpa [#allocation13], 1 }
 0x89d   :  { %6312 = vsyncpa [#allocation13 + $0x1], 1 }
 0x89e   :  { %6313 = vsyncpa [#allocation8], 1 }
 0x89f   :  { %6315 = vsyncpa [#allocation8 + $0x1], 1 }

</bundles_post_ra>
